<compile_context>
chip_gen: v7x
topology: tpu7x:2x2x1
jax: 0.10.0
libtpu: 0.0.40
codegen_flags: <defaults>
</compile_context>

<pallas_src>
import numpy as np
import jax
import jax.numpy as jnp
from jax.experimental import pallas as pl
from jax.experimental.pallas import tpu as pltpu

BN_EPS = 1e-5
IMG_H = 14     # Proj1 MNIST-pairs input: (B, 2, 14, 14)
IMG_W = 14
IN_C = 2
OUT_PAD = 128  # lane-dense padded fc3 output width

# valid (non-cross-sample) output rows per sample after each conv
V1 = IMG_H - 4   # 10 (conv1, k=5)
V2 = V1 - 4      # 6  (conv2, k=5)
V3 = V2 - 2      # 4  (conv3, k=3)


# --------------------------------------------------------------------------- #
# Kernel
# --------------------------------------------------------------------------- #
def _cnn_kernel(x_ref, m1_ref, m2_ref, m3_ref, bias_ref, s1_ref, s2_ref, g_ref,
                w1_ref, w2_ref, w3_ref, o_ref):
    """Full forward pass for one batch tile, everything resident in VMEM."""

    def conv_relu(a, m_ref, bias):
        # out[r, :] = relu( sum_di  a[r+di, :] @ M[di]  + bias )
        k = m_ref.shape[0]
        r_out = a.shape[0] - (k - 1)
        acc = jnp.dot(a[0:r_out, :], m_ref[0], preferred_element_type=jnp.float32)
        for di in range(1, k):
            acc = acc + jnp.dot(a[di:di + r_out, :], m_ref[di],
                                preferred_element_type=jnp.float32)
        return jnp.maximum(acc + bias, 0.0)

    x = x_ref[...]                                   # (tb*14, 28)

    n1 = m1_ref.shape[2]                             # 10*32 = 320
    n2 = m2_ref.shape[2]                             #  6*64 = 384
    n3 = m3_ref.shape[2]                             #  4*64 = 256

    # conv1 + BN1 + ReLU, then compact to the 10 valid rows of each sample.
    z1 = conv_relu(x, m1_ref, bias_ref[0:1, 0:n1])          # (tb*14-4, 320)
    z1 = jnp.dot(s1_ref[...], z1, preferred_element_type=jnp.float32)   # (tb*10, 320)

    # conv2 + BN2 + ReLU, then compact to the 6 valid rows of each sample.
    z2 = conv_relu(z1, m2_ref, bias_ref[1:2, 0:n2])          # (tb*10-4, 384)
    z2 = jnp.dot(s2_ref[...], z2, preferred_element_type=jnp.float32)   # (tb*6, 384)

    # conv3 + BN3 + ReLU.
    z3 = conv_relu(z2, m3_ref, bias_ref[2:3, 0:n3])          # (tb*6-2, 256)

    # MaxPool2d(2): reduce lane (column) pairs, then row pairs.
    c3 = n3 // 4                                             # conv3 channels (64)
    zp = jnp.concatenate(
        [jnp.maximum(z3[:, 0:c3],          z3[:, c3:2 * c3]),
         jnp.maximum(z3[:, 2 * c3:3 * c3], z3[:, 3 * c3:4 * c3])],
        axis=1)                                              # (tb*6-2, 128): lanes = (pj, c)
    r3 = z3.shape[0]
    zr = jnp.maximum(zp[0:r3 - 1, :], zp[1:r3, :])           # (tb*6-3, 128)

    # Gather the two pooled rows (pi = 0, 1) of every sample via selection matmuls.
    v = jnp.concatenate(
        [jnp.dot(g_ref[0], zr, preferred_element_type=jnp.float32),
         jnp.dot(g_ref[1], zr, preferred_element_type=jnp.float32)],
        axis=1)                                              # (tb, 256): lanes = (pi, pj, c)

    nh1 = w1_ref.shape[1]
    nh2 = w2_ref.shape[1]
    h = jnp.dot(v, w1_ref[...], preferred_element_type=jnp.float32) + bias_ref[3:4, 0:nh1]
    h = jnp.maximum(h, 0.0)                                  # fc1 + BN4 + ReLU (dropout p=0)
    h = jnp.dot(h, w2_ref[...], preferred_element_type=jnp.float32) + bias_ref[4:5, 0:nh2]
    h = jnp.maximum(h, 0.0)                                  # fc2 + BN5 + ReLU (dropout p=0)
    out = jnp.dot(h, w3_ref[...], preferred_element_type=jnp.float32) \
        + bias_ref[5:6, 0:o_ref.shape[1]]                    # fc3 (lane-dense padded)
    o_ref[...] = out.astype(o_ref.dtype)


# --------------------------------------------------------------------------- #
# Offline parameter preparation (BN folding, banded conv matrices, packing)
# --------------------------------------------------------------------------- #
def _fold_bn_conv(w, b, gamma, beta, mean, var):
    s = gamma / np.sqrt(var + BN_EPS)
    return w * s[:, None, None, None], (b - mean) * s + beta


def _fold_bn_linear(w, b, gamma, beta, mean, var):
    s = gamma / np.sqrt(var + BN_EPS)
    return w * s[:, None], (b - mean) * s + beta


def _conv_band(w, w_in):
    """Per-tap banded matrices M (K, w_in*Cin, w_out*Cout) such that
       conv_out[r, j*Cout+co] = sum_di X[r+di, :] @ M[di]  (rows = image rows)."""
    c_out, c_in, k, _ = w.shape
    w_out = w_in - k + 1
    m = np.zeros((k, w_in * c_in, w_out * c_out), np.float32)
    for di in range(k):
        for j in range(w_out):
            for dj in range(k):
                jj = j + dj
                m[di, jj * c_in:(jj + 1) * c_in, j * c_out:(j + 1) * c_out] = \
                    w[:, :, di, dj].T
    return m


def prepare_params(params):
    p = {k: np.asarray(v, np.float32) for k, v in params.items()}

    cw1, cb1 = _fold_bn_conv(p['cw1'], p['cb1'], p['g1'], p['be1'], p['m1'], p['v1'])
    cw2, cb2 = _fold_bn_conv(p['cw2'], p['cb2'], p['g2'], p['be2'], p['m2'], p['v2'])
    cw3, cb3 = _fold_bn_conv(p['cw3'], p['cb3'], p['g3'], p['be3'], p['m3'], p['v3'])
    fw1, fb1 = _fold_bn_linear(p['fw1'], p['fb1'], p['g4'], p['be4'], p['m4'], p['v4'])
    fw2, fb2 = _fold_bn_linear(p['fw2'], p['fb2'], p['g5'], p['be5'], p['m5'], p['v5'])
    fw3, fb3 = p['fw3'], p['fb3']

    m1 = _conv_band(cw1, IMG_W)        # (5,  28, 320)
    m2 = _conv_band(cw2, IMG_W - 4)    # (5, 320, 384)
    m3 = _conv_band(cw3, IMG_W - 8)    # (3, 384, 256)

    b1 = np.tile(cb1, IMG_W - 4)       # (320,)  lane order (j, c)
    b2 = np.tile(cb2, IMG_W - 8)       # (384,)
    b3 = np.tile(cb3, IMG_W - 10)      # (256,)

    nh1, nh2 = fw1.shape[0], fw2.shape[0]
    c3o = cw3.shape[0]

    # fc1 column permutation: kernel lane l = pi*2*c3o + pj*c3o + c
    # PyTorch flatten index       f = c*4 + pi*2 + pj
    perm = np.zeros(4 * c3o, np.int64)
    for pi in range(2):
        for pj in range(2):
            for c in range(c3o):
                perm[pi * 2 * c3o + pj * c3o + c] = c * 4 + pi * 2 + pj
    w1k = np.ascontiguousarray(fw1[:, perm].T)       # (256, nh1)
    w2k = np.ascontiguousarray(fw2.T)                # (nh1, nh2)
    w3k = np.zeros((nh2, OUT_PAD), np.float32)       # lane-dense padded fc3
    w3k[:, :fw3.shape[0]] = fw3.T

    bw = max(m1.shape[2], m2.shape[2], m3.shape[2], nh1, nh2, OUT_PAD)
    biases = np.zeros((6, bw), np.float32)
    biases[0, :b1.shape[0]] = b1
    biases[1, :b2.shape[0]] = b2
    biases[2, :b3.shape[0]] = b3
    biases[3, :nh1] = fb1
    biases[4, :nh2] = fb2
    biases[5, :fb3.shape[0]] = fb3

    return dict(m1=jnp.asarray(m1), m2=jnp.asarray(m2), m3=jnp.asarray(m3),
                biases=jnp.asarray(biases),
                w1=jnp.asarray(w1k), w2=jnp.asarray(w2k), w3=jnp.asarray(w3k))


# --------------------------------------------------------------------------- #
# Wrapper
# --------------------------------------------------------------------------- #
def basenet_cnn_forward(x, prepared, batch_tile=None):
    """x: (B, 2, 14, 14) float32  ->  logits (B, 2) float32.  Jit-friendly."""
    b = x.shape[0]
    tb = b if batch_tile is None else batch_tile
    assert b % tb == 0 and (tb == b or tb % 8 == 0)

    # glue: NCHW -> rows = B*14 image rows, lanes = (column, channel)
    x2d = jnp.transpose(x, (0, 2, 3, 1)).reshape(b * IMG_H, IMG_W * IN_C)

    # 0/1 selection matrices (host-built; compile-time constants under jit):
    #   s1 compacts conv1 rows: keeps rows s*14+i, i<10  -> (tb*10, tb*14-4)
    #   s2 compacts conv2 rows: keeps rows s*10+i, i<6   -> (tb*6,  tb*10-4)
    #   g  picks the two pooled rows (s*6+0, s*6+2) of each sample from zr
    r1 = tb * IMG_H - 4
    rows = np.arange(tb * V1)
    s1 = np.zeros((tb * V1, r1), np.float32)
    s1[rows, (rows // V1) * IMG_H + rows % V1] = 1.0

    r2 = tb * V1 - 4
    rows = np.arange(tb * V2)
    s2 = np.zeros((tb * V2, r2), np.float32)
    s2[rows, (rows // V2) * V1 + rows % V2] = 1.0

    rz = tb * V2 - 3
    g = np.zeros((2, tb, rz), np.float32)
    g[0, np.arange(tb), np.arange(tb) * V2 + 0] = 1.0
    g[1, np.arange(tb), np.arange(tb) * V2 + 2] = 1.0

    s1 = jnp.asarray(s1)
    s2 = jnp.asarray(s2)
    g = jnp.asarray(g)

    m1, m2, m3 = prepared['m1'], prepared['m2'], prepared['m3']
    biases, w1, w2, w3 = prepared['biases'], prepared['w1'], prepared['w2'], prepared['w3']

    def full(a):
        nd = a.ndim
        return pl.BlockSpec(a.shape, lambda i: (0,) * nd)

    flops_tile = 2 * (
        r1 * m1.shape[1] * m1.shape[2] * m1.shape[0]
        + s1.shape[0] * s1.shape[1] * m1.shape[2]
        + r2 * m2.shape[1] * m2.shape[2] * m2.shape[0]
        + s2.shape[0] * s2.shape[1] * m2.shape[2]
        + (tb * V2 - 2) * m3.shape[1] * m3.shape[2] * m3.shape[0]
        + 2 * tb * rz * (m3.shape[2] // 2)
        + tb * w1.shape[0] * w1.shape[1]
        + tb * w2.shape[0] * w2.shape[1]
        + tb * w3.shape[0] * w3.shape[1])
    flops = (b // tb) * flops_tile
    bytes_accessed = 4 * (x2d.size + m1.size + m2.size + m3.size + biases.size
                          + s1.size + s2.size + g.size
                          + w1.size + w2.size + w3.size + b * OUT_PAD)

    out = pl.pallas_call(
        _cnn_kernel,
        out_shape=jax.ShapeDtypeStruct((b, OUT_PAD), jnp.float32),
        grid=(b // tb,),
        in_specs=[
            pl.BlockSpec((tb * IMG_H, IMG_W * IN_C), lambda i: (i, 0)),
            full(m1), full(m2), full(m3), full(biases),
            full(s1), full(s2), full(g),
            full(w1), full(w2), full(w3),
        ],
        out_specs=pl.BlockSpec((tb, OUT_PAD), lambda i: (i, 0)),
        compiler_params=pltpu.CompilerParams(dimension_semantics=("parallel",)),
        cost_estimate=pl.CostEstimate(flops=flops, transcendentals=0,
                                      bytes_accessed=bytes_accessed),
    )(x2d, m1, m2, m3, biases, s1, s2, g, w1, w2, w3)

    return out[:, :2]


# --------------------------------------------------------------------------- #
# Synthetic parameters (exact BaseNetCNN shapes) and pure-JAX reference
# --------------------------------------------------------------------------- #
def init_params(key, nb_hidden1=64, nb_hidden2=64):
    ks = iter(jax.random.split(key, 40))   # independent keys for every tensor

    def lin(fan_in, shape_w, shape_b):
        bound = 1.0 / np.sqrt(fan_in)
        w = jax.random.uniform(next(ks), shape_w, jnp.float32, -bound, bound)
        b = jax.random.uniform(next(ks), shape_b, jnp.float32, -bound, bound)
        return w, b

    def bn(n):
        gg = 1.0 + 0.1 * jax.random.normal(next(ks), (n,), jnp.float32)
        be = 0.1 * jax.random.normal(next(ks), (n,), jnp.float32)
        mm = 0.1 * jax.random.normal(next(ks), (n,), jnp.float32)
        vv = 1.0 + 0.1 * jax.random.uniform(next(ks), (n,), jnp.float32)
        return gg, be, mm, vv

    cw1, cb1 = lin(2 * 5 * 5, (32, 2, 5, 5), (32,));  g1, be1, m1, v1 = bn(32)
    cw2, cb2 = lin(32 * 5 * 5, (64, 32, 5, 5), (64,)); g2, be2, m2, v2 = bn(64)
    cw3, cb3 = lin(64 * 3 * 3, (64, 64, 3, 3), (64,)); g3, be3, m3, v3 = bn(64)
    fw1, fb1 = lin(256, (nb_hidden1, 256), (nb_hidden1,));          g4, be4, m4, v4 = bn(nb_hidden1)
    fw2, fb2 = lin(nb_hidden1, (nb_hidden2, nb_hidden1), (nb_hidden2,)); g5, be5, m5, v5 = bn(nb_hidden2)
    fw3, fb3 = lin(nb_hidden2, (2, nb_hidden2), (2,))

    return dict(cw1=cw1, cb1=cb1, g1=g1, be1=be1, m1=m1, v1=v1,
                cw2=cw2, cb2=cb2, g2=g2, be2=be2, m2=m2, v2=v2,
                cw3=cw3, cb3=cb3, g3=g3, be3=be3, m3=m3, v3=v3,
                fw1=fw1, fb1=fb1, g4=g4, be4=be4, m4=m4, v4=v4,
                fw2=fw2, fb2=fb2, g5=g5, be5=be5, m5=m5, v5=v5,
                fw3=fw3, fb3=fb3)


def _reference(x, p):
    """Pure-JAX reference of the PyTorch BaseNetCNN forward (eval mode)."""
    def bn2d(h, g, be, m, v):
        rs = lambda t: t.reshape(1, -1, 1, 1)
        return rs(g) * (h - rs(m)) / jnp.sqrt(rs(v) + BN_EPS) + rs(be)

    def conv(h, w, b):
        y = jax.lax.conv_general_dilated(h, w, (1, 1), 'VALID',
                                         dimension_numbers=('NCHW', 'OIHW', 'NCHW'))
        return y + b.reshape(1, -1, 1, 1)

    h = jnp.maximum(bn2d(conv(x, p['cw1'], p['cb1']), p['g1'], p['be1'], p['m1'], p['v1']), 0.0)
    h = jnp.maximum(bn2d(conv(h, p['cw2'], p['cb2']), p['g2'], p['be2'], p['m2'], p['v2']), 0.0)
    h = jnp.maximum(bn2d(conv(h, p['cw3'], p['cb3']), p['g3'], p['be3'], p['m3'], p['v3']), 0.0)
    h = jax.lax.reduce_window(h, -jnp.inf, jax.lax.max, (1, 1, 2, 2), (1, 1, 2, 2), 'VALID')
    h = h.reshape(h.shape[0], -1)                      # (B, 256) NCHW flatten
    h = h @ p['fw1'].T + p['fb1']
    h = jnp.maximum(p['g4'] * (h - p['m4']) / jnp.sqrt(p['v4'] + BN_EPS) + p['be4'], 0.0)
    h = h @ p['fw2'].T + p['fb2']
    h = jnp.maximum(p['g5'] * (h - p['m5']) / jnp.sqrt(p['v5'] + BN_EPS) + p['be5'], 0.0)
    return h @ p['fw3'].T + p['fb3']


if __name__ == "__main__":
    key = jax.random.PRNGKey(0)
    kx, kp = jax.random.split(key)

    B = 8                                            # batch, multiple of 8 (f32 sublane tile)
    x = jax.random.normal(kx, (B, 2, 14, 14), jnp.float32)
    params = init_params(kp, nb_hidden1=64, nb_hidden2=64)

    prepared = prepare_params(params)
    fwd = jax.jit(basenet_cnn_forward)               # selection matrices fold to constants
    out = jax.block_until_ready(fwd(x, prepared))

    ref = _reference(x, params)
    assert out.shape == (B, 2)
    err = float(jnp.max(jnp.abs(out - ref)))
    assert jnp.allclose(out, ref, atol=1e-3, rtol=1e-3), f"mismatch vs reference (max abs err {err})"

    print("KERNEL_OK")
</pallas_src>

<mosaic_0001>
module attributes {stable_mosaic.version = 11 : i64} {
  func.func @_cnn_kernel(%arg0: i32, %arg1: memref<112x28xf32, #tpu.memory_space<vmem>>, %arg2: memref<5x28x320xf32, #tpu.memory_space<vmem>>, %arg3: memref<5x320x384xf32, #tpu.memory_space<vmem>>, %arg4: memref<3x384x256xf32, #tpu.memory_space<vmem>>, %arg5: memref<6x384xf32, #tpu.memory_space<vmem>>, %arg6: memref<80x108xf32, #tpu.memory_space<vmem>>, %arg7: memref<48x76xf32, #tpu.memory_space<vmem>>, %arg8: memref<2x8x45xf32, #tpu.memory_space<vmem>>, %arg9: memref<256x64xf32, #tpu.memory_space<vmem>>, %arg10: memref<64x64xf32, #tpu.memory_space<vmem>>, %arg11: memref<64x128xf32, #tpu.memory_space<vmem>>, %arg12: memref<8x128xf32, #tpu.memory_space<vmem>>) attributes {dimension_semantics = [#tpu.dimension_semantics<parallel>], iteration_bounds = array<i64: 1>, scalar_prefetch = 0 : i64, scratch_operands = 0 : i64, tpu.core_type = #tpu.core_type<tc>, window_params = [{transform_indices = @transform_0, window_bounds = array<i64: 112, 28>}, {pipeline_mode = #tpu.pipeline_mode<synchronous>, transform_indices = @transform_1, window_bounds = array<i64: 5, 28, 320>}, {pipeline_mode = #tpu.pipeline_mode<synchronous>, transform_indices = @transform_2, window_bounds = array<i64: 5, 320, 384>}, {pipeline_mode = #tpu.pipeline_mode<synchronous>, transform_indices = @transform_3, window_bounds = array<i64: 3, 384, 256>}, {pipeline_mode = #tpu.pipeline_mode<synchronous>, transform_indices = @transform_4, window_bounds = array<i64: 6, 384>}, {pipeline_mode = #tpu.pipeline_mode<synchronous>, transform_indices = @transform_5, window_bounds = array<i64: 80, 108>}, {pipeline_mode = #tpu.pipeline_mode<synchronous>, transform_indices = @transform_6, window_bounds = array<i64: 48, 76>}, {pipeline_mode = #tpu.pipeline_mode<synchronous>, transform_indices = @transform_7, window_bounds = array<i64: 2, 8, 45>}, {pipeline_mode = #tpu.pipeline_mode<synchronous>, transform_indices = @transform_8, window_bounds = array<i64: 256, 64>}, {pipeline_mode = #tpu.pipeline_mode<synchronous>, transform_indices = @transform_9, window_bounds = array<i64: 64, 64>}, {pipeline_mode = #tpu.pipeline_mode<synchronous>, transform_indices = @transform_10, window_bounds = array<i64: 64, 128>}, {transform_indices = @transform_11, window_bounds = array<i64: 8, 128>}]} {
    %c0 = arith.constant 0 : index
    %c0_0 = arith.constant 0 : index
    %0 = vector.load %arg1[%c0, %c0_0] : memref<112x28xf32, #tpu.memory_space<vmem>>, vector<112x28xf32>
    %c0_1 = arith.constant 0 : index
    %c0_2 = arith.constant 0 : index
    %1 = vector.load %arg5[%c0_1, %c0_2] : memref<6x384xf32, #tpu.memory_space<vmem>>, vector<1x320xf32>
    %2 = vector.extract_strided_slice %0 {offsets = [0, 0], sizes = [108, 28], strides = [1, 1]} : vector<112x28xf32> to vector<108x28xf32>
    %c0_3 = arith.constant 0 : index
    %c0_4 = arith.constant 0 : index
    %c0_5 = arith.constant 0 : index
    %3 = vector.load %arg2[%c0_3, %c0_4, %c0_5] : memref<5x28x320xf32, #tpu.memory_space<vmem>>, vector<1x28x320xf32>
    %4 = vector.shape_cast %3 : vector<1x28x320xf32> to vector<28x320xf32>
    %cst = arith.constant dense<0.000000e+00> : vector<108x320xf32>
    %5 = tpu.matmul %2, %4, %cst {dimension_numbers = #tpu.dot_dimension_numbers<[1], [0], [0], [1], [0, 0, 1, 1], [], []>} : vector<108x28xf32>, vector<28x320xf32>, vector<108x320xf32> -> vector<108x320xf32>
    %6 = vector.extract_strided_slice %0 {offsets = [1, 0], sizes = [108, 28], strides = [1, 1]} : vector<112x28xf32> to vector<108x28xf32>
    %c1 = arith.constant 1 : index
    %c0_6 = arith.constant 0 : index
    %c0_7 = arith.constant 0 : index
    %7 = vector.load %arg2[%c1, %c0_6, %c0_7] : memref<5x28x320xf32, #tpu.memory_space<vmem>>, vector<1x28x320xf32>
    %8 = vector.shape_cast %7 : vector<1x28x320xf32> to vector<28x320xf32>
    %cst_8 = arith.constant dense<0.000000e+00> : vector<108x320xf32>
    %9 = tpu.matmul %6, %8, %cst_8 {dimension_numbers = #tpu.dot_dimension_numbers<[1], [0], [0], [1], [0, 0, 1, 1], [], []>} : vector<108x28xf32>, vector<28x320xf32>, vector<108x320xf32> -> vector<108x320xf32>
    %10 = arith.addf %5, %9 : vector<108x320xf32>
    %11 = vector.extract_strided_slice %0 {offsets = [2, 0], sizes = [108, 28], strides = [1, 1]} : vector<112x28xf32> to vector<108x28xf32>
    %c2 = arith.constant 2 : index
    %c0_9 = arith.constant 0 : index
    %c0_10 = arith.constant 0 : index
    %12 = vector.load %arg2[%c2, %c0_9, %c0_10] : memref<5x28x320xf32, #tpu.memory_space<vmem>>, vector<1x28x320xf32>
    %13 = vector.shape_cast %12 : vector<1x28x320xf32> to vector<28x320xf32>
    %cst_11 = arith.constant dense<0.000000e+00> : vector<108x320xf32>
    %14 = tpu.matmul %11, %13, %cst_11 {dimension_numbers = #tpu.dot_dimension_numbers<[1], [0], [0], [1], [0, 0, 1, 1], [], []>} : vector<108x28xf32>, vector<28x320xf32>, vector<108x320xf32> -> vector<108x320xf32>
    %15 = arith.addf %10, %14 : vector<108x320xf32>
    %16 = vector.extract_strided_slice %0 {offsets = [3, 0], sizes = [108, 28], strides = [1, 1]} : vector<112x28xf32> to vector<108x28xf32>
    %c3 = arith.constant 3 : index
    %c0_12 = arith.constant 0 : index
    %c0_13 = arith.constant 0 : index
    %17 = vector.load %arg2[%c3, %c0_12, %c0_13] : memref<5x28x320xf32, #tpu.memory_space<vmem>>, vector<1x28x320xf32>
    %18 = vector.shape_cast %17 : vector<1x28x320xf32> to vector<28x320xf32>
    %cst_14 = arith.constant dense<0.000000e+00> : vector<108x320xf32>
    %19 = tpu.matmul %16, %18, %cst_14 {dimension_numbers = #tpu.dot_dimension_numbers<[1], [0], [0], [1], [0, 0, 1, 1], [], []>} : vector<108x28xf32>, vector<28x320xf32>, vector<108x320xf32> -> vector<108x320xf32>
    %20 = arith.addf %15, %19 : vector<108x320xf32>
    %21 = vector.extract_strided_slice %0 {offsets = [4, 0], sizes = [108, 28], strides = [1, 1]} : vector<112x28xf32> to vector<108x28xf32>
    %c4 = arith.constant 4 : index
    %c0_15 = arith.constant 0 : index
    %c0_16 = arith.constant 0 : index
    %22 = vector.load %arg2[%c4, %c0_15, %c0_16] : memref<5x28x320xf32, #tpu.memory_space<vmem>>, vector<1x28x320xf32>
    %23 = vector.shape_cast %22 : vector<1x28x320xf32> to vector<28x320xf32>
    %cst_17 = arith.constant dense<0.000000e+00> : vector<108x320xf32>
    %24 = tpu.matmul %21, %23, %cst_17 {dimension_numbers = #tpu.dot_dimension_numbers<[1], [0], [0], [1], [0, 0, 1, 1], [], []>} : vector<108x28xf32>, vector<28x320xf32>, vector<108x320xf32> -> vector<108x320xf32>
    %25 = arith.addf %20, %24 : vector<108x320xf32>
    %26 = vector.broadcast %1 : vector<1x320xf32> to vector<108x320xf32>
    %27 = arith.addf %25, %26 : vector<108x320xf32>
    %cst_18 = arith.constant 0.000000e+00 : f32
    %28 = vector.broadcast %cst_18 : f32 to vector<108x320xf32>
    %29 = arith.maximumf %27, %28 : vector<108x320xf32>
    %c0_19 = arith.constant 0 : index
    %c0_20 = arith.constant 0 : index
    %30 = vector.load %arg6[%c0_19, %c0_20] : memref<80x108xf32, #tpu.memory_space<vmem>>, vector<80x108xf32>
    %cst_21 = arith.constant dense<0.000000e+00> : vector<80x320xf32>
    %31 = tpu.matmul %30, %29, %cst_21 {dimension_numbers = #tpu.dot_dimension_numbers<[1], [0], [0], [1], [0, 0, 1, 1], [], []>} : vector<80x108xf32>, vector<108x320xf32>, vector<80x320xf32> -> vector<80x320xf32>
    %c1_22 = arith.constant 1 : index
    %c0_23 = arith.constant 0 : index
    %32 = vector.load %arg5[%c1_22, %c0_23] : memref<6x384xf32, #tpu.memory_space<vmem>>, vector<1x384xf32>
    %33 = vector.extract_strided_slice %31 {offsets = [0, 0], sizes = [76, 320], strides = [1, 1]} : vector<80x320xf32> to vector<76x320xf32>
    %c0_24 = arith.constant 0 : index
    %c0_25 = arith.constant 0 : index
    %c0_26 = arith.constant 0 : index
    %34 = vector.load %arg3[%c0_24, %c0_25, %c0_26] : memref<5x320x384xf32, #tpu.memory_space<vmem>>, vector<1x320x384xf32>
    %35 = vector.shape_cast %34 : vector<1x320x384xf32> to vector<320x384xf32>
    %cst_27 = arith.constant dense<0.000000e+00> : vector<76x384xf32>
    %36 = tpu.matmul %33, %35, %cst_27 {dimension_numbers = #tpu.dot_dimension_numbers<[1], [0], [0], [1], [0, 0, 1, 1], [], []>} : vector<76x320xf32>, vector<320x384xf32>, vector<76x384xf32> -> vector<76x384xf32>
    %37 = vector.extract_strided_slice %31 {offsets = [1, 0], sizes = [76, 320], strides = [1, 1]} : vector<80x320xf32> to vector<76x320xf32>
    %c1_28 = arith.constant 1 : index
    %c0_29 = arith.constant 0 : index
    %c0_30 = arith.constant 0 : index
    %38 = vector.load %arg3[%c1_28, %c0_29, %c0_30] : memref<5x320x384xf32, #tpu.memory_space<vmem>>, vector<1x320x384xf32>
    %39 = vector.shape_cast %38 : vector<1x320x384xf32> to vector<320x384xf32>
    %cst_31 = arith.constant dense<0.000000e+00> : vector<76x384xf32>
    %40 = tpu.matmul %37, %39, %cst_31 {dimension_numbers = #tpu.dot_dimension_numbers<[1], [0], [0], [1], [0, 0, 1, 1], [], []>} : vector<76x320xf32>, vector<320x384xf32>, vector<76x384xf32> -> vector<76x384xf32>
    %41 = arith.addf %36, %40 : vector<76x384xf32>
    %42 = vector.extract_strided_slice %31 {offsets = [2, 0], sizes = [76, 320], strides = [1, 1]} : vector<80x320xf32> to vector<76x320xf32>
    %c2_32 = arith.constant 2 : index
    %c0_33 = arith.constant 0 : index
    %c0_34 = arith.constant 0 : index
    %43 = vector.load %arg3[%c2_32, %c0_33, %c0_34] : memref<5x320x384xf32, #tpu.memory_space<vmem>>, vector<1x320x384xf32>
    %44 = vector.shape_cast %43 : vector<1x320x384xf32> to vector<320x384xf32>
    %cst_35 = arith.constant dense<0.000000e+00> : vector<76x384xf32>
    %45 = tpu.matmul %42, %44, %cst_35 {dimension_numbers = #tpu.dot_dimension_numbers<[1], [0], [0], [1], [0, 0, 1, 1], [], []>} : vector<76x320xf32>, vector<320x384xf32>, vector<76x384xf32> -> vector<76x384xf32>
    %46 = arith.addf %41, %45 : vector<76x384xf32>
    %47 = vector.extract_strided_slice %31 {offsets = [3, 0], sizes = [76, 320], strides = [1, 1]} : vector<80x320xf32> to vector<76x320xf32>
    %c3_36 = arith.constant 3 : index
    %c0_37 = arith.constant 0 : index
    %c0_38 = arith.constant 0 : index
    %48 = vector.load %arg3[%c3_36, %c0_37, %c0_38] : memref<5x320x384xf32, #tpu.memory_space<vmem>>, vector<1x320x384xf32>
    %49 = vector.shape_cast %48 : vector<1x320x384xf32> to vector<320x384xf32>
    %cst_39 = arith.constant dense<0.000000e+00> : vector<76x384xf32>
    %50 = tpu.matmul %47, %49, %cst_39 {dimension_numbers = #tpu.dot_dimension_numbers<[1], [0], [0], [1], [0, 0, 1, 1], [], []>} : vector<76x320xf32>, vector<320x384xf32>, vector<76x384xf32> -> vector<76x384xf32>
    %51 = arith.addf %46, %50 : vector<76x384xf32>
    %52 = vector.extract_strided_slice %31 {offsets = [4, 0], sizes = [76, 320], strides = [1, 1]} : vector<80x320xf32> to vector<76x320xf32>
    %c4_40 = arith.constant 4 : index
    %c0_41 = arith.constant 0 : index
    %c0_42 = arith.constant 0 : index
    %53 = vector.load %arg3[%c4_40, %c0_41, %c0_42] : memref<5x320x384xf32, #tpu.memory_space<vmem>>, vector<1x320x384xf32>
    %54 = vector.shape_cast %53 : vector<1x320x384xf32> to vector<320x384xf32>
    %cst_43 = arith.constant dense<0.000000e+00> : vector<76x384xf32>
    %55 = tpu.matmul %52, %54, %cst_43 {dimension_numbers = #tpu.dot_dimension_numbers<[1], [0], [0], [1], [0, 0, 1, 1], [], []>} : vector<76x320xf32>, vector<320x384xf32>, vector<76x384xf32> -> vector<76x384xf32>
    %56 = arith.addf %51, %55 : vector<76x384xf32>
    %57 = vector.broadcast %32 : vector<1x384xf32> to vector<76x384xf32>
    %58 = arith.addf %56, %57 : vector<76x384xf32>
    %cst_44 = arith.constant 0.000000e+00 : f32
    %59 = vector.broadcast %cst_44 : f32 to vector<76x384xf32>
    %60 = arith.maximumf %58, %59 : vector<76x384xf32>
    %c0_45 = arith.constant 0 : index
    %c0_46 = arith.constant 0 : index
    %61 = vector.load %arg7[%c0_45, %c0_46] : memref<48x76xf32, #tpu.memory_space<vmem>>, vector<48x76xf32>
    %cst_47 = arith.constant dense<0.000000e+00> : vector<48x384xf32>
    %62 = tpu.matmul %61, %60, %cst_47 {dimension_numbers = #tpu.dot_dimension_numbers<[1], [0], [0], [1], [0, 0, 1, 1], [], []>} : vector<48x76xf32>, vector<76x384xf32>, vector<48x384xf32> -> vector<48x384xf32>
    %c2_48 = arith.constant 2 : index
    %c0_49 = arith.constant 0 : index
    %63 = vector.load %arg5[%c2_48, %c0_49] : memref<6x384xf32, #tpu.memory_space<vmem>>, vector<1x256xf32>
    %64 = vector.extract_strided_slice %62 {offsets = [0, 0], sizes = [46, 384], strides = [1, 1]} : vector<48x384xf32> to vector<46x384xf32>
    %c0_50 = arith.constant 0 : index
    %c0_51 = arith.constant 0 : index
    %c0_52 = arith.constant 0 : index
    %65 = vector.load %arg4[%c0_50, %c0_51, %c0_52] : memref<3x384x256xf32, #tpu.memory_space<vmem>>, vector<1x384x256xf32>
    %66 = vector.shape_cast %65 : vector<1x384x256xf32> to vector<384x256xf32>
    %cst_53 = arith.constant dense<0.000000e+00> : vector<46x256xf32>
    %67 = tpu.matmul %64, %66, %cst_53 {dimension_numbers = #tpu.dot_dimension_numbers<[1], [0], [0], [1], [0, 0, 1, 1], [], []>} : vector<46x384xf32>, vector<384x256xf32>, vector<46x256xf32> -> vector<46x256xf32>
    %68 = vector.extract_strided_slice %62 {offsets = [1, 0], sizes = [46, 384], strides = [1, 1]} : vector<48x384xf32> to vector<46x384xf32>
    %c1_54 = arith.constant 1 : index
    %c0_55 = arith.constant 0 : index
    %c0_56 = arith.constant 0 : index
    %69 = vector.load %arg4[%c1_54, %c0_55, %c0_56] : memref<3x384x256xf32, #tpu.memory_space<vmem>>, vector<1x384x256xf32>
    %70 = vector.shape_cast %69 : vector<1x384x256xf32> to vector<384x256xf32>
    %cst_57 = arith.constant dense<0.000000e+00> : vector<46x256xf32>
    %71 = tpu.matmul %68, %70, %cst_57 {dimension_numbers = #tpu.dot_dimension_numbers<[1], [0], [0], [1], [0, 0, 1, 1], [], []>} : vector<46x384xf32>, vector<384x256xf32>, vector<46x256xf32> -> vector<46x256xf32>
    %72 = arith.addf %67, %71 : vector<46x256xf32>
    %73 = vector.extract_strided_slice %62 {offsets = [2, 0], sizes = [46, 384], strides = [1, 1]} : vector<48x384xf32> to vector<46x384xf32>
    %c2_58 = arith.constant 2 : index
    %c0_59 = arith.constant 0 : index
    %c0_60 = arith.constant 0 : index
    %74 = vector.load %arg4[%c2_58, %c0_59, %c0_60] : memref<3x384x256xf32, #tpu.memory_space<vmem>>, vector<1x384x256xf32>
    %75 = vector.shape_cast %74 : vector<1x384x256xf32> to vector<384x256xf32>
    %cst_61 = arith.constant dense<0.000000e+00> : vector<46x256xf32>
    %76 = tpu.matmul %73, %75, %cst_61 {dimension_numbers = #tpu.dot_dimension_numbers<[1], [0], [0], [1], [0, 0, 1, 1], [], []>} : vector<46x384xf32>, vector<384x256xf32>, vector<46x256xf32> -> vector<46x256xf32>
    %77 = arith.addf %72, %76 : vector<46x256xf32>
    %78 = vector.broadcast %63 : vector<1x256xf32> to vector<46x256xf32>
    %79 = arith.addf %77, %78 : vector<46x256xf32>
    %cst_62 = arith.constant 0.000000e+00 : f32
    %80 = vector.broadcast %cst_62 : f32 to vector<46x256xf32>
    %81 = arith.maximumf %79, %80 : vector<46x256xf32>
    %82 = vector.extract_strided_slice %81 {offsets = [0, 0], sizes = [46, 64], strides = [1, 1]} : vector<46x256xf32> to vector<46x64xf32>
    %83 = vector.extract_strided_slice %81 {offsets = [0, 64], sizes = [46, 64], strides = [1, 1]} : vector<46x256xf32> to vector<46x64xf32>
    %84 = arith.maximumf %82, %83 : vector<46x64xf32>
    %85 = vector.extract_strided_slice %81 {offsets = [0, 128], sizes = [46, 64], strides = [1, 1]} : vector<46x256xf32> to vector<46x64xf32>
    %86 = vector.extract_strided_slice %81 {offsets = [0, 192], sizes = [46, 64], strides = [1, 1]} : vector<46x256xf32> to vector<46x64xf32>
    %87 = arith.maximumf %85, %86 : vector<46x64xf32>
    %88 = tpu.concatenate %84, %87 in 1 : vector<46x64xf32>, vector<46x64xf32> -> vector<46x128xf32>
    %89 = vector.extract_strided_slice %88 {offsets = [0, 0], sizes = [45, 128], strides = [1, 1]} : vector<46x128xf32> to vector<45x128xf32>
    %90 = vector.extract_strided_slice %88 {offsets = [1, 0], sizes = [45, 128], strides = [1, 1]} : vector<46x128xf32> to vector<45x128xf32>
    %91 = arith.maximumf %89, %90 : vector<45x128xf32>
    %c0_63 = arith.constant 0 : index
    %c0_64 = arith.constant 0 : index
    %c0_65 = arith.constant 0 : index
    %92 = vector.load %arg8[%c0_63, %c0_64, %c0_65] : memref<2x8x45xf32, #tpu.memory_space<vmem>>, vector<1x8x45xf32>
    %93 = vector.shape_cast %92 : vector<1x8x45xf32> to vector<8x45xf32>
    %cst_66 = arith.constant dense<0.000000e+00> : vector<8x128xf32>
    %94 = tpu.matmul %93, %91, %cst_66 {dimension_numbers = #tpu.dot_dimension_numbers<[1], [0], [0], [1], [0, 0, 1, 1], [], []>} : vector<8x45xf32>, vector<45x128xf32>, vector<8x128xf32> -> vector<8x128xf32>
    %c1_67 = arith.constant 1 : index
    %c0_68 = arith.constant 0 : index
    %c0_69 = arith.constant 0 : index
    %95 = vector.load %arg8[%c1_67, %c0_68, %c0_69] : memref<2x8x45xf32, #tpu.memory_space<vmem>>, vector<1x8x45xf32>
    %96 = vector.shape_cast %95 : vector<1x8x45xf32> to vector<8x45xf32>
    %cst_70 = arith.constant dense<0.000000e+00> : vector<8x128xf32>
    %97 = tpu.matmul %96, %91, %cst_70 {dimension_numbers = #tpu.dot_dimension_numbers<[1], [0], [0], [1], [0, 0, 1, 1], [], []>} : vector<8x45xf32>, vector<45x128xf32>, vector<8x128xf32> -> vector<8x128xf32>
    %98 = tpu.concatenate %94, %97 in 1 : vector<8x128xf32>, vector<8x128xf32> -> vector<8x256xf32>
    %c0_71 = arith.constant 0 : index
    %c0_72 = arith.constant 0 : index
    %99 = vector.load %arg9[%c0_71, %c0_72] : memref<256x64xf32, #tpu.memory_space<vmem>>, vector<256x64xf32>
    %cst_73 = arith.constant dense<0.000000e+00> : vector<8x64xf32>
    %100 = tpu.matmul %98, %99, %cst_73 {dimension_numbers = #tpu.dot_dimension_numbers<[1], [0], [0], [1], [0, 0, 1, 1], [], []>} : vector<8x256xf32>, vector<256x64xf32>, vector<8x64xf32> -> vector<8x64xf32>
    %c3_74 = arith.constant 3 : index
    %c0_75 = arith.constant 0 : index
    %101 = vector.load %arg5[%c3_74, %c0_75] : memref<6x384xf32, #tpu.memory_space<vmem>>, vector<1x64xf32>
    %102 = vector.broadcast %101 : vector<1x64xf32> to vector<8x64xf32>
    %103 = arith.addf %100, %102 : vector<8x64xf32>
    %cst_76 = arith.constant 0.000000e+00 : f32
    %104 = vector.broadcast %cst_76 : f32 to vector<8x64xf32>
    %105 = arith.maximumf %103, %104 : vector<8x64xf32>
    %c0_77 = arith.constant 0 : index
    %c0_78 = arith.constant 0 : index
    %106 = vector.load %arg10[%c0_77, %c0_78] : memref<64x64xf32, #tpu.memory_space<vmem>>, vector<64x64xf32>
    %cst_79 = arith.constant dense<0.000000e+00> : vector<8x64xf32>
    %107 = tpu.matmul %105, %106, %cst_79 {dimension_numbers = #tpu.dot_dimension_numbers<[1], [0], [0], [1], [0, 0, 1, 1], [], []>} : vector<8x64xf32>, vector<64x64xf32>, vector<8x64xf32> -> vector<8x64xf32>
    %c4_80 = arith.constant 4 : index
    %c0_81 = arith.constant 0 : index
    %108 = vector.load %arg5[%c4_80, %c0_81] : memref<6x384xf32, #tpu.memory_space<vmem>>, vector<1x64xf32>
    %109 = vector.broadcast %108 : vector<1x64xf32> to vector<8x64xf32>
    %110 = arith.addf %107, %109 : vector<8x64xf32>
    %cst_82 = arith.constant 0.000000e+00 : f32
    %111 = vector.broadcast %cst_82 : f32 to vector<8x64xf32>
    %112 = arith.maximumf %110, %111 : vector<8x64xf32>
    %c0_83 = arith.constant 0 : index
    %c0_84 = arith.constant 0 : index
    %113 = vector.load %arg11[%c0_83, %c0_84] : memref<64x128xf32, #tpu.memory_space<vmem>>, vector<64x128xf32>
    %cst_85 = arith.constant dense<0.000000e+00> : vector<8x128xf32>
    %114 = tpu.matmul %112, %113, %cst_85 {dimension_numbers = #tpu.dot_dimension_numbers<[1], [0], [0], [1], [0, 0, 1, 1], [], []>} : vector<8x64xf32>, vector<64x128xf32>, vector<8x128xf32> -> vector<8x128xf32>
    %c5 = arith.constant 5 : index
    %c0_86 = arith.constant 0 : index
    %115 = vector.load %arg5[%c5, %c0_86] : memref<6x384xf32, #tpu.memory_space<vmem>>, vector<1x128xf32>
    %116 = vector.broadcast %115 : vector<1x128xf32> to vector<8x128xf32>
    %117 = arith.addf %114, %116 : vector<8x128xf32>
    %c0_87 = arith.constant 0 : index
    %c0_88 = arith.constant 0 : index
    %118 = vector.load %arg12[%c0_87, %c0_88] : memref<8x128xf32, #tpu.memory_space<vmem>>, vector<8x128xf32>
    tpu.vector_store %arg12[%c0_87, %c0_88], %117 {strides = array<i32>} : memref<8x128xf32, #tpu.memory_space<vmem>>, vector<8x128xf32>,
    return
  }
  func.func @transform_0(%arg0: i32) -> (i32, i32) {
    %c0_i32 = arith.constant 0 : i32
    %c0_i32_0 = arith.constant 0 : i32
    return %arg0, %c0_i32 : i32, i32
  }
  func.func @transform_1(%arg0: i32) -> (i32, i32, i32) {
    %c0_i32 = arith.constant 0 : i32
    %c0_i32_0 = arith.constant 0 : i32
    %c0_i32_1 = arith.constant 0 : i32
    %c0_i32_2 = arith.constant 0 : i32
    return %c0_i32, %c0_i32_0, %c0_i32_1 : i32, i32, i32
  }
  func.func @transform_2(%arg0: i32) -> (i32, i32, i32) {
    %c0_i32 = arith.constant 0 : i32
    %c0_i32_0 = arith.constant 0 : i32
    %c0_i32_1 = arith.constant 0 : i32
    %c0_i32_2 = arith.constant 0 : i32
    return %c0_i32, %c0_i32_0, %c0_i32_1 : i32, i32, i32
  }
  func.func @transform_3(%arg0: i32) -> (i32, i32, i32) {
    %c0_i32 = arith.constant 0 : i32
    %c0_i32_0 = arith.constant 0 : i32
    %c0_i32_1 = arith.constant 0 : i32
    %c0_i32_2 = arith.constant 0 : i32
    return %c0_i32, %c0_i32_0, %c0_i32_1 : i32, i32, i32
  }
  func.func @transform_4(%arg0: i32) -> (i32, i32) {
    %c0_i32 = arith.constant 0 : i32
    %c0_i32_0 = arith.constant 0 : i32
    %c0_i32_1 = arith.constant 0 : i32
    return %c0_i32, %c0_i32_0 : i32, i32
  }
  func.func @transform_5(%arg0: i32) -> (i32, i32) {
    %c0_i32 = arith.constant 0 : i32
    %c0_i32_0 = arith.constant 0 : i32
    %c0_i32_1 = arith.constant 0 : i32
    return %c0_i32, %c0_i32_0 : i32, i32
  }
  func.func @transform_6(%arg0: i32) -> (i32, i32) {
    %c0_i32 = arith.constant 0 : i32
    %c0_i32_0 = arith.constant 0 : i32
    %c0_i32_1 = arith.constant 0 : i32
    return %c0_i32, %c0_i32_0 : i32, i32
  }
  func.func @transform_7(%arg0: i32) -> (i32, i32, i32) {
    %c0_i32 = arith.constant 0 : i32
    %c0_i32_0 = arith.constant 0 : i32
    %c0_i32_1 = arith.constant 0 : i32
    %c0_i32_2 = arith.constant 0 : i32
    return %c0_i32, %c0_i32_0, %c0_i32_1 : i32, i32, i32
  }
  func.func @transform_8(%arg0: i32) -> (i32, i32) {
    %c0_i32 = arith.constant 0 : i32
    %c0_i32_0 = arith.constant 0 : i32
    %c0_i32_1 = arith.constant 0 : i32
    return %c0_i32, %c0_i32_0 : i32, i32
  }
  func.func @transform_9(%arg0: i32) -> (i32, i32) {
    %c0_i32 = arith.constant 0 : i32
    %c0_i32_0 = arith.constant 0 : i32
    %c0_i32_1 = arith.constant 0 : i32
    return %c0_i32, %c0_i32_0 : i32, i32
  }
  func.func @transform_10(%arg0: i32) -> (i32, i32) {
    %c0_i32 = arith.constant 0 : i32
    %c0_i32_0 = arith.constant 0 : i32
    %c0_i32_1 = arith.constant 0 : i32
    return %c0_i32, %c0_i32_0 : i32, i32
  }
  func.func @transform_11(%arg0: i32) -> (i32, i32) {
    %c0_i32 = arith.constant 0 : i32
    %c0_i32_0 = arith.constant 0 : i32
    return %arg0, %c0_i32 : i32, i32
  }
}

</mosaic_0001>

<bundles_post_ra>
// kernel: basenet_cnn_forward.1
= control target key start
LH: loop header
LB: loop body
LE: loop exit
PB: predicated region body
PF: predicated region fallthrough
CT: control target
= control target key end

     0   :  { %16 = vsyncpa [#allocation3], 0  ;;  %s13993_s0 = inlined_call_operand.vmem [shape: f32[112,28], index: 0, kind: input, shape index: {}]   ;;  %s13994_s1 = inlined_call_operand.hbm [shape: f32[5,28,320], index: 1, kind: input, shape index: {}]   ;;  %s13995_s2 = inlined_call_operand.hbm [shape: f32[5,320,384], index: 2, kind: input, shape index: {}]   ;;  %s13996_s3 = inlined_call_operand.hbm [shape: f32[3,384,256], index: 3, kind: input, shape index: {}]   ;;  %s13997_s4 = inlined_call_operand.hbm [shape: f32[6,384], index: 4, kind: input, shape index: {}]   ;;  %s13998_s5 = inlined_call_operand.hbm [shape: f32[80,108], index: 5, kind: input, shape index: {}]   ;;  %s13999_s6 = inlined_call_operand.hbm [shape: f32[48,76], index: 6, kind: input, shape index: {}]   ;;  %s14000_s7 = inlined_call_operand.hbm [shape: f32[2,8,45], index: 7, kind: input, shape index: {}]   ;;  %s14001_s8 = inlined_call_operand.vmem [shape: f32[256,64], index: 8, kind: input, shape index: {}]   ;;  %s14002_s9 = inlined_call_operand.hbm [shape: f32[64,64], index: 9, kind: input, shape index: {}]   ;;  %s14003_s10 = inlined_call_operand.hbm [shape: f32[64,128], index: 10, kind: input, shape index: {}]   ;;  %s14004_s11 = inlined_call_operand.vmem [shape: f32[8,128], index: 11, kind: output, shape index: {}]  }
   0x1   :  { %17 = vsyncpa [#allocation5], 0 }
   0x2   :  { %18 = vsyncpa [#allocation8], 0 }
   0x3   :  { %19 = vsyncpa [#allocation11], 0 }
   0x4   :  { %20 = vsyncpa [#allocation14], 0  ;;  %s11251_s17 = smov [#allocation4]   ;;  %s11252_s19 = smov [#allocation7]  }
   0x5   :  { %s40_s18 = sshll.u32 %s11251_s17, 4  ;;  %s65_s20 = sshll.u32 %s11252_s19, 4  ;;  %s41_s18 = int_to_ptr.vmem [resolvable:$true] %s40_s18  ;;  %s66_s20 = int_to_ptr.vmem [resolvable:$true] %s65_s20 }
   0x6   :  { %s11043_s23 = scalar_lea.hbm %s13995_s2, 76800 }
   0x7   :  { %p11044_p0 = scmp.ne.s32.totalorder %s13995_s2, %s11043_s23  ;;  %p11047_p1 = scmp.lt.u32.totalorder %s11043_s23, %s13995_s2 }
   0x9   :  { %p11049_p2 = pnand %p11047_p1, %p11044_p0 }
   0xb   :  { %11052 = shalt.err (!%p11049_p2)
}
   0xc   :  { %s11053_s28 = scalar_lea.vmem %s41_s18, 76800  ;;  %p11058_p4 = scmp.lt.s32.totalorder %s41_s18, %s41_s18 }
   0xd   :  { %p11054_p3 = scmp.ne.s32.totalorder %s41_s18, %s11053_s28  ;;  %p11059_p5 = scmp.lt.s32.totalorder %s11053_s28, %s11053_s28 }
   0xf   :  { %p11060_p6 = por %p11059_p5, %p11058_p4 }
  0x11   :  { %p11061_p7 = pnand %p11060_p6, %p11054_p3 }
  0x13   :  { %11064 = shalt.err (!%p11061_p7)
}
  0x14   :  { %s11253_s29 = smov 384   ;;  %s11254_s30 = smov 24  }
  0x15   :  { %46 = dma.hbm_to_vmem [thread:$0]  %s13995_s2, 76800, %s41_s18, [#allocation5], %s11253_s29, %s11253_s29, %s11254_s30  }
  0x16   :  { %s11065_s16 = scalar_lea.hbm %s13997_s4, 384 }
  0x17   :  { %p11066_p8 = scmp.ne.s32.totalorder %s13997_s4, %s11065_s16  ;;  %p11069_p9 = scmp.lt.u32.totalorder %s11065_s16, %s13997_s4 }
  0x19   :  { %p11071_p10 = pnand %p11069_p9, %p11066_p8 }
  0x1b   :  { %11074 = shalt.err (!%p11071_p10)
}
  0x1c   :  { %s11075_s23 = scalar_lea.vmem %s66_s20, 384  ;;  %p11080_p12 = scmp.lt.s32.totalorder %s66_s20, %s66_s20 }
  0x1d   :  { %p11076_p11 = scmp.ne.s32.totalorder %s66_s20, %s11075_s23  ;;  %p11081_p13 = scmp.lt.s32.totalorder %s11075_s23, %s11075_s23 }
  0x1f   :  { %p11082_p0 = por %p11081_p13, %p11080_p12 }
  0x21   :  { %p11083_p1 = pnand %p11082_p0, %p11076_p11 }
  0x23   :  { %11086 = shalt.err (!%p11083_p1)
}
  0x24   :  { %68 = dma.hbm_to_vmem [thread:$0]  %s13997_s4, 384, %s66_s20, [#allocation8]  }
  0x25   :  { %s11255_s24 = smov [#allocation10]   ;;  %s11256_s26 = smov [#allocation13]  }
  0x26   :  { %s86_s25 = sshll.u32 %s11255_s24, 4  ;;  %s112_s27 = sshll.u32 %s11256_s26, 4  ;;  %s87_s25 = int_to_ptr.vmem [resolvable:$true] %s86_s25  ;;  %s11358_s27 = int_to_ptr.vmem [resolvable:$true] %s112_s27 }
  0x27   :  { %s11087_s13 = scalar_lea.hbm %s13999_s6, 768 }
  0x28   :  { %p11088_p2 = scmp.ne.s32.totalorder %s13999_s6, %s11087_s13  ;;  %p11091_p3 = scmp.lt.u32.totalorder %s11087_s13, %s13999_s6 }
  0x2a   :  { %p11093_p4 = pnand %p11091_p3, %p11088_p2 }
  0x2c   :  { %11096 = shalt.err (!%p11093_p4)
}
  0x2d   :  { %s11097_s4 = scalar_lea.vmem %s87_s25, 768  ;;  %p11102_p6 = scmp.lt.s32.totalorder %s87_s25, %s87_s25 }
  0x2e   :  { %p11098_p5 = scmp.ne.s32.totalorder %s87_s25, %s11097_s4  ;;  %p11103_p7 = scmp.lt.s32.totalorder %s11097_s4, %s11097_s4 }
  0x30   :  { %p11104_p8 = por %p11103_p7, %p11102_p6 }
  0x32   :  { %p11105_p9 = pnand %p11104_p8, %p11098_p5 }
  0x34   :  { %11108 = shalt.err (!%p11105_p9)
}
  0x35   :  { %s11257_s20 = smov 128   ;;  %s11258_s19 = smov 8  }
  0x36   :  { %92 = dma.hbm_to_vmem [thread:$0]  %s13999_s6, 768, %s87_s25, [#allocation11], %s11257_s20, %s11257_s20, %s11258_s19  }
  0x37   :  { %s11109_s18 = scalar_lea.hbm %s14002_s9, 1024 }
  0x38   :  { %p11110_p10 = scmp.ne.s32.totalorder %s14002_s9, %s11109_s18  ;;  %p11113_p11 = scmp.lt.u32.totalorder %s11109_s18, %s14002_s9 }
  0x3a   :  { %p11115_p12 = pnand %p11113_p11, %p11110_p10 }
  0x3c   :  { %11118 = shalt.err (!%p11115_p12)
}
  0x3d   :  { %s11119_s13 = scalar_lea.vmem %s11358_s27, 1024  ;;  %p11124_p0 = scmp.lt.s32.totalorder %s11358_s27, %s11358_s27 }
  0x3e   :  { %p11120_p13 = scmp.ne.s32.totalorder %s11358_s27, %s11119_s13  ;;  %p11125_p1 = scmp.lt.s32.totalorder %s11119_s13, %s11119_s13 }
  0x40   :  { %p11126_p2 = por %p11125_p1, %p11124_p0 }
  0x42   :  { %p11127_p3 = pnand %p11126_p2, %p11120_p13 }
  0x44   :  { %11130 = shalt.err (!%p11127_p3)
}
  0x45   :  { %118 = dma.hbm_to_vmem [thread:$0]  %s14002_s9, 1024, %s11358_s27, [#allocation14], %s11257_s20, %s11257_s20, %s11258_s19  }
  0x46   :  { %s11259_s14 = smov [#allocation2]   ;;  %s11260_s16 = smov [#allocation6]  }
  0x47   :  { %s28_s15 = sshll.u32 %s11259_s14, 4  ;;  %s52_s17 = sshll.u32 %s11260_s16, 4  ;;  %s29_s15 = int_to_ptr.vmem [resolvable:$true] %s28_s15  ;;  %s11395_s17 = int_to_ptr.vmem [resolvable:$true] %s52_s17 }
  0x48   :  { %s11131_s22 = scalar_lea.hbm %s13994_s1, 7680 }
  0x49   :  { %p11132_p4 = scmp.ne.s32.totalorder %s13994_s1, %s11131_s22  ;;  %p11135_p5 = scmp.lt.u32.totalorder %s11131_s22, %s13994_s1 }
  0x4b   :  { %p11137_p6 = pnand %p11135_p5, %p11132_p4 }
  0x4d   :  { %11140 = shalt.err (!%p11137_p6)
}
  0x4e   :  { %s11141_s9 = scalar_lea.vmem %s29_s15, 7680  ;;  %p11146_p8 = scmp.lt.s32.totalorder %s29_s15, %s29_s15 }
  0x4f   :  { %p11142_p7 = scmp.ne.s32.totalorder %s29_s15, %s11141_s9  ;;  %p11147_p9 = scmp.lt.s32.totalorder %s11141_s9, %s11141_s9 }
  0x51   :  { %p11148_p10 = por %p11147_p9, %p11146_p8 }
  0x53   :  { %p11149_p11 = pnand %p11148_p10, %p11142_p7 }
  0x55   :  { %11152 = shalt.err (!%p11149_p11)
}
  0x56   :  { %34 = dma.hbm_to_vmem [thread:$0]  %s13994_s1, 7680, %s29_s15, [#allocation3], %s11253_s29, %s11253_s29, %s11254_s30  }
  0x57   :  { %s11153_s13 = scalar_lea.hbm %s13996_s3, 36864 }
  0x58   :  { %p11154_p12 = scmp.ne.s32.totalorder %s13996_s3, %s11153_s13  ;;  %p11157_p13 = scmp.lt.u32.totalorder %s11153_s13, %s13996_s3 }
  0x5a   :  { %p11159_p0 = pnand %p11157_p13, %p11154_p12 }
  0x5c   :  { %11162 = shalt.err (!%p11159_p0)
}
  0x5d   :  { %s11163_s4 = scalar_lea.vmem %s11395_s17, 36864  ;;  %p11168_p2 = scmp.lt.s32.totalorder %s11395_s17, %s11395_s17 }
  0x5e   :  { %p11164_p1 = scmp.ne.s32.totalorder %s11395_s17, %s11163_s4  ;;  %p11169_p3 = scmp.lt.s32.totalorder %s11163_s4, %s11163_s4 }
  0x60   :  { %p11170_p4 = por %p11169_p3, %p11168_p2 }
  0x62   :  { %p11171_p5 = pnand %p11170_p4, %p11164_p1 }
  0x64   :  { %11174 = shalt.err (!%p11171_p5)
}
  0x65   :  { %s11261_s1 = smov 256   ;;  %s11262_s29 = smov 16  }
  0x66   :  { %58 = dma.hbm_to_vmem [thread:$0]  %s13996_s3, 36864, %s11395_s17, [#allocation5], %s11261_s1, %s11261_s1, %s11262_s29  }
  0x67   :  { %s11263_s21 = smov [#allocation9]   ;;  %s11264_s23 = smov [#allocation12]  }
  0x68   :  { %s74_s22 = sshll.u32 %s11263_s21, 4  ;;  %s98_s2 = sshll.u32 %s11264_s23, 4  ;;  %s75_s22 = int_to_ptr.vmem [resolvable:$true] %s74_s22  ;;  %s11429_s2 = int_to_ptr.vmem [resolvable:$true] %s98_s2 }
  0x69   :  { %s11175_s9 = scalar_lea.hbm %s13998_s5, 1280 }
  0x6a   :  { %p11176_p6 = scmp.ne.s32.totalorder %s13998_s5, %s11175_s9  ;;  %p11179_p7 = scmp.lt.u32.totalorder %s11175_s9, %s13998_s5 }
  0x6c   :  { %p11181_p8 = pnand %p11179_p7, %p11176_p6 }
  0x6e   :  { %11184 = shalt.err (!%p11181_p8)
}
  0x6f   :  { %s11185_s3 = scalar_lea.vmem %s75_s22, 1280  ;;  %p11190_p10 = scmp.lt.s32.totalorder %s75_s22, %s75_s22 }
  0x70   :  { %p11186_p9 = scmp.ne.s32.totalorder %s75_s22, %s11185_s3  ;;  %p11191_p11 = scmp.lt.s32.totalorder %s11185_s3, %s11185_s3 }
  0x72   :  { %p11192_p12 = por %p11191_p11, %p11190_p10 }
  0x74   :  { %p11193_p13 = pnand %p11192_p12, %p11186_p9 }
  0x76   :  { %11196 = shalt.err (!%p11193_p13)
}
  0x77   :  { %80 = dma.hbm_to_vmem [thread:$0]  %s13998_s5, 1280, %s75_s22, [#allocation8], %s11257_s20, %s11257_s20, %s11258_s19  }
  0x78   :  { %s11197_s14 = scalar_lea.hbm %s14000_s7, 256 }
  0x79   :  { %p11198_p0 = scmp.ne.s32.totalorder %s14000_s7, %s11197_s14  ;;  %p11201_p1 = scmp.lt.u32.totalorder %s11197_s14, %s14000_s7 }
  0x7b   :  { %p11203_p2 = pnand %p11201_p1, %p11198_p0 }
  0x7d   :  { %11206 = shalt.err (!%p11203_p2)
}
  0x7e   :  { %s11207_s30 = scalar_lea.vmem %s11429_s2, 256  ;;  %p11212_p4 = scmp.lt.s32.totalorder %s11429_s2, %s11429_s2 }
  0x7f   :  { %p11208_p3 = scmp.ne.s32.totalorder %s11429_s2, %s11207_s30  ;;  %p11213_p5 = scmp.lt.s32.totalorder %s11207_s30, %s11207_s30 }
  0x81   :  { %p11214_p6 = por %p11213_p5, %p11212_p4 }
  0x83   :  { %p11215_p7 = pnand %p11214_p6, %p11208_p3 }
  0x85   :  { %11218 = shalt.err (!%p11215_p7)
}
  0x86   :  { %104 = dma.hbm_to_vmem [thread:$0]  %s14000_s7, 256, %s11429_s2, [#allocation11], %s11257_s20, %s11257_s20, %s11258_s19  }
  0x87   :  { %s11265_s21 = smov [#allocation15]   ;;  %s11219_s24 = scalar_lea.hbm %s14003_s10, 1024 }
  0x88   :  { %s124_s22 = sshll.u32 %s11265_s21, 4  ;;  %p11220_p8 = scmp.ne.s32.totalorder %s14003_s10, %s11219_s24  ;;  %s125_s22 = int_to_ptr.vmem [resolvable:$true] %s124_s22 }
  0x89   :  { %p11223_p9 = scmp.lt.u32.totalorder %s11219_s24, %s14003_s10 }
  0x8b   :  { %p11225_p10 = pnand %p11223_p9, %p11220_p8 }
  0x8d   :  { %11228 = shalt.err (!%p11225_p10)
}
  0x8e   :  { %s11229_s12 = scalar_lea.vmem %s125_s22, 1024  ;;  %p11234_p12 = scmp.lt.s32.totalorder %s125_s22, %s125_s22 }
  0x8f   :  { %p11230_p11 = scmp.ne.s32.totalorder %s125_s22, %s11229_s12  ;;  %p11235_p13 = scmp.lt.s32.totalorder %s11229_s12, %s11229_s12 }
  0x91   :  { %p11236_p0 = por %p11235_p13, %p11234_p12 }
  0x93   :  { %p11237_p1 = pnand %p11236_p0, %p11230_p11 }
  0x95   :  { %11240 = shalt.err (!%p11237_p1)
}
  0x96   :  { %130 = dma.hbm_to_vmem [thread:$0]  %s14003_s10, 1024, %s125_s22, [#allocation14], %s11257_s20, %s11257_s20, %s11258_s19  }
  0x97   :  { %11241 = dma.done.wait [#allocation3], 7680  }
  0x98   :  { %11242 = vsyncadd [#allocation3], 4294959616 }
  0x99   :  { %11243 = dma.done.wait [#allocation5], 113664  }
  0x9a   :  { %11244 = vsyncadd [#allocation5], 4294853632 }
  0x9b   :  { %11245 = dma.done.wait [#allocation8], 1664  }
  0x9c   :  { %11246 = vsyncadd [#allocation8], 4294965632 }
  0x9d   :  { %11247 = dma.done.wait [#allocation11], 1024  }
  0x9e   :  { %11248 = vsyncadd [#allocation11], 4294966272 }
  0x9f   :  { %11249 = dma.done.wait [#allocation14], 2048  }
  0xa0   :  { %11250 = vsyncadd [#allocation14], 4294965248  ;;  %v14006_v0 = vmov 0.0   ;;  %vm269_vm0 = vcmask 1043456   ;;  %vm11267_vm1 = vmmov 1   ;;  %v14097_v1 = vmov 0 }
  0xa1   :  { %343 = vmatprep.mubr.f32.mxu0 %v14006_v0  ;;  %403 = vmatprep.mubr.f32.mxu1 %v14006_v0  ;;  %vm11485_vm2 = vmpackc.low %vm269_vm0, %vm11267_vm1  ;;  %v187_v2 = vld [vmem:[#allocation2 + $0x68] sm:$0xff]  ;;  %v190_v3 = vld [vmem:[#allocation2 + $0x80] sm:$0xff]  ;;  %vm212_vm3 = vcmask 1046528   ;;  %vm897_vm4 = vcmask 1045504   ;;  %vm240_vm5 = vcmask 228352   ;;  %vm1301_vm6 = vcmask 1044480  }
  0xa2   :  { %v14098_v1 = vsel %vm11485_vm2, 4294967295, %v14097_v1  ;;  %v186_v4 = vld [vmem:[#allocation2 + $0x60] sm:$0xff]  ;;  %v9278_v5 = vpack.c.bf16 %v190_v3, %v187_v2  ;;  %v189_v6 = vld [vmem:[#allocation2 + $0x78] sm:$0xff]  ;;  %v196_v8 = vld [vmem:[#allocation2 + $0xb0] sm:$0xf]  ;;  %vm2205_vm7 = vcmask 883712  }
  0xa3   :  { %14099 = vst [vmem:[#allocation21_spill] sm:$0xff] %v14098_v1  ;;  %v193_v7 = vld [vmem:[#allocation2 + $0x98] sm:$0xff]  ;;  %v9280_v9 = vpack.c.bf16 %v189_v6, %v186_v4  ;;  %v192_v11 = vld [vmem:[#allocation2 + $0x90] sm:$0xff]  ;;  %v195_v12 = vld [vmem:[#allocation2 + $0xa8] sm:$0xf]  ;;  %vm2835_vm8 = vcmask 523264  }
  0xa4   :  { %v9282_v10 = vpack.c.bf16 %v196_v8, %v193_v7  ;;  %v11492_v13 = vld [vmem:[%s13993_s0] sm:$0xff]  ;;  %9279 = vmatprep.subr.bf16.mxu0 %v9278_v5  ;;  %v9285_v14 = vpack.c.bf16 %v195_v12, %v192_v11  ;;  %v11497_v15 = vld [vmem:[%s13993_s0 + $0x8] sm:$0xff]  ;;  %10486 = vmatprep.subr.bf16.mxu1 %v9278_v5  ;;  %v11508_v22 = vld [vmem:[%s13993_s0 + $0x10] sm:$0xff]  ;;  %vm6102_vm9 = vcmask 621568   ;;  %vm11270_vm10 = vmmov 0  }
  0xa5   :  { %v174_v16 = vld [vmem:[#allocation2 + $0x8] sm:$0xff]  ;;  %9281 = vmatpush1.bf16.msra.mxu0 %v9280_v9  ;;  %v213_v17 = vrot.slane %v11492_v13, 1  ;;  %v214_v18 = vrot.slane %v11497_v15, 1  ;;  %v177_v19 = vld [vmem:[#allocation2 + $0x20] sm:$0xff]  ;;  %10488 = vmatpush1.bf16.msra.mxu1 %v9280_v9  ;;  %v898_v20 = vrot.slane %v11492_v13, 2  ;;  %v899_v21 = vrot.slane %v11497_v15, 2  ;;  %vm13865_vm11 = vmpackc.low %vm1301_vm6, %vm11267_vm1 }
  0xa6   :  { %9284 = vmatprep.subr.msk.bf16.mxu0 %vm11485_vm2, %v9282_v10  ;;  %v9298_v23 = vpack.c.bf16 %v177_v19, %v174_v16  ;;  %v173_v24 = vld [vmem:[#allocation2] sm:$0xff]  ;;  %v176_v25 = vld [vmem:[#allocation2 + $0x18] sm:$0xff]  ;;  %10487 = vmatprep.subr.msk.bf16.mxu1 %vm11485_vm2, %v9282_v10  ;;  %v183_v28 = vld [vmem:[#allocation2 + $0x50] sm:$0xf]  ;;  %v901_v29 = vrot.slane %v11508_v22, 2  ;;  %v216_v31 = vrot.slane %v11508_v22, 1 }
  0xa7   :  { %v180_v26 = vld [vmem:[#allocation2 + $0x38] sm:$0xff]  ;;  %v11521_v30 = vsel %vm212_vm3, %v213_v17, %v214_v18  ;;  %v9300_v32 = vpack.c.bf16 %v176_v25, %v173_v24  ;;  %v179_v33 = vld [vmem:[#allocation2 + $0x30] sm:$0xff]  ;;  %v182_v34 = vld [vmem:[#allocation2 + $0x48] sm:$0xf]  ;;  %v11527_v35 = vsel %vm897_vm4, %v898_v20, %v899_v21  ;;  %v1303_v16 = vrot.slane %v11497_v15, 3 }
  0xa8   :  { %v11515_v27 = vld [vmem:[%s13993_s0 + $0x18] sm:$0xff]  ;;  %v9302_v36 = vpack.c.bf16 %v183_v28, %v180_v26  ;;  %v11532_v37 = vld [vmem:[%s13993_s0 + $0x50] sm:$0xff]  ;;  %v11542_v39 = vld [vmem:[%s13993_s0 + $0x60] sm:$0xff]  ;;  %v11561_v51 = vsel %vm897_vm4, %v899_v21, %v901_v29  ;;  %v11566_v53 = vsel %vm212_vm3, %v214_v18, %v216_v31  ;;  %v9305_v54 = vpack.c.bf16 %v182_v34, %v179_v33 }
  0xa9   :  { %9287 = vmatpush1.bf16.msk.msra.mxu0 %vm11485_vm2, %v9285_v14  ;;  %10489 = vmatpush1.bf16.msk.msra.mxu1 %vm11485_vm2, %v9285_v14  ;;  %v11537_v38 = vld [vmem:[%s13993_s0 + $0x58] sm:$0xff]  ;;  %v218_v40 = vrot.slane %v11515_v27, 1  ;;  %v11548_v41 = vld [vmem:[%s13993_s0 + $0x20] sm:$0xff]  ;;  %v232_v42 = vrot.slane %v11532_v37, 1  ;;  %v188_v44 = vld [vmem:[#allocation2 + $0x70] sm:$0xff]  ;;  %v236_v46 = vrot.slane %v11542_v39, 1 }
  0xaa   :  { %9299 = vmatprep.subr.bf16.mxu0 %v9298_v23  ;;  %v234_v43 = vrot.slane %v11537_v38, 1  ;;  %v191_v45 = vld [vmem:[#allocation2 + $0x88] sm:$0xff]  ;;  %v889_v50 = vld [vmem:[#allocation2 + $0xe0] sm:$0xff]  ;;  %v903_v52 = vrot.slane %v11515_v27, 2  ;;  %v197_v57 = vld [vmem:[#allocation2 + $0xb8] sm:$0xf] }
  0xab   :  { %v11558_v47 = vld [vmem:[%s13993_s0 + $0x68] sm:$0xff]  ;;  %v9288_v48 = vpack.c.bf16 %v191_v45, %v188_v44  ;;  %v194_v56 = vld [vmem:[#allocation2 + $0xa0] sm:$0xff]  ;;  %v905_v58 = vrot.slane %v11548_v41, 2  ;;  %v175_v60 = vld [vmem:[#allocation2 + $0x10] sm:$0xff]  ;;  %v219_v4 = vsel %vm212_vm3, %v216_v31, %v218_v40  ;;  %v220_v5 = vrot.slane %v11548_v41, 1 }
  0xac   :  { %7944 = vmatmul.mubr.msk.f32.vlgmr.msra.gmra.mrb[0].mxu0 %vm240_vm5, %v11521_v30  ;;  %v886_v49 = vld [vmem:[#allocation2 + $0xc8] sm:$0xff]  ;;  %v11571_v55 = vsel %vm212_vm3, %v232_v42, %v234_v43  ;;  %v11580_v62 = vsel %vm212_vm3, %v234_v43, %v236_v46  ;;  %v11583_v63 = vrot.slane %v11558_v47, 1  ;;  %v9292_v2 = vpack.c.bf16 %v197_v57, %v194_v56  ;;  %v11623_v12 = vld [vmem:[%s13993_s0 + $0x30] sm:$0xff]  ;;  %v181_v23 = vld [vmem:[#allocation2 + $0x40] sm:$0xff] }
  0xad   :  { %349 = vmatprep.mubr.f32.mxu0 %v14006_v0  ;;  %9301 = vmatpush1.bf16.msra.mxu0 %v9300_v32  ;;  %v9318_v59 = vpack.c.bf16 %v889_v50, %v886_v49  ;;  %v178_v61 = vld [vmem:[#allocation2 + $0x28] sm:$0xff]  ;;  %v11588_v3 = vsel %vm897_vm4, %v901_v29, %v903_v52  ;;  %v11598_v7 = vsel %vm897_vm4, %v903_v52, %v905_v58  ;;  %v1302_v14 = vrot.slane %v11492_v13, 3  ;;  %v184_v24 = vld [vmem:[#allocation2 + $0x58] sm:$0xf]  ;;  %v11666_v44 = vld [vmem:[%s13993_s0 + $0x40] sm:$0xff] }
  0xae   :  { %9304 = vmatprep.subr.msk.bf16.mxu0 %vm11485_vm2, %v9302_v36  ;;  %7954 = vmatmul.mubr.msk.f32.vlgmr.msra.gmra.mrb[0].mxu1 %vm240_vm5, %v11571_v55  ;;  %v9308_v6 = vpack.c.bf16 %v178_v61, %v175_v60  ;;  %v11603_v8 = vld [vmem:[%s13993_s0 + $0x28] sm:$0xff]  ;;  %v11610_v9 = vsel %vm212_vm3, %v236_v46, %v11583_v63  ;;  %v221_v10 = vsel %vm212_vm3, %v218_v40, %v220_v5  ;;  %v1305_v17 = vrot.slane %v11508_v22, 3  ;;  %v11643_v26 = vld [vmem:[%s13993_s0 + $0x38] sm:$0xff]  ;;  %v887_v40 = vld [vmem:[#allocation2 + $0xd0] sm:$0xff] }
  0xaf   :  { %409 = vmatprep.mubr.f32.mxu1 %v14006_v0  ;;  %9289 = vmatprep.subr.bf16.mxu1 %v9288_v48  ;;  %v222_v11 = vrot.slane %v11603_v8, 1  ;;  %v1307_v18 = vrot.slane %v11515_v27, 3  ;;  %v1309_v19 = vrot.slane %v11548_v41, 3  ;;  %v224_v21 = vrot.slane %v11623_v12, 1  ;;  %v890_v43 = vld [vmem:[#allocation2 + $0xe8] sm:$0xff]  ;;  %v885_v56 = vld [vmem:[#allocation2 + $0xc0] sm:$0xff] }
  0xb0   :  { %7945 = vmatmul.mubr.msk.f32.gmra.mrb[2].mxu0 %vm240_vm5, %v11566_v53  ;;  %9291 = vmatpush3.bf16.msra.mxu1 %v9288_v48  ;;  %v11638_v25 = vsel %vm1301_vm6, %v1302_v14, %v1303_v16  ;;  %v11648_v28 = vsel %vm1301_vm6, %v1303_v16, %v1305_v17  ;;  %v9312_v32 = vpack.c.bf16 %v184_v24, %v181_v23  ;;  %v1311_v33 = vrot.slane %v11603_v8, 3  ;;  %v11687_v49 = vld [vmem:[%s13993_s0 + $0x48] sm:$0xff]  ;;  %v888_v57 = vld [vmem:[#allocation2 + $0xd8] sm:$0xff]  ;;  %v895_v60 = vld [vmem:[#allocation2 + $0x110] sm:$0xf]  ;;  %s11268_s0 = smov 64  }
  0xb1   :  { %355 = vmatprep.mubr.f32.mxu0 %v14006_v0  ;;  %9307 = vmatpush1.bf16.msk.msra.mxu0 %vm11485_vm2, %v9305_v54  ;;  %v223_v20 = vsel %vm212_vm3, %v220_v5, %v222_v11  ;;  %v11651_v29 = vsel %vm1301_vm6, %v1305_v17, %v1307_v18  ;;  %v11654_v31 = vsel %vm1301_vm6, %v1307_v18, %v1309_v19  ;;  %v226_v36 = vrot.slane %v11643_v26, 1  ;;  %v1290_v14 = vld [vmem:[#allocation2 + $0x128] sm:$0xff]  ;;  %v1293_v16 = vld [vmem:[#allocation2 + $0x140] sm:$0xff] }
  0xb2   :  { %7955 = vmatmul.mubr.msk.f32.gmra.mrb[2].mxu1 %vm240_vm5, %v11580_v62  ;;  %9319 = vmatprep.subr.bf16.mxu0 %v9318_v59  ;;  %v225_v34 = vsel %vm212_vm3, %v222_v11, %v224_v21  ;;  %v11679_v45 = vpack.c.bf16 %v890_v43, %v887_v40  ;;  %v228_v48 = vrot.slane %v11666_v44, 1  ;;  %v230_v52 = vrot.slane %v11687_v49, 1  ;;  %v892_v59 = vld [vmem:[#allocation2 + $0xf8] sm:$0xff]  ;;  %v1695_v40 = vld [vmem:[#allocation2 + $0x190] sm:$0xff]  ;;  %v1698_v43 = vld [vmem:[#allocation2 + $0x1a8] sm:$0xff] }
  0xb3   :  { %415 = vmatprep.mubr.f32.mxu1 %v14006_v0  ;;  %9294 = vmatprep.subr.msk.bf16.mxu1 %vm11485_vm2, %v9292_v2  ;;  %v227_v46 = vsel %vm212_vm3, %v224_v21, %v226_v36  ;;  %v1705_v61 = vrot.slane %v11492_v13, 4  ;;  %v9322_v5 = vpack.c.bf16 %v895_v60, %v892_v59  ;;  %v1710_v17 = vrot.slane %v11515_v27, 4 }
  0xb4   :  { %7946 = vmatmul.mubr.msk.f32.gmra.mrb[4].mxu0 %vm240_vm5, %v219_v4  ;;  %9297 = vmatpush3.bf16.msk.msra.mxu1 %vm11485_vm2, %v9292_v2  ;;  %v229_v50 = vsel %vm212_vm3, %v226_v36, %v228_v48  ;;  %v233_v54 = vsel %vm212_vm3, %v230_v52, %v232_v42  ;;  %v1706_v2 = vrot.slane %v11497_v15, 4  ;;  %v9320_v42 = vpack.c.bf16 %v888_v57, %v885_v56 }
  0xb5   :  { %361 = vmatprep.mubr.f32.mxu0 %v14006_v0  ;;  %9309 = vmatprep.subr.bf16.mxu1 %v9308_v6  ;;  %v917_v56 = vrot.slane %v11532_v37, 2  ;;  %v919_v59 = vrot.slane %v11537_v38, 2  ;;  %vm7511_vm12 = vcmask 367616  }
  0xb6   :  { %7956 = vmatmul.mubr.msk.f32.gmra.mrb[4].mxu1 %vm240_vm5, %v11610_v9 }
  0xb7   :  { %421 = vmatprep.mubr.f32.mxu1 %v14006_v0 }
  0xb8   :  { %7947 = vmatmul.mubr.msk.f32.gmra.mrb[6].mxu0 %vm240_vm5, %v221_v10 }
  0xb9   :  { %367 = vmatprep.mubr.f32.mxu0 %v14006_v0 }
  0xba   :  { %7957 = vmatmul.mubr.msk.f32.gmra.mrb[6].mxu1 %vm240_vm5, %v11583_v63 }
  0xbb   :  { %8846 = vmatprep.mubr.msk.f32.mxu1 %vm240_vm5, %v11521_v30  ;;  %v11673_v30 = vsel %vm1301_vm6, %v1309_v19, %v1311_v33  ;;  %v893_v19 = vld [vmem:[#allocation2 + $0x100] sm:$0xff] }
  0xbc   :  { %7948 = vmatmul.mubr.msk.f32.gmra.mrb[8].mxu0 %vm240_vm5, %v223_v20 }
  0xbd   :  { %373 = vmatprep.mubr.f32.mxu0 %v14006_v0 }
  0xbe   :  { %8847 = vmatmul.mubr.msk.f32.vlgmr.msra.gmra.mrb[8].mxu1 %vm240_vm5, %v11566_v53  ;;  %v231_v53 = vsel %vm212_vm3, %v228_v48, %v230_v52  ;;  %v909_v48 = vrot.slane %v11623_v12, 2  ;;  %v911_v52 = vrot.slane %v11643_v26, 2 }
  0xbf   :  { %8849 = vmatprep.mubr.msk.f32.mxu1 %vm240_vm5, %v219_v4  ;;  %9311 = vmatpush3.bf16.msra.mxu1 %v9308_v6  ;;  %v1708_v4 = vrot.slane %v11508_v22, 4  ;;  %v891_v6 = vld [vmem:[#allocation2 + $0xf0] sm:$0xff] }
  0xc0   :  { %7949 = vmatmul.mubr.msk.f32.gmra.mrb[10].mxu0 %vm240_vm5, %v225_v34  ;;  %9314 = vmatprep.subr.msk.bf16.mxu1 %vm11485_vm2, %v9312_v32 }
  0xc1   :  { %379 = vmatprep.mubr.f32.mxu0 %v14006_v0  ;;  %v11724_v11 = vsel %vm269_vm0, %v1706_v2, %v1708_v4  ;;  %v11738_v21 = vsel %vm269_vm0, %v1708_v4, %v1710_v17  ;;  %v11873_v4 = vsel %vm897_vm4, %v917_v56, %v919_v59 }
  0xc2   :  { %8850 = vmatmul.mubr.msk.f32.gmra.mrb[10].mxu1 %vm240_vm5, %v221_v10  ;;  %v894_v10 = vld [vmem:[#allocation2 + $0x108] sm:$0xf] }
  0xc3   :  { %8852 = vmatprep.mubr.msk.f32.mxu1 %vm240_vm5, %v223_v20  ;;  %9317 = vmatpush3.bf16.msk.msra.mxu1 %vm11485_vm2, %v9312_v32  ;;  %v9325_v18 = vpack.c.bf16 %v894_v10, %v891_v6  ;;  %v896_v20 = vld [vmem:[#allocation2 + $0x118] sm:$0xf]  ;;  %v1714_v32 = vrot.slane %v11603_v8, 4 }
  0xc4   :  { %7950 = vmatmul.mubr.msk.f32.gmra.mrb[12].mxu0 %vm240_vm5, %v227_v46  ;;  %9329 = vmatprep.subr.bf16.mxu1 %v11679_v45  ;;  %v9332_v24 = vpack.c.bf16 %v896_v20, %v893_v19  ;;  %v1292_v6 = vld [vmem:[#allocation2 + $0x138] sm:$0xff]  ;;  %v1295_v19 = vld [vmem:[#allocation2 + $0x150] sm:$0xff]  ;;  %v1298_v20 = vld [vmem:[#allocation2 + $0x168] sm:$0xf] }
  0xc5   :  { %385 = vmatprep.mubr.f32.mxu0 %v14006_v0 }
  0xc6   :  { %8853 = vmatmul.mubr.msk.f32.gmra.mrb[12].mxu1 %vm240_vm5, %v225_v34  ;;  %v1294_v34 = vld [vmem:[#allocation2 + $0x148] sm:$0xff] }
  0xc7   :  { %8855 = vmatprep.mubr.msk.f32.mxu1 %vm240_vm5, %v227_v46  ;;  %v11819_v46 = vpack.c.bf16 %v1698_v43, %v1695_v40  ;;  %v1319_v43 = vrot.slane %v11687_v49, 3 }
  0xc8   :  { %7951 = vmatmul.mubr.msk.f32.gmra.mrb[14].mxu0 %vm240_vm5, %v229_v50 }
  0xc9   :  { %391 = vmatprep.mubr.f32.mxu0 %v14006_v0 }
  0xca   :  { %8856 = vmatmul.mubr.msk.f32.gmra.mrb[14].mxu1 %vm240_vm5, %v229_v50 }
  0xcb   :  { %8858 = vmatprep.mubr.msk.f32.mxu1 %vm240_vm5, %v231_v53 }
  0xcc   :  { %7952 = vmatmul.mubr.msk.f32.gmra.mrb[16].mxu0 %vm240_vm5, %v231_v53  ;;  %v915_v53 = vrot.slane %v11687_v49, 2 }
  0xcd   :  { %397 = vmatprep.mubr.f32.mxu0 %v14006_v0 }
  0xce   :  { %8859 = vmatmul.mubr.msk.f32.gmra.mrb[16].mxu1 %vm240_vm5, %v233_v54 }
  0xcf   :  { %8861 = vmatprep.mubr.msk.f32.mxu1 %vm240_vm5, %v11571_v55  ;;  %v11721_v55 = vsel %vm269_vm0, %v1705_v61, %v1706_v2  ;;  %v11867_v61 = vsel %vm897_vm4, %v915_v53, %v917_v56  ;;  %v921_v2 = vrot.slane %v11542_v39, 2  ;;  %v1718_v56 = vrot.slane %v11643_v26, 4 }
  0xd0   :  { %7953 = vmatmul.mubr.msk.f32.gmra.mrb[18].mxu0 %vm240_vm5, %v233_v54  ;;  %v11847_v54 = vsel %vm897_vm4, %v909_v48, %v911_v52 }
  0xd1   :  { %664 = vmatprep.mubr.f32.mxu0 %v14006_v0  ;;  %v11884_v10 = vsel %vm897_vm4, %v919_v59, %v921_v2  ;;  %v1722_v59 = vrot.slane %v11687_v49, 4 }
  0xd2   :  { %8862 = vmatmul.mubr.msk.f32.gmra.mrb[18].mxu1 %vm240_vm5, %v11580_v62  ;;  %v1712_v62 = vrot.slane %v11548_v41, 4 }
  0xd3   :  { %8864 = vmatprep.mubr.msk.f32.mxu1 %vm240_vm5, %v11610_v9  ;;  %v9338_v9 = vpack.c.bf16 %v1293_v16, %v1290_v14  ;;  %v1296_v14 = vld [vmem:[#allocation2 + $0x158] sm:$0xff]  ;;  %v1299_v16 = vld [vmem:[#allocation2 + $0x170] sm:$0xf] }
  0xd4   :  { %7975 = vmatmul.mubr.msk.f32.vlgmr.msra.gmra.mrb[0].mxu0 %vm240_vm5, %v11492_v13  ;;  %v11741_v23 = vsel %vm269_vm0, %v1710_v17, %v1712_v62 }
  0xd5   :  { %670 = vmatprep.mubr.f32.mxu0 %v14006_v0  ;;  %9321 = vmatpush1.bf16.msra.mxu0 %v9320_v42  ;;  %v11876_v42 = vrot.slane %v11558_v47, 2 }
  0xd6   :  { %9324 = vmatprep.subr.msk.bf16.mxu0 %vm11485_vm2, %v9322_v5  ;;  %8865 = vmatmul.mubr.msk.f32.gmra.mrb[20].mxu1 %vm240_vm5, %v11583_v63  ;;  %v1291_v63 = vld [vmem:[#allocation2 + $0x130] sm:$0xff]  ;;  %v1289_v5 = vld [vmem:[#allocation2 + $0x120] sm:$0xff] }
  0xd7   :  { %8875 = vmatprep.mubr.msk.f32.mxu1 %vm240_vm5, %v11492_v13  ;;  %v11756_v13 = vsel %vm269_vm0, %v1712_v62, %v1714_v32  ;;  %v9348_v36 = vpack.c.bf16 %v1294_v34, %v1291_v63  ;;  %v11890_v17 = vsel %vm897_vm4, %v921_v2, %v11876_v42  ;;  %v9340_v62 = vpack.c.bf16 %v1292_v6, %v1289_v5  ;;  %v1701_v34 = vld [vmem:[#allocation2 + $0x1c0] sm:$0xff]  ;;  %v1700_v5 = vld [vmem:[#allocation2 + $0x1b8] sm:$0xff]  ;;  %v1703_v6 = vld [vmem:[#allocation2 + $0x1d0] sm:$0xf] }
  0xd8   :  { %7976 = vmatmul.mubr.msk.f32.gmra.mrb[2].mxu0 %vm240_vm5, %v11497_v15  ;;  %v9345_v63 = vpack.c.bf16 %v1298_v20, %v1295_v19  ;;  %v1693_v2 = vld [vmem:[#allocation2 + $0x180] sm:$0xff] }
  0xd9   :  { %676 = vmatprep.mubr.f32.mxu0 %v14006_v0  ;;  %9327 = vmatpush1.bf16.msk.msra.mxu0 %vm11485_vm2, %v9325_v18  ;;  %v9342_v18 = vpack.c.bf16 %v1299_v16, %v1296_v14  ;;  %v9362_v14 = vpack.c.bf16 %v1703_v6, %v1700_v5  ;;  %v1699_v16 = vld [vmem:[#allocation2 + $0x1b0] sm:$0xff] }
  0xda   :  { %8876 = vmatmul.mubr.msk.f32.vlgmr.msra.gmra.mrb[8].mxu1 %vm240_vm5, %v11497_v15  ;;  %9339 = vmatprep.subr.bf16.mxu0 %v9338_v9  ;;  %v1297_v15 = vld [vmem:[#allocation2 + $0x160] sm:$0xff]  ;;  %v1694_v9 = vld [vmem:[#allocation2 + $0x188] sm:$0xff] }
  0xdb   :  { %8878 = vmatprep.mubr.msk.f32.mxu1 %vm240_vm5, %v11508_v22  ;;  %9331 = vmatpush3.bf16.msra.mxu1 %v11679_v45  ;;  %v907_v45 = vrot.slane %v11603_v8, 2 }
  0xdc   :  { %7977 = vmatmul.mubr.msk.f32.gmra.mrb[4].mxu0 %vm240_vm5, %v11508_v22  ;;  %9334 = vmatprep.subr.msk.bf16.mxu1 %vm11485_vm2, %v9332_v24  ;;  %v1300_v22 = vld [vmem:[#allocation2 + $0x178] sm:$0xf] }
  0xdd   :  { %682 = vmatprep.mubr.f32.mxu0 %v14006_v0  ;;  %v11826_v50 = vsel %vm897_vm4, %v905_v58, %v907_v45  ;;  %v913_v58 = vrot.slane %v11666_v44, 2 }
  0xde   :  { %8879 = vmatmul.mubr.msk.f32.gmra.mrb[10].mxu1 %vm240_vm5, %v11515_v27 }
  0xdf   :  { %8881 = vmatprep.mubr.msk.f32.mxu1 %vm240_vm5, %v11548_v41  ;;  %9337 = vmatpush3.bf16.msk.msra.mxu1 %vm11485_vm2, %v9332_v24  ;;  %v11855_v57 = vsel %vm897_vm4, %v913_v58, %v915_v53  ;;  %v11860_v60 = vsel %vm897_vm4, %v911_v52, %v913_v58  ;;  %v1697_v24 = vld [vmem:[#allocation2 + $0x1a0] sm:$0xff]  ;;  %v1325_v52 = vrot.slane %v11542_v39, 3  ;;  %v11971_v53 = vrot.slane %v11558_v47, 3 }
  0xe0   :  { %7978 = vmatmul.mubr.msk.f32.gmra.mrb[6].mxu0 %vm240_vm5, %v11515_v27  ;;  %9349 = vmatprep.subr.bf16.mxu1 %v9348_v36  ;;  %v9352_v27 = vpack.c.bf16 %v1300_v22, %v1297_v15  ;;  %v9358_v15 = vpack.c.bf16 %v1697_v24, %v1694_v9  ;;  %v1313_v22 = vrot.slane %v11623_v12, 3 }
  0xe1   :  { %688 = vmatprep.mubr.f32.mxu0 %v14006_v0 }
  0xe2   :  { %8882 = vmatmul.mubr.msk.f32.gmra.mrb[12].mxu1 %vm240_vm5, %v11603_v8 }
  0xe3   :  { %8884 = vmatprep.mubr.msk.f32.mxu1 %vm240_vm5, %v11623_v12 }
  0xe4   :  { %7979 = vmatmul.mubr.msk.f32.gmra.mrb[8].mxu0 %vm240_vm5, %v11548_v41  ;;  %v11841_v41 = vsel %vm897_vm4, %v907_v45, %v909_v48  ;;  %v1321_v45 = vrot.slane %v11532_v37, 3 }
  0xe5   :  { %694 = vmatprep.mubr.f32.mxu0 %v14006_v0 }
  0xe6   :  { %8885 = vmatmul.mubr.msk.f32.gmra.mrb[14].mxu1 %vm240_vm5, %v11643_v26  ;;  %v11962_v48 = vsel %vm1301_vm6, %v1319_v43, %v1321_v45 }
  0xe7   :  { %8887 = vmatprep.mubr.msk.f32.mxu1 %vm240_vm5, %v11666_v44 }
  0xe8   :  { %7980 = vmatmul.mubr.msk.f32.gmra.mrb[10].mxu0 %vm240_vm5, %v11603_v8 }
  0xe9   :  { %700 = vmatprep.mubr.f32.mxu0 %v14006_v0 }
  0xea   :  { %8888 = vmatmul.mubr.msk.f32.gmra.mrb[16].mxu1 %vm240_vm5, %v11687_v49 }
  0xeb   :  { %8890 = vmatprep.mubr.msk.f32.mxu1 %vm240_vm5, %v11532_v37 }
  0xec   :  { %7981 = vmatmul.mubr.msk.f32.gmra.mrb[12].mxu0 %vm240_vm5, %v11623_v12 }
  0xed   :  { %706 = vmatprep.mubr.f32.mxu0 %v14006_v0 }
  0xee   :  { %8891 = vmatmul.mubr.msk.f32.gmra.mrb[18].mxu1 %vm240_vm5, %v11537_v38 }
  0xef   :  { %8893 = vmatprep.mubr.msk.f32.mxu1 %vm240_vm5, %v11542_v39 }
  0xf0   :  { %7982 = vmatmul.mubr.msk.f32.gmra.mrb[14].mxu0 %vm240_vm5, %v11643_v26 }
  0xf1   :  { %712 = vmatprep.mubr.f32.mxu0 %v14006_v0 }
  0xf2   :  { %8894 = vmatmul.mubr.msk.f32.gmra.mrb[20].mxu1 %vm240_vm5, %v11558_v47 }
  0xf3   :  { %8904 = vmatprep.mubr.msk.f32.mxu1 %vm240_vm5, %v11527_v35 }
  0xf4   :  { %7983 = vmatmul.mubr.msk.f32.gmra.mrb[16].mxu0 %vm240_vm5, %v11666_v44 }
  0xf5   :  { %718 = vmatprep.mubr.f32.mxu0 %v14006_v0 }
  0xf6   :  { %8905 = vmatmul.mubr.msk.f32.vlgmr.msra.gmra.mrb[8].mxu1 %vm240_vm5, %v11561_v51 }
  0xf7   :  { %8907 = vmatprep.mubr.msk.f32.mxu1 %vm240_vm5, %v11588_v3  ;;  %9351 = vmatpush3.bf16.msra.mxu1 %v9348_v36  ;;  %v1704_v36 = vld [vmem:[#allocation2 + $0x1d8] sm:$0xf] }
  0xf8   :  { %7984 = vmatmul.mubr.msk.f32.gmra.mrb[18].mxu0 %vm240_vm5, %v11687_v49  ;;  %9354 = vmatprep.subr.msk.bf16.mxu1 %vm11485_vm2, %v9352_v27  ;;  %v1726_v49 = vrot.slane %v11537_v38, 4 }
  0xf9   :  { %724 = vmatprep.mubr.f32.mxu0 %v14006_v0 }
  0xfa   :  { %8908 = vmatmul.mubr.msk.f32.gmra.mrb[10].mxu1 %vm240_vm5, %v11598_v7 }
  0xfb   :  { %8910 = vmatprep.mubr.msk.f32.mxu1 %vm240_vm5, %v11826_v50  ;;  %9357 = vmatpush3.bf16.msk.msra.mxu1 %vm11485_vm2, %v9352_v27  ;;  %v11930_v27 = vsel %vm1301_vm6, %v1311_v33, %v1313_v22 }
  0xfc   :  { %7985 = vmatmul.mubr.msk.f32.gmra.mrb[20].mxu0 %vm240_vm5, %v11532_v37  ;;  %9369 = vmatprep.subr.bf16.mxu1 %v11819_v46 }
  0xfd   :  { %730 = vmatprep.mubr.f32.mxu0 %v14006_v0 }
  0xfe   :  { %8911 = vmatmul.mubr.msk.f32.gmra.mrb[12].mxu1 %vm240_vm5, %v11841_v41 }
  0xff   :  { %8913 = vmatprep.mubr.msk.f32.mxu1 %vm240_vm5, %v11847_v54 }
 0x100   :  { %7986 = vmatmul.mubr.msk.f32.gmra.mrb[22].mxu0 %vm240_vm5, %v11537_v38 }
 0x101   :  { %736 = vmatprep.mubr.f32.mxu0 %v14006_v0 }
 0x102   :  { %8914 = vmatmul.mubr.msk.f32.gmra.mrb[14].mxu1 %vm240_vm5, %v11860_v60 }
 0x103   :  { %8916 = vmatprep.mubr.msk.f32.mxu1 %vm240_vm5, %v11855_v57 }
 0x104   :  { %7987 = vmatmul.mubr.msk.f32.gmra.mrb[24].mxu0 %vm240_vm5, %v11542_v39 }
 0x105   :  { %742 = vmatprep.mubr.f32.mxu0 %v14006_v0 }
 0x106   :  { %8917 = vmatmul.mubr.msk.f32.gmra.mrb[16].mxu1 %vm240_vm5, %v11867_v61 }
 0x107   :  { %8919 = vmatprep.mubr.msk.f32.mxu1 %vm240_vm5, %v11873_v4 }
 0x108   :  { %7988 = vmatmul.mubr.msk.f32.gmra.mrb[26].mxu0 %vm240_vm5, %v11558_v47 }
 0x109   :  { %1026 = vmatprep.mubr.f32.mxu0 %v14006_v0 }
 0x10a   :  { %8920 = vmatmul.mubr.msk.f32.gmra.mrb[18].mxu1 %vm240_vm5, %v11884_v10 }
 0x10b   :  { %8922 = vmatprep.mubr.msk.f32.mxu1 %vm240_vm5, %v11890_v17 }
 0x10c   :  { %8006 = vmatmul.mubr.msk.f32.vlgmr.msra.gmra.mrb[0].mxu0 %vm240_vm5, %v11527_v35  ;;  %v9372_v35 = vpack.c.bf16 %v1704_v36, %v1701_v34 }
 0x10d   :  { %1032 = vmatprep.mubr.f32.mxu0 %v14006_v0  ;;  %9341 = vmatpush1.bf16.msra.mxu0 %v9340_v62 }
 0x10e   :  { %9344 = vmatprep.subr.msk.bf16.mxu0 %vm11485_vm2, %v9342_v18  ;;  %8923 = vmatmul.mubr.msk.f32.gmra.mrb[20].mxu1 %vm240_vm5, %v11876_v42  ;;  %v172_v18 = vld [vmem:[#allocation7] ss:$8 sm:$0x7] }
 0x10f   :  { %8933 = vmatprep.mubr.msk.f32.mxu1 %vm240_vm5, %v11638_v25 }
 0x110   :  { %8007 = vmatmul.mubr.msk.f32.gmra.mrb[2].mxu0 %vm240_vm5, %v11561_v51  ;;  %v1315_v51 = vrot.slane %v11643_v26, 3 }
 0x111   :  { %1038 = vmatprep.mubr.f32.mxu0 %v14006_v0  ;;  %9347 = vmatpush1.bf16.msk.msra.mxu0 %vm11485_vm2, %v9345_v63 }
 0x112   :  { %8934 = vmatmul.mubr.msk.f32.vlgmr.msra.gmra.mrb[8].mxu1 %vm240_vm5, %v11648_v28  ;;  %9359 = vmatprep.subr.bf16.mxu0 %v9358_v15  ;;  %v11938_v40 = vsel %vm1301_vm6, %v1313_v22, %v1315_v51 }
 0x113   :  { %8936 = vmatprep.mubr.msk.f32.mxu1 %vm240_vm5, %v11651_v29  ;;  %9371 = vmatpush3.bf16.msra.mxu1 %v11819_v46  ;;  %v1323_v46 = vrot.slane %v11537_v38, 3  ;;  %v12057_v38 = vrot.slane %v11558_v47, 4 }
 0x114   :  { %8008 = vmatmul.mubr.msk.f32.gmra.mrb[4].mxu0 %vm240_vm5, %v11588_v3  ;;  %9374 = vmatprep.subr.msk.bf16.mxu1 %vm11485_vm2, %v9372_v35  ;;  %v1317_v3 = vrot.slane %v11666_v44, 3 }
 0x115   :  { %1044 = vmatprep.mubr.f32.mxu0 %v14006_v0  ;;  %v11979_v58 = vsel %vm1301_vm6, %v1323_v46, %v1325_v52 }
 0x116   :  { %8937 = vmatmul.mubr.msk.f32.gmra.mrb[10].mxu1 %vm240_vm5, %v11654_v31  ;;  %v11947_v33 = vsel %vm1301_vm6, %v1315_v51, %v1317_v3 }
 0x117   :  { %8939 = vmatprep.mubr.msk.f32.mxu1 %vm240_vm5, %v11673_v30  ;;  %9377 = vmatpush3.bf16.msk.msra.mxu1 %vm11485_vm2, %v9372_v35 }
 0x118   :  { %8009 = vmatmul.mubr.msk.f32.gmra.mrb[6].mxu0 %vm240_vm5, %v11598_v7  ;;  %v11953_v7 = vsel %vm1301_vm6, %v1317_v3, %v1319_v43 }
 0x119   :  { %1050 = vmatprep.mubr.f32.mxu0 %v14006_v0 }
 0x11a   :  { %8940 = vmatmul.mubr.msk.f32.gmra.mrb[12].mxu1 %vm240_vm5, %v11930_v27 }
 0x11b   :  { %8942 = vmatprep.mubr.msk.f32.mxu1 %vm240_vm5, %v11938_v40 }
 0x11c   :  { %8010 = vmatmul.mubr.msk.f32.gmra.mrb[8].mxu0 %vm240_vm5, %v11826_v50  ;;  %v11968_v50 = vsel %vm1301_vm6, %v1321_v45, %v1323_v46 }
 0x11d   :  { %1056 = vmatprep.mubr.f32.mxu0 %v14006_v0 }
 0x11e   :  { %8943 = vmatmul.mubr.msk.f32.gmra.mrb[14].mxu1 %vm240_vm5, %v11947_v33 }
 0x11f   :  { %8945 = vmatprep.mubr.msk.f32.mxu1 %vm240_vm5, %v11953_v7 }
 0x120   :  { %8011 = vmatmul.mubr.msk.f32.gmra.mrb[10].mxu0 %vm240_vm5, %v11841_v41  ;;  %v11985_v41 = vsel %vm1301_vm6, %v1325_v52, %v11971_v53 }
 0x121   :  { %1062 = vmatprep.mubr.f32.mxu0 %v14006_v0 }
 0x122   :  { %8946 = vmatmul.mubr.msk.f32.gmra.mrb[16].mxu1 %vm240_vm5, %v11962_v48 }
 0x123   :  { %8948 = vmatprep.mubr.msk.f32.mxu1 %vm240_vm5, %v11968_v50 }
 0x124   :  { %8012 = vmatmul.mubr.msk.f32.gmra.mrb[12].mxu0 %vm240_vm5, %v11847_v54  ;;  %v1716_v54 = vrot.slane %v11623_v12, 4  ;;  %v1720_v12 = vrot.slane %v11666_v44, 4  ;;  %v1724_v44 = vrot.slane %v11532_v37, 4  ;;  %v1728_v37 = vrot.slane %v11542_v39, 4 }
 0x125   :  { %1068 = vmatprep.mubr.f32.mxu0 %v14006_v0 }
 0x126   :  { %8949 = vmatmul.mubr.msk.f32.gmra.mrb[18].mxu1 %vm240_vm5, %v11979_v58  ;;  %v12024_v26 = vsel %vm269_vm0, %v1716_v54, %v1718_v56  ;;  %v12033_v8 = vsel %vm269_vm0, %v1718_v56, %v1720_v12  ;;  %v12065_v39 = vsel %vm269_vm0, %v1726_v49, %v1728_v37  ;;  %v12071_v47 = vsel %vm269_vm0, %v1728_v37, %v12057_v38 }
 0x127   :  { %8951 = vmatprep.mubr.msk.f32.mxu1 %vm240_vm5, %v11985_v41 }
 0x128   :  { %8013 = vmatmul.mubr.msk.f32.gmra.mrb[14].mxu0 %vm240_vm5, %v11860_v60  ;;  %v12048_v60 = vsel %vm269_vm0, %v1722_v59, %v1724_v44 }
 0x129   :  { %1074 = vmatprep.mubr.f32.mxu0 %v14006_v0 }
 0x12a   :  { %8952 = vmatmul.mubr.msk.f32.gmra.mrb[20].mxu1 %vm240_vm5, %v11971_v53 }
 0x12b   :  { %8962 = vmatprep.mubr.msk.f32.mxu1 %vm240_vm5, %v11721_v55 }
 0x12c   :  { %8014 = vmatmul.mubr.msk.f32.gmra.mrb[16].mxu0 %vm240_vm5, %v11855_v57  ;;  %v12018_v57 = vsel %vm269_vm0, %v1714_v32, %v1716_v54  ;;  %v12039_v32 = vsel %vm269_vm0, %v1720_v12, %v1722_v59 }
 0x12d   :  { %1080 = vmatprep.mubr.f32.mxu0 %v14006_v0 }
 0x12e   :  { %8963 = vmatmul.mubr.msk.f32.vlgmr.msra.gmra.mrb[8].mxu1 %vm240_vm5, %v11724_v11 }
 0x12f   :  { %8965 = vmatprep.mubr.msk.f32.mxu1 %vm240_vm5, %v11738_v21 }
 0x130   :  { %8015 = vmatmul.mubr.msk.f32.gmra.mrb[18].mxu0 %vm240_vm5, %v11867_v61  ;;  %v12054_v61 = vsel %vm269_vm0, %v1724_v44, %v1726_v49 }
 0x131   :  { %1086 = vmatprep.mubr.f32.mxu0 %v14006_v0 }
 0x132   :  { %8966 = vmatmul.mubr.msk.f32.gmra.mrb[10].mxu1 %vm240_vm5, %v11741_v23 }
 0x133   :  { %8968 = vmatprep.mubr.msk.f32.mxu1 %vm240_vm5, %v11756_v13 }
 0x134   :  { %8016 = vmatmul.mubr.msk.f32.gmra.mrb[20].mxu0 %vm240_vm5, %v11873_v4  ;;  %v1696_v4 = vld [vmem:[#allocation2 + $0x198] sm:$0xff] }
 0x135   :  { %1092 = vmatprep.mubr.f32.mxu0 %v14006_v0 }
 0x136   :  { %8969 = vmatmul.mubr.msk.f32.gmra.mrb[12].mxu1 %vm240_vm5, %v12018_v57 }
 0x137   :  { %8971 = vmatprep.mubr.msk.f32.mxu1 %vm240_vm5, %v12024_v26 }
 0x138   :  { %8017 = vmatmul.mubr.msk.f32.gmra.mrb[22].mxu0 %vm240_vm5, %v11884_v10  ;;  %v9360_v10 = vpack.c.bf16 %v1696_v4, %v1693_v2 }
 0x139   :  { %1098 = vmatprep.mubr.f32.mxu0 %v14006_v0 }
 0x13a   :  { %8972 = vmatmul.mubr.msk.f32.gmra.mrb[14].mxu1 %vm240_vm5, %v12033_v8 }
 0x13b   :  { %8974 = vmatprep.mubr.msk.f32.mxu1 %vm240_vm5, %v12039_v32 }
 0x13c   :  { %8018 = vmatmul.mubr.msk.f32.gmra.mrb[24].mxu0 %vm240_vm5, %v11890_v17  ;;  %v1702_v17 = vld [vmem:[#allocation2 + $0x1c8] sm:$0xf] }
 0x13d   :  { %1104 = vmatprep.mubr.f32.mxu0 %v14006_v0 }
 0x13e   :  { %8975 = vmatmul.mubr.msk.f32.gmra.mrb[16].mxu1 %vm240_vm5, %v12048_v60 }
 0x13f   :  { %8977 = vmatprep.mubr.msk.f32.mxu1 %vm240_vm5, %v12054_v61 }
 0x140   :  { %8019 = vmatmul.mubr.msk.f32.gmra.mrb[26].mxu0 %vm240_vm5, %v11876_v42  ;;  %v9365_v42 = vpack.c.bf16 %v1702_v17, %v1699_v16 }
 0x141   :  { %1430 = vmatprep.mubr.f32.mxu0 %v14006_v0 }
 0x142   :  { %8978 = vmatmul.mubr.msk.f32.gmra.mrb[18].mxu1 %vm240_vm5, %v12065_v39 }
 0x143   :  { %8980 = vmatprep.mubr.msk.f32.mxu1 %vm240_vm5, %v12071_v47 }
 0x144   :  { %8037 = vmatmul.mubr.msk.f32.vlgmr.msra.gmra.mrb[0].mxu0 %vm240_vm5, %v11638_v25 }
 0x145   :  { %1436 = vmatprep.mubr.f32.mxu0 %v14006_v0  ;;  %9361 = vmatpush1.bf16.msra.mxu0 %v9360_v10 }
 0x146   :  { %9364 = vmatprep.subr.msk.bf16.mxu0 %vm11485_vm2, %v9362_v14  ;;  %8981 = vmatmul.mubr.msk.f32.gmra.mrb[20].mxu1 %vm240_vm5, %v12057_v38 }
 0x147   :  { %2309 = vmatprep.mubr.f32.mxu1 %v14006_v0 }
 0x148   :  { %8038 = vmatmul.mubr.msk.f32.gmra.mrb[2].mxu0 %vm240_vm5, %v11648_v28 }
 0x149   :  { %1442 = vmatprep.mubr.f32.mxu0 %v14006_v0  ;;  %9367 = vmatpush1.bf16.msk.msra.mxu0 %vm11485_vm2, %v9365_v42 }
 0x14c   :  { %8039 = vmatmul.mubr.msk.f32.gmra.mrb[4].mxu0 %vm240_vm5, %v11651_v29 }
 0x14d   :  { %1448 = vmatprep.mubr.f32.mxu0 %v14006_v0 }
 0x150   :  { %8040 = vmatmul.mubr.msk.f32.gmra.mrb[6].mxu0 %vm240_vm5, %v11654_v31 }
 0x151   :  { %1454 = vmatprep.mubr.f32.mxu0 %v14006_v0 }
 0x154   :  { %8041 = vmatmul.mubr.msk.f32.gmra.mrb[8].mxu0 %vm240_vm5, %v11673_v30 }
 0x155   :  { %1460 = vmatprep.mubr.f32.mxu0 %v14006_v0 }
 0x158   :  { %8042 = vmatmul.mubr.msk.f32.gmra.mrb[10].mxu0 %vm240_vm5, %v11930_v27 }
 0x159   :  { %1466 = vmatprep.mubr.f32.mxu0 %v14006_v0 }
 0x15c   :  { %8043 = vmatmul.mubr.msk.f32.gmra.mrb[12].mxu0 %vm240_vm5, %v11938_v40 }
 0x15d   :  { %1472 = vmatprep.mubr.f32.mxu0 %v14006_v0 }
 0x160   :  { %8044 = vmatmul.mubr.msk.f32.gmra.mrb[14].mxu0 %vm240_vm5, %v11947_v33 }
 0x161   :  { %1478 = vmatprep.mubr.f32.mxu0 %v14006_v0 }
 0x164   :  { %8045 = vmatmul.mubr.msk.f32.gmra.mrb[16].mxu0 %vm240_vm5, %v11953_v7 }
 0x165   :  { %1484 = vmatprep.mubr.f32.mxu0 %v14006_v0 }
 0x168   :  { %8046 = vmatmul.mubr.msk.f32.gmra.mrb[18].mxu0 %vm240_vm5, %v11962_v48 }
 0x169   :  { %1490 = vmatprep.mubr.f32.mxu0 %v14006_v0 }
 0x16c   :  { %8047 = vmatmul.mubr.msk.f32.gmra.mrb[20].mxu0 %vm240_vm5, %v11968_v50 }
 0x16d   :  { %1496 = vmatprep.mubr.f32.mxu0 %v14006_v0 }
 0x170   :  { %8048 = vmatmul.mubr.msk.f32.gmra.mrb[22].mxu0 %vm240_vm5, %v11979_v58 }
 0x171   :  { %1502 = vmatprep.mubr.f32.mxu0 %v14006_v0 }
 0x174   :  { %8049 = vmatmul.mubr.msk.f32.gmra.mrb[24].mxu0 %vm240_vm5, %v11985_v41 }
 0x175   :  { %1508 = vmatprep.mubr.f32.mxu0 %v14006_v0 }
 0x178   :  { %8050 = vmatmul.mubr.msk.f32.gmra.mrb[26].mxu0 %vm240_vm5, %v11971_v53 }
 0x179   :  { %1833 = vmatprep.mubr.f32.mxu0 %v14006_v0 }
 0x17c   :  { %8068 = vmatmul.mubr.msk.f32.vlgmr.msra.gmra.mrb[0].mxu0 %vm240_vm5, %v11721_v55 }
 0x17d   :  { %1839 = vmatprep.mubr.f32.mxu0 %v14006_v0 }
 0x180   :  { %8069 = vmatmul.mubr.msk.f32.gmra.mrb[2].mxu0 %vm240_vm5, %v11724_v11 }
 0x181   :  { %1845 = vmatprep.mubr.f32.mxu0 %v14006_v0  ;;  %v12133_v25 = vpop.f32.mrb[0].mxu1 }
 0x182   :  { %v12135_v28 = vpop.f32.mrb[1].mxu1 }
 0x184   :  { %8070 = vmatmul.mubr.msk.f32.gmra.mrb[4].mxu0 %vm240_vm5, %v11738_v21 }
 0x185   :  { %1851 = vmatprep.mubr.f32.mxu0 %v14006_v0  ;;  %v12140_v29 = vpop.f32.mrb[2].mxu1 }
 0x186   :  { %v12142_v31 = vpop.f32.mrb[3].mxu1 }
 0x188   :  { %8071 = vmatmul.mubr.msk.f32.gmra.mrb[6].mxu0 %vm240_vm5, %v11741_v23  ;;  %v2096_v23 = vlaneseq }
 0x189   :  { %1857 = vmatprep.mubr.f32.mxu0 %v14006_v0  ;;  %v12147_v30 = vpop.f32.mrb[4].mxu1 }
 0x18a   :  { %v12149_v55 = vpop.f32.mrb[5].mxu1 }
 0x18c   :  { %8072 = vmatmul.mubr.msk.f32.gmra.mrb[8].mxu0 %vm240_vm5, %v11756_v13  ;;  %v12184_v13 = vshrl.u32 %v2096_v23, 7 }
 0x18d   :  { %1863 = vmatprep.mubr.f32.mxu0 %v14006_v0  ;;  %v12154_v11 = vpop.f32.mrb[6].mxu1 }
 0x18e   :  { %v12156_v21 = vpop.f32.mrb[7].mxu1  ;;  %14100 = vst [vmem:[#allocation22_spill] sm:$0xff] %v12184_v13  ;;  %v14005_v62 = vsub.s32 2, %v12184_v13  ;;  %v12204_v23 = vsub.s32 0, %v12184_v13 }
 0x190   :  { %8073 = vmatmul.mubr.msk.f32.gmra.mrb[10].mxu0 %vm240_vm5, %v12018_v57  ;;  %v2107_v19 = vrot.slane %v172_v18, %v14005_v62  ;;  %14101 = vst [vmem:[#allocation23_spill] sm:$0xff] %v12204_v23 }
 0x191   :  { %1869 = vmatprep.mubr.f32.mxu0 %v14006_v0 }
 0x194   :  { %8074 = vmatmul.mubr.msk.f32.gmra.mrb[12].mxu0 %vm240_vm5, %v12024_v26 }
 0x195   :  { %1875 = vmatprep.mubr.f32.mxu0 %v14006_v0 }
 0x198   :  { %8075 = vmatmul.mubr.msk.f32.gmra.mrb[14].mxu0 %vm240_vm5, %v12033_v8 }
 0x199   :  { %1881 = vmatprep.mubr.f32.mxu0 %v14006_v0 }
 0x19c   :  { %8076 = vmatmul.mubr.msk.f32.gmra.mrb[16].mxu0 %vm240_vm5, %v12039_v32 }
 0x19d   :  { %1887 = vmatprep.mubr.f32.mxu0 %v14006_v0 }
 0x1a0   :  { %8077 = vmatmul.mubr.msk.f32.gmra.mrb[18].mxu0 %vm240_vm5, %v12048_v60 }
 0x1a1   :  { %1893 = vmatprep.mubr.f32.mxu0 %v14006_v0 }
 0x1a4   :  { %8078 = vmatmul.mubr.msk.f32.gmra.mrb[20].mxu0 %vm240_vm5, %v12054_v61 }
 0x1a5   :  { %1899 = vmatprep.mubr.f32.mxu0 %v14006_v0 }
 0x1a8   :  { %8079 = vmatmul.mubr.msk.f32.gmra.mrb[22].mxu0 %vm240_vm5, %v12065_v39 }
 0x1a9   :  { %1905 = vmatprep.mubr.f32.mxu0 %v14006_v0 }
 0x1ac   :  { %8080 = vmatmul.mubr.msk.f32.gmra.mrb[24].mxu0 %vm240_vm5, %v12071_v47 }
 0x1ad   :  { %1911 = vmatprep.mubr.f32.mxu0 %v14006_v0 }
 0x1b0   :  { %8081 = vmatmul.mubr.msk.f32.gmra.mrb[26].mxu0 %vm240_vm5, %v12057_v38 }
 0x201   :  { %v8964_v20 = vpop.f32.mrb[8].mxu1 }
 0x202   :  { %v2116_v9 = vadd.f32 %v8964_v20, %v2107_v19  ;;  %v1984_v24 = vpop.f32.mrb[9].mxu1  ;;  %v12207_v20 = vsub.s32 1, %v12184_v13 }
 0x203   :  { %v2113_v63 = vadd.f32 %v2107_v19, %v1984_v24 }
 0x204   :  { %v2158_v34 = vmax.f32 %v2116_v9, 0.0  ;;  %14102 = vst [vmem:[#allocation24_spill] sm:$0xff] %v12207_v20  ;;  %v12210_v9 = vrot.slane %v172_v18, %v12204_v23 }
 0x205   :  { %v2155_v36 = vmax.f32 %v2113_v63, 0.0  ;;  %v8967_v15 = vpop.f32.mrb[10].mxu1  ;;  %v12213_v63 = vrot.slane %v172_v18, %v12207_v20 }
 0x206   :  { %v2122_v35 = vadd.f32 %v8967_v15, %v2107_v19  ;;  %v1994_v22 = vpop.f32.mrb[11].mxu1 }
 0x207   :  { %v12189_v51 = vpack.c.bf16 %v2158_v34, %v2155_v36  ;;  %v2119_v27 = vadd.f32 %v2107_v19, %v1994_v22 }
 0x208   :  { %v2164_v3 = vmax.f32 %v2122_v35, 0.0 }
 0x209   :  { %v2161_v40 = vmax.f32 %v2119_v27, 0.0  ;;  %v8970_v43 = vpop.f32.mrb[12].mxu1 }
 0x20a   :  { %v2128_v33 = vadd.f32 %v8970_v43, %v2107_v19  ;;  %v2004_v45 = vpop.f32.mrb[13].mxu1 }
 0x20b   :  { %v12191_v7 = vpack.c.bf16 %v2164_v3, %v2161_v40  ;;  %v2125_v46 = vadd.f32 %v2107_v19, %v2004_v45 }
 0x20c   :  { %v2170_v48 = vmax.f32 %v2128_v33, 0.0 }
 0x20d   :  { %v2167_v52 = vmax.f32 %v2125_v46, 0.0  ;;  %v8973_v50 = vpop.f32.mrb[14].mxu1  ;;  %v2658_v46 = vld [vmem:[#allocation4 + $0x550] sm:$0xff] }
 0x20e   :  { %v2134_v53 = vadd.f32 %v8973_v50, %v2107_v19  ;;  %v2014_v58 = vpop.f32.mrb[15].mxu1 }
 0x20f   :  { %v12193_v41 = vpack.c.bf16 %v2170_v48, %v2167_v52  ;;  %v2131_v54 = vadd.f32 %v2107_v19, %v2014_v58  ;;  %v2661_v48 = vld [vmem:[#allocation4 + $0x568] sm:$0xff] }
 0x210   :  { %v2176_v56 = vmax.f32 %v2134_v53, 0.0  ;;  %v9518_v50 = vpack.c.bf16 %v2661_v48, %v2658_v46 }
 0x211   :  { %v2173_v57 = vmax.f32 %v2131_v54, 0.0  ;;  %v8976_v12 = vpop.f32.mrb[16].mxu1  ;;  %v2610_v54 = vld [vmem:[#allocation4 + $0x3d0] sm:$0xff] }
 0x212   :  { %v2140_v26 = vadd.f32 %v8976_v12, %v2107_v19  ;;  %v2024_v59 = vpop.f32.mrb[17].mxu1  ;;  %9519 = vmatprep.subr.bf16.mxu0 %v9518_v50 }
 0x213   :  { %v12195_v8 = vpack.c.bf16 %v2176_v56, %v2173_v57  ;;  %v2137_v44 = vadd.f32 %v2107_v19, %v2024_v59  ;;  %v2613_v56 = vld [vmem:[#allocation4 + $0x3e8] sm:$0xff]  ;;  %v2664_v59 = vld [vmem:[#allocation4 + $0x580] sm:$0xff] }
 0x214   :  { %v2182_v32 = vmax.f32 %v2140_v26, 0.0  ;;  %v9520_v26 = vpack.c.bf16 %v2613_v56, %v2610_v54 }
 0x215   :  { %v2179_v49 = vmax.f32 %v2137_v44, 0.0  ;;  %v8979_v60 = vpop.f32.mrb[18].mxu1  ;;  %v2667_v44 = vld [vmem:[#allocation4 + $0x598] sm:$0xff] }
 0x216   :  { %v2146_v37 = vadd.f32 %v8979_v60, %v2107_v19  ;;  %v2034_v61 = vpop.f32.mrb[19].mxu1  ;;  %v9522_v60 = vpack.c.bf16 %v2667_v44, %v2664_v59  ;;  %9521 = vmatpush3.bf16.msra.mxu0 %v9520_v26  ;;  %v2682_v26 = vld [vmem:[#allocation4 + $0x610] sm:$0xff]  ;;  %v2685_v59 = vld [vmem:[#allocation4 + $0x628] sm:$0xff] }
 0x217   :  { %v12197_v38 = vpack.c.bf16 %v2182_v32, %v2179_v49  ;;  %v2143_v2 = vadd.f32 %v2107_v19, %v2034_v61 }
 0x218   :  { %v2188_v4 = vmax.f32 %v2146_v37, 0.0  ;;  %9523 = vmatprep.subr.bf16.mxu0 %v9522_v60 }
 0x219   :  { %v2185_v39 = vmax.f32 %v2143_v2, 0.0  ;;  %v8982_v5 = vpop.f32.mrb[20].mxu1 }
 0x21a   :  { %v2152_v6 = vadd.f32 %v8982_v5, %v2107_v19  ;;  %v2044_v47 = vpop.f32.mrb[21].mxu1 }
 0x21b   :  { %v12199_v10 = vpack.c.bf16 %v2188_v4, %v2185_v39  ;;  %v2149_v14 = vadd.f32 %v2107_v19, %v2044_v47  ;;  %v2616_v4 = vld [vmem:[#allocation4 + $0x400] sm:$0xff]  ;;  %v2619_v39 = vld [vmem:[#allocation4 + $0x418] sm:$0xff] }
 0x21c   :  { %v2194_v16 = vmax.f32 %v2152_v6, 0.0 }
 0x21d   :  { %v2191_v17 = vmax.f32 %v2149_v14, 0.0  ;;  %v9524_v14 = vpack.c.bf16 %v2619_v39, %v2616_v4 }
 0x21f   :  { %v12201_v42 = vpack.c.bf16 %v2194_v16, %v2191_v17  ;;  %v2670_v16 = vld [vmem:[#allocation4 + $0x5b0] sm:$0xff]  ;;  %v2673_v17 = vld [vmem:[#allocation4 + $0x5c8] sm:$0xff]  ;;  %9525 = vmatpush3.bf16.msra.mxu0 %v9524_v14 }
 0x24f   :  { %v1835_v24 = vpop.f32.mrb[0].mxu0 }
 0x250   :  { %v1837_v34 = vpop.f32.mrb[1].mxu0  ;;  %v2111_v19 = vadd.f32 %v12210_v9, %v1835_v24 }
 0x251   :  { %v2112_v36 = vadd.f32 %v12213_v63, %v1837_v34 }
 0x252   :  { %v2153_v3 = vmax.f32 %v2111_v19, 0.0  ;;  %v9526_v19 = vpack.c.bf16 %v2673_v17, %v2670_v16 }
 0x253   :  { %v1841_v15 = vpop.f32.mrb[2].mxu0  ;;  %v2154_v43 = vmax.f32 %v2112_v36, 0.0 }
 0x254   :  { %v2114_v35 = vadd.f32 %v12210_v9, %v1841_v15  ;;  %v1843_v22 = vpop.f32.mrb[3].mxu0  ;;  %9527 = vmatprep.subr.bf16.mxu0 %v9526_v19 }
 0x255   :  { %v2115_v27 = vadd.f32 %v12213_v63, %v1843_v22  ;;  %v2625_v22 = vld [vmem:[#allocation4 + $0x448] sm:$0xff] }
 0x256   :  { %v2156_v40 = vmax.f32 %v2114_v35, 0.0  ;;  %v2622_v35 = vld [vmem:[#allocation4 + $0x430] sm:$0xff] }
 0x257   :  { %v2157_v33 = vmax.f32 %v2115_v27, 0.0  ;;  %v1847_v45 = vpop.f32.mrb[4].mxu0 }
 0x258   :  { %v9380_v18 = vpack.c.bf16 %v2156_v40, %v2153_v3  ;;  %v1849_v52 = vpop.f32.mrb[5].mxu0  ;;  %v2117_v58 = vadd.f32 %v12210_v9, %v1847_v45  ;;  %v9528_v40 = vpack.c.bf16 %v2625_v22, %v2622_v35 }
 0x259   :  { %v9378_v53 = vpack.c.bf16 %v2157_v33, %v2154_v43  ;;  %v2118_v57 = vadd.f32 %v12213_v63, %v1849_v52  ;;  %v2676_v43 = vld [vmem:[#allocation4 + $0x5e0] sm:$0xff]  ;;  %v2679_v33 = vld [vmem:[#allocation4 + $0x5f8] sm:$0xff] }
 0x25a   :  { %v2159_v61 = vmax.f32 %v2117_v58, 0.0  ;;  %v9530_v48 = vpack.c.bf16 %v2679_v33, %v2676_v43  ;;  %9529 = vmatpush3.bf16.msra.mxu0 %v9528_v40  ;;  %v2631_v58 = vld [vmem:[#allocation4 + $0x478] sm:$0xff] }
 0x25b   :  { %v1853_v12 = vpop.f32.mrb[6].mxu0  ;;  %9379 = vmatprep.subr.bf16.mxu1 %v9378_v53  ;;  %v2160_v5 = vmax.f32 %v2118_v57, 0.0  ;;  %v2628_v53 = vld [vmem:[#allocation4 + $0x460] sm:$0xff] }
 0x25c   :  { %v2120_v32 = vadd.f32 %v12210_v9, %v1853_v12  ;;  %v1855_v49 = vpop.f32.mrb[7].mxu0  ;;  %9381 = vmatpush1.bf16.msra.mxu1 %v9380_v18  ;;  %9531 = vmatprep.subr.bf16.mxu0 %v9530_v48  ;;  %v9532_v12 = vpack.c.bf16 %v2631_v58, %v2628_v53 }
 0x25d   :  { %v2121_v37 = vadd.f32 %v12213_v63, %v1855_v49  ;;  %v9534_v49 = vpack.c.bf16 %v2685_v59, %v2682_v26 }
 0x25e   :  { %v2162_v2 = vmax.f32 %v2120_v32, 0.0  ;;  %9533 = vmatpush3.bf16.msra.mxu0 %v9532_v12 }
 0x25f   :  { %v2163_v6 = vmax.f32 %v2121_v37, 0.0  ;;  %v1859_v47 = vpop.f32.mrb[8].mxu0  ;;  %9535 = vmatprep.subr.bf16.mxu0 %v9534_v49 }
 0x260   :  { %v9384_v24 = vpack.c.bf16 %v2162_v2, %v2159_v61  ;;  %v1861_v34 = vpop.f32.mrb[9].mxu0  ;;  %v2123_v15 = vadd.f32 %v12210_v9, %v1859_v47  ;;  %v2634_v61 = vld [vmem:[#allocation4 + $0x490] sm:$0xff]  ;;  %v2637_v2 = vld [vmem:[#allocation4 + $0x4a8] sm:$0xff]  ;;  %v2691_v47 = vld [vmem:[#allocation4 + $0x658] sm:$0xff] }
 0x261   :  { %v9382_v36 = vpack.c.bf16 %v2163_v6, %v2160_v5  ;;  %v2124_v27 = vadd.f32 %v12213_v63, %v1861_v34  ;;  %v9536_v5 = vpack.c.bf16 %v2637_v2, %v2634_v61  ;;  %v2688_v6 = vld [vmem:[#allocation4 + $0x640] sm:$0xff] }
 0x262   :  { %v2165_v52 = vmax.f32 %v2123_v15, 0.0  ;;  %v9538_v17 = vpack.c.bf16 %v2691_v47, %v2688_v6  ;;  %v2643_v15 = vld [vmem:[#allocation4 + $0x4d8] sm:$0xff] }
 0x263   :  { %v1865_v3 = vpop.f32.mrb[10].mxu0  ;;  %9383 = vmatprep.subr.bf16.mxu1 %v9382_v36  ;;  %v2166_v54 = vmax.f32 %v2124_v27, 0.0  ;;  %9537 = vmatpush3.bf16.msra.mxu0 %v9536_v5  ;;  %v2640_v36 = vld [vmem:[#allocation4 + $0x4c0] sm:$0xff] }
 0x264   :  { %v2126_v45 = vadd.f32 %v12210_v9, %v1865_v3  ;;  %v1867_v46 = vpop.f32.mrb[11].mxu0  ;;  %9385 = vmatpush1.bf16.msra.mxu1 %v9384_v24  ;;  %9539 = vmatprep.subr.bf16.mxu0 %v9538_v17  ;;  %v9540_v3 = vpack.c.bf16 %v2643_v15, %v2640_v36 }
 0x265   :  { %v2127_v18 = vadd.f32 %v12213_v63, %v1867_v46 }
 0x266   :  { %v2168_v50 = vmax.f32 %v2126_v45, 0.0 }
 0x267   :  { %v2169_v56 = vmax.f32 %v2127_v18, 0.0  ;;  %v1871_v57 = vpop.f32.mrb[12].mxu0  ;;  %9541 = vmatpush3.bf16.msra.mxu0 %v9540_v3 }
 0x268   :  { %v9388_v44 = vpack.c.bf16 %v2168_v50, %v2165_v52  ;;  %v1873_v32 = vpop.f32.mrb[13].mxu0  ;;  %v2129_v37 = vadd.f32 %v12210_v9, %v1871_v57 }
 0x269   :  { %v9386_v60 = vpack.c.bf16 %v2169_v56, %v2166_v54  ;;  %v2130_v4 = vadd.f32 %v12213_v63, %v1873_v32 }
 0x26a   :  { %v2171_v34 = vmax.f32 %v2129_v37, 0.0 }
 0x26b   :  { %v1877_v39 = vpop.f32.mrb[14].mxu0  ;;  %9387 = vmatprep.subr.bf16.mxu1 %v9386_v60  ;;  %v2172_v35 = vmax.f32 %v2130_v4, 0.0 }
 0x26c   :  { %v2132_v14 = vadd.f32 %v12210_v9, %v1877_v39  ;;  %v1879_v16 = vpop.f32.mrb[15].mxu0  ;;  %9389 = vmatpush1.bf16.msra.mxu1 %v9388_v44 }
 0x26d   :  { %v2133_v24 = vadd.f32 %v12213_v63, %v1879_v16 }
 0x26e   :  { %v2174_v19 = vmax.f32 %v2132_v14, 0.0 }
 0x26f   :  { %v2175_v22 = vmax.f32 %v2133_v24, 0.0  ;;  %v1883_v27 = vpop.f32.mrb[16].mxu0 }
 0x270   :  { %v9392_v40 = vpack.c.bf16 %v2174_v19, %v2171_v34  ;;  %v1885_v43 = vpop.f32.mrb[17].mxu0  ;;  %v2135_v45 = vadd.f32 %v12210_v9, %v1883_v27 }
 0x271   :  { %v9390_v33 = vpack.c.bf16 %v2175_v22, %v2172_v35  ;;  %v2136_v46 = vadd.f32 %v12213_v63, %v1885_v43 }
 0x272   :  { %v2177_v53 = vmax.f32 %v2135_v45, 0.0 }
 0x273   :  { %v1889_v48 = vpop.f32.mrb[18].mxu0  ;;  %9391 = vmatprep.subr.bf16.mxu1 %v9390_v33  ;;  %v2178_v54 = vmax.f32 %v2136_v46, 0.0  ;;  %v2612_v46 = vld [vmem:[#allocation4 + $0x3e0] sm:$0xff] }
 0x274   :  { %v2138_v18 = vadd.f32 %v12210_v9, %v1889_v48  ;;  %v1891_v52 = vpop.f32.mrb[19].mxu0  ;;  %9393 = vmatpush1.bf16.msra.mxu1 %v9392_v40 }
 0x275   :  { %v2139_v50 = vadd.f32 %v12213_v63, %v1891_v52  ;;  %v2608_v52 = vld [vmem:[#allocation4 + $0x3c0] sm:$0xff] }
 0x276   :  { %v2180_v58 = vmax.f32 %v2138_v18, 0.0  ;;  %v2204_v18 = vld [vmem:[#allocation9 + $0x48] sm:$0xff] }
 0x277   :  { %v2181_v56 = vmax.f32 %v2139_v50, 0.0  ;;  %v1895_v57 = vpop.f32.mrb[20].mxu0  ;;  %v2611_v50 = vld [vmem:[#allocation4 + $0x3d8] sm:$0xff] }
 0x278   :  { %v9396_v12 = vpack.c.bf16 %v2180_v58, %v2177_v53  ;;  %v10490_v26 = vadd.f32 %v1895_v57, %v12133_v25  ;;  %v1897_v59 = vpop.f32.mrb[21].mxu0  ;;  %v2615_v53 = vld [vmem:[#allocation4 + $0x3f8] sm:$0xff]  ;;  %v2618_v58 = vld [vmem:[#allocation4 + $0x410] sm:$0xff]  ;;  %v2617_v57 = vld [vmem:[#allocation4 + $0x408] sm:$0xff] }
 0x279   :  { %v9394_v44 = vpack.c.bf16 %v2181_v56, %v2178_v54  ;;  %v10491_v32 = vadd.f32 %v1897_v59, %v12135_v28  ;;  %v9442_v54 = vpack.c.bf16 %v2618_v58, %v2615_v53  ;;  %v2614_v56 = vld [vmem:[#allocation4 + $0x3f0] sm:$0xff]  ;;  %v2668_v53 = vld [vmem:[#allocation4 + $0x5a0] sm:$0xff]  ;;  %v2671_v58 = vld [vmem:[#allocation4 + $0x5b8] sm:$0xff] }
 0x27a   :  { %v2141_v60 = vadd.f32 %v10490_v26, %v12210_v9  ;;  %v2624_v26 = vld [vmem:[#allocation4 + $0x440] sm:$0xff]  ;;  %v9444_v59 = vpack.c.bf16 %v2617_v57, %v2614_v56  ;;  %v9480_v56 = vpack.c.bf16 %v2671_v58, %v2668_v53  ;;  %v12317_v58 = vld [vmem:[#allocation4 + $0x728] sm:$0xff] }
 0x27b   :  { %v1901_v49 = vpop.f32.mrb[22].mxu0  ;;  %9395 = vmatprep.subr.bf16.mxu1 %v9394_v44  ;;  %v2142_v2 = vadd.f32 %v10491_v32, %v12213_v63  ;;  %v2620_v32 = vld [vmem:[#allocation4 + $0x420] sm:$0xff] }
 0x27c   :  { %v10492_v37 = vadd.f32 %v1901_v49, %v12140_v29  ;;  %v1903_v61 = vpop.f32.mrb[23].mxu0  ;;  %9397 = vmatpush1.bf16.msra.mxu1 %v9396_v12  ;;  %v2183_v6 = vmax.f32 %v2141_v60, 0.0  ;;  %v2621_v12 = vld [vmem:[#allocation4 + $0x428] sm:$0xff]  ;;  %v2623_v49 = vld [vmem:[#allocation4 + $0x438] sm:$0xff] }
 0x27d   :  { %v10493_v4 = vadd.f32 %v1903_v61, %v12142_v31  ;;  %v2184_v16 = vmax.f32 %v2142_v2, 0.0  ;;  %v9446_v44 = vpack.c.bf16 %v2624_v26, %v2621_v12  ;;  %v2627_v60 = vld [vmem:[#allocation4 + $0x458] sm:$0xff]  ;;  %v9448_v61 = vpack.c.bf16 %v2623_v49, %v2620_v32  ;;  %v2674_v12 = vld [vmem:[#allocation4 + $0x5d0] sm:$0xff]  ;;  %v2677_v26 = vld [vmem:[#allocation4 + $0x5e8] sm:$0xff] }
 0x27e   :  { %v2144_v39 = vadd.f32 %v10492_v37, %v12210_v9  ;;  %v2630_v37 = vld [vmem:[#allocation4 + $0x470] sm:$0xff]  ;;  %v9484_v32 = vpack.c.bf16 %v2677_v26, %v2674_v12  ;;  %v12325_v12 = vld [vmem:[#allocation4 + $0x738] sm:$0xff] }
 0x27f   :  { %v2145_v25 = vadd.f32 %v10493_v4, %v12213_v63  ;;  %v1907_v5 = vpop.f32.mrb[24].mxu0  ;;  %v9450_v2 = vpack.c.bf16 %v2630_v37, %v2627_v60  ;;  %v2626_v4 = vld [vmem:[#allocation4 + $0x450] sm:$0xff]  ;;  %v2680_v60 = vld [vmem:[#allocation4 + $0x600] sm:$0xff]  ;;  %v2683_v37 = vld [vmem:[#allocation4 + $0x618] sm:$0xff] }
 0x280   :  { %v2186_v47 = vmax.f32 %v2144_v39, 0.0  ;;  %v10494_v28 = vadd.f32 %v1907_v5, %v12147_v30  ;;  %v1909_v14 = vpop.f32.mrb[25].mxu0  ;;  %v2629_v39 = vld [vmem:[#allocation4 + $0x468] sm:$0xff]  ;;  %v2636_v5 = vld [vmem:[#allocation4 + $0x4a0] sm:$0xff] }
 0x281   :  { %v2187_v17 = vmax.f32 %v2145_v25, 0.0  ;;  %v10495_v29 = vadd.f32 %v1909_v14, %v12149_v55  ;;  %v2633_v25 = vld [vmem:[#allocation4 + $0x488] sm:$0xff]  ;;  %v2635_v14 = vld [vmem:[#allocation4 + $0x498] sm:$0xff] }
 0x282   :  { %v9400_v24 = vpack.c.bf16 %v2186_v47, %v2183_v6  ;;  %v2147_v36 = vadd.f32 %v10494_v28, %v12210_v9  ;;  %v9452_v6 = vpack.c.bf16 %v2629_v39, %v2626_v4  ;;  %v9454_v47 = vpack.c.bf16 %v2636_v5, %v2633_v25  ;;  %v2632_v28 = vld [vmem:[#allocation4 + $0x480] sm:$0xff]  ;;  %v2690_v4 = vld [vmem:[#allocation4 + $0x650] sm:$0xff]  ;;  %v2697_v39 = vld [vmem:[#allocation4 + $0x688] sm:$0xff] }
 0x283   :  { %v1913_v34 = vpop.f32.mrb[26].mxu0  ;;  %v9398_v19 = vpack.c.bf16 %v2187_v17, %v2184_v16  ;;  %v2148_v35 = vadd.f32 %v10495_v29, %v12213_v63  ;;  %v2639_v16 = vld [vmem:[#allocation4 + $0x4b8] sm:$0xff]  ;;  %v2642_v17 = vld [vmem:[#allocation4 + $0x4d0] sm:$0xff]  ;;  %v9456_v29 = vpack.c.bf16 %v2635_v14, %v2632_v28 }
 0x284   :  { %v10496_v31 = vadd.f32 %v1913_v34, %v12154_v11  ;;  %v1915_v15 = vpop.f32.mrb[27].mxu0  ;;  %v2189_v3 = vmax.f32 %v2147_v36, 0.0  ;;  %v2195_v11 = vld [vmem:[#allocation9] sm:$0xff]  ;;  %v2638_v34 = vld [vmem:[#allocation4 + $0x4b0] sm:$0xff]  ;;  %v2645_v36 = vld [vmem:[#allocation4 + $0x4e8] sm:$0xff] }
 0x285   :  { %v10497_v22 = vadd.f32 %v1915_v15, %v12156_v21  ;;  %9399 = vmatprep.subr.bf16.mxu1 %v9398_v19  ;;  %v2190_v40 = vmax.f32 %v2148_v35, 0.0  ;;  %v2196_v21 = vld [vmem:[#allocation9 + $0x8] sm:$0xff]  ;;  %v2641_v19 = vld [vmem:[#allocation4 + $0x4c8] sm:$0xff]  ;;  %v2646_v5 = vld [vmem:[#allocation4 + $0x4f0] sm:$0xff] }
 0x286   :  { %v2150_v30 = vadd.f32 %v10496_v31, %v12210_v9  ;;  %9401 = vmatpush1.bf16.msra.mxu1 %v9400_v24  ;;  %v2197_v9 = vld [vmem:[#allocation9 + $0x10] sm:$0xff]  ;;  %v9458_v24 = vpack.c.bf16 %v2642_v17, %v2639_v16  ;;  %v2648_v31 = vld [vmem:[#allocation4 + $0x500] sm:$0xff]  ;;  %v9460_v15 = vpack.c.bf16 %v2641_v19, %v2638_v34  ;;  %v2686_v16 = vld [vmem:[#allocation4 + $0x630] sm:$0xff] }
 0x287   :  { %v2151_v27 = vadd.f32 %v10497_v22, %v12213_v63  ;;  %v2609_v63 = vld [vmem:[#allocation4 + $0x3c8] sm:$0xff]  ;;  %v9462_v35 = vpack.c.bf16 %v2648_v31, %v2645_v36  ;;  %v2644_v22 = vld [vmem:[#allocation4 + $0x4e0] sm:$0xff]  ;;  %v2703_v19 = vld [vmem:[#allocation4 + $0x6b8] sm:$0xff] }
 0x288   :  { %v2192_v55 = vmax.f32 %v2150_v30, 0.0  ;;  %v9438_v48 = vpack.c.bf16 %v2612_v46, %v2609_v63  ;;  %v2647_v30 = vld [vmem:[#allocation4 + $0x4f8] sm:$0xff]  ;;  %v2666_v63 = vld [vmem:[#allocation4 + $0x590] sm:$0xff]  ;;  %v2689_v17 = vld [vmem:[#allocation4 + $0x648] sm:$0xff] }
 0x289   :  { %v2193_v43 = vmax.f32 %v2151_v27, 0.0  ;;  %v2651_v27 = vld [vmem:[#allocation4 + $0x518] sm:$0xff]  ;;  %v2696_v34 = vld [vmem:[#allocation4 + $0x680] sm:$0xff] }
 0x28a   :  { %v9405_v33 = vpack.c.bf16 %v2192_v55, %v2189_v3  ;;  %v2654_v3 = vld [vmem:[#allocation4 + $0x530] sm:$0xff]  ;;  %v9464_v55 = vpack.c.bf16 %v2647_v30, %v2644_v22  ;;  %v2652_v31 = vld [vmem:[#allocation4 + $0x520] sm:$0xff] }
 0x28b   :  { %v9402_v45 = vpack.c.bf16 %v2193_v43, %v2190_v40  ;;  %v9466_v40 = vpack.c.bf16 %v2654_v3, %v2651_v27  ;;  %v2650_v43 = vld [vmem:[#allocation4 + $0x510] sm:$0xff]  ;;  %v2692_v27 = vld [vmem:[#allocation4 + $0x660] sm:$0xff]  ;;  %v2695_v3 = vld [vmem:[#allocation4 + $0x678] sm:$0xff] }
 0x28d   :  { %9404 = vmatprep.subr.msk.bf16.mxu1 %vm11485_vm2, %v9402_v45  ;;  %v2657_v45 = vld [vmem:[#allocation4 + $0x548] sm:$0xff] }
 0x28e   :  { %9407 = vmatpush1.bf16.msk.msra.mxu1 %vm11485_vm2, %v9405_v33  ;;  %v2653_v33 = vld [vmem:[#allocation4 + $0x528] sm:$0xff] }
 0x28f   :  { %9409 = vmatprep.subr.bf16.mxu1 %v12189_v51 }
 0x291   :  { %8099 = vmatmul.mubr.msk.f32.vlgmr.msra.gmra.mrb[22].mxu1 %vm2205_vm7, %v2195_v11 }
 0x292   :  { %9411 = vmatpush3.bf16.msra.mxu1 %v12189_v51  ;;  %2315 = vmatprep.mubr.f32.mxu1 %v14006_v0  ;;  %v2198_v51 = vld [vmem:[#allocation9 + $0x18] sm:$0xff] }
 0x293   :  { %9413 = vmatprep.subr.bf16.mxu1 %v12191_v7 }
 0x295   :  { %8100 = vmatmul.mubr.msk.f32.gmra.mrb[24].mxu1 %vm2205_vm7, %v2196_v21 }
 0x296   :  { %9415 = vmatpush3.bf16.msra.mxu1 %v12191_v7  ;;  %2321 = vmatprep.mubr.f32.mxu1 %v14006_v0  ;;  %v2199_v7 = vld [vmem:[#allocation9 + $0x20] sm:$0xff] }
 0x297   :  { %9417 = vmatprep.subr.bf16.mxu1 %v12193_v41 }
 0x299   :  { %8101 = vmatmul.mubr.msk.f32.gmra.mrb[26].mxu1 %vm2205_vm7, %v2197_v9 }
 0x29a   :  { %9419 = vmatpush3.bf16.msra.mxu1 %v12193_v41  ;;  %2327 = vmatprep.mubr.f32.mxu1 %v14006_v0  ;;  %v2200_v41 = vld [vmem:[#allocation9 + $0x28] sm:$0xff] }
 0x29b   :  { %9421 = vmatprep.subr.bf16.mxu1 %v12195_v8 }
 0x29d   :  { %8102 = vmatmul.mubr.msk.f32.gmra.mrb[28].mxu1 %vm2205_vm7, %v2198_v51 }
 0x29e   :  { %9423 = vmatpush3.bf16.msra.mxu1 %v12195_v8  ;;  %2333 = vmatprep.mubr.f32.mxu1 %v14006_v0  ;;  %v2201_v8 = vld [vmem:[#allocation9 + $0x30] sm:$0xff] }
 0x29f   :  { %9425 = vmatprep.subr.bf16.mxu1 %v12197_v38 }
 0x2a1   :  { %8103 = vmatmul.mubr.msk.f32.gmra.mrb[30].mxu1 %vm2205_vm7, %v2199_v7 }
 0x2a2   :  { %9427 = vmatpush3.bf16.msra.mxu1 %v12197_v38  ;;  %2339 = vmatprep.mubr.f32.mxu1 %v14006_v0  ;;  %v2202_v38 = vld [vmem:[#allocation9 + $0x38] sm:$0xff] }
 0x2a3   :  { %9429 = vmatprep.subr.bf16.mxu1 %v12199_v10 }
 0x2a5   :  { %8104 = vmatmul.mubr.msk.f32.gmra.mrb[32].mxu1 %vm2205_vm7, %v2200_v41 }
 0x2a6   :  { %9431 = vmatpush3.bf16.msra.mxu1 %v12199_v10  ;;  %2345 = vmatprep.mubr.f32.mxu1 %v14006_v0  ;;  %v2203_v10 = vld [vmem:[#allocation9 + $0x40] sm:$0xff] }
 0x2a7   :  { %9434 = vmatprep.subr.msk.bf16.mxu1 %vm11485_vm2, %v12201_v42 }
 0x2a9   :  { %8105 = vmatmul.mubr.msk.f32.gmra.mrb[34].mxu1 %vm2205_vm7, %v2201_v8 }
 0x2aa   :  { %9437 = vmatpush3.bf16.msk.msra.mxu1 %vm11485_vm2, %v12201_v42  ;;  %2351 = vmatprep.mubr.f32.mxu1 %v14006_v0  ;;  %v9440_v42 = vpack.c.bf16 %v2611_v50, %v2608_v52 }
 0x2ab   :  { %9439 = vmatprep.subr.bf16.mxu1 %v9438_v48  ;;  %v2662_v48 = vld [vmem:[#allocation4 + $0x570] sm:$0xff] }
 0x2ad   :  { %8106 = vmatmul.mubr.msk.f32.gmra.mrb[36].mxu1 %vm2205_vm7, %v2202_v38 }
 0x2ae   :  { %2357 = vmatprep.mubr.f32.mxu1 %v14006_v0 }
 0x2b1   :  { %8107 = vmatmul.mubr.msk.f32.gmra.mrb[38].mxu1 %vm2205_vm7, %v2203_v10 }
 0x2b2   :  { %2363 = vmatprep.mubr.f32.mxu1 %v14006_v0 }
 0x2b5   :  { %8108 = vmatmul.mubr.msk.f32.gmra.mrb[40].mxu1 %vm2205_vm7, %v2204_v18 }
 0x2b6   :  { %9011 = vmatprep.mubr.msk.f32.mxu1 %vm2205_vm7, %v2195_v11  ;;  %v2660_v11 = vld [vmem:[#allocation4 + $0x560] sm:$0xff] }
 0x2b9   :  { %9012 = vmatmul.mubr.msk.f32.vlgmr.msra.gmra.mrb[42].mxu1 %vm2205_vm7, %v2196_v21  ;;  %v9468_v21 = vpack.c.bf16 %v2653_v33, %v2650_v43  ;;  %v9496_v43 = vpack.c.bf16 %v2695_v3, %v2692_v27 }
 0x2ba   :  { %9014 = vmatprep.mubr.msk.f32.mxu1 %vm2205_vm7, %v2197_v9  ;;  %9441 = vmatpush1.bf16.msra.mxu1 %v9440_v42  ;;  %v9470_v9 = vpack.c.bf16 %v2660_v11, %v2657_v45  ;;  %v2675_v42 = vld [vmem:[#allocation4 + $0x5d8] sm:$0xff]  ;;  %v2698_v45 = vld [vmem:[#allocation4 + $0x690] sm:$0xff]  ;;  %v2701_v11 = vld [vmem:[#allocation4 + $0x6a8] sm:$0xff] }
 0x2bb   :  { %9443 = vmatprep.subr.bf16.mxu1 %v9442_v54  ;;  %v2678_v54 = vld [vmem:[#allocation4 + $0x5f0] sm:$0xff] }
 0x2bc   :  { %v9482_v57 = vpack.c.bf16 %v2678_v54, %v2675_v42  ;;  %v12319_v42 = vld [vmem:[#allocation4 + $0x740] sm:$0xff]  ;;  %v2715_v54 = vld [vmem:[#allocation4 + $0x718] sm:$0xff] }
 0x2bd   :  { %9015 = vmatmul.mubr.msk.f32.gmra.mrb[44].mxu1 %vm2205_vm7, %v2198_v51  ;;  %v2656_v51 = vld [vmem:[#allocation4 + $0x540] sm:$0xff] }
 0x2be   :  { %9017 = vmatprep.mubr.msk.f32.mxu1 %vm2205_vm7, %v2199_v7  ;;  %9445 = vmatpush1.bf16.msra.mxu1 %v9444_v59  ;;  %v2659_v7 = vld [vmem:[#allocation4 + $0x558] sm:$0xff]  ;;  %v2681_v59 = vld [vmem:[#allocation4 + $0x608] sm:$0xff] }
 0x2bf   :  { %9447 = vmatprep.subr.bf16.mxu1 %v9446_v44  ;;  %v9472_v46 = vpack.c.bf16 %v2659_v7, %v2656_v51  ;;  %v2684_v44 = vld [vmem:[#allocation4 + $0x620] sm:$0xff] }
 0x2c0   :  { %v9486_v49 = vpack.c.bf16 %v2684_v44, %v2681_v59  ;;  %v2708_v51 = vld [vmem:[#allocation4 + $0x6e0] sm:$0xff] }
 0x2c1   :  { %9018 = vmatmul.mubr.msk.f32.gmra.mrb[46].mxu1 %vm2205_vm7, %v2200_v41  ;;  %v2663_v41 = vld [vmem:[#allocation4 + $0x578] sm:$0xff] }
 0x2c2   :  { %9020 = vmatprep.mubr.msk.f32.mxu1 %vm2205_vm7, %v2201_v8  ;;  %9449 = vmatpush1.bf16.msra.mxu1 %v9448_v61  ;;  %v9474_v8 = vpack.c.bf16 %v2666_v63, %v2663_v41  ;;  %v2694_v61 = vld [vmem:[#allocation4 + $0x670] sm:$0xff]  ;;  %v2709_v63 = vld [vmem:[#allocation4 + $0x6e8] sm:$0xff] }
 0x2c3   :  { %9451 = vmatprep.subr.bf16.mxu1 %v9450_v2  ;;  %v2687_v2 = vld [vmem:[#allocation4 + $0x638] sm:$0xff]  ;;  %v9542_v25 = vpack.c.bf16 %v2697_v39, %v2694_v61  ;;  %v2706_v41 = vld [vmem:[#allocation4 + $0x6d0] sm:$0xff] }
 0x2c4   :  { %v9490_v14 = vpack.c.bf16 %v2690_v4, %v2687_v2  ;;  %v2718_v2 = vld [vmem:[#allocation4 + $0x730] sm:$0xff] }
 0x2c5   :  { %9021 = vmatmul.mubr.msk.f32.gmra.mrb[48].mxu1 %vm2205_vm7, %v2202_v38  ;;  %v2665_v38 = vld [vmem:[#allocation4 + $0x588] sm:$0xff]  ;;  %9543 = vmatprep.subr.bf16.mxu0 %v9542_v25 }
 0x2c6   :  { %9023 = vmatprep.mubr.msk.f32.mxu1 %vm2205_vm7, %v2203_v10  ;;  %9453 = vmatpush1.bf16.msra.mxu1 %v9452_v6  ;;  %v2669_v10 = vld [vmem:[#allocation4 + $0x5a8] sm:$0xff]  ;;  %v9476_v52 = vpack.c.bf16 %v2665_v38, %v2662_v48  ;;  %v2707_v48 = vld [vmem:[#allocation4 + $0x6d8] sm:$0xff] }
 0x2c7   :  { %9455 = vmatprep.subr.bf16.mxu1 %v9454_v47  ;;  %v2649_v6 = vld [vmem:[#allocation4 + $0x508] sm:$0xff]  ;;  %v9488_v47 = vpack.c.bf16 %v2683_v37, %v2680_v60  ;;  %v12307_v38 = vld [vmem:[#allocation4 + $0x6f8] sm:$0xff] }
 0x2c8   :  { %v9544_v28 = vpack.c.bf16 %v2649_v6, %v2646_v5 }
 0x2c9   :  { %9024 = vmatmul.mubr.msk.f32.gmra.mrb[50].mxu1 %vm2205_vm7, %v2204_v18  ;;  %v2672_v18 = vld [vmem:[#allocation4 + $0x5c0] sm:$0xff] }
 0x2ca   :  { %9457 = vmatpush1.bf16.msra.mxu1 %v9456_v29  ;;  %v9478_v50 = vpack.c.bf16 %v2672_v18, %v2669_v10  ;;  %v2700_v29 = vld [vmem:[#allocation4 + $0x6a0] sm:$0xff]  ;;  %9545 = vmatpush3.bf16.msra.mxu0 %v9544_v28  ;;  %v12309_v10 = vld [vmem:[#allocation4 + $0x710] sm:$0xff] }
 0x2cb   :  { %9459 = vmatprep.subr.bf16.mxu1 %v9458_v24  ;;  %v2693_v24 = vld [vmem:[#allocation4 + $0x668] sm:$0xff]  ;;  %v9546_v36 = vpack.c.bf16 %v2703_v19, %v2700_v29  ;;  %v12311_v18 = vld [vmem:[#allocation4 + $0x6f0] sm:$0xff]  ;;  %v9506_v59 = vpack.c.bf16 %v12309_v10, %v12307_v38 }
 0x2cc   :  { %v9494_v30 = vpack.c.bf16 %v2696_v34, %v2693_v24  ;;  %v12390_v38 = vld [vmem:[#allocation4 + $0x768] sm:$0xff] }
 0x2cd   :  { %9547 = vmatprep.subr.bf16.mxu0 %v9546_v36 }
 0x2ce   :  { %9461 = vmatpush1.bf16.msra.mxu1 %v9460_v15  ;;  %v2655_v15 = vld [vmem:[#allocation4 + $0x538] sm:$0xff] }
 0x2cf   :  { %9463 = vmatprep.subr.bf16.mxu1 %v9462_v35  ;;  %v9492_v35 = vpack.c.bf16 %v2689_v17, %v2686_v16  ;;  %v9548_v22 = vpack.c.bf16 %v2655_v15, %v2652_v31 }
 0x2d1   :  { %9549 = vmatpush3.bf16.msra.mxu0 %v9548_v22 }
 0x2d2   :  { %9465 = vmatpush1.bf16.msra.mxu1 %v9464_v55  ;;  %v2699_v55 = vld [vmem:[#allocation4 + $0x698] sm:$0xff] }
 0x2d3   :  { %9467 = vmatprep.subr.bf16.mxu1 %v9466_v40  ;;  %v2702_v40 = vld [vmem:[#allocation4 + $0x6b0] sm:$0xff] }
 0x2d4   :  { %v9498_v33 = vpack.c.bf16 %v2702_v40, %v2699_v55  ;;  %v12373_v40 = vld [vmem:[#allocation4 + $0x758] sm:$0xff] }
 0x2d6   :  { %9469 = vmatpush1.bf16.msra.mxu1 %v9468_v21  ;;  %v9500_v21 = vpack.c.bf16 %v2701_v11, %v2698_v45 }
 0x2d7   :  { %9471 = vmatprep.subr.bf16.mxu1 %v9470_v9  ;;  %v2705_v9 = vld [vmem:[#allocation4 + $0x6c8] sm:$0xff] }
 0x2d8   :  { %v9502_v7 = vpack.c.bf16 %v2708_v51, %v2705_v9  ;;  %v2724_v9 = vld [vmem:[#allocation4 + $0x760] sm:$0xff]  ;;  %v2727_v51 = vld [vmem:[#allocation4 + $0x778] sm:$0xff] }
 0x2da   :  { %9473 = vmatpush1.bf16.msra.mxu1 %v9472_v46  ;;  %v12302_v46 = vpack.c.bf16 %v2709_v63, %v2706_v41 }
 0x2db   :  { %9475 = vmatprep.subr.bf16.mxu1 %v9474_v8  ;;  %v12305_v8 = vld [vmem:[#allocation4 + $0x6c0] sm:$0xff] }
 0x2dc   :  { %9551 = vmatprep.subr.bf16.mxu0 %v12302_v46  ;;  %v9504_v26 = vpack.c.bf16 %v2707_v48, %v12305_v8  ;;  %v12388_v48 = vld [vmem:[#allocation4 + $0x750] sm:$0xff] }
 0x2de   :  { %9477 = vmatpush1.bf16.msra.mxu1 %v9476_v52  ;;  %v12313_v52 = vld [vmem:[#allocation4 + $0x708] sm:$0xff] }
 0x2df   :  { %9479 = vmatprep.subr.bf16.mxu1 %v9478_v50  ;;  %v2712_v50 = vld [vmem:[#allocation4 + $0x700] sm:$0xff]  ;;  %v9508_v44 = vpack.c.bf16 %v12313_v52, %v12311_v18 }
 0x2e2   :  { %9481 = vmatpush1.bf16.msra.mxu1 %v9480_v56 }
 0x2e3   :  { %9483 = vmatprep.subr.bf16.mxu1 %v9482_v57  ;;  %v12323_v57 = vld [vmem:[#allocation4 + $0x720] sm:$0xff] }
 0x2e4   :  { %v9512_v61 = vpack.c.bf16 %v12325_v12, %v12323_v57 }
 0x2e6   :  { %9485 = vmatpush1.bf16.msra.mxu1 %v9484_v32  ;;  %v9510_v32 = vpack.c.bf16 %v12319_v42, %v12317_v58 }
 0x2e7   :  { %9487 = vmatprep.subr.bf16.mxu1 %v9486_v49  ;;  %v12334_v49 = vpack.c.bf16 %v2715_v54, %v2712_v50 }
 0x2ea   :  { %9489 = vmatpush1.bf16.msra.mxu1 %v9488_v47  ;;  %v2721_v47 = vld [vmem:[#allocation4 + $0x748] sm:$0xff] }
 0x2eb   :  { %9491 = vmatprep.subr.bf16.mxu1 %v9490_v14  ;;  %v12362_v22 = vpack.c.bf16 %v2721_v47, %v2718_v2 }
 0x2ee   :  { %9493 = vmatpush1.bf16.msra.mxu1 %v9492_v35 }
 0x2ef   :  { %9495 = vmatprep.subr.bf16.mxu1 %v9494_v30 }
 0x2f2   :  { %9497 = vmatpush1.bf16.msra.mxu1 %v9496_v43  ;;  %v12375_v43 = vld [vmem:[#allocation4 + $0x770] sm:$0xff] }
 0x2f3   :  { %9499 = vmatprep.subr.bf16.mxu1 %v9498_v33 }
 0x2f6   :  { %9501 = vmatpush1.bf16.msra.mxu1 %v9500_v21 }
 0x2f7   :  { %9503 = vmatprep.subr.bf16.mxu1 %v9502_v7 }
 0x364   :  { %v12315_v53 = vpop.f32.mrb[22].mxu1 }
 0x365   :  { %v12321_v56 = vpop.f32.mrb[23].mxu1  ;;  %v2758_v37 = vrot.slane %v12315_v53, 1  ;;  %v3957_v4 = vrot.slane %v12315_v53, 2  ;;  %v4685_v39 = vrot.slane %v12315_v53, 3 }
 0x366   :  { %v2761_v5 = vrot.slane %v12321_v56, 1  ;;  %v3960_v28 = vrot.slane %v12321_v56, 2  ;;  %v4688_v29 = vrot.slane %v12321_v56, 3  ;;  %v5416_v11 = vrot.slane %v12321_v56, 4 }
 0x368   :  { %v12336_v60 = vpop.f32.mrb[24].mxu1 }
 0x369   :  { %v12343_v25 = vpop.f32.mrb[25].mxu1  ;;  %v2759_v6 = vrot.slane %v12336_v60, 1  ;;  %v3958_v14 = vrot.slane %v12336_v60, 2  ;;  %v4686_v36 = vrot.slane %v12336_v60, 3 }
 0x36a   :  { %v2762_v16 = vrot.slane %v12343_v25, 1  ;;  %v3961_v17 = vrot.slane %v12343_v25, 2  ;;  %v4689_v24 = vrot.slane %v12343_v25, 3  ;;  %v5417_v31 = vrot.slane %v12343_v25, 4 }
 0x36b   :  { %v2760_v34 = vsel %vm212_vm3, %v2758_v37, %v2759_v6  ;;  %v12355_v19 = vsel %vm897_vm4, %v3957_v4, %v3958_v14  ;;  %v12379_v45 = vsel %vm1301_vm6, %v4685_v39, %v4686_v36  ;;  %v12412_v39 = vpack.c.bf16 %v2727_v51, %v2724_v9 }
 0x36c   :  { %14103 = vst [vmem:[#allocation25_spill] sm:$0xff] %v12355_v19  ;;  %v12359_v15 = vpop.f32.mrb[26].mxu1  ;;  %v2763_v35 = vsel %vm212_vm3, %v2761_v5, %v2762_v16  ;;  %v12365_v30 = vsel %vm897_vm4, %v3960_v28, %v3961_v17  ;;  %v12368_v27 = vsel %vm1301_vm6, %v4688_v29, %v4689_v24  ;;  %14106 = vst [vmem:[#allocation28_spill] sm:$0xff] %v12379_v45  ;;  %v12414_v5 = vld [vmem:[#allocation4 + $0x8] sm:$0xff] }
 0x36d   :  { %14104 = vst [vmem:[#allocation26_spill] sm:$0xff] %v12365_v30  ;;  %14105 = vst [vmem:[#allocation27_spill] sm:$0xff] %v12368_v27  ;;  %v12370_v3 = vpop.f32.mrb[27].mxu1  ;;  %2920 = vmatprep.mubr.f32.mxu1 %v2763_v35  ;;  %3170 = vmatprep.mubr.f32.mxu0 %v2763_v35  ;;  %v2767_v55 = vrot.slane %v12359_v15, 1  ;;  %v3966_v33 = vrot.slane %v12359_v15, 2  ;;  %v4694_v63 = vrot.slane %v12359_v15, 3  ;;  %v12398_v50 = vsel %vm269_vm0, %v5416_v11, %v5417_v31 }
 0x36e   :  { %2921 = vmatmul.mubr.f32.vlgmr.msra.gmra.mrb[52].mxu1 %v2760_v34  ;;  %3171 = vmatmul.mubr.f32.vlgmr.msra.gmra.mrb[28].mxu0 %v2760_v34  ;;  %v2769_v21 = vrot.slane %v12370_v3, 1  ;;  %v3968_v7 = vrot.slane %v12370_v3, 2  ;;  %v4696_v41 = vrot.slane %v12370_v3, 3  ;;  %14108 = vst [vmem:[#allocation30_spill] sm:$0xff] %v12398_v50  ;;  %v14009_v35 = vrot.slane %v12336_v60, 4 }
 0x36f   :  { %v2768_v8 = vsel %vm212_vm3, %v2759_v6, %v2767_v55  ;;  %9505 = vmatpush1.bf16.msra.mxu1 %v9504_v26  ;;  %9553 = vmatpush3.bf16.msra.mxu0 %v12302_v46  ;;  %v12393_v10 = vsel %vm897_vm4, %v3958_v14, %v3966_v33  ;;  %v9514_v46 = vpack.c.bf16 %v12375_v43, %v12373_v40  ;;  %v12416_v6 = vld [vmem:[#allocation4 + $0x20] sm:$0xff]  ;;  %v2537_v43 = vld [vmem:[#allocation4 + $0x190] sm:$0xff] }
 0x370   :  { %14107 = vst [vmem:[#allocation29_spill] sm:$0xff] %v12393_v10  ;;  %v12400_v54 = vpop.f32.mrb[28].mxu1  ;;  %v2770_v37 = vsel %vm212_vm3, %v2762_v16, %v2769_v21  ;;  %9507 = vmatprep.subr.bf16.mxu1 %v9506_v59  ;;  %9555 = vmatprep.subr.bf16.mxu0 %v12334_v49  ;;  %v12407_v26 = vsel %vm897_vm4, %v3961_v17, %v3968_v7 }
 0x371   :  { %14109 = vst [vmem:[#allocation31_spill] sm:$0xff] %v12407_v26  ;;  %v12409_v2 = vpop.f32.mrb[29].mxu1  ;;  %2926 = vmatprep.mubr.f32.mxu1 %v2770_v37  ;;  %3175 = vmatprep.mubr.f32.mxu0 %v2770_v37  ;;  %v2773_v4 = vrot.slane %v12400_v54, 1  ;;  %v3972_v59 = vrot.slane %v12400_v54, 2  ;;  %v12420_v47 = vsel %vm1301_vm6, %v4689_v24, %v4696_v41  ;;  %v9516_v14 = vpack.c.bf16 %v12390_v38, %v12388_v48 }
 0x372   :  { %14110 = vst [vmem:[#allocation32_spill] sm:$0xff] %v12420_v47  ;;  %2927 = vmatmul.mubr.f32.gmra.mrb[54].mxu1 %v2768_v8  ;;  %3176 = vmatmul.mubr.f32.gmra.mrb[30].mxu0 %v2768_v8  ;;  %v2775_v28 = vrot.slane %v12409_v2, 1  ;;  %v3974_v16 = vrot.slane %v12409_v2, 2  ;;  %v12427_v17 = vsel %vm1301_vm6, %v4686_v36, %v4694_v63  ;;  %v4702_v34 = vrot.slane %v12409_v2, 3 }
 0x373   :  { %14111 = vst [vmem:[#allocation33_spill] sm:$0xff] %v12427_v17  ;;  %v2774_v29 = vsel %vm212_vm3, %v2767_v55, %v2773_v4  ;;  %9509 = vmatpush1.bf16.msra.mxu1 %v9508_v44  ;;  %9557 = vmatpush3.bf16.msra.mxu0 %v12334_v49  ;;  %v12435_v24 = vsel %vm897_vm4, %v3966_v33, %v3972_v59  ;;  %v4700_v44 = vrot.slane %v12400_v54, 3  ;;  %v2540_v33 = vld [vmem:[#allocation4 + $0x1a8] sm:$0xff] }
 0x374   :  { %14112 = vst [vmem:[#allocation34_spill] sm:$0xff] %v12435_v24  ;;  %v12439_v40 = vpop.f32.mrb[30].mxu1  ;;  %v2776_v36 = vsel %vm212_vm3, %v2769_v21, %v2775_v28  ;;  %9511 = vmatprep.subr.bf16.mxu1 %v9510_v32  ;;  %9559 = vmatprep.subr.bf16.mxu0 %v12362_v22  ;;  %v9566_v18 = vpack.c.bf16 %v12416_v6, %v12414_v5  ;;  %v5413_v32 = vrot.slane %v12315_v53, 4  ;;  %v14008_v6 = vrot.slane %v12370_v3, 4 }
 0x375   :  { %v12449_v52 = vsel %vm897_vm4, %v3968_v7, %v3974_v16  ;;  %v12452_v49 = vpop.f32.mrb[31].mxu1  ;;  %2932 = vmatprep.mubr.f32.mxu1 %v2776_v36  ;;  %3180 = vmatprep.mubr.f32.mxu0 %v2776_v36  ;;  %v2779_v55 = vrot.slane %v12439_v40, 1  ;;  %v3978_v58 = vrot.slane %v12439_v40, 2  ;;  %v12457_v42 = vsel %vm1301_vm6, %v4696_v41, %v4702_v34 }
 0x376   :  { %14113 = vst [vmem:[#allocation35_spill] sm:$0xff] %v12449_v52  ;;  %14114 = vst [vmem:[#allocation36_spill] sm:$0xff] %v12457_v42  ;;  %2933 = vmatmul.mubr.f32.gmra.mrb[56].mxu1 %v2774_v29  ;;  %3181 = vmatmul.mubr.f32.gmra.mrb[32].mxu0 %v2774_v29  ;;  %v2781_v11 = vrot.slane %v12452_v49, 1  ;;  %v3980_v21 = vrot.slane %v12452_v49, 2  ;;  %v12463_v9 = vsel %vm1301_vm6, %v4694_v63, %v4700_v44  ;;  %v4708_v51 = vrot.slane %v12452_v49, 3 }
 0x377   :  { %14115 = vst [vmem:[#allocation37_spill] sm:$0xff] %v12463_v9  ;;  %v2780_v7 = vsel %vm212_vm3, %v2773_v4, %v2779_v55  ;;  %9513 = vmatpush1.bf16.msra.mxu1 %v9512_v61  ;;  %9561 = vmatpush3.bf16.msra.mxu0 %v12362_v22  ;;  %v12472_v41 = vsel %vm897_vm4, %v3972_v59, %v3978_v58  ;;  %v4706_v8 = vrot.slane %v12439_v40, 3  ;;  %v14149_v42 = vrot.slane %v12409_v2, 4 }
 0x378   :  { %14116 = vst [vmem:[#allocation38_spill] sm:$0xff] %v12472_v41  ;;  %v12478_v63 = vsel %vm269_vm0, %v5413_v32, %v14009_v35  ;;  %v12480_v48 = vpop.f32.mrb[32].mxu1  ;;  %v2782_v38 = vsel %vm212_vm3, %v2775_v28, %v2781_v11  ;;  %9515 = vmatprep.subr.bf16.mxu1 %v9514_v46  ;;  %9563 = vmatprep.subr.bf16.mxu0 %v12412_v39  ;;  %v5434_v17 = vrot.slane %v12439_v40, 4 }
 0x379   :  { %14117 = vst [vmem:[#allocation39_spill] sm:$0xff] %v12478_v63  ;;  %v9646_v57 = vpack.c.bf16 %v2540_v33, %v2537_v43  ;;  %v12485_v12 = vsel %vm897_vm4, %v3974_v16, %v3980_v21  ;;  %v12487_v61 = vpop.f32.mrb[33].mxu1  ;;  %2938 = vmatprep.mubr.f32.mxu1 %v2782_v38  ;;  %3185 = vmatprep.mubr.f32.mxu0 %v2782_v38  ;;  %v2785_v22 = vrot.slane %v12480_v48, 1  ;;  %v3984_v37 = vrot.slane %v12480_v48, 2 }
 0x37a   :  { %14118 = vst [vmem:[#allocation40_spill] sm:$0xff] %v12485_v12  ;;  %2939 = vmatmul.mubr.f32.gmra.mrb[58].mxu1 %v2780_v7  ;;  %3186 = vmatmul.mubr.f32.gmra.mrb[34].mxu0 %v2780_v7  ;;  %v2787_v4 = vrot.slane %v12487_v61, 1  ;;  %v3986_v46 = vrot.slane %v12487_v61, 2  ;;  %v12494_v5 = vsel %vm1301_vm6, %v4702_v34, %v4708_v51  ;;  %v12503_v16 = vsel %vm1301_vm6, %v4700_v44, %v4706_v8 }
 0x37b   :  { %14119 = vst [vmem:[#allocation41_spill] sm:$0xff] %v12494_v5  ;;  %v2786_v59 = vsel %vm212_vm3, %v2779_v55, %v2785_v22  ;;  %9517 = vmatpush1.bf16.msra.mxu1 %v9516_v14  ;;  %9565 = vmatpush3.bf16.msra.mxu0 %v12412_v39  ;;  %v12500_v28 = vsel %vm897_vm4, %v3978_v58, %v3984_v37  ;;  %14121 = vst [vmem:[#allocation43_spill] sm:$0xff] %v12503_v16  ;;  %v4714_v29 = vrot.slane %v12487_v61, 3 }
 0x37c   :  { %14120 = vst [vmem:[#allocation42_spill] sm:$0xff] %v12500_v28  ;;  %v12506_v36 = vpop.f32.mrb[34].mxu1  ;;  %v2788_v34 = vsel %vm212_vm3, %v2781_v11, %v2787_v4  ;;  %9567 = vmatprep.subr.bf16.mxu1 %v9566_v18  ;;  %9647 = vmatprep.subr.bf16.mxu0 %v9646_v57  ;;  %v12510_v43 = vsel %vm897_vm4, %v3980_v21, %v3986_v46  ;;  %v4712_v14 = vrot.slane %v12480_v48, 3  ;;  %v14018_v58 = vrot.slane %v12359_v15, 4 }
 0x37d   :  { %14122 = vst [vmem:[#allocation44_spill] sm:$0xff] %v12510_v43  ;;  %v12513_v39 = vpop.f32.mrb[35].mxu1  ;;  %2944 = vmatprep.mubr.f32.mxu1 %v2788_v34  ;;  %3190 = vmatprep.mubr.f32.mxu0 %v2788_v34  ;;  %v2791_v44 = vrot.slane %v12506_v36, 1  ;;  %v3990_v55 = vrot.slane %v12506_v36, 2  ;;  %v12518_v33 = vsel %vm1301_vm6, %v4708_v51, %v4714_v29  ;;  %v4718_v51 = vrot.slane %v12506_v36, 3  ;;  %v12748_v43 = vld [vmem:[#allocation4 + $0x70] sm:$0xff] }
 0x37e   :  { %14123 = vst [vmem:[#allocation45_spill] sm:$0xff] %v12518_v33  ;;  %2945 = vmatmul.mubr.f32.gmra.mrb[60].mxu1 %v2786_v59  ;;  %3191 = vmatmul.mubr.f32.gmra.mrb[36].mxu0 %v2786_v59  ;;  %v2793_v18 = vrot.slane %v12513_v39, 1  ;;  %v3992_v32 = vrot.slane %v12513_v39, 2  ;;  %v12524_v11 = vsel %vm1301_vm6, %v4706_v8, %v4712_v14  ;;  %v4720_v21 = vrot.slane %v12513_v39, 3  ;;  %v12664_v33 = vld [vmem:[#allocation4 + $0x48] sm:$0xff] }
 0x37f   :  { %14124 = vst [vmem:[#allocation46_spill] sm:$0xff] %v12524_v11  ;;  %v2792_v7 = vsel %vm212_vm3, %v2785_v22, %v2791_v44  ;;  %v12529_v38 = vsel %vm897_vm4, %v3984_v37, %v3990_v55  ;;  %v12537_v57 = vsel %vm269_vm0, %v5417_v31, %v14008_v6  ;;  %v12553_v31 = vsel %vm1301_vm6, %v4712_v14, %v4718_v51 }
 0x380   :  { %14125 = vst [vmem:[#allocation47_spill] sm:$0xff] %v12529_v38  ;;  %14126 = vst [vmem:[#allocation48_spill] sm:$0xff] %v12537_v57  ;;  %v12539_v59 = vpop.f32.mrb[36].mxu1  ;;  %v2794_v8 = vsel %vm212_vm3, %v2787_v4, %v2793_v18  ;;  %v12543_v34 = vsel %vm897_vm4, %v3986_v46, %v3992_v32  ;;  %v12546_v22 = vsel %vm1301_vm6, %v4714_v29, %v4720_v21  ;;  %v14131_v14 = vrot.slane %v12336_v60, 4 }
 0x381   :  { %14127 = vst [vmem:[#allocation49_spill] sm:$0xff] %v12543_v34  ;;  %14128 = vst [vmem:[#allocation50_spill] sm:$0xff] %v12546_v22  ;;  %v12548_v37 = vpop.f32.mrb[37].mxu1  ;;  %2950 = vmatprep.mubr.f32.mxu1 %v2794_v8  ;;  %3195 = vmatprep.mubr.f32.mxu0 %v2794_v8  ;;  %v2797_v62 = vrot.slane %v12539_v59, 1  ;;  %v3996_v0 = vrot.slane %v12539_v59, 2  ;;  %v4724_v6 = vrot.slane %v12539_v59, 3 }
 0x382   :  { %14129 = vst [vmem:[#allocation51_spill] sm:$0xff] %v12553_v31  ;;  %2951 = vmatmul.mubr.f32.gmra.mrb[62].mxu1 %v2792_v7  ;;  %3196 = vmatmul.mubr.f32.gmra.mrb[38].mxu0 %v2792_v7  ;;  %v2799_v4 = vrot.slane %v12548_v37, 1  ;;  %v3998_v46 = vrot.slane %v12548_v37, 2  ;;  %v4726_v29 = vrot.slane %v12548_v37, 3  ;;  %v12568_v1 = vsel %vm269_vm0, %v14131_v14, %v14018_v58  ;;  %v12658_v31 = vld [vmem:[#allocation4 + $0x1d8] sm:$0xff] }
 0x383   :  { %v2798_v35 = vsel %vm212_vm3, %v2791_v44, %v2797_v62  ;;  %v12561_v8 = vsel %vm897_vm4, %v3990_v55, %v3996_v0  ;;  %14132 = vst [vmem:[#allocation53_spill] sm:$0xff] %v12568_v1  ;;  %v12585_v58 = vsel %vm1301_vm6, %v4718_v51, %v4724_v6  ;;  %v14137_v51 = vrot.slane %v12409_v2, 4 }
 0x384   :  { %14130 = vst [vmem:[#allocation52_spill] sm:$0xff] %v12561_v8  ;;  %v12571_v20 = vpop.f32.mrb[38].mxu1  ;;  %v2800_v23 = vsel %vm212_vm3, %v2793_v18, %v2799_v4  ;;  %v12575_v13 = vsel %vm897_vm4, %v3992_v32, %v3998_v46  ;;  %v12578_v44 = vsel %vm1301_vm6, %v4720_v21, %v4726_v29  ;;  %14135 = vst [vmem:[#allocation56_spill] sm:$0xff] %v12585_v58  ;;  %v14138_v63 = vrot.slane %v12370_v3, 4  ;;  %v12629_v32 = vld [vmem:[#allocation4 + $0x18] sm:$0xff]  ;;  %v12708_v8 = vld [vmem:[#allocation4 + $0x1f0] sm:$0xff] }
 0x385   :  { %14133 = vst [vmem:[#allocation54_spill] sm:$0xff] %v12575_v13  ;;  %14134 = vst [vmem:[#allocation55_spill] sm:$0xff] %v12578_v44  ;;  %v12580_v55 = vpop.f32.mrb[39].mxu1  ;;  %2956 = vmatprep.mubr.f32.mxu1 %v2800_v23  ;;  %3200 = vmatprep.mubr.f32.mxu0 %v2800_v23  ;;  %v2803_v57 = vrot.slane %v12571_v20, 1  ;;  %v14022_v14 = vrot.slane %v12571_v20, 2  ;;  %v12647_v44 = vld [vmem:[#allocation4 + $0x38] sm:$0xff] }
 0x386   :  { %2957 = vmatmul.mubr.f32.gmra.mrb[64].mxu1 %v2798_v35  ;;  %3201 = vmatmul.mubr.f32.gmra.mrb[40].mxu0 %v2798_v35  ;;  %v2805_v18 = vrot.slane %v12580_v55, 1  ;;  %v12602_v35 = vsel %vm269_vm0, %v14138_v63, %v14137_v51  ;;  %v14144_v51 = vrot.slane %v12571_v20, 3  ;;  %v14154_v38 = vrot.slane %v12400_v54, 4 }
 0x387   :  { %v2804_v1 = vsel %vm212_vm3, %v2797_v62, %v2803_v57  ;;  %v12595_v23 = vsel %vm897_vm4, %v3996_v0, %v14022_v14  ;;  %14139 = vst [vmem:[#allocation58_spill] sm:$0xff] %v12602_v35  ;;  %v14140_v62 = vrot.slane %v12580_v55, 2  ;;  %v14142_v0 = vrot.slane %v12580_v55, 3 }
 0x388   :  { %14136 = vst [vmem:[#allocation57_spill] sm:$0xff] %v12595_v23  ;;  %v12605_v50 = vpop.f32.mrb[40].mxu1  ;;  %v2806_v7 = vsel %vm212_vm3, %v2799_v4, %v2805_v18  ;;  %v12624_v4 = vsel %vm1301_vm6, %v4724_v6, %v14144_v51  ;;  %v5436_v6 = vrot.slane %v12452_v49, 4  ;;  %v12720_v34 = vsel %vm269_vm0, %v14154_v38, %v5434_v17  ;;  %v12738_v38 = vld [vmem:[#allocation4 + $0x78] sm:$0xff] }
 0x389   :  { %v12611_v21 = vsel %vm897_vm4, %v3998_v46, %v14140_v62  ;;  %v12616_v14 = vsel %vm1301_vm6, %v4726_v29, %v14142_v0  ;;  %v12618_v58 = vpop.f32.mrb[41].mxu1  ;;  %2962 = vmatprep.mubr.f32.mxu1 %v2806_v7  ;;  %3205 = vmatprep.mubr.f32.mxu0 %v2806_v7  ;;  %v2809_v63 = vrot.slane %v12605_v50, 1  ;;  %14145 = vst [vmem:[#allocation61_spill] sm:$0xff] %v12624_v4  ;;  %v12627_v62 = vld [vmem:[#allocation4] sm:$0xff]  ;;  %v14146_v0 = vrot.slane %v12400_v54, 4  ;;  %v12643_v4 = vld [vmem:[#allocation4 + $0x10] sm:$0xff] }
 0x38a   :  { %14141 = vst [vmem:[#allocation59_spill] sm:$0xff] %v12611_v21  ;;  %14143 = vst [vmem:[#allocation60_spill] sm:$0xff] %v12616_v14  ;;  %2963 = vmatmul.mubr.f32.gmra.mrb[66].mxu1 %v2804_v1  ;;  %3206 = vmatmul.mubr.f32.gmra.mrb[42].mxu0 %v2804_v1  ;;  %v2811_v46 = vrot.slane %v12618_v58, 1  ;;  %v14147_v7 = vrot.slane %v12359_v15, 4  ;;  %v12645_v14 = vld [vmem:[#allocation4 + $0x28] sm:$0xff]  ;;  %v12685_v21 = vld [vmem:[#allocation4 + $0x58] sm:$0xff] }
 0x38b   :  { %v2810_v29 = vsel %vm212_vm3, %v2803_v57, %v2809_v63  ;;  %v9648_v9 = vpack.c.bf16 %v12645_v14, %v12643_v4  ;;  %14155 = vst [vmem:[#allocation66_spill] sm:$0xff] %v12720_v34  ;;  %v14163_v26 = vrot.slane %v12480_v48, 4 }
 0x38c   :  { %v12637_v35 = vsel %vm269_vm0, %v14147_v7, %v14146_v0  ;;  %v2812_v51 = vsel %vm212_vm3, %v2805_v18, %v2811_v46  ;;  %v12641_v1 = vpop.f32.mrb[42].mxu1  ;;  %v12656_v18 = vld [vmem:[#allocation4 + $0x1c0] sm:$0xff] }
 0x38d   :  { %14148 = vst [vmem:[#allocation62_spill] sm:$0xff] %v12637_v35  ;;  %2968 = vmatprep.mubr.f32.mxu1 %v2812_v51  ;;  %3210 = vmatprep.mubr.f32.mxu0 %v2812_v51  ;;  %v12649_v57 = vpop.f32.mrb[43].mxu1  ;;  %v2765_v0 = vrot.slane %v12641_v1, 1  ;;  %v12654_v35 = vld [vmem:[#allocation4 + $0x50] sm:$0xff]  ;;  %v3964_v22 = vrot.slane %v12641_v1, 2  ;;  %v4692_v5 = vrot.slane %v12641_v1, 3 }
 0x38e   :  { %2969 = vmatmul.mubr.f32.gmra.mrb[68].mxu1 %v2810_v29  ;;  %3211 = vmatmul.mubr.f32.gmra.mrb[44].mxu0 %v2810_v29  ;;  %v2764_v11 = vrot.slane %v12649_v57, 1  ;;  %v12662_v51 = vld [vmem:[#allocation4 + $0x30] sm:$0xff]  ;;  %v3963_v16 = vrot.slane %v12649_v57, 2  ;;  %v4691_v7 = vrot.slane %v12649_v57, 3  ;;  %v12674_v29 = vsel %vm269_vm0, %v14149_v42, %v5436_v6 }
 0x38f   :  { %2974 = vmatprep.mubr.f32.mxu1 %v2811_v46  ;;  %3215 = vmatprep.mubr.f32.mxu0 %v2811_v46  ;;  %14150 = vst [vmem:[#allocation63_spill] sm:$0xff] %v12674_v29  ;;  %v9570_v23 = vpack.c.bf16 %v12654_v35, %v12647_v44  ;;  %v12683_v46 = vld [vmem:[#allocation4 + $0x40] sm:$0xff]  ;;  %v12700_v35 = vld [vmem:[#allocation4 + $0x68] sm:$0xff]  ;;  %v14153_v44 = vmov 0.0  }
 0x390   :  { %v12678_v45 = vpop.f32.mrb[44].mxu1  ;;  %v2766_v27 = vsel %vm212_vm3, %v2764_v11, %v2765_v0  ;;  %v12688_v14 = vsel %vm897_vm4, %v3963_v16, %v3964_v22  ;;  %v12691_v42 = vsel %vm1301_vm6, %v4691_v7, %v4692_v5  ;;  %v9650_v11 = vpack.c.bf16 %v12658_v31, %v12656_v18  ;;  %v12702_v29 = vld [vmem:[#allocation4 + $0x80] sm:$0xff]  ;;  %v12710_v31 = vld [vmem:[#allocation4 + $0x208] sm:$0xff] }
 0x391   :  { %14151 = vst [vmem:[#allocation64_spill] sm:$0xff] %v12688_v14  ;;  %14152 = vst [vmem:[#allocation65_spill] sm:$0xff] %v12691_v42  ;;  %v12693_v4 = vpop.f32.mrb[45].mxu1  ;;  %v2777_v47 = vrot.slane %v12678_v45, 1  ;;  %v3976_v16 = vrot.slane %v12678_v45, 2  ;;  %v4704_v18 = vrot.slane %v12678_v45, 3  ;;  %v9652_v13 = vpack.c.bf16 %v12685_v21, %v12683_v46 }
 0x392   :  { %v2771_v14 = vrot.slane %v12693_v4, 1  ;;  %v3970_v7 = vrot.slane %v12693_v4, 2  ;;  %v4698_v42 = vrot.slane %v12693_v4, 3  ;;  %2975 = vmatmul.mubr.f32.gmra.mrb[70].mxu1 %v2809_v63  ;;  %3216 = vmatmul.mubr.f32.gmra.mrb[46].mxu0 %v2809_v63  ;;  %v14156_v63 = vrot.slane %v12487_v61, 4  ;;  %v12736_v46 = vld [vmem:[#allocation4 + $0x60] sm:$0xff] }
 0x393   :  { %3045 = vmatprep.mubr.f32.mxu1 %v14153_v44  ;;  %9042 = vmatprep.mubr.msk.f32.mxu0 %vm2835_vm8, %v2766_v27  ;;  %v9574_v21 = vpack.c.bf16 %v12702_v29, %v12700_v35 }
 0x394   :  { %v12725_v28 = vsel %vm269_vm0, %v5436_v6, %v14156_v63  ;;  %v12728_v41 = vpop.f32.mrb[46].mxu1  ;;  %v2772_v12 = vsel %vm212_vm3, %v2765_v0, %v2771_v14  ;;  %v12732_v24 = vsel %vm212_vm3, %v2771_v14, %v2777_v47  ;;  %v12741_v34 = vsel %vm897_vm4, %v3964_v22, %v3970_v7  ;;  %v12750_v14 = vld [vmem:[#allocation4 + $0x88] sm:$0xff] }
 0x395   :  { %14157 = vst [vmem:[#allocation67_spill] sm:$0xff] %v12725_v28  ;;  %14158 = vst [vmem:[#allocation68_spill] sm:$0xff] %v12741_v34  ;;  %v12743_v6 = vpop.f32.mrb[47].mxu1  ;;  %v2789_v63 = vrot.slane %v12728_v41, 1  ;;  %v9654_v0 = vpack.c.bf16 %v12710_v31, %v12708_v8  ;;  %v12753_v29 = vsel %vm897_vm4, %v3970_v7, %v3976_v16  ;;  %v3988_v35 = vrot.slane %v12728_v41, 2  ;;  %v12759_v28 = vld [vmem:[#allocation4 + $0x98] sm:$0xff] }
 0x396   :  { %14159 = vst [vmem:[#allocation69_spill] sm:$0xff] %v12753_v29  ;;  %8120 = vmatmul.mubr.msk.f32.vlgmr.msra.gmra.mrb[52].mxu1 %vm2835_vm8, %v2766_v27  ;;  %9043 = vmatmul.mubr.msk.f32.vlgmr.msra.gmra.mrb[48].mxu0 %vm2835_vm8, %v2772_v12  ;;  %v2783_v22 = vrot.slane %v12743_v6, 1  ;;  %v12761_v34 = vld [vmem:[#allocation4 + $0xb0] sm:$0xff]  ;;  %v3982_v8 = vrot.slane %v12743_v6, 2  ;;  %v12765_v31 = vsel %vm1301_vm6, %v4692_v5, %v4698_v42  ;;  %v12768_v7 = vsel %vm1301_vm6, %v4698_v42, %v4704_v18  ;;  %v12795_v42 = vld [vmem:[#allocation4 + $0x220] sm:$0xff] }
 0x397   :  { %14160 = vst [vmem:[#allocation70_spill] sm:$0xff] %v12765_v31  ;;  %14161 = vst [vmem:[#allocation71_spill] sm:$0xff] %v12768_v7  ;;  %v14162_v29 = vpack.c.bf16 %v12629_v32, %v12627_v62  ;;  %9649 = vmatpush3.bf16.msra.mxu0 %v9648_v9  ;;  %v9576_v27 = vpack.c.bf16 %v12738_v38, %v12736_v46  ;;  %v4710_v52 = vrot.slane %v12743_v6, 3  ;;  %v4716_v10 = vrot.slane %v12728_v41, 3  ;;  %v12804_v38 = vld [vmem:[#allocation4 + $0x90] sm:$0xff] }
 0x398   :  { %v12780_v5 = vsel %vm269_vm0, %v5434_v17, %v14163_v26  ;;  %v12782_v31 = vpop.f32.mrb[48].mxu1  ;;  %3051 = vmatprep.mubr.f32.mxu1 %v14153_v44  ;;  %9045 = vmatprep.mubr.msk.f32.mxu0 %vm2835_vm8, %v12732_v24  ;;  %v12788_v9 = vsel %vm212_vm3, %v2777_v47, %v2783_v22  ;;  %v12791_v32 = vsel %vm212_vm3, %v2783_v22, %v2789_v63  ;;  %v12797_v26 = vld [vmem:[#allocation4 + $0x238] sm:$0xff] }
 0x399   :  { %9569 = vmatpush1.bf16.msra.mxu1 %v14162_v29  ;;  %14164 = vst [vmem:[#allocation72_spill] sm:$0xff] %v12780_v5  ;;  %v9656_v62 = vpack.c.bf16 %v12750_v14, %v12748_v43  ;;  %9651 = vmatprep.subr.bf16.mxu0 %v9650_v11  ;;  %v12799_v17 = vpop.f32.mrb[49].mxu1  ;;  %v2801_v46 = vrot.slane %v12782_v31, 1  ;;  %v9578_v47 = vpack.c.bf16 %v12761_v34, %v12759_v28  ;;  %v12806_v29 = vld [vmem:[#allocation4 + $0xa8] sm:$0xff]  ;;  %v12818_v11 = vld [vmem:[#allocation4 + $0xa0] sm:$0xff]  ;;  %v12820_v28 = vld [vmem:[#allocation4 + $0xb8] sm:$0xff] }
 0x39a   :  { %9571 = vmatprep.subr.bf16.mxu1 %v9570_v23  ;;  %v12809_v22 = vsel %vm897_vm4, %v3976_v16, %v3982_v8  ;;  %v12812_v43 = vsel %vm897_vm4, %v3982_v8, %v3988_v35  ;;  %8121 = vmatmul.mubr.msk.f32.gmra.mrb[54].mxu1 %vm2835_vm8, %v2772_v12  ;;  %v2795_v23 = vrot.slane %v12799_v17, 1  ;;  %v3994_v34 = vrot.slane %v12799_v17, 2 }
 0x39b   :  { %14165 = vst [vmem:[#allocation73_spill] sm:$0xff] %v12809_v22  ;;  %14166 = vst [vmem:[#allocation74_spill] sm:$0xff] %v12812_v43  ;;  %9046 = vmatmul.mubr.msk.f32.gmra.mrb[50].mxu0 %vm2835_vm8, %v12788_v9  ;;  %v4000_v14 = vrot.slane %v12782_v31, 2  ;;  %v12825_v16 = vsel %vm1301_vm6, %v4704_v18, %v4710_v52  ;;  %v14168_v8 = vpack.c.bf16 %v12664_v33, %v12662_v51  ;;  %v4722_v7 = vrot.slane %v12799_v17, 3 }
 0x39c   :  { %14167 = vst [vmem:[#allocation75_spill] sm:$0xff] %v12825_v16  ;;  %9653 = vmatpush3.bf16.msra.mxu0 %v9652_v13  ;;  %v9658_v12 = vpack.c.bf16 %v12797_v26, %v12795_v42  ;;  %v12833_v5 = vsel %vm1301_vm6, %v4710_v52, %v4716_v10  ;;  %v4728_v43 = vrot.slane %v12782_v31, 3  ;;  %v12837_v22 = vpop.f32.mrb[50].mxu1  ;;  %3057 = vmatprep.mubr.f32.mxu1 %v14153_v44  ;;  %v2512_v26 = vld [vmem:[#allocation4 + $0xc8] sm:$0xff]  ;;  %v5446_v16 = vrot.slane %v12506_v36, 4 }
 0x39d   :  { %9573 = vmatpush1.bf16.msra.mxu1 %v14168_v8  ;;  %14169 = vst [vmem:[#allocation76_spill] sm:$0xff] %v12833_v5  ;;  %14170 = vst [vmem:[#allocation77_spill] sm:$0xff] %v12837_v22  ;;  %9048 = vmatprep.mubr.msk.f32.mxu0 %vm2835_vm8, %v12791_v32  ;;  %v12843_v33 = vsel %vm212_vm3, %v2789_v63, %v2795_v23  ;;  %v12846_v13 = vsel %vm212_vm3, %v2795_v23, %v2801_v46  ;;  %v12850_v51 = vpop.f32.mrb[51].mxu1  ;;  %v12855_v42 = vrot.slane %v12837_v22, 1  ;;  %v2514_v8 = vld [vmem:[#allocation4 + $0xd8] sm:$0xff] }
 0x39e   :  { %v9580_v52 = vpack.c.bf16 %v12806_v29, %v12804_v38  ;;  %9575 = vmatprep.subr.bf16.mxu1 %v9574_v21  ;;  %9655 = vmatprep.subr.bf16.mxu0 %v9654_v0  ;;  %v9660_v18 = vpack.c.bf16 %v12820_v28, %v12818_v11  ;;  %v12858_v63 = vsel %vm897_vm4, %v3988_v35, %v3994_v34  ;;  %v2807_v21 = vrot.slane %v12850_v51, 1  ;;  %v2515_v0 = vld [vmem:[#allocation4 + $0xe0] sm:$0xff]  ;;  %v2561_v38 = vld [vmem:[#allocation4 + $0x250] sm:$0xff]  ;;  %v2564_v29 = vld [vmem:[#allocation4 + $0x268] sm:$0xff] }
 0x39f   :  { %14171 = vst [vmem:[#allocation78_spill] sm:$0xff] %v12858_v63  ;;  %v12861_v23 = vsel %vm897_vm4, %v3994_v34, %v4000_v14  ;;  %8122 = vmatmul.mubr.msk.f32.gmra.mrb[56].mxu1 %vm2835_vm8, %v12732_v24  ;;  %9049 = vmatmul.mubr.msk.f32.gmra.mrb[52].mxu0 %vm2835_vm8, %v12843_v33  ;;  %v12870_v28 = vsel %vm1301_vm6, %v4716_v10, %v4722_v7  ;;  %v5448_v35 = vrot.slane %v12513_v39, 4  ;;  %v2511_v34 = vld [vmem:[#allocation4 + $0xc0] sm:$0xff]  ;;  %v5452_v5 = vrot.slane %v12539_v59, 4  ;;  %v2521_v63 = vld [vmem:[#allocation4 + $0x110] sm:$0xff] }
 0x3a0   :  { %14172 = vst [vmem:[#allocation79_spill] sm:$0xff] %v12861_v23  ;;  %14173 = vst [vmem:[#allocation80_spill] sm:$0xff] %v12870_v28  ;;  %9657 = vmatpush3.bf16.msra.mxu0 %v9656_v62  ;;  %v12874_v24 = vsel %vm1301_vm6, %v4722_v7, %v4728_v43  ;;  %v5454_v23 = vrot.slane %v12548_v37, 4  ;;  %3063 = vmatprep.mubr.f32.mxu1 %v14153_v44  ;;  %v12883_v10 = vsel %vm212_vm3, %v2801_v46, %v2807_v21  ;;  %v2513_v7 = vld [vmem:[#allocation4 + $0xd0] sm:$0xff]  ;;  %v2516_v62 = vld [vmem:[#allocation4 + $0xe8] sm:$0xff] }
 0x3a1   :  { %9577 = vmatpush1.bf16.msra.mxu1 %v9576_v27  ;;  %14174 = vst [vmem:[#allocation81_spill] sm:$0xff] %v12874_v24  ;;  %9051 = vmatprep.mubr.msk.f32.mxu0 %vm2835_vm8, %v12846_v13  ;;  %v12887_v27 = vsel %vm212_vm3, %v2807_v21, %v12855_v42  ;;  %v9582_v11 = vpack.c.bf16 %v2515_v0, %v2512_v26  ;;  %v2518_v28 = vld [vmem:[#allocation4 + $0xf8] sm:$0xff]  ;;  %v14175_v19 = vrot.slane %v12850_v51, 2  ;;  %v12900_v26 = vld [vmem:[#allocation4 + $0xf0] sm:$0xff]  ;;  %v14177_v0 = vrot.slane %v12850_v51, 3 }
 0x3a2   :  { %9579 = vmatprep.subr.bf16.mxu1 %v9578_v47  ;;  %9659 = vmatprep.subr.bf16.mxu0 %v9658_v12  ;;  %v9662_v24 = vpack.c.bf16 %v2564_v29, %v2561_v38  ;;  %v9584_v21 = vpack.c.bf16 %v2514_v8, %v2511_v34  ;;  %v2567_v47 = vld [vmem:[#allocation4 + $0x280] sm:$0xff]  ;;  %v2570_v12 = vld [vmem:[#allocation4 + $0x298] sm:$0xff]  ;;  %v9664_v29 = vpack.c.bf16 %v2516_v62, %v2513_v7  ;;  %v2520_v34 = vld [vmem:[#allocation4 + $0x108] sm:$0xff] }
 0x3a3   :  { %v12893_v30 = vsel %vm897_vm4, %v4000_v14, %v14175_v19  ;;  %8123 = vmatmul.mubr.msk.f32.gmra.mrb[58].mxu1 %vm2835_vm8, %v12788_v9  ;;  %9052 = vmatmul.mubr.msk.f32.gmra.mrb[54].mxu0 %vm2835_vm8, %v12883_v10  ;;  %v12905_v38 = vsel %vm1301_vm6, %v4728_v43, %v14177_v0  ;;  %v14178_v19 = vrot.slane %v12487_v61, 4  ;;  %v14080_v9 = vrot.slane %v12571_v20, 4  ;;  %v2519_v8 = vld [vmem:[#allocation4 + $0x100] sm:$0xff]  ;;  %v2522_v46 = vld [vmem:[#allocation4 + $0x118] sm:$0xff]  ;;  %v2524_v62 = vld [vmem:[#allocation4 + $0x128] sm:$0xff] }
 0x3a4   :  { %14176 = vst [vmem:[#allocation82_spill] sm:$0xff] %v12893_v30  ;;  %9661 = vmatpush3.bf16.msra.mxu0 %v9660_v18  ;;  %v14180_v30 = vrot.slane %v12480_v48, 4  ;;  %v12919_v43 = vsel %vm269_vm0, %v5448_v35, %v5454_v23  ;;  %v5426_v0 = vrot.slane %v12693_v4, 4  ;;  %3069 = vmatprep.mubr.f32.mxu1 %v14153_v44  ;;  %v14184_v18 = vrot.slane %v12580_v55, 4 }
 0x3a5   :  { %v12910_v14 = vsel %vm269_vm0, %v14178_v19, %v5448_v35  ;;  %9581 = vmatpush1.bf16.msra.mxu1 %v9580_v52  ;;  %14182 = vst [vmem:[#allocation85_spill] sm:$0xff] %v12919_v43  ;;  %9054 = vmatprep.mubr.msk.f32.mxu0 %vm2835_vm8, %v12887_v27  ;;  %v12926_v52 = vsel %vm269_vm0, %v5446_v16, %v5452_v5  ;;  %v2527_v19 = vld [vmem:[#allocation4 + $0x140] sm:$0xff] }
 0x3a6   :  { %14179 = vst [vmem:[#allocation83_spill] sm:$0xff] %v12910_v14  ;;  %v12916_v22 = vsel %vm269_vm0, %v14180_v30, %v5446_v16  ;;  %14183 = vst [vmem:[#allocation86_spill] sm:$0xff] %v12926_v52  ;;  %v12931_v7 = vsel %vm269_vm0, %v5454_v23, %v14184_v18  ;;  %9583 = vmatprep.subr.bf16.mxu1 %v9582_v11  ;;  %9663 = vmatprep.subr.bf16.mxu0 %v9662_v24  ;;  %v2576_v11 = vld [vmem:[#allocation4 + $0x2c8] sm:$0xff]  ;;  %v5432_v24 = vrot.slane %v12678_v45, 4  ;;  %v2533_v52 = vld [vmem:[#allocation4 + $0x170] sm:$0xff] }
 0x3a7   :  { %14181 = vst [vmem:[#allocation84_spill] sm:$0xff] %v12916_v22  ;;  %14185 = vst [vmem:[#allocation87_spill] sm:$0xff] %v12931_v7  ;;  %v9586_v30 = vpack.c.bf16 %v2521_v63, %v2518_v28  ;;  %v9666_v35 = vpack.c.bf16 %v2570_v12, %v2567_v47  ;;  %v12936_v43 = vsel %vm269_vm0, %v5452_v5, %v14080_v9  ;;  %v5419_v22 = vrot.slane %v12649_v57, 4  ;;  %v2573_v63 = vld [vmem:[#allocation4 + $0x2b0] sm:$0xff]  ;;  %v2523_v5 = vld [vmem:[#allocation4 + $0x120] sm:$0xff] }
 0x3a8   :  { %14186 = vst [vmem:[#allocation88_spill] sm:$0xff] %v12936_v43  ;;  %8124 = vmatmul.mubr.msk.f32.gmra.mrb[60].mxu1 %vm2835_vm8, %v12791_v32  ;;  %9055 = vmatmul.mubr.msk.f32.gmra.mrb[56].mxu0 %vm2835_vm8, %v12855_v42  ;;  %v9588_v16 = vpack.c.bf16 %v2520_v34, %v12900_v26  ;;  %v9668_v23 = vpack.c.bf16 %v2522_v46, %v2519_v8  ;;  %v5420_v28 = vrot.slane %v12641_v1, 4  ;;  %v2526_v47 = vld [vmem:[#allocation4 + $0x138] sm:$0xff]  ;;  %v5438_v12 = vrot.slane %v12743_v6, 4  ;;  %v2525_v26 = vld [vmem:[#allocation4 + $0x130] sm:$0xff]  ;;  %v2528_v34 = vld [vmem:[#allocation4 + $0x148] sm:$0xff] }
 0x3a9   :  { %9585 = vmatpush1.bf16.msra.mxu1 %v9584_v21  ;;  %9665 = vmatpush3.bf16.msra.mxu0 %v9664_v29  ;;  %v5444_v32 = vrot.slane %v12728_v41, 4  ;;  %v5450_v18 = vrot.slane %v12799_v17, 4  ;;  %v5456_v9 = vrot.slane %v12782_v31, 4  ;;  %v9590_v46 = vpack.c.bf16 %v2527_v19, %v2524_v62  ;;  %v2530_v7 = vld [vmem:[#allocation4 + $0x158] sm:$0xff]  ;;  %v2579_v19 = vld [vmem:[#allocation4 + $0x2e0] sm:$0xff] }
 0x3aa   :  { %3670 = vmatprep.mubr.f32.mxu0 %v12321_v56  ;;  %3075 = vmatprep.mubr.f32.mxu1 %v14153_v44  ;;  %v12953_v21 = vsel %vm269_vm0, %v5419_v22, %v5420_v28  ;;  %v12956_v29 = vsel %vm269_vm0, %v5420_v28, %v5426_v0  ;;  %v14086_v8 = vrot.slane %v12850_v51, 4  ;;  %v9670_v43 = vpack.c.bf16 %v2576_v11, %v2573_v63  ;;  %v2582_v28 = vld [vmem:[#allocation4 + $0x2f8] sm:$0xff] }
 0x3ab   :  { %14187 = vst [vmem:[#allocation89_spill] sm:$0xff] %v12956_v29  ;;  %9587 = vmatprep.subr.bf16.mxu1 %v9586_v30  ;;  %9667 = vmatprep.subr.bf16.mxu0 %v9666_v35  ;;  %v12960_v14 = vsel %vm269_vm0, %v5426_v0, %v5432_v24  ;;  %v12963_v62 = vsel %vm269_vm0, %v5432_v24, %v5438_v12  ;;  %v2529_v0 = vld [vmem:[#allocation4 + $0x150] sm:$0xff]  ;;  %v2532_v24 = vld [vmem:[#allocation4 + $0x168] sm:$0xff] }
 0x3ac   :  { %14188 = vst [vmem:[#allocation90_spill] sm:$0xff] %v12963_v62  ;;  %8125 = vmatmul.mubr.msk.f32.gmra.mrb[62].mxu1 %vm2835_vm8, %v12843_v33  ;;  %v9592_v22 = vpack.c.bf16 %v2526_v47, %v2523_v5  ;;  %v12968_v29 = vsel %vm269_vm0, %v5438_v12, %v5444_v32  ;;  %v12971_v30 = vsel %vm269_vm0, %v5444_v32, %v5450_v18  ;;  %v2531_v5 = vld [vmem:[#allocation4 + $0x160] sm:$0xff]  ;;  %v2534_v47 = vld [vmem:[#allocation4 + $0x178] sm:$0xff]  ;;  %v2585_v32 = vld [vmem:[#allocation4 + $0x310] sm:$0xff] }
 0x3ad   :  { %14189 = vst [vmem:[#allocation91_spill] sm:$0xff] %v12968_v29  ;;  %14190 = vst [vmem:[#allocation92_spill] sm:$0xff] %v12971_v30  ;;  %9589 = vmatpush1.bf16.msra.mxu1 %v9588_v16  ;;  %9669 = vmatpush3.bf16.msra.mxu0 %v9668_v23  ;;  %v9672_v35 = vpack.c.bf16 %v2528_v34, %v2525_v26  ;;  %v12974_v63 = vsel %vm269_vm0, %v5450_v18, %v5456_v9  ;;  %v2536_v23 = vld [vmem:[#allocation4 + $0x188] sm:$0xff]  ;;  %v2539_v12 = vld [vmem:[#allocation4 + $0x1a0] sm:$0xff] }
 0x3ae   :  { %14191 = vst [vmem:[#allocation93_spill] sm:$0xff] %v12974_v63  ;;  %v12979_v33 = vsel %vm269_vm0, %v5456_v9, %v14086_v8  ;;  %3081 = vmatprep.mubr.f32.mxu1 %v14153_v44  ;;  %9591 = vmatprep.subr.bf16.mxu1 %v9590_v46  ;;  %v9594_v11 = vpack.c.bf16 %v2533_v52, %v2530_v7  ;;  %v2588_v18 = vld [vmem:[#allocation4 + $0x328] sm:$0xff]  ;;  %v2535_v7 = vld [vmem:[#allocation4 + $0x180] sm:$0xff]  ;;  %v2538_v46 = vld [vmem:[#allocation4 + $0x198] sm:$0xff] }
 0x3af   :  { %14192 = vst [vmem:[#allocation94_spill] sm:$0xff] %v12979_v33  ;;  %9671 = vmatprep.subr.bf16.mxu0 %v9670_v43  ;;  %v9674_v16 = vpack.c.bf16 %v2582_v28, %v2579_v19  ;;  %v9596_v9 = vpack.c.bf16 %v2532_v24, %v2529_v0  ;;  %v9676_v26 = vpack.c.bf16 %v2534_v47, %v2531_v5  ;;  %v2542_v43 = vld [vmem:[#allocation4 + $0x1b8] sm:$0xff]  ;;  %v2545_v34 = vld [vmem:[#allocation4 + $0x1d0] sm:$0xff]  ;;  %v2548_v0 = vld [vmem:[#allocation4 + $0x1e8] sm:$0xff] }
 0x3b0   :  { %8126 = vmatmul.mubr.msk.f32.gmra.mrb[64].mxu1 %vm2835_vm8, %v12846_v13  ;;  %v9598_v52 = vpack.c.bf16 %v2539_v12, %v2536_v23  ;;  %v9678_v19 = vpack.c.bf16 %v2588_v18, %v2585_v32  ;;  %v9600_v13 = vpack.c.bf16 %v2538_v46, %v2535_v7  ;;  %v2541_v28 = vld [vmem:[#allocation4 + $0x1b0] sm:$0xff]  ;;  %v2591_v24 = vld [vmem:[#allocation4 + $0x340] sm:$0xff]  ;;  %v2594_v5 = vld [vmem:[#allocation4 + $0x358] sm:$0xff] }
 0x3b1   :  { %9593 = vmatpush1.bf16.msra.mxu1 %v9592_v22  ;;  %9673 = vmatpush3.bf16.msra.mxu0 %v9672_v35  ;;  %v9602_v22 = vpack.c.bf16 %v2545_v34, %v2542_v43  ;;  %v2544_v35 = vld [vmem:[#allocation4 + $0x1c8] sm:$0xff]  ;;  %v2550_v23 = vld [vmem:[#allocation4 + $0x1f8] sm:$0xff]  ;;  %v2557_v32 = vld [vmem:[#allocation4 + $0x230] sm:$0xff]  ;;  %v9682_v18 = vpack.c.bf16 %v2594_v5, %v2591_v24 }
 0x3b2   :  { %3087 = vmatprep.mubr.f32.mxu1 %v14153_v44  ;;  %9595 = vmatprep.subr.bf16.mxu1 %v9594_v11  ;;  %v2551_v11 = vld [vmem:[#allocation4 + $0x200] sm:$0xff]  ;;  %v2554_v12 = vld [vmem:[#allocation4 + $0x218] sm:$0xff]  ;;  %v2553_v7 = vld [vmem:[#allocation4 + $0x210] sm:$0xff] }
 0x3b3   :  { %9675 = vmatprep.subr.bf16.mxu0 %v9674_v16  ;;  %v9606_v47 = vpack.c.bf16 %v2551_v11, %v2548_v0  ;;  %v2547_v16 = vld [vmem:[#allocation4 + $0x1e0] sm:$0xff]  ;;  %v2556_v46 = vld [vmem:[#allocation4 + $0x228] sm:$0xff]  ;;  %v2566_v0 = vld [vmem:[#allocation4 + $0x278] sm:$0xff] }
 0x3b4   :  { %8127 = vmatmul.mubr.msk.f32.gmra.mrb[66].mxu1 %vm2835_vm8, %v12883_v10  ;;  %v9604_v10 = vpack.c.bf16 %v2544_v35, %v2541_v28  ;;  %v2560_v43 = vld [vmem:[#allocation4 + $0x248] sm:$0xff]  ;;  %v2563_v34 = vld [vmem:[#allocation4 + $0x260] sm:$0xff]  ;;  %v2569_v11 = vld [vmem:[#allocation4 + $0x290] sm:$0xff] }
 0x3b5   :  { %9597 = vmatpush1.bf16.msra.mxu1 %v9596_v9  ;;  %9677 = vmatpush3.bf16.msra.mxu0 %v9676_v26  ;;  %v2600_v9 = vld [vmem:[#allocation4 + $0x388] sm:$0xff]  ;;  %v9608_v26 = vpack.c.bf16 %v2550_v23, %v2547_v16  ;;  %v9614_v28 = vpack.c.bf16 %v2563_v34, %v2560_v43  ;;  %v2559_v35 = vld [vmem:[#allocation4 + $0x240] sm:$0xff]  ;;  %v3887_v5 = vld [vmem:[#allocation4 + $0x910] sm:$0xff]  ;;  %v9618_v16 = vpack.c.bf16 %v2569_v11, %v2566_v0 }
 0x3b6   :  { %3093 = vmatprep.mubr.f32.mxu1 %v14153_v44  ;;  %9599 = vmatprep.subr.bf16.mxu1 %v9598_v52  ;;  %v9610_v52 = vpack.c.bf16 %v2557_v32, %v2554_v12  ;;  %v2565_v23 = vld [vmem:[#allocation4 + $0x270] sm:$0xff]  ;;  %v2568_v12 = vld [vmem:[#allocation4 + $0x288] sm:$0xff]  ;;  %v2583_v0 = vld [vmem:[#allocation4 + $0x300] sm:$0xff] }
 0x3b7   :  { %9679 = vmatprep.subr.bf16.mxu0 %v9678_v19  ;;  %v2572_v32 = vld [vmem:[#allocation4 + $0x2a8] sm:$0xff]  ;;  %v2581_v43 = vld [vmem:[#allocation4 + $0x2f0] sm:$0xff]  ;;  %v2586_v11 = vld [vmem:[#allocation4 + $0x318] sm:$0xff] }
 0x3b8   :  { %3671 = vmatmul.mubr.f32.vlgmr.msra.gmra.mrb[58].mxu0 %v12315_v53  ;;  %8128 = vmatmul.mubr.msk.f32.gmra.mrb[68].mxu1 %vm2835_vm8, %v12887_v27  ;;  %v2597_v27 = vld [vmem:[#allocation4 + $0x370] sm:$0xff]  ;;  %v4648_v8 = vld [vmem:[#allocation4 + $0xdd8] sm:$0xff]  ;;  %v3934_v63 = vld [vmem:[#allocation4 + $0xa88] sm:$0xff] }
 0x3b9   :  { %9601 = vmatpush1.bf16.msra.mxu1 %v9600_v13  ;;  %3675 = vmatprep.mubr.f32.mxu0 %v12343_v25  ;;  %v2603_v13 = vld [vmem:[#allocation4 + $0x3a0] sm:$0xff]  ;;  %v4651_v33 = vld [vmem:[#allocation4 + $0xdf0] sm:$0xff]  ;;  %v3940_v29 = vld [vmem:[#allocation4 + $0xab8] sm:$0xff] }
 0x3ba   :  { %3099 = vmatprep.mubr.f32.mxu1 %v14153_v44  ;;  %9603 = vmatprep.subr.bf16.mxu1 %v9602_v22  ;;  %v9612_v22 = vpack.c.bf16 %v2556_v46, %v2553_v7  ;;  %v2574_v7 = vld [vmem:[#allocation4 + $0x2b8] sm:$0xff]  ;;  %v3937_v30 = vld [vmem:[#allocation4 + $0xaa0] sm:$0xff]  ;;  %v3943_v62 = vld [vmem:[#allocation4 + $0xad0] sm:$0xff] }
 0x3bb   :  { %9681 = vmatpush3.bf16.msra.mxu0 %v9678_v19  ;;  %v9686_v19 = vpack.c.bf16 %v2600_v9, %v2597_v27  ;;  %v2575_v27 = vld [vmem:[#allocation4 + $0x2c0] sm:$0xff]  ;;  %v9620_v9 = vpack.c.bf16 %v2568_v12, %v2565_v23  ;;  %v2578_v46 = vld [vmem:[#allocation4 + $0x2d8] sm:$0xff]  ;;  %v2592_v23 = vld [vmem:[#allocation4 + $0x348] sm:$0xff] }
 0x3bc   :  { %3676 = vmatmul.mubr.f32.gmra.mrb[60].mxu0 %v12336_v60  ;;  %8129 = vmatmul.mubr.msk.f32.gmra.mrb[70].mxu1 %vm2835_vm8, %v12855_v42  ;;  %v2606_v42 = vld [vmem:[#allocation4 + $0x3b8] sm:$0xff]  ;;  %v2596_v12 = vld [vmem:[#allocation4 + $0x368] sm:$0xff] }
 0x3bd   :  { %9605 = vmatpush1.bf16.msra.mxu1 %v9604_v10  ;;  %3680 = vmatprep.mubr.f32.mxu0 %v12370_v3  ;;  %v9690_v24 = vpack.c.bf16 %v2606_v42, %v2603_v13  ;;  %v3890_v10 = vld [vmem:[#allocation4 + $0x928] sm:$0xff]  ;;  %v2577_v13 = vld [vmem:[#allocation4 + $0x2d0] sm:$0xff] }
 0x3be   :  { %3420 = vmatprep.mubr.f32.mxu1 %v12321_v56  ;;  %9607 = vmatprep.subr.bf16.mxu1 %v9606_v47  ;;  %v2562_v56 = vld [vmem:[#allocation4 + $0x258] sm:$0xff]  ;;  %v2580_v42 = vld [vmem:[#allocation4 + $0x2e8] sm:$0xff] }
 0x3bf   :  { %9683 = vmatprep.subr.bf16.mxu0 %v9682_v18  ;;  %v9616_v47 = vpack.c.bf16 %v2562_v56, %v2559_v35  ;;  %v9628_v35 = vpack.c.bf16 %v2580_v42, %v2577_v13  ;;  %v3899_v13 = vld [vmem:[#allocation4 + $0x970] sm:$0xff]  ;;  %v3902_v42 = vld [vmem:[#allocation4 + $0x988] sm:$0xff] }
 0x3c0   :  { %3681 = vmatmul.mubr.f32.gmra.mrb[62].mxu0 %v12359_v15 }
 0x3c1   :  { %9609 = vmatpush1.bf16.msra.mxu1 %v9608_v26  ;;  %3685 = vmatprep.mubr.f32.mxu0 %v12409_v2  ;;  %v9622_v26 = vpack.c.bf16 %v2575_v27, %v2572_v32  ;;  %v2599_v32 = vld [vmem:[#allocation4 + $0x380] sm:$0xff]  ;;  %v3839_v27 = vld [vmem:[#allocation4 + $0x790] sm:$0xff] }
 0x3c2   :  { %9611 = vmatprep.subr.bf16.mxu1 %v9610_v52  ;;  %9685 = vmatpush3.bf16.msra.mxu0 %v9682_v18  ;;  %v9774_v18 = vpack.c.bf16 %v3890_v10, %v3887_v5  ;;  %v2571_v52 = vld [vmem:[#allocation4 + $0x2a0] sm:$0xff]  ;;  %v2593_v5 = vld [vmem:[#allocation4 + $0x350] sm:$0xff]  ;;  %v9632_v10 = vpack.c.bf16 %v2586_v11, %v2583_v0  ;;  %v3854_v0 = vld [vmem:[#allocation4 + $0x808] sm:$0xff] }
 0x3c3   :  { %9687 = vmatprep.subr.bf16.mxu0 %v9686_v19  ;;  %v9624_v34 = vpack.c.bf16 %v2574_v7, %v2571_v52  ;;  %v3896_v52 = vld [vmem:[#allocation4 + $0x958] sm:$0xff]  ;;  %v9638_v7 = vpack.c.bf16 %v2599_v32, %v2596_v12  ;;  %v3905_v11 = vld [vmem:[#allocation4 + $0x9a0] sm:$0xff]  ;;  %v3911_v12 = vld [vmem:[#allocation4 + $0x9d0] sm:$0xff] }
 0x3c4   :  { %3686 = vmatmul.mubr.f32.gmra.mrb[64].mxu0 %v12400_v54  ;;  %v3914_v32 = vld [vmem:[#allocation4 + $0x9e8] sm:$0xff] }
 0x3c5   :  { %9613 = vmatpush1.bf16.msra.mxu1 %v9612_v22  ;;  %3690 = vmatprep.mubr.f32.mxu0 %v12452_v49  ;;  %v2584_v22 = vld [vmem:[#allocation4 + $0x308] sm:$0xff] }
 0x3c6   :  { %9615 = vmatprep.subr.bf16.mxu1 %v9614_v28  ;;  %9689 = vmatpush3.bf16.msra.mxu0 %v9686_v19  ;;  %v9626_v19 = vpack.c.bf16 %v2581_v43, %v2578_v46  ;;  %v2587_v28 = vld [vmem:[#allocation4 + $0x320] sm:$0xff]  ;;  %v2598_v46 = vld [vmem:[#allocation4 + $0x378] sm:$0xff] }
 0x3c7   :  { %9691 = vmatprep.subr.bf16.mxu0 %v9690_v24  ;;  %v9630_v56 = vpack.c.bf16 %v2587_v28, %v2584_v22  ;;  %v2605_v28 = vld [vmem:[#allocation4 + $0x3b0] sm:$0xff] }
 0x3c8   :  { %3691 = vmatmul.mubr.f32.gmra.mrb[66].mxu0 %v12439_v40 }
 0x3c9   :  { %9617 = vmatpush1.bf16.msra.mxu1 %v9616_v47  ;;  %3695 = vmatprep.mubr.f32.mxu0 %v12487_v61 }
 0x3ca   :  { %9619 = vmatprep.subr.bf16.mxu1 %v9618_v16  ;;  %9693 = vmatpush3.bf16.msra.mxu0 %v9690_v24  ;;  %v2590_v24 = vld [vmem:[#allocation4 + $0x338] sm:$0xff]  ;;  %v2589_v16 = vld [vmem:[#allocation4 + $0x330] sm:$0xff] }
 0x3cb   :  { %9775 = vmatprep.subr.bf16.mxu0 %v9774_v18  ;;  %v9634_v47 = vpack.c.bf16 %v2593_v5, %v2590_v24  ;;  %v3842_v18 = vld [vmem:[#allocation4 + $0x7a8] sm:$0xff]  ;;  %v3908_v24 = vld [vmem:[#allocation4 + $0x9b8] sm:$0xff]  ;;  %v2601_v5 = vld [vmem:[#allocation4 + $0x390] sm:$0xff] }
 0x3cc   :  { %3696 = vmatmul.mubr.f32.gmra.mrb[68].mxu0 %v12480_v48 }
 0x3cd   :  { %9621 = vmatpush1.bf16.msra.mxu1 %v9620_v9  ;;  %3700 = vmatprep.mubr.f32.mxu0 %v12513_v39  ;;  %v9636_v9 = vpack.c.bf16 %v2592_v23, %v2589_v16  ;;  %v3857_v16 = vld [vmem:[#allocation4 + $0x820] sm:$0xff]  ;;  %v3860_v23 = vld [vmem:[#allocation4 + $0x838] sm:$0xff] }
 0x3ce   :  { %9623 = vmatprep.subr.bf16.mxu1 %v9622_v26  ;;  %v3893_v26 = vld [vmem:[#allocation4 + $0x940] sm:$0xff] }
 0x3cf   :  { %v9778_v43 = vpack.c.bf16 %v3896_v52, %v3893_v26  ;;  %v3863_v26 = vld [vmem:[#allocation4 + $0x850] sm:$0xff]  ;;  %v3866_v52 = vld [vmem:[#allocation4 + $0x868] sm:$0xff] }
 0x3d0   :  { %3701 = vmatmul.mubr.f32.gmra.mrb[70].mxu0 %v12506_v36 }
 0x3d1   :  { %9625 = vmatpush1.bf16.msra.mxu1 %v9624_v34  ;;  %3705 = vmatprep.mubr.f32.mxu0 %v12548_v37  ;;  %v3845_v34 = vld [vmem:[#allocation4 + $0x7c0] sm:$0xff] }
 0x3d2   :  { %9627 = vmatprep.subr.bf16.mxu1 %v9626_v19  ;;  %v3848_v19 = vld [vmem:[#allocation4 + $0x7d8] sm:$0xff] }
 0x3d4   :  { %3706 = vmatmul.mubr.f32.gmra.mrb[72].mxu0 %v12539_v59 }
 0x3d5   :  { %9629 = vmatpush1.bf16.msra.mxu1 %v9628_v35  ;;  %3710 = vmatprep.mubr.f32.mxu0 %v12580_v55  ;;  %v9782_v35 = vpack.c.bf16 %v3902_v42, %v3899_v13  ;;  %v14194_v13 = vld [vmem:[#allocation26_spill] sm:$0xff] }
 0x3d6   :  { %9631 = vmatprep.subr.bf16.mxu1 %v9630_v56  ;;  %v3851_v56 = vld [vmem:[#allocation4 + $0x7f0] sm:$0xff] }
 0x3d8   :  { %3421 = vmatmul.mubr.f32.vlgmr.msra.gmra.mrb[52].mxu1 %v12315_v53  ;;  %3711 = vmatmul.mubr.f32.gmra.mrb[74].mxu0 %v12571_v20  ;;  %v2595_v53 = vld [vmem:[#allocation4 + $0x360] sm:$0xff] }
 0x3d9   :  { %3426 = vmatprep.mubr.f32.mxu1 %v12343_v25  ;;  %3715 = vmatprep.mubr.f32.mxu0 %v12618_v58  ;;  %v9776_v25 = vpack.c.bf16 %v3842_v18, %v3839_v27  ;;  %v9640_v22 = vpack.c.bf16 %v2598_v46, %v2595_v53  ;;  %v3838_v27 = vld [vmem:[#allocation4 + $0x788] sm:$0xff]  ;;  %v3841_v18 = vld [vmem:[#allocation4 + $0x7a0] sm:$0xff]  ;;  %v3920_v53 = vld [vmem:[#allocation4 + $0xa18] sm:$0xff] }
 0x3da   :  { %9633 = vmatpush1.bf16.msra.mxu1 %v9632_v10  ;;  %v2604_v10 = vld [vmem:[#allocation4 + $0x3a8] sm:$0xff] }
 0x3db   :  { %9635 = vmatprep.subr.bf16.mxu1 %v9634_v47  ;;  %v9786_v47 = vpack.c.bf16 %v3908_v24, %v3905_v11  ;;  %v3938_v11 = vld [vmem:[#allocation4 + $0xaa8] sm:$0xff] }
 0x3dc   :  { %3427 = vmatmul.mubr.f32.gmra.mrb[54].mxu1 %v12336_v60  ;;  %3716 = vmatmul.mubr.f32.gmra.mrb[76].mxu0 %v12605_v50  ;;  %v2602_v60 = vld [vmem:[#allocation4 + $0x398] sm:$0xff] }
 0x3dd   :  { %3432 = vmatprep.mubr.f32.mxu1 %v12370_v3  ;;  %9073 = vmatprep.mubr.msk.f32.mxu0 %vm2835_vm8, %v12649_v57  ;;  %v9780_v3 = vpack.c.bf16 %v3848_v19, %v3845_v34  ;;  %v3923_v34 = vld [vmem:[#allocation4 + $0xa30] sm:$0xff]  ;;  %v3926_v19 = vld [vmem:[#allocation4 + $0xa48] sm:$0xff] }
 0x3de   :  { %9637 = vmatpush1.bf16.msra.mxu1 %v9636_v9  ;;  %v9790_v9 = vpack.c.bf16 %v3914_v32, %v3911_v12  ;;  %v9798_v42 = vpack.c.bf16 %v3926_v19, %v3923_v34  ;;  %v3846_v12 = vld [vmem:[#allocation4 + $0x7c8] sm:$0xff]  ;;  %v3855_v19 = vld [vmem:[#allocation4 + $0x810] sm:$0xff] }
 0x3df   :  { %9639 = vmatprep.subr.bf16.mxu1 %v9638_v7  ;;  %v3917_v7 = vld [vmem:[#allocation4 + $0xa00] sm:$0xff]  ;;  %v3850_v32 = vld [vmem:[#allocation4 + $0x7e8] sm:$0xff] }
 0x3e0   :  { %3433 = vmatmul.mubr.f32.gmra.mrb[56].mxu1 %v12359_v15  ;;  %9074 = vmatmul.mubr.msk.f32.vlgmr.msra.gmra.mrb[48].mxu0 %vm2835_vm8, %v12641_v1  ;;  %v9642_v15 = vpack.c.bf16 %v2605_v28, %v2602_v60  ;;  %v9794_v46 = vpack.c.bf16 %v3920_v53, %v3917_v7  ;;  %v3878_v60 = vld [vmem:[#allocation4 + $0x8c8] sm:$0xff]  ;;  %v3929_v28 = vld [vmem:[#allocation4 + $0xa60] sm:$0xff]  ;;  %v3852_v53 = vld [vmem:[#allocation4 + $0x7f8] sm:$0xff] }
 0x3e1   :  { %9777 = vmatpush3.bf16.msra.mxu0 %v9776_v25  ;;  %3438 = vmatprep.mubr.f32.mxu1 %v12409_v2  ;;  %v9784_v2 = vpack.c.bf16 %v3854_v0, %v3851_v56  ;;  %v3869_v25 = vld [vmem:[#allocation4 + $0x880] sm:$0xff]  ;;  %v3884_v0 = vld [vmem:[#allocation4 + $0x8f8] sm:$0xff] }
 0x3e2   :  { %9076 = vmatprep.mubr.msk.f32.mxu0 %vm2835_vm8, %v12693_v4  ;;  %9779 = vmatprep.subr.bf16.mxu0 %v9778_v43  ;;  %v3872_v43 = vld [vmem:[#allocation4 + $0x898] sm:$0xff]  ;;  %v3881_v56 = vld [vmem:[#allocation4 + $0x8e0] sm:$0xff] }
 0x3e3   :  { %9641 = vmatpush1.bf16.msra.mxu1 %v9640_v22  ;;  %v3875_v22 = vld [vmem:[#allocation4 + $0x8b0] sm:$0xff]  ;;  %v9804_v24 = vpack.c.bf16 %v3884_v0, %v3881_v56  ;;  %v3849_v7 = vld [vmem:[#allocation4 + $0x7e0] sm:$0xff]  ;;  %v3864_v0 = vld [vmem:[#allocation4 + $0x858] sm:$0xff] }
 0x3e4   :  { %3439 = vmatmul.mubr.f32.gmra.mrb[58].mxu1 %v12400_v54  ;;  %9077 = vmatmul.mubr.msk.f32.gmra.mrb[50].mxu0 %vm2835_vm8, %v12678_v45  ;;  %v9644_v54 = vpack.c.bf16 %v2604_v10, %v2601_v5  ;;  %v3840_v5 = vld [vmem:[#allocation4 + $0x798] sm:$0xff]  ;;  %v3861_v56 = vld [vmem:[#allocation4 + $0x840] sm:$0xff] }
 0x3e5   :  { %9781 = vmatpush3.bf16.msra.mxu0 %v9780_v3  ;;  %3444 = vmatprep.mubr.f32.mxu1 %v12452_v49  ;;  %v9788_v49 = vpack.c.bf16 %v3860_v23, %v3857_v16  ;;  %v3932_v3 = vld [vmem:[#allocation4 + $0xa78] sm:$0xff]  ;;  %v3843_v23 = vld [vmem:[#allocation4 + $0x7b0] sm:$0xff] }
 0x3e6   :  { %9079 = vmatprep.mubr.msk.f32.mxu0 %vm2835_vm8, %v12743_v6  ;;  %9783 = vmatprep.subr.bf16.mxu0 %v9782_v35  ;;  %v9802_v35 = vpack.c.bf16 %v3932_v3, %v3929_v28  ;;  %v3844_v10 = vld [vmem:[#allocation4 + $0x7b8] sm:$0xff]  ;;  %v3947_v28 = vld [vmem:[#allocation4 + $0xaf0] sm:$0xff]  ;;  %v14200_v3 = vld [vmem:[#allocation40_spill] sm:$0xff] }
 0x3e7   :  { %9643 = vmatprep.subr.bf16.mxu1 %v9642_v15  ;;  %v3837_v15 = vld [vmem:[#allocation4 + $0x780] sm:$0xff] }
 0x3e8   :  { %3445 = vmatmul.mubr.f32.gmra.mrb[60].mxu1 %v12439_v40  ;;  %9080 = vmatmul.mubr.msk.f32.gmra.mrb[52].mxu0 %vm2835_vm8, %v12728_v41  ;;  %v9694_v40 = vpack.c.bf16 %v3841_v18, %v3838_v27  ;;  %v14195_v27 = vld [vmem:[#allocation25_spill] sm:$0xff]  ;;  %v3941_v18 = vld [vmem:[#allocation4 + $0xac0] sm:$0xff] }
 0x3e9   :  { %9785 = vmatpush3.bf16.msra.mxu0 %v9784_v2  ;;  %3450 = vmatprep.mubr.f32.mxu1 %v12487_v61  ;;  %v9792_v61 = vpack.c.bf16 %v3866_v52, %v3863_v26  ;;  %v3847_v2 = vld [vmem:[#allocation4 + $0x7d0] sm:$0xff]  ;;  %v9700_v26 = vpack.c.bf16 %v3846_v12, %v3843_v23  ;;  %v3953_v12 = vld [vmem:[#allocation4 + $0xb20] sm:$0xff] }
 0x3ea   :  { %9082 = vmatprep.mubr.msk.f32.mxu0 %vm2835_vm8, %v12799_v17  ;;  %9787 = vmatprep.subr.bf16.mxu0 %v9786_v47  ;;  %v9696_v47 = vpack.c.bf16 %v3840_v5, %v3837_v15  ;;  %v9698_v16 = vpack.c.bf16 %v3847_v2, %v3844_v10  ;;  %v14201_v15 = vld [vmem:[#allocation38_spill] sm:$0xff]  ;;  %v9712_v5 = vpack.c.bf16 %v3864_v0, %v3861_v56  ;;  %v3870_v2 = vld [vmem:[#allocation4 + $0x888] sm:$0xff]  ;;  %v3885_v56 = vld [vmem:[#allocation4 + $0x900] sm:$0xff] }
 0x3eb   :  { %9645 = vmatpush1.bf16.msra.mxu1 %v9644_v54  ;;  %v3853_v54 = vld [vmem:[#allocation4 + $0x800] sm:$0xff]  ;;  %v3867_v10 = vld [vmem:[#allocation4 + $0x870] sm:$0xff]  ;;  %v3888_v0 = vld [vmem:[#allocation4 + $0x918] sm:$0xff] }
 0x3ec   :  { %3451 = vmatmul.mubr.f32.gmra.mrb[62].mxu1 %v12480_v48  ;;  %9083 = vmatmul.mubr.msk.f32.gmra.mrb[54].mxu0 %vm2835_vm8, %v12782_v31  ;;  %v14193_v48 = vld [vmem:[#allocation77_spill] sm:$0xff]  ;;  %v9702_v52 = vpack.c.bf16 %v3853_v54, %v3850_v32  ;;  %v14203_v23 = vld [vmem:[#allocation42_spill] sm:$0xff]  ;;  %v9716_v54 = vpack.c.bf16 %v3870_v2, %v3867_v10  ;;  %v9728_v2 = vpack.c.bf16 %v3888_v0, %v3885_v56  ;;  %v4576_v56 = vld [vmem:[#allocation4 + $0xb98] sm:$0xff] }
 0x3ed   :  { %9789 = vmatpush3.bf16.msra.mxu0 %v9788_v49  ;;  %3456 = vmatprep.mubr.f32.mxu1 %v12513_v39  ;;  %v9796_v39 = vpack.c.bf16 %v3872_v43, %v3869_v25  ;;  %v3944_v49 = vld [vmem:[#allocation4 + $0xad8] sm:$0xff]  ;;  %v14197_v25 = vld [vmem:[#allocation29_spill] sm:$0xff]  ;;  %v9704_v43 = vpack.c.bf16 %v3852_v53, %v3849_v7  ;;  %v3883_v7 = vld [vmem:[#allocation4 + $0x8f0] sm:$0xff] }
 0x3ee   :  { %9085 = vmatprep.mubr.msk.f32.mxu0 %vm2835_vm8, %v12850_v51  ;;  %9791 = vmatprep.subr.bf16.mxu0 %v9790_v9  ;;  %v14196_v9 = vld [vmem:[#allocation31_spill] sm:$0xff]  ;;  %v14204_v32 = vld [vmem:[#allocation49_spill] sm:$0xff]  ;;  %v3903_v0 = vld [vmem:[#allocation4 + $0x990] sm:$0xff] }
 0x3ef   :  { %9695 = vmatprep.subr.bf16.mxu1 %v9694_v40  ;;  %v3856_v40 = vld [vmem:[#allocation4 + $0x818] sm:$0xff] }
 0x3f0   :  { %3457 = vmatmul.mubr.f32.gmra.mrb[64].mxu1 %v12506_v36  ;;  %9086 = vmatmul.mubr.msk.f32.gmra.mrb[56].mxu0 %vm2835_vm8, %v14193_v48  ;;  %v9800_v36 = vpack.c.bf16 %v3878_v60, %v3875_v22  ;;  %v3865_v22 = vld [vmem:[#allocation4 + $0x860] sm:$0xff]  ;;  %v14199_v60 = vld [vmem:[#allocation34_spill] sm:$0xff] }
 0x3f1   :  { %9793 = vmatpush3.bf16.msra.mxu0 %v9792_v61  ;;  %3462 = vmatprep.mubr.f32.mxu1 %v12548_v37  ;;  %v3935_v37 = vld [vmem:[#allocation4 + $0xa90] sm:$0xff] }
 0x3f2   :  { %4368 = vmatprep.mubr.f32.mxu0 %v14194_v13  ;;  %9795 = vmatprep.subr.bf16.mxu0 %v9794_v46  ;;  %v3859_v61 = vld [vmem:[#allocation4 + $0x830] sm:$0xff]  ;;  %v9810_v46 = vpack.c.bf16 %v3944_v49, %v3941_v18  ;;  %v3873_v49 = vld [vmem:[#allocation4 + $0x8a0] sm:$0xff] }
 0x3f3   :  { %v9706_v34 = vpack.c.bf16 %v3859_v61, %v3856_v40  ;;  %v14205_v40 = vld [vmem:[#allocation47_spill] sm:$0xff] }
 0x3f4   :  { %3463 = vmatmul.mubr.f32.gmra.mrb[66].mxu1 %v12539_v59  ;;  %v9806_v59 = vpack.c.bf16 %v3938_v11, %v3935_v37  ;;  %v3868_v37 = vld [vmem:[#allocation4 + $0x878] sm:$0xff]  ;;  %v3871_v11 = vld [vmem:[#allocation4 + $0x890] sm:$0xff] }
 0x3f5   :  { %9797 = vmatpush3.bf16.msra.mxu0 %v9796_v39  ;;  %3468 = vmatprep.mubr.f32.mxu1 %v12580_v55  ;;  %v3858_v39 = vld [vmem:[#allocation4 + $0x828] sm:$0xff] }
 0x3f6   :  { %9799 = vmatprep.subr.bf16.mxu0 %v9798_v42  ;;  %v3862_v42 = vld [vmem:[#allocation4 + $0x848] sm:$0xff] }
 0x3f8   :  { %3469 = vmatmul.mubr.f32.gmra.mrb[68].mxu1 %v12571_v20 }
 0x3f9   :  { %9801 = vmatpush3.bf16.msra.mxu0 %v9800_v36  ;;  %3474 = vmatprep.mubr.f32.mxu1 %v12618_v58  ;;  %v9708_v36 = vpack.c.bf16 %v3858_v39, %v3855_v19  ;;  %v3886_v19 = vld [vmem:[#allocation4 + $0x908] sm:$0xff]  ;;  %v3889_v39 = vld [vmem:[#allocation4 + $0x920] sm:$0xff] }
 0x3fa   :  { %9803 = vmatprep.subr.bf16.mxu0 %v9802_v35  ;;  %v9710_v35 = vpack.c.bf16 %v3865_v22, %v3862_v42  ;;  %v14207_v42 = vld [vmem:[#allocation52_spill] sm:$0xff]  ;;  %v4615_v22 = vld [vmem:[#allocation4 + $0xcd0] sm:$0xff] }
 0x3fc   :  { %3475 = vmatmul.mubr.f32.gmra.mrb[70].mxu1 %v12605_v50 }
 0x3fd   :  { %9805 = vmatpush3.bf16.msra.mxu0 %v9804_v24  ;;  %3545 = vmatprep.mubr.f32.mxu1 %v14153_v44 }
 0x3fe   :  { %9807 = vmatprep.subr.bf16.mxu0 %v9806_v59 }
 0x400   :  { %4369 = vmatmul.mubr.f32.vlgmr.msra.gmra.mrb[78].mxu0 %v14195_v27  ;;  %8140 = vmatmul.mubr.msk.f32.vlgmr.msra.gmra.mrb[52].mxu1 %vm2835_vm8, %v12649_v57  ;;  %v14198_v57 = vld [vmem:[#allocation35_spill] sm:$0xff] }
 0x401   :  { %9697 = vmatpush1.bf16.msra.mxu1 %v9696_v47  ;;  %4373 = vmatprep.mubr.f32.mxu0 %v14196_v9  ;;  %v3874_v47 = vld [vmem:[#allocation4 + $0x8a8] sm:$0xff] }
 0x402   :  { %3551 = vmatprep.mubr.f32.mxu1 %v14153_v44  ;;  %9699 = vmatprep.subr.bf16.mxu1 %v9698_v16  ;;  %v3877_v16 = vld [vmem:[#allocation4 + $0x8c0] sm:$0xff] }
 0x403   :  { %9809 = vmatpush3.bf16.msra.mxu0 %v9806_v59  ;;  %v9714_v59 = vpack.c.bf16 %v3871_v11, %v3868_v37  ;;  %v9718_v18 = vpack.c.bf16 %v3877_v16, %v3874_v47  ;;  %v13093_v37 = vrot.slane %v12605_v50, 2  ;;  %v3892_v11 = vld [vmem:[#allocation4 + $0x938] sm:$0xff]  ;;  %v3891_v16 = vld [vmem:[#allocation4 + $0x930] sm:$0xff] }
 0x404   :  { %4374 = vmatmul.mubr.f32.gmra.mrb[80].mxu0 %v14197_v25  ;;  %8141 = vmatmul.mubr.msk.f32.gmra.mrb[54].mxu1 %vm2835_vm8, %v12641_v1  ;;  %v3950_v1 = vld [vmem:[#allocation4 + $0xb08] sm:$0xff] }
 0x405   :  { %9701 = vmatpush1.bf16.msra.mxu1 %v9700_v26  ;;  %4378 = vmatprep.mubr.f32.mxu0 %v14198_v57  ;;  %v9814_v24 = vpack.c.bf16 %v3950_v1, %v3947_v28  ;;  %v3876_v26 = vld [vmem:[#allocation4 + $0x8b8] sm:$0xff]  ;;  %v4618_v28 = vld [vmem:[#allocation4 + $0xce8] sm:$0xff] }
 0x406   :  { %3557 = vmatprep.mubr.f32.mxu1 %v14153_v44  ;;  %9703 = vmatprep.subr.bf16.mxu1 %v9702_v52  ;;  %v3880_v52 = vld [vmem:[#allocation4 + $0x8d8] sm:$0xff]  ;;  %v9720_v61 = vpack.c.bf16 %v3876_v26, %v3873_v49  ;;  %v4567_v26 = vld [vmem:[#allocation4 + $0xb50] sm:$0xff] }
 0x407   :  { %9811 = vmatprep.subr.bf16.mxu0 %v9810_v46  ;;  %v14208_v1 = vld [vmem:[#allocation59_spill] sm:$0xff] }
 0x408   :  { %4379 = vmatmul.mubr.f32.gmra.mrb[82].mxu0 %v14199_v60  ;;  %8142 = vmatmul.mubr.msk.f32.gmra.mrb[56].mxu1 %vm2835_vm8, %v12693_v4  ;;  %v14202_v4 = vld [vmem:[#allocation44_spill] sm:$0xff] }
 0x409   :  { %9705 = vmatpush1.bf16.msra.mxu1 %v9704_v43  ;;  %4383 = vmatprep.mubr.f32.mxu0 %v14200_v3  ;;  %v3879_v43 = vld [vmem:[#allocation4 + $0x8d0] sm:$0xff] }
 0x40a   :  { %3563 = vmatprep.mubr.f32.mxu1 %v14153_v44  ;;  %9707 = vmatprep.subr.bf16.mxu1 %v9706_v34  ;;  %v3882_v34 = vld [vmem:[#allocation4 + $0x8e8] sm:$0xff] }
 0x40b   :  { %9813 = vmatpush3.bf16.msra.mxu0 %v9810_v46  ;;  %v9722_v46 = vpack.c.bf16 %v3883_v7, %v3880_v52  ;;  %v4570_v7 = vld [vmem:[#allocation4 + $0xb68] sm:$0xff] }
 0x40c   :  { %4384 = vmatmul.mubr.f32.gmra.mrb[84].mxu0 %v14201_v15  ;;  %8143 = vmatmul.mubr.msk.f32.gmra.mrb[58].mxu1 %vm2835_vm8, %v12678_v45  ;;  %v3956_v45 = vld [vmem:[#allocation4 + $0xb38] sm:$0xff] }
 0x40d   :  { %9709 = vmatpush1.bf16.msra.mxu1 %v9708_v36  ;;  %4388 = vmatprep.mubr.f32.mxu0 %v14202_v4  ;;  %v9818_v53 = vpack.c.bf16 %v3956_v45, %v3953_v12  ;;  %v9724_v36 = vpack.c.bf16 %v3882_v34, %v3879_v43  ;;  %v3894_v12 = vld [vmem:[#allocation4 + $0x948] sm:$0xff]  ;;  %v14211_v45 = vrot.slane %v12571_v20, 2  ;;  %v4624_v43 = vld [vmem:[#allocation4 + $0xd18] sm:$0xff] }
 0x40e   :  { %3569 = vmatprep.mubr.f32.mxu1 %v14153_v44  ;;  %9711 = vmatprep.subr.bf16.mxu1 %v9710_v35  ;;  %v9726_v35 = vpack.c.bf16 %v3889_v39, %v3886_v19  ;;  %v9732_v49 = vpack.c.bf16 %v3894_v12, %v3891_v16  ;;  %v3904_v34 = vld [vmem:[#allocation4 + $0x998] sm:$0xff]  ;;  %v3907_v19 = vld [vmem:[#allocation4 + $0x9b0] sm:$0xff]  ;;  %v14212_v39 = vld [vmem:[#allocation64_spill] sm:$0xff] }
 0x40f   :  { %9815 = vmatprep.subr.bf16.mxu0 %v9814_v24  ;;  %v3913_v16 = vld [vmem:[#allocation4 + $0x9e0] sm:$0xff] }
 0x410   :  { %4389 = vmatmul.mubr.f32.gmra.mrb[86].mxu0 %v14203_v23  ;;  %8144 = vmatmul.mubr.msk.f32.gmra.mrb[60].mxu1 %vm2835_vm8, %v12743_v6  ;;  %v14206_v6 = vld [vmem:[#allocation54_spill] sm:$0xff] }
 0x411   :  { %9713 = vmatpush1.bf16.msra.mxu1 %v9712_v5  ;;  %4393 = vmatprep.mubr.f32.mxu0 %v14204_v32  ;;  %v14209_v5 = vld [vmem:[#allocation57_spill] sm:$0xff] }
 0x412   :  { %3575 = vmatprep.mubr.f32.mxu1 %v14153_v44  ;;  %9715 = vmatprep.subr.bf16.mxu1 %v9714_v59  ;;  %v14210_v59 = vrot.slane %v12580_v55, 2 }
 0x413   :  { %9817 = vmatpush3.bf16.msra.mxu0 %v9814_v24  ;;  %v9902_v24 = vpack.c.bf16 %v4618_v28, %v4615_v22  ;;  %v9904_v22 = vpack.c.bf16 %v4570_v7, %v4567_v26  ;;  %v3909_v26 = vld [vmem:[#allocation4 + $0x9c0] sm:$0xff] }
 0x414   :  { %4394 = vmatmul.mubr.f32.gmra.mrb[88].mxu0 %v14205_v40  ;;  %8145 = vmatmul.mubr.msk.f32.gmra.mrb[62].mxu1 %vm2835_vm8, %v12728_v41  ;;  %v13088_v41 = vrot.slane %v12618_v58, 2 }
 0x415   :  { %9717 = vmatpush1.bf16.msra.mxu1 %v9716_v54  ;;  %4398 = vmatprep.mubr.f32.mxu0 %v14206_v6  ;;  %v3898_v54 = vld [vmem:[#allocation4 + $0x968] sm:$0xff] }
 0x416   :  { %3581 = vmatprep.mubr.f32.mxu1 %v14153_v44  ;;  %9719 = vmatprep.subr.bf16.mxu1 %v9718_v18  ;;  %v13102_v10 = vsel %vm897_vm4, %v14210_v59, %v13088_v41  ;;  %v3901_v18 = vld [vmem:[#allocation4 + $0x980] sm:$0xff]  ;;  %v4630_v59 = vld [vmem:[#allocation4 + $0xd48] sm:$0xff] }
 0x417   :  { %9819 = vmatprep.subr.bf16.mxu0 %v9818_v53  ;;  %v9734_v52 = vpack.c.bf16 %v3901_v18, %v3898_v54  ;;  %v4579_v54 = vld [vmem:[#allocation4 + $0xbb0] sm:$0xff]  ;;  %v14214_v18 = vld [vmem:[#allocation69_spill] sm:$0xff] }
 0x418   :  { %4399 = vmatmul.mubr.f32.gmra.mrb[90].mxu0 %v14207_v42  ;;  %8146 = vmatmul.mubr.msk.f32.gmra.mrb[64].mxu1 %vm2835_vm8, %v12799_v17  ;;  %v3895_v17 = vld [vmem:[#allocation4 + $0x950] sm:$0xff] }
 0x419   :  { %9721 = vmatpush1.bf16.msra.mxu1 %v9720_v61  ;;  %4403 = vmatprep.mubr.f32.mxu0 %v14208_v1  ;;  %v9730_v47 = vpack.c.bf16 %v3895_v17, %v3892_v11  ;;  %v3900_v61 = vld [vmem:[#allocation4 + $0x978] sm:$0xff]  ;;  %v3906_v11 = vld [vmem:[#allocation4 + $0x9a8] sm:$0xff]  ;;  %v9738_v17 = vpack.c.bf16 %v3907_v19, %v3904_v34  ;;  %v3919_v34 = vld [vmem:[#allocation4 + $0xa10] sm:$0xff] }
 0x41a   :  { %3587 = vmatprep.mubr.f32.mxu1 %v14153_v44  ;;  %9723 = vmatprep.subr.bf16.mxu1 %v9722_v46  ;;  %v4621_v46 = vld [vmem:[#allocation4 + $0xd00] sm:$0xff] }
 0x41b   :  { %9821 = vmatpush3.bf16.msra.mxu0 %v9818_v53  ;;  %v3897_v53 = vld [vmem:[#allocation4 + $0x960] sm:$0xff] }
 0x41c   :  { %4404 = vmatmul.mubr.f32.gmra.mrb[92].mxu0 %v14209_v5  ;;  %8147 = vmatmul.mubr.msk.f32.gmra.mrb[66].mxu1 %vm2835_vm8, %v12782_v31  ;;  %v13110_v31 = vsel %vm897_vm4, %v14211_v45, %v13093_v37  ;;  %v9736_v28 = vpack.c.bf16 %v3900_v61, %v3897_v53  ;;  %v9740_v45 = vpack.c.bf16 %v3906_v11, %v3903_v0  ;;  %v4633_v53 = vld [vmem:[#allocation4 + $0xd60] sm:$0xff]  ;;  %v4636_v61 = vld [vmem:[#allocation4 + $0xd78] sm:$0xff]  ;;  %v3915_v0 = vld [vmem:[#allocation4 + $0x9f0] sm:$0xff] }
 0x41d   :  { %9725 = vmatpush1.bf16.msra.mxu1 %v9724_v36  ;;  %4408 = vmatprep.mubr.f32.mxu0 %v13102_v10  ;;  %v4573_v36 = vld [vmem:[#allocation4 + $0xb80] sm:$0xff]  ;;  %v3918_v11 = vld [vmem:[#allocation4 + $0xa08] sm:$0xff] }
 0x41e   :  { %3593 = vmatprep.mubr.f32.mxu1 %v14153_v44  ;;  %9727 = vmatprep.subr.bf16.mxu1 %v9726_v35  ;;  %v9906_v35 = vpack.c.bf16 %v4624_v43, %v4621_v46  ;;  %v9908_v12 = vpack.c.bf16 %v4576_v56, %v4573_v36  ;;  %v14215_v46 = vld [vmem:[#allocation73_spill] sm:$0xff]  ;;  %v3916_v43 = vld [vmem:[#allocation4 + $0x9f8] sm:$0xff]  ;;  %v14216_v36 = vld [vmem:[#allocation74_spill] sm:$0xff] }
 0x41f   :  { %9903 = vmatprep.subr.bf16.mxu0 %v9902_v24  ;;  %v4627_v24 = vld [vmem:[#allocation4 + $0xd30] sm:$0xff]  ;;  %v4588_v56 = vld [vmem:[#allocation4 + $0xbf8] sm:$0xff] }
 0x420   :  { %4409 = vmatmul.mubr.f32.gmra.mrb[94].mxu0 %v13110_v31  ;;  %8148 = vmatmul.mubr.msk.f32.gmra.mrb[68].mxu1 %vm2835_vm8, %v12850_v51 }
 0x421   :  { %9729 = vmatpush1.bf16.msra.mxu1 %v9728_v2  ;;  %4413 = vmatprep.mubr.f32.mxu0 %v13088_v41  ;;  %v14213_v2 = vld [vmem:[#allocation68_spill] sm:$0xff] }
 0x422   :  { %3599 = vmatprep.mubr.f32.mxu1 %v14153_v44  ;;  %9731 = vmatprep.subr.bf16.mxu1 %v9730_v47  ;;  %v3910_v47 = vld [vmem:[#allocation4 + $0x9c8] sm:$0xff] }
 0x423   :  { %v9742_v7 = vpack.c.bf16 %v3913_v16, %v3910_v47  ;;  %v14217_v47 = vld [vmem:[#allocation78_spill] sm:$0xff]  ;;  %v3922_v16 = vld [vmem:[#allocation4 + $0xa28] sm:$0xff] }
 0x424   :  { %4414 = vmatmul.mubr.f32.gmra.mrb[96].mxu0 %v13093_v37  ;;  %8149 = vmatmul.mubr.msk.f32.gmra.mrb[70].mxu1 %vm2835_vm8, %v14193_v48 }
 0x425   :  { %9733 = vmatpush1.bf16.msra.mxu1 %v9732_v49  ;;  %9104 = vmatprep.mubr.msk.f32.mxu0 %vm2835_vm8, %v14212_v39  ;;  %v4582_v49 = vld [vmem:[#allocation4 + $0xbc8] sm:$0xff] }
 0x426   :  { %4118 = vmatprep.mubr.f32.mxu1 %v14194_v13  ;;  %9735 = vmatprep.subr.bf16.mxu1 %v9734_v52  ;;  %v9910_v13 = vpack.c.bf16 %v4630_v59, %v4627_v24  ;;  %v3912_v52 = vld [vmem:[#allocation4 + $0x9d8] sm:$0xff]  ;;  %v9912_v19 = vpack.c.bf16 %v4582_v49, %v4579_v54  ;;  %v4639_v24 = vld [vmem:[#allocation4 + $0xd90] sm:$0xff]  ;;  %v4642_v59 = vld [vmem:[#allocation4 + $0xda8] sm:$0xff]  ;;  %v9748_v54 = vpack.c.bf16 %v3918_v11, %v3915_v0  ;;  %v13134_v49 = vrot.slane %v14193_v48, 2 }
 0x428   :  { %9105 = vmatmul.mubr.msk.f32.vlgmr.msra.gmra.mrb[48].mxu0 %vm2835_vm8, %v14213_v2 }
 0x429   :  { %9905 = vmatpush3.bf16.msra.mxu0 %v9904_v22  ;;  %9737 = vmatpush1.bf16.msra.mxu1 %v9736_v28  ;;  %v9744_v22 = vpack.c.bf16 %v3912_v52, %v3909_v26  ;;  %v4585_v28 = vld [vmem:[#allocation4 + $0xbe0] sm:$0xff]  ;;  %v14218_v26 = vld [vmem:[#allocation79_spill] sm:$0xff]  ;;  %v9918_v52 = vpack.c.bf16 %v4642_v59, %v4639_v24 }
 0x42a   :  { %9107 = vmatprep.mubr.msk.f32.mxu0 %vm2835_vm8, %v14214_v18  ;;  %9907 = vmatprep.subr.bf16.mxu0 %v9906_v35  ;;  %v9914_v35 = vpack.c.bf16 %v4636_v61, %v4633_v53  ;;  %v3921_v53 = vld [vmem:[#allocation4 + $0xa20] sm:$0xff]  ;;  %v3924_v61 = vld [vmem:[#allocation4 + $0xa38] sm:$0xff] }
 0x42b   :  { %9739 = vmatprep.subr.bf16.mxu1 %v9738_v17  ;;  %v9746_v17 = vpack.c.bf16 %v3919_v34, %v3916_v43  ;;  %v4645_v34 = vld [vmem:[#allocation4 + $0xdc0] sm:$0xff]  ;;  %v9752_v11 = vpack.c.bf16 %v3924_v61, %v3921_v53  ;;  %v14221_v53 = vld [vmem:[#allocation27_spill] sm:$0xff]  ;;  %v4606_v61 = vld [vmem:[#allocation4 + $0xc88] sm:$0xff] }
 0x42c   :  { %9108 = vmatmul.mubr.msk.f32.gmra.mrb[50].mxu0 %vm2835_vm8, %v14215_v46  ;;  %v4597_v24 = vld [vmem:[#allocation4 + $0xc40] sm:$0xff]  ;;  %v9922_v59 = vpack.c.bf16 %v4648_v8, %v4645_v34  ;;  %v4603_v8 = vld [vmem:[#allocation4 + $0xc70] sm:$0xff] }
 0x42d   :  { %9909 = vmatpush3.bf16.msra.mxu0 %v9908_v12  ;;  %9741 = vmatpush1.bf16.msra.mxu1 %v9740_v45  ;;  %v3925_v12 = vld [vmem:[#allocation4 + $0xa40] sm:$0xff]  ;;  %v9916_v45 = vpack.c.bf16 %v4588_v56, %v4585_v28  ;;  %v3931_v28 = vld [vmem:[#allocation4 + $0xa70] sm:$0xff]  ;;  %v14220_v56 = vrot.slane %v12850_v51, 2 }
 0x42e   :  { %9110 = vmatprep.mubr.msk.f32.mxu0 %vm2835_vm8, %v14216_v36  ;;  %9911 = vmatprep.subr.bf16.mxu0 %v9910_v13  ;;  %v4591_v13 = vld [vmem:[#allocation4 + $0xc10] sm:$0xff]  ;;  %v9750_v43 = vpack.c.bf16 %v3925_v12, %v3922_v16  ;;  %v3930_v12 = vld [vmem:[#allocation4 + $0xa68] sm:$0xff]  ;;  %v4657_v34 = vld [vmem:[#allocation4 + $0xe20] sm:$0xff] }
 0x42f   :  { %9743 = vmatprep.subr.bf16.mxu1 %v9742_v7  ;;  %v4594_v7 = vld [vmem:[#allocation4 + $0xc28] sm:$0xff]  ;;  %v3927_v16 = vld [vmem:[#allocation4 + $0xa50] sm:$0xff] }
 0x430   :  { %9111 = vmatmul.mubr.msk.f32.gmra.mrb[52].mxu0 %vm2835_vm8, %v14217_v47  ;;  %v9920_v0 = vpack.c.bf16 %v4594_v7, %v4591_v13  ;;  %v9756_v7 = vpack.c.bf16 %v3930_v12, %v3927_v16  ;;  %v9762_v16 = vpack.c.bf16 %v3943_v62, %v3940_v29  ;;  %v3942_v12 = vld [vmem:[#allocation4 + $0xac8] sm:$0xff]  ;;  %v3948_v29 = vld [vmem:[#allocation4 + $0xaf8] sm:$0xff]  ;;  %v4669_v62 = vld [vmem:[#allocation4 + $0xe80] sm:$0xff] }
 0x431   :  { %9913 = vmatpush3.bf16.msra.mxu0 %v9912_v19  ;;  %9745 = vmatpush1.bf16.msra.mxu1 %v9744_v22  ;;  %v14219_v19 = vld [vmem:[#allocation82_spill] sm:$0xff]  ;;  %v3928_v22 = vld [vmem:[#allocation4 + $0xa58] sm:$0xff] }
 0x432   :  { %9113 = vmatprep.mubr.msk.f32.mxu0 %vm2835_vm8, %v14218_v26  ;;  %9915 = vmatprep.subr.bf16.mxu0 %v9914_v35  ;;  %v13144_v35 = vsel %vm897_vm4, %v14220_v56, %v13134_v49  ;;  %v9758_v56 = vpack.c.bf16 %v3937_v30, %v3934_v63  ;;  %v4666_v30 = vld [vmem:[#allocation4 + $0xe68] sm:$0xff] }
 0x433   :  { %9747 = vmatprep.subr.bf16.mxu1 %v9746_v17  ;;  %v4600_v17 = vld [vmem:[#allocation4 + $0xc58] sm:$0xff]  ;;  %v3946_v63 = vld [vmem:[#allocation4 + $0xae8] sm:$0xff] }
 0x434   :  { %9114 = vmatmul.mubr.msk.f32.gmra.mrb[54].mxu0 %vm2835_vm8, %v14219_v19  ;;  %v9924_v13 = vpack.c.bf16 %v4600_v17, %v4597_v24  ;;  %v4609_v24 = vld [vmem:[#allocation4 + $0xca0] sm:$0xff]  ;;  %v4612_v17 = vld [vmem:[#allocation4 + $0xcb8] sm:$0xff] }
 0x435   :  { %9917 = vmatpush3.bf16.msra.mxu0 %v9916_v45  ;;  %9749 = vmatpush1.bf16.msra.mxu1 %v9748_v54  ;;  %v9754_v45 = vpack.c.bf16 %v3931_v28, %v3928_v22  ;;  %v4654_v54 = vld [vmem:[#allocation4 + $0xe08] sm:$0xff]  ;;  %v3933_v22 = vld [vmem:[#allocation4 + $0xa80] sm:$0xff]  ;;  %v3936_v28 = vld [vmem:[#allocation4 + $0xa98] sm:$0xff] }
 0x436   :  { %9116 = vmatprep.mubr.msk.f32.mxu0 %vm2835_vm8, %v13144_v35  ;;  %9919 = vmatprep.subr.bf16.mxu0 %v9918_v52  ;;  %v9926_v52 = vpack.c.bf16 %v4654_v54, %v4651_v33  ;;  %v3939_v33 = vld [vmem:[#allocation4 + $0xab0] sm:$0xff] }
 0x437   :  { %9751 = vmatprep.subr.bf16.mxu1 %v9750_v43  ;;  %v4660_v43 = vld [vmem:[#allocation4 + $0xe38] sm:$0xff]  ;;  %v4663_v54 = vld [vmem:[#allocation4 + $0xe50] sm:$0xff] }
 0x438   :  { %9117 = vmatmul.mubr.msk.f32.gmra.mrb[56].mxu0 %vm2835_vm8, %v13134_v49 }
 0x439   :  { %9921 = vmatpush3.bf16.msra.mxu0 %v9920_v0  ;;  %9753 = vmatpush1.bf16.msra.mxu1 %v9752_v11  ;;  %v9928_v0 = vpack.c.bf16 %v4606_v61, %v4603_v8  ;;  %v9930_v11 = vpack.c.bf16 %v4660_v43, %v4657_v34  ;;  %v3945_v34 = vld [vmem:[#allocation4 + $0xae0] sm:$0xff]  ;;  %v3952_v43 = vld [vmem:[#allocation4 + $0xb18] sm:$0xff] }
 0x43a   :  { %5096 = vmatprep.mubr.f32.mxu0 %v14221_v53  ;;  %9923 = vmatprep.subr.bf16.mxu0 %v9922_v59  ;;  %v9760_v59 = vpack.c.bf16 %v3936_v28, %v3933_v22  ;;  %v3955_v22 = vld [vmem:[#allocation4 + $0xb30] sm:$0xff]  ;;  %v9768_v28 = vpack.c.bf16 %v3948_v29, %v3945_v34  ;;  %v4681_v34 = vld [vmem:[#allocation4 + $0xee0] sm:$0xff]  ;;  %v4684_v29 = vld [vmem:[#allocation4 + $0xef8] sm:$0xff] }
 0x43b   :  { %9755 = vmatprep.subr.bf16.mxu1 %v9754_v45  ;;  %v3949_v45 = vld [vmem:[#allocation4 + $0xb00] sm:$0xff] }
 0x43c   :  { %v9766_v61 = vpack.c.bf16 %v3949_v45, %v3946_v63 }
 0x43d   :  { %9925 = vmatpush3.bf16.msra.mxu0 %v9924_v13  ;;  %9757 = vmatpush1.bf16.msra.mxu1 %v9756_v7  ;;  %v9932_v13 = vpack.c.bf16 %v4612_v17, %v4609_v24  ;;  %v9764_v7 = vpack.c.bf16 %v3942_v12, %v3939_v33  ;;  %v9770_v24 = vpack.c.bf16 %v3955_v22, %v3952_v43  ;;  %v3951_v17 = vld [vmem:[#allocation4 + $0xb10] sm:$0xff]  ;;  %v4678_v12 = vld [vmem:[#allocation4 + $0xec8] sm:$0xff] }
 0x43e   :  { %9927 = vmatprep.subr.bf16.mxu0 %v9926_v52  ;;  %9759 = vmatprep.subr.bf16.mxu1 %v9758_v56  ;;  %v9934_v52 = vpack.c.bf16 %v4666_v30, %v4663_v54  ;;  %v4675_v33 = vld [vmem:[#allocation4 + $0xeb0] sm:$0xff]  ;;  %v4566_v54 = vld [vmem:[#allocation4 + $0xb48] sm:$0xff]  ;;  %v14223_v30 = vld [vmem:[#allocation32_spill] sm:$0xff] }
 0x43f   :  { %v5343_v43 = vld [vmem:[#allocation4 + $0x1090] sm:$0xff]  ;;  %v5346_v22 = vld [vmem:[#allocation4 + $0x10a8] sm:$0xff] }
 0x440   :  { %4119 = vmatmul.mubr.f32.vlgmr.msra.gmra.mrb[52].mxu1 %v14195_v27  ;;  %v4672_v27 = vld [vmem:[#allocation4 + $0xe98] sm:$0xff] }
 0x441   :  { %9929 = vmatpush3.bf16.msra.mxu0 %v9928_v0  ;;  %4124 = vmatprep.mubr.f32.mxu1 %v14196_v9  ;;  %v8387_v8 = vpop.f32.mrb[28].mxu0 }
 0x442   :  { %9931 = vmatprep.subr.bf16.mxu0 %v9930_v11  ;;  %9761 = vmatpush1.bf16.msra.mxu1 %v9760_v59  ;;  %v8388_v56 = vpop.f32.mrb[29].mxu0  ;;  %v9938_v11 = vpack.c.bf16 %v4672_v27, %v4669_v62  ;;  %v3954_v59 = vld [vmem:[#allocation4 + $0xb28] sm:$0xff]  ;;  %v14225_v62 = vld [vmem:[#allocation36_spill] sm:$0xff] }
 0x443   :  { %9763 = vmatprep.subr.bf16.mxu1 %v9762_v16  ;;  %v13155_v9 = vadd.f32 %v8388_v56, %v8387_v8  ;;  %v9772_v45 = vpack.c.bf16 %v3954_v59, %v3951_v17  ;;  %v9946_v56 = vpack.c.bf16 %v4684_v29, %v4681_v34  ;;  %v14226_v27 = vld [vmem:[#allocation37_spill] sm:$0xff]  ;;  %v4565_v34 = vld [vmem:[#allocation4 + $0xb40] sm:$0xff]  ;;  %v4568_v29 = vld [vmem:[#allocation4 + $0xb58] sm:$0xff] }
 0x444   :  { %4125 = vmatmul.mubr.f32.gmra.mrb[54].mxu1 %v14197_v25  ;;  %v14222_v25 = vld [vmem:[#allocation28_spill] sm:$0xff]  ;;  %v14229_v59 = vld [vmem:[#allocation45_spill] sm:$0xff] }
 0x445   :  { %9933 = vmatpush3.bf16.msra.mxu0 %v9932_v13  ;;  %4130 = vmatprep.mubr.f32.mxu1 %v14198_v57  ;;  %v8390_v0 = vpop.f32.mrb[30].mxu0  ;;  %v4569_v57 = vld [vmem:[#allocation4 + $0xb60] sm:$0xff] }
 0x446   :  { %9765 = vmatpush1.bf16.msra.mxu1 %v9764_v7  ;;  %9935 = vmatprep.subr.bf16.mxu0 %v9934_v52  ;;  %v8391_v16 = vpop.f32.mrb[31].mxu0  ;;  %v9942_v7 = vpack.c.bf16 %v4678_v12, %v4675_v33  ;;  %v9822_v8 = vpack.c.bf16 %v4569_v57, %v4566_v54  ;;  %v14231_v12 = vld [vmem:[#allocation50_spill] sm:$0xff]  ;;  %v14232_v57 = vld [vmem:[#allocation51_spill] sm:$0xff] }
 0x447   :  { %9767 = vmatprep.subr.bf16.mxu1 %v9766_v61  ;;  %v13161_v63 = vadd.f32 %v8391_v16, %v8390_v0  ;;  %v14224_v61 = vld [vmem:[#allocation33_spill] sm:$0xff] }
 0x448   :  { %5097 = vmatmul.mubr.f32.vlgmr.msra.gmra.mrb[98].mxu0 %v14222_v25  ;;  %4131 = vmatmul.mubr.f32.gmra.mrb[56].mxu1 %v14199_v60 }
 0x449   :  { %5101 = vmatprep.mubr.f32.mxu0 %v14223_v30  ;;  %4136 = vmatprep.mubr.f32.mxu1 %v14200_v3  ;;  %v8393_v13 = vpop.f32.mrb[32].mxu0 }
 0x44a   :  { %9769 = vmatpush1.bf16.msra.mxu1 %v9768_v28  ;;  %9937 = vmatpush3.bf16.msra.mxu0 %v9934_v52  ;;  %v8394_v60 = vpop.f32.mrb[33].mxu0  ;;  %v14227_v28 = vld [vmem:[#allocation41_spill] sm:$0xff] }
 0x44b   :  { %9939 = vmatprep.subr.bf16.mxu0 %v9938_v11  ;;  %9771 = vmatprep.subr.bf16.mxu1 %v9770_v24  ;;  %v13167_v3 = vadd.f32 %v8394_v60, %v8393_v13  ;;  %v14228_v24 = vld [vmem:[#allocation43_spill] sm:$0xff]  ;;  %v14236_v60 = vld [vmem:[#allocation60_spill] sm:$0xff] }
 0x44c   :  { %5102 = vmatmul.mubr.f32.gmra.mrb[100].mxu0 %v14224_v61  ;;  %4137 = vmatmul.mubr.f32.gmra.mrb[58].mxu1 %v14201_v15 }
 0x44d   :  { %5106 = vmatprep.mubr.f32.mxu0 %v14225_v62  ;;  %4142 = vmatprep.mubr.f32.mxu1 %v14202_v4  ;;  %v8396_v52 = vpop.f32.mrb[34].mxu0 }
 0x44e   :  { %9941 = vmatpush3.bf16.msra.mxu0 %v9938_v11  ;;  %9773 = vmatpush1.bf16.msra.mxu1 %v9772_v45  ;;  %v8397_v15 = vpop.f32.mrb[35].mxu0  ;;  %v10030_v11 = vpack.c.bf16 %v5346_v22, %v5343_v43  ;;  %v14233_v45 = vld [vmem:[#allocation55_spill] sm:$0xff]  ;;  %v14238_v43 = vld [vmem:[#allocation61_spill] sm:$0xff] }
 0x44f   :  { %9943 = vmatprep.subr.bf16.mxu0 %v9942_v7  ;;  %9823 = vmatprep.subr.bf16.mxu1 %v9822_v8  ;;  %v13173_v4 = vadd.f32 %v8397_v15, %v8396_v52  ;;  %v13196_v8 = vrot.slane %v12618_v58, 3  ;;  %v13203_v52 = vrot.slane %v12605_v50, 3  ;;  %v4575_v15 = vld [vmem:[#allocation4 + $0xb90] sm:$0xff] }
 0x450   :  { %5107 = vmatmul.mubr.f32.gmra.mrb[102].mxu0 %v14226_v27  ;;  %4143 = vmatmul.mubr.f32.gmra.mrb[60].mxu1 %v14203_v23 }
 0x451   :  { %5111 = vmatprep.mubr.f32.mxu0 %v14227_v28  ;;  %4148 = vmatprep.mubr.f32.mxu1 %v14204_v32  ;;  %v8399_v0 = vpop.f32.mrb[36].mxu0  ;;  %v14230_v32 = vld [vmem:[#allocation46_spill] sm:$0xff]  ;;  %14235 = vst [vmem:[#allocation77_spill] sm:$0xff] %v13196_v8  ;;  %14237 = vst [vmem:[#allocation26_spill] sm:$0xff] %v13203_v52 }
 0x452   :  { %9945 = vmatpush3.bf16.msra.mxu0 %v9942_v7  ;;  %v8400_v17 = vpop.f32.mrb[37].mxu0  ;;  %v14234_v7 = vld [vmem:[#allocation56_spill] sm:$0xff] }
 0x453   :  { %9947 = vmatprep.subr.bf16.mxu0 %v9946_v56  ;;  %v13179_v23 = vadd.f32 %v8400_v17, %v8399_v0 }
 0x454   :  { %5112 = vmatmul.mubr.f32.gmra.mrb[104].mxu0 %v14228_v24  ;;  %4149 = vmatmul.mubr.f32.gmra.mrb[62].mxu1 %v14205_v40 }
 0x455   :  { %5116 = vmatprep.mubr.f32.mxu0 %v14229_v59  ;;  %4154 = vmatprep.mubr.f32.mxu1 %v14206_v6  ;;  %v8402_v33 = vpop.f32.mrb[38].mxu0 }
 0x456   :  { %9949 = vmatpush3.bf16.msra.mxu0 %v9946_v56  ;;  %v8403_v16 = vpop.f32.mrb[39].mxu0  ;;  %v4572_v56 = vld [vmem:[#allocation4 + $0xb78] sm:$0xff] }
 0x457   :  { %10031 = vmatprep.subr.bf16.mxu0 %v10030_v11  ;;  %v13185_v40 = vadd.f32 %v8403_v16, %v8402_v33  ;;  %v9824_v11 = vpack.c.bf16 %v4568_v29, %v4565_v34  ;;  %v9826_v17 = vpack.c.bf16 %v4575_v15, %v4572_v56  ;;  %v4571_v33 = vld [vmem:[#allocation4 + $0xb70] sm:$0xff]  ;;  %v4574_v16 = vld [vmem:[#allocation4 + $0xb88] sm:$0xff] }
 0x458   :  { %5117 = vmatmul.mubr.f32.gmra.mrb[106].mxu0 %v14230_v32  ;;  %4155 = vmatmul.mubr.f32.gmra.mrb[64].mxu1 %v14207_v42  ;;  %v9828_v29 = vpack.c.bf16 %v4574_v16, %v4571_v33  ;;  %v5295_v56 = vld [vmem:[#allocation4 + $0xf10] sm:$0xff] }
 0x459   :  { %5121 = vmatprep.mubr.f32.mxu0 %v14231_v12  ;;  %4160 = vmatprep.mubr.f32.mxu1 %v14208_v1  ;;  %v8405_v54 = vpop.f32.mrb[40].mxu0 }
 0x45a   :  { %v8406_v6 = vpop.f32.mrb[41].mxu0 }
 0x45b   :  { %v13191_v13 = vadd.f32 %v8406_v6, %v8405_v54 }
 0x45c   :  { %5122 = vmatmul.mubr.f32.gmra.mrb[108].mxu0 %v14232_v57  ;;  %4161 = vmatmul.mubr.f32.gmra.mrb[66].mxu1 %v14209_v5 }
 0x45d   :  { %5126 = vmatprep.mubr.f32.mxu0 %v14233_v45  ;;  %4166 = vmatprep.mubr.f32.mxu1 %v13102_v10  ;;  %v8408_v42 = vpop.f32.mrb[42].mxu0 }
 0x45e   :  { %v8409_v1 = vpop.f32.mrb[43].mxu0 }
 0x45f   :  { %v13200_v5 = vadd.f32 %v8409_v1, %v8408_v42  ;;  %v4578_v42 = vld [vmem:[#allocation4 + $0xba8] sm:$0xff]  ;;  %v4581_v1 = vld [vmem:[#allocation4 + $0xbc0] sm:$0xff] }
 0x460   :  { %5127 = vmatmul.mubr.f32.gmra.mrb[110].mxu0 %v14234_v7  ;;  %4167 = vmatmul.mubr.f32.gmra.mrb[68].mxu1 %v13110_v31  ;;  %v14239_v31 = vrot.slane %v12580_v55, 3  ;;  %v9830_v15 = vpack.c.bf16 %v4581_v1, %v4578_v42  ;;  %v5304_v1 = vld [vmem:[#allocation4 + $0xf58] sm:$0xff] }
 0x461   :  { %5131 = vmatprep.mubr.f32.mxu0 %v14236_v60  ;;  %4172 = vmatprep.mubr.f32.mxu1 %v13088_v41  ;;  %v8411_v10 = vpop.f32.mrb[44].mxu0  ;;  %v5358_v60 = vld [vmem:[#allocation4 + $0x1108] sm:$0xff]  ;;  %v14246_v7 = vld [vmem:[#allocation75_spill] sm:$0xff] }
 0x462   :  { %v13211_v22 = vsel %vm1301_vm6, %v14239_v31, %v13196_v8  ;;  %v8412_v41 = vpop.f32.mrb[45].mxu0  ;;  %v5298_v31 = vld [vmem:[#allocation4 + $0xf28] sm:$0xff] }
 0x463   :  { %14240 = vst [vmem:[#allocation25_spill] sm:$0xff] %v13211_v22  ;;  %v13214_v0 = vadd.f32 %v8412_v41, %v8411_v10  ;;  %v4577_v41 = vld [vmem:[#allocation4 + $0xba0] sm:$0xff]  ;;  %v10032_v33 = vpack.c.bf16 %v5298_v31, %v5295_v56 }
 0x464   :  { %5132 = vmatmul.mubr.f32.gmra.mrb[112].mxu0 %v14238_v43  ;;  %4173 = vmatmul.mubr.f32.gmra.mrb[70].mxu1 %v13093_v37  ;;  %v14241_v37 = vrot.slane %v12571_v20, 3  ;;  %v5355_v43 = vld [vmem:[#allocation4 + $0x10f0] sm:$0xff]  ;;  %v4593_v56 = vld [vmem:[#allocation4 + $0xc20] sm:$0xff] }
 0x465   :  { %5136 = vmatprep.mubr.f32.mxu0 %v13211_v22  ;;  %4243 = vmatprep.mubr.f32.mxu1 %v14153_v44  ;;  %v8414_v6 = vpop.f32.mrb[46].mxu0  ;;  %v5349_v22 = vld [vmem:[#allocation4 + $0x10c0] sm:$0xff] }
 0x466   :  { %v13221_v54 = vsel %vm1301_vm6, %v14241_v37, %v13203_v52  ;;  %v8415_v10 = vpop.f32.mrb[47].mxu0  ;;  %v4580_v37 = vld [vmem:[#allocation4 + $0xbb8] sm:$0xff] }
 0x467   :  { %14242 = vst [vmem:[#allocation31_spill] sm:$0xff] %v13221_v54  ;;  %v13227_v34 = vadd.f32 %v8415_v10, %v8414_v6  ;;  %v14243_v6 = vld [vmem:[#allocation65_spill] sm:$0xff]  ;;  %v9832_v16 = vpack.c.bf16 %v4580_v37, %v4577_v41  ;;  %v4583_v10 = vld [vmem:[#allocation4 + $0xbd0] sm:$0xff] }
 0x468   :  { %5137 = vmatmul.mubr.f32.gmra.mrb[114].mxu0 %v13221_v54  ;;  %8160 = vmatmul.mubr.msk.f32.vlgmr.msra.gmra.mrb[52].mxu1 %vm2835_vm8, %v14212_v39  ;;  %v5352_v54 = vld [vmem:[#allocation4 + $0x10d8] sm:$0xff]  ;;  %v5310_v37 = vld [vmem:[#allocation4 + $0xf88] sm:$0xff] }
 0x469   :  { %9825 = vmatpush1.bf16.msra.mxu1 %v9824_v11  ;;  %5141 = vmatprep.mubr.f32.mxu0 %v13196_v8  ;;  %v4584_v39 = vld [vmem:[#allocation4 + $0xbd8] sm:$0xff]  ;;  %v4587_v11 = vld [vmem:[#allocation4 + $0xbf0] sm:$0xff]  ;;  %v10034_v42 = vpack.c.bf16 %v5352_v54, %v5349_v22  ;;  %v4586_v8 = vld [vmem:[#allocation4 + $0xbe8] sm:$0xff]  ;;  %v10038_v54 = vpack.c.bf16 %v5358_v60, %v5355_v43 }
 0x46a   :  { %4249 = vmatprep.mubr.f32.mxu1 %v14153_v44  ;;  %9827 = vmatprep.subr.bf16.mxu1 %v9826_v17  ;;  %v5301_v17 = vld [vmem:[#allocation4 + $0xf40] sm:$0xff]  ;;  %v9836_v41 = vpack.c.bf16 %v4586_v8, %v4583_v10  ;;  %v14245_v22 = vld [vmem:[#allocation71_spill] sm:$0xff]  ;;  %v4598_v10 = vld [vmem:[#allocation4 + $0xc48] sm:$0xff] }
 0x46b   :  { %v10036_v31 = vpack.c.bf16 %v5304_v1, %v5301_v17  ;;  %v4596_v8 = vld [vmem:[#allocation4 + $0xc38] sm:$0xff]  ;;  %v14247_v17 = vld [vmem:[#allocation76_spill] sm:$0xff]  ;;  %v4595_v1 = vld [vmem:[#allocation4 + $0xc30] sm:$0xff] }
 0x46c   :  { %5142 = vmatmul.mubr.f32.gmra.mrb[116].mxu0 %v13203_v52  ;;  %8161 = vmatmul.mubr.msk.f32.gmra.mrb[54].mxu1 %vm2835_vm8, %v14213_v2  ;;  %v9834_v52 = vpack.c.bf16 %v4587_v11, %v4584_v39  ;;  %v14244_v2 = vld [vmem:[#allocation70_spill] sm:$0xff]  ;;  %v4589_v39 = vld [vmem:[#allocation4 + $0xc00] sm:$0xff]  ;;  %v4592_v11 = vld [vmem:[#allocation4 + $0xc18] sm:$0xff] }
 0x46d   :  { %9829 = vmatpush1.bf16.msra.mxu1 %v9828_v29  ;;  %9135 = vmatprep.mubr.msk.f32.mxu0 %vm2835_vm8, %v14243_v6  ;;  %v4590_v29 = vld [vmem:[#allocation4 + $0xc08] sm:$0xff]  ;;  %v5364_v6 = vld [vmem:[#allocation4 + $0x1138] sm:$0xff]  ;;  %v9840_v43 = vpack.c.bf16 %v4592_v11, %v4589_v39 }
 0x46e   :  { %4255 = vmatprep.mubr.f32.mxu1 %v14153_v44  ;;  %9831 = vmatprep.subr.bf16.mxu1 %v9830_v15  ;;  %v5307_v15 = vld [vmem:[#allocation4 + $0xf70] sm:$0xff]  ;;  %v5322_v11 = vld [vmem:[#allocation4 + $0xfe8] sm:$0xff] }
 0x46f   :  { %v10040_v60 = vpack.c.bf16 %v5310_v37, %v5307_v15  ;;  %v9844_v15 = vpack.c.bf16 %v4598_v10, %v4595_v1  ;;  %v5319_v37 = vld [vmem:[#allocation4 + $0xfd0] sm:$0xff] }
 0x470   :  { %9136 = vmatmul.mubr.msk.f32.vlgmr.msra.gmra.mrb[48].mxu0 %vm2835_vm8, %v14244_v2  ;;  %8162 = vmatmul.mubr.msk.f32.gmra.mrb[56].mxu1 %vm2835_vm8, %v14214_v18  ;;  %v9838_v2 = vpack.c.bf16 %v4593_v56, %v4590_v29  ;;  %v5361_v18 = vld [vmem:[#allocation4 + $0x1120] sm:$0xff]  ;;  %v5370_v56 = vld [vmem:[#allocation4 + $0x1168] sm:$0xff]  ;;  %v10048_v1 = vpack.c.bf16 %v5322_v11, %v5319_v37 }
 0x471   :  { %10033 = vmatpush3.bf16.msra.mxu0 %v10032_v33  ;;  %9833 = vmatpush1.bf16.msra.mxu1 %v9832_v16  ;;  %v4599_v33 = vld [vmem:[#allocation4 + $0xc50] sm:$0xff]  ;;  %v5313_v16 = vld [vmem:[#allocation4 + $0xfa0] sm:$0xff]  ;;  %v4614_v37 = vld [vmem:[#allocation4 + $0xcc8] sm:$0xff] }
 0x472   :  { %9138 = vmatprep.mubr.msk.f32.mxu0 %vm2835_vm8, %v14245_v22  ;;  %10035 = vmatprep.subr.bf16.mxu0 %v10034_v42  ;;  %v5316_v42 = vld [vmem:[#allocation4 + $0xfb8] sm:$0xff]  ;;  %v9842_v29 = vpack.c.bf16 %v4599_v33, %v4596_v8  ;;  %v5373_v33 = vld [vmem:[#allocation4 + $0x1180] sm:$0xff] }
 0x473   :  { %4261 = vmatprep.mubr.f32.mxu1 %v14153_v44  ;;  %9835 = vmatprep.subr.bf16.mxu1 %v9834_v52  ;;  %v10042_v52 = vpack.c.bf16 %v5364_v6, %v5361_v18  ;;  %v10044_v6 = vpack.c.bf16 %v5316_v42, %v5313_v16  ;;  %v4601_v18 = vld [vmem:[#allocation4 + $0xc60] sm:$0xff]  ;;  %v4604_v8 = vld [vmem:[#allocation4 + $0xc78] sm:$0xff]  ;;  %v4611_v16 = vld [vmem:[#allocation4 + $0xcb0] sm:$0xff] }
 0x474   :  { %9139 = vmatmul.mubr.msk.f32.gmra.mrb[50].mxu0 %vm2835_vm8, %v14246_v7  ;;  %8163 = vmatmul.mubr.msk.f32.gmra.mrb[58].mxu1 %vm2835_vm8, %v14215_v46  ;;  %v5367_v46 = vld [vmem:[#allocation4 + $0x1150] sm:$0xff]  ;;  %v14248_v7 = vld [vmem:[#allocation80_spill] sm:$0xff]  ;;  %v9848_v10 = vpack.c.bf16 %v4604_v8, %v4601_v18 }
 0x475   :  { %10037 = vmatpush3.bf16.msra.mxu0 %v10036_v31  ;;  %9837 = vmatpush1.bf16.msra.mxu1 %v9836_v41  ;;  %v4602_v31 = vld [vmem:[#allocation4 + $0xc68] sm:$0xff]  ;;  %v4605_v41 = vld [vmem:[#allocation4 + $0xc80] sm:$0xff]  ;;  %v10046_v39 = vpack.c.bf16 %v5370_v56, %v5367_v46  ;;  %v5328_v56 = vld [vmem:[#allocation4 + $0x1018] sm:$0xff] }
 0x476   :  { %9141 = vmatprep.mubr.msk.f32.mxu0 %vm2835_vm8, %v14247_v17  ;;  %10039 = vmatprep.subr.bf16.mxu0 %v10038_v54  ;;  %v13255_v54 = vrot.slane %v14193_v48, 3  ;;  %v4617_v11 = vld [vmem:[#allocation4 + $0xce0] sm:$0xff]  ;;  %v5331_v8 = vld [vmem:[#allocation4 + $0x1030] sm:$0xff] }
 0x477   :  { %4267 = vmatprep.mubr.f32.mxu1 %v14153_v44  ;;  %9839 = vmatprep.subr.bf16.mxu1 %v9838_v2  ;;  %v14250_v2 = vld [vmem:[#allocation81_spill] sm:$0xff] }
 0x478   :  { %9142 = vmatmul.mubr.msk.f32.gmra.mrb[52].mxu0 %vm2835_vm8, %v14248_v7  ;;  %8164 = vmatmul.mubr.msk.f32.gmra.mrb[60].mxu1 %vm2835_vm8, %v14216_v36  ;;  %14249 = vst [vmem:[#allocation29_spill] sm:$0xff] %v13255_v54  ;;  %v9846_v36 = vpack.c.bf16 %v4605_v41, %v4602_v31  ;;  %v4610_v31 = vld [vmem:[#allocation4 + $0xca8] sm:$0xff] }
 0x479   :  { %10041 = vmatpush3.bf16.msra.mxu0 %v10040_v60  ;;  %9841 = vmatpush1.bf16.msra.mxu1 %v9840_v43  ;;  %v5376_v60 = vld [vmem:[#allocation4 + $0x1198] sm:$0xff] }
 0x47a   :  { %9144 = vmatprep.mubr.msk.f32.mxu0 %vm2835_vm8, %v14250_v2  ;;  %10043 = vmatprep.subr.bf16.mxu0 %v10042_v52  ;;  %v4608_v43 = vld [vmem:[#allocation4 + $0xc98] sm:$0xff]  ;;  %v14251_v52 = vrot.slane %v12850_v51, 3  ;;  %v10050_v46 = vpack.c.bf16 %v5376_v60, %v5373_v33  ;;  %v14252_v33 = vld [vmem:[#allocation30_spill] sm:$0xff]  ;;  %v5334_v60 = vld [vmem:[#allocation4 + $0x1048] sm:$0xff] }
 0x47b   :  { %4273 = vmatprep.mubr.f32.mxu1 %v14153_v44  ;;  %9843 = vmatprep.subr.bf16.mxu1 %v9842_v29  ;;  %v5325_v29 = vld [vmem:[#allocation4 + $0x1000] sm:$0xff]  ;;  %v9850_v41 = vpack.c.bf16 %v4611_v16, %v4608_v43  ;;  %v4616_v16 = vld [vmem:[#allocation4 + $0xcd8] sm:$0xff] }
 0x47c   :  { %9145 = vmatmul.mubr.msk.f32.gmra.mrb[54].mxu0 %vm2835_vm8, %v12905_v38  ;;  %8165 = vmatmul.mubr.msk.f32.gmra.mrb[62].mxu1 %vm2835_vm8, %v14217_v47  ;;  %v13268_v42 = vsel %vm1301_vm6, %v14251_v52, %v13255_v54  ;;  %v4607_v47 = vld [vmem:[#allocation4 + $0xc90] sm:$0xff]  ;;  %v4613_v43 = vld [vmem:[#allocation4 + $0xcc0] sm:$0xff]  ;;  %v9854_v52 = vpack.c.bf16 %v4617_v11, %v4614_v37  ;;  %v4626_v37 = vld [vmem:[#allocation4 + $0xd28] sm:$0xff] }
 0x47d   :  { %10045 = vmatpush3.bf16.msra.mxu0 %v10044_v6  ;;  %9845 = vmatpush1.bf16.msra.mxu1 %v9844_v15  ;;  %v5379_v6 = vld [vmem:[#allocation4 + $0x11b0] sm:$0xff]  ;;  %v5382_v15 = vld [vmem:[#allocation4 + $0x11c8] sm:$0xff]  ;;  %v9852_v18 = vpack.c.bf16 %v4610_v31, %v4607_v47  ;;  %v5340_v31 = vld [vmem:[#allocation4 + $0x1078] sm:$0xff] }
 0x47e   :  { %9147 = vmatprep.mubr.msk.f32.mxu0 %vm2835_vm8, %v13268_v42  ;;  %10047 = vmatprep.subr.bf16.mxu0 %v10046_v39  ;;  %v10052_v39 = vpack.c.bf16 %v5328_v56, %v5325_v29  ;;  %v10056_v29 = vpack.c.bf16 %v5334_v60, %v5331_v8  ;;  %v9856_v56 = vpack.c.bf16 %v4616_v16, %v4613_v43  ;;  %v4629_v11 = vld [vmem:[#allocation4 + $0xd40] sm:$0xff]  ;;  %v4628_v60 = vld [vmem:[#allocation4 + $0xd38] sm:$0xff] }
 0x47f   :  { %4279 = vmatprep.mubr.f32.mxu1 %v14153_v44  ;;  %9847 = vmatprep.subr.bf16.mxu1 %v9846_v36  ;;  %v10054_v36 = vpack.c.bf16 %v5382_v15, %v5379_v6  ;;  %v4619_v6 = vld [vmem:[#allocation4 + $0xcf0] sm:$0xff]  ;;  %v4632_v16 = vld [vmem:[#allocation4 + $0xd58] sm:$0xff] }
 0x480   :  { %9148 = vmatmul.mubr.msk.f32.gmra.mrb[56].mxu0 %vm2835_vm8, %v13255_v54  ;;  %8166 = vmatmul.mubr.msk.f32.gmra.mrb[64].mxu1 %vm2835_vm8, %v14218_v26  ;;  %v5385_v54 = vld [vmem:[#allocation4 + $0x11e0] sm:$0xff]  ;;  %v5388_v26 = vld [vmem:[#allocation4 + $0x11f8] sm:$0xff] }
 0x481   :  { %10049 = vmatpush3.bf16.msra.mxu0 %v10048_v1  ;;  %9849 = vmatpush1.bf16.msra.mxu1 %v9848_v10  ;;  %v4620_v1 = vld [vmem:[#allocation4 + $0xcf8] sm:$0xff]  ;;  %v4623_v10 = vld [vmem:[#allocation4 + $0xd10] sm:$0xff]  ;;  %v10058_v47 = vpack.c.bf16 %v5388_v26, %v5385_v54  ;;  %v9862_v54 = vpack.c.bf16 %v4629_v11, %v4626_v37  ;;  %v4641_v37 = vld [vmem:[#allocation4 + $0xda0] sm:$0xff] }
 0x482   :  { %5824 = vmatprep.mubr.f32.mxu0 %v14252_v33  ;;  %10051 = vmatprep.subr.bf16.mxu0 %v10050_v46  ;;  %v5337_v46 = vld [vmem:[#allocation4 + $0x1060] sm:$0xff]  ;;  %v9858_v15 = vpack.c.bf16 %v4623_v10, %v4620_v1  ;;  %v5400_v10 = vld [vmem:[#allocation4 + $0x1258] sm:$0xff] }
 0x483   :  { %4285 = vmatprep.mubr.f32.mxu1 %v14153_v44  ;;  %9851 = vmatprep.subr.bf16.mxu1 %v9850_v41  ;;  %v4622_v41 = vld [vmem:[#allocation4 + $0xd08] sm:$0xff]  ;;  %v5397_v1 = vld [vmem:[#allocation4 + $0x1240] sm:$0xff]  ;;  %v14253_v11 = vld [vmem:[#allocation39_spill] sm:$0xff] }
 0x484   :  { %8167 = vmatmul.mubr.msk.f32.gmra.mrb[66].mxu1 %vm2835_vm8, %v14219_v19  ;;  %v5391_v19 = vld [vmem:[#allocation4 + $0x1210] sm:$0xff]  ;;  %v9860_v8 = vpack.c.bf16 %v4622_v41, %v4619_v6 }
 0x485   :  { %10053 = vmatpush3.bf16.msra.mxu0 %v10052_v39  ;;  %9853 = vmatpush1.bf16.msra.mxu1 %v9852_v18  ;;  %v5394_v39 = vld [vmem:[#allocation4 + $0x1228] sm:$0xff]  ;;  %v10060_v18 = vpack.c.bf16 %v5340_v31, %v5337_v46 }
 0x486   :  { %10055 = vmatprep.subr.bf16.mxu0 %v10054_v36  ;;  %4291 = vmatprep.mubr.f32.mxu1 %v14153_v44  ;;  %v4625_v36 = vld [vmem:[#allocation4 + $0xd20] sm:$0xff]  ;;  %v10062_v26 = vpack.c.bf16 %v5394_v39, %v5391_v19  ;;  %v4634_v31 = vld [vmem:[#allocation4 + $0xd68] sm:$0xff]  ;;  %v5403_v39 = vld [vmem:[#allocation4 + $0x1270] sm:$0xff] }
 0x487   :  { %9855 = vmatprep.subr.bf16.mxu1 %v9854_v52  ;;  %v4635_v52 = vld [vmem:[#allocation4 + $0xd70] sm:$0xff] }
 0x488   :  { %8168 = vmatmul.mubr.msk.f32.gmra.mrb[68].mxu1 %vm2835_vm8, %v13144_v35  ;;  %v9866_v46 = vpack.c.bf16 %v4635_v52, %v4632_v16  ;;  %v4644_v52 = vld [vmem:[#allocation4 + $0xdb8] sm:$0xff] }
 0x489   :  { %10057 = vmatpush3.bf16.msra.mxu0 %v10056_v29  ;;  %9857 = vmatpush1.bf16.msra.mxu1 %v9856_v56  ;;  %v9864_v56 = vpack.c.bf16 %v4628_v60, %v4625_v36  ;;  %v4637_v60 = vld [vmem:[#allocation4 + $0xd80] sm:$0xff] }
 0x48a   :  { %10059 = vmatprep.subr.bf16.mxu0 %v10058_v47  ;;  %4297 = vmatprep.mubr.f32.mxu1 %v14153_v44  ;;  %v4631_v47 = vld [vmem:[#allocation4 + $0xd50] sm:$0xff] }
 0x48b   :  { %9859 = vmatprep.subr.bf16.mxu1 %v9858_v15  ;;  %v8467_v43 = vpop.f32.mrb[58].mxu0  ;;  %v4638_v15 = vld [vmem:[#allocation4 + $0xd88] sm:$0xff] }
 0x48c   :  { %8169 = vmatmul.mubr.msk.f32.gmra.mrb[70].mxu1 %vm2835_vm8, %v13134_v49  ;;  %v8468_v35 = vpop.f32.mrb[59].mxu0  ;;  %v10066_v49 = vpack.c.bf16 %v5400_v10, %v5397_v1  ;;  %v9870_v36 = vpack.c.bf16 %v4641_v37, %v4638_v15  ;;  %v14255_v10 = vld [vmem:[#allocation53_spill] sm:$0xff] }
 0x48d   :  { %10061 = vmatpush3.bf16.msra.mxu0 %v10060_v18  ;;  %9861 = vmatpush1.bf16.msra.mxu1 %v9860_v8  ;;  %v8469_v29 = vadd.f32 %v8468_v35, %v8467_v43  ;;  %v5406_v18 = vld [vmem:[#allocation4 + $0x1288] sm:$0xff]  ;;  %v14254_v8 = vld [vmem:[#allocation48_spill] sm:$0xff]  ;;  %v4647_v35 = vld [vmem:[#allocation4 + $0xdd0] sm:$0xff] }
 0x48e   :  { %4846 = vmatprep.mubr.f32.mxu1 %v14221_v53  ;;  %9863 = vmatprep.subr.bf16.mxu1 %v9862_v54  ;;  %v9868_v54 = vpack.c.bf16 %v4634_v31, %v4631_v47  ;;  %v10070_v1 = vpack.c.bf16 %v5406_v18, %v5403_v39  ;;  %v4643_v31 = vld [vmem:[#allocation4 + $0xdb0] sm:$0xff]  ;;  %v4653_v39 = vld [vmem:[#allocation4 + $0xe00] sm:$0xff] }
 0x48f   :  { %v13289_v6 = vadd.f32 %v8469_v29, %v13155_v9  ;;  %v8470_v41 = vpop.f32.mrb[60].mxu0  ;;  %10063 = vmatprep.subr.bf16.mxu0 %v10062_v26  ;;  %v4640_v9 = vld [vmem:[#allocation4 + $0xd98] sm:$0xff] }
 0x490   :  { %5825 = vmatmul.mubr.f32.vlgmr.msra.gmra.mrb[118].mxu0 %v14253_v11  ;;  %v8471_v19 = vpop.f32.mrb[61].mxu0  ;;  %v9872_v47 = vpack.c.bf16 %v4640_v9, %v4637_v60  ;;  %v4649_v9 = vld [vmem:[#allocation4 + $0xde0] sm:$0xff] }
 0x491   :  { %5829 = vmatprep.mubr.f32.mxu0 %v14254_v8  ;;  %9865 = vmatpush1.bf16.msra.mxu1 %v9864_v56  ;;  %v8472_v53 = vadd.f32 %v8471_v19, %v8470_v41  ;;  %v5409_v8 = vld [vmem:[#allocation4 + $0x12a0] sm:$0xff]  ;;  %v5412_v56 = vld [vmem:[#allocation4 + $0x12b8] sm:$0xff]  ;;  %v14256_v41 = vld [vmem:[#allocation58_spill] sm:$0xff] }
 0x492   :  { %9867 = vmatprep.subr.bf16.mxu1 %v9866_v46  ;;  %10065 = vmatpush3.bf16.msra.mxu0 %v10062_v26  ;;  %v9874_v26 = vpack.c.bf16 %v4647_v35, %v4644_v52  ;;  %v4650_v19 = vld [vmem:[#allocation4 + $0xde8] sm:$0xff]  ;;  %v10074_v18 = vpack.c.bf16 %v5412_v56, %v5409_v8  ;;  %v4656_v52 = vld [vmem:[#allocation4 + $0xe18] sm:$0xff]  ;;  %v4659_v35 = vld [vmem:[#allocation4 + $0xe30] sm:$0xff] }
 0x493   :  { %v13294_v43 = vadd.f32 %v8472_v53, %v13161_v63  ;;  %v8473_v16 = vpop.f32.mrb[62].mxu0  ;;  %10067 = vmatprep.subr.bf16.mxu0 %v10066_v49  ;;  %v4646_v63 = vld [vmem:[#allocation4 + $0xdc8] sm:$0xff]  ;;  %v14257_v53 = vld [vmem:[#allocation62_spill] sm:$0xff]  ;;  %v9878_v60 = vpack.c.bf16 %v4653_v39, %v4650_v19  ;;  %v14260_v56 = vld [vmem:[#allocation67_spill] sm:$0xff] }
 0x494   :  { %5830 = vmatmul.mubr.f32.gmra.mrb[120].mxu0 %v14255_v10  ;;  %v8474_v29 = vpop.f32.mrb[63].mxu0  ;;  %v14259_v8 = vld [vmem:[#allocation66_spill] sm:$0xff]  ;;  %v14261_v19 = vld [vmem:[#allocation72_spill] sm:$0xff] }
 0x495   :  { %5834 = vmatprep.mubr.f32.mxu0 %v14256_v41  ;;  %9869 = vmatpush1.bf16.msra.mxu1 %v9868_v54  ;;  %v8475_v46 = vadd.f32 %v8474_v29, %v8473_v16  ;;  %v14258_v41 = vld [vmem:[#allocation63_spill] sm:$0xff] }
 0x496   :  { %9871 = vmatprep.subr.bf16.mxu1 %v9870_v36  ;;  %10069 = vmatpush3.bf16.msra.mxu0 %v10066_v49  ;;  %v9876_v36 = vpack.c.bf16 %v4646_v63, %v4643_v31  ;;  %v4652_v49 = vld [vmem:[#allocation4 + $0xdf8] sm:$0xff]  ;;  %v4658_v31 = vld [vmem:[#allocation4 + $0xe28] sm:$0xff] }
 0x497   :  { %v13299_v15 = vadd.f32 %v8475_v46, %v13167_v3  ;;  %v8476_v37 = vpop.f32.mrb[64].mxu0  ;;  %10071 = vmatprep.subr.bf16.mxu0 %v10070_v1  ;;  %v9880_v46 = vpack.c.bf16 %v4652_v49, %v4649_v9  ;;  %v4662_v63 = vld [vmem:[#allocation4 + $0xe48] sm:$0xff]  ;;  %v4661_v49 = vld [vmem:[#allocation4 + $0xe40] sm:$0xff] }
 0x498   :  { %5835 = vmatmul.mubr.f32.gmra.mrb[122].mxu0 %v14257_v53  ;;  %v8477_v10 = vpop.f32.mrb[65].mxu0 }
 0x499   :  { %5839 = vmatprep.mubr.f32.mxu0 %v14258_v41  ;;  %9873 = vmatpush1.bf16.msra.mxu1 %v9872_v47  ;;  %v8478_v54 = vadd.f32 %v8477_v10, %v8476_v37  ;;  %v9882_v47 = vpack.c.bf16 %v4659_v35, %v4656_v52  ;;  %v4665_v37 = vld [vmem:[#allocation4 + $0xe60] sm:$0xff] }
 0x49a   :  { %9875 = vmatprep.subr.bf16.mxu1 %v9874_v26  ;;  %10073 = vmatpush3.bf16.msra.mxu0 %v10070_v1  ;;  %v4655_v26 = vld [vmem:[#allocation4 + $0xe10] sm:$0xff]  ;;  %v14263_v52 = vld [vmem:[#allocation84_spill] sm:$0xff] }
 0x49b   :  { %v13304_v3 = vadd.f32 %v8478_v54, %v13173_v4  ;;  %v8479_v16 = vpop.f32.mrb[66].mxu0  ;;  %10075 = vmatprep.subr.bf16.mxu0 %v10074_v18  ;;  %v14262_v54 = vld [vmem:[#allocation83_spill] sm:$0xff] }
 0x49c   :  { %5840 = vmatmul.mubr.f32.gmra.mrb[124].mxu0 %v14259_v8  ;;  %v8480_v29 = vpop.f32.mrb[67].mxu0 }
 0x49d   :  { %5844 = vmatprep.mubr.f32.mxu0 %v14260_v56  ;;  %9877 = vmatpush1.bf16.msra.mxu1 %v9876_v36  ;;  %v8481_v10 = vadd.f32 %v8480_v29, %v8479_v16  ;;  %v9884_v16 = vpack.c.bf16 %v4658_v31, %v4655_v26  ;;  %v4668_v29 = vld [vmem:[#allocation4 + $0xe78] sm:$0xff]  ;;  %v4667_v31 = vld [vmem:[#allocation4 + $0xe70] sm:$0xff] }
 0x49e   :  { %9879 = vmatprep.subr.bf16.mxu1 %v9878_v60  ;;  %10077 = vmatpush3.bf16.msra.mxu0 %v10074_v18  ;;  %v9886_v60 = vpack.c.bf16 %v4665_v37, %v4662_v63  ;;  %v14265_v63 = vld [vmem:[#allocation86_spill] sm:$0xff] }
 0x49f   :  { %v13309_v4 = vadd.f32 %v8481_v10, %v13179_v23  ;;  %v8482_v1 = vpop.f32.mrb[68].mxu0  ;;  %v4664_v23 = vld [vmem:[#allocation4 + $0xe58] sm:$0xff]  ;;  %v4671_v10 = vld [vmem:[#allocation4 + $0xe90] sm:$0xff] }
 0x4a0   :  { %5845 = vmatmul.mubr.f32.gmra.mrb[126].mxu0 %v14261_v19  ;;  %v8483_v39 = vpop.f32.mrb[69].mxu0  ;;  %v14264_v19 = vld [vmem:[#allocation85_spill] sm:$0xff] }
 0x4a1   :  { %5849 = vmatprep.mubr.f32.mxu0 %v14262_v54  ;;  %9881 = vmatpush1.bf16.msra.mxu1 %v9880_v46  ;;  %v8484_v36 = vadd.f32 %v8483_v39, %v8482_v1  ;;  %v9888_v46 = vpack.c.bf16 %v4664_v23, %v4661_v49  ;;  %v4670_v1 = vld [vmem:[#allocation4 + $0xe88] sm:$0xff]  ;;  %v13324_v39 = vrot.slane %v12618_v58, 4  ;;  %v13332_v23 = vrot.slane %v12605_v50, 4  ;;  %v4673_v58 = vld [vmem:[#allocation4 + $0xea0] sm:$0xff] }
 0x4a2   :  { %9883 = vmatprep.subr.bf16.mxu1 %v9882_v47 }
 0x4a3   :  { %v13314_v9 = vadd.f32 %v8484_v36, %v13185_v40  ;;  %v8485_v18 = vpop.f32.mrb[70].mxu0  ;;  %v9890_v40 = vpack.c.bf16 %v4671_v10, %v4668_v29  ;;  %v4674_v36 = vld [vmem:[#allocation4 + $0xea8] sm:$0xff]  ;;  %v14267_v29 = vld [vmem:[#allocation88_spill] sm:$0xff] }
 0x4a4   :  { %5850 = vmatmul.mubr.f32.gmra.mrb[128].mxu0 %v14263_v52  ;;  %v8486_v35 = vpop.f32.mrb[71].mxu0 }
 0x4a5   :  { %5854 = vmatprep.mubr.f32.mxu0 %v14264_v19  ;;  %9885 = vmatpush1.bf16.msra.mxu1 %v9884_v16  ;;  %v8487_v54 = vadd.f32 %v8486_v35, %v8485_v18  ;;  %v4677_v16 = vld [vmem:[#allocation4 + $0xec0] sm:$0xff]  ;;  %v14266_v18 = vld [vmem:[#allocation87_spill] sm:$0xff] }
 0x4a6   :  { %9887 = vmatprep.subr.bf16.mxu1 %v9886_v60  ;;  %v4676_v35 = vld [vmem:[#allocation4 + $0xeb8] sm:$0xff] }
 0x4a7   :  { %v13319_v47 = vadd.f32 %v8487_v54, %v13191_v13  ;;  %v8488_v26 = vpop.f32.mrb[72].mxu0  ;;  %v9892_v54 = vpack.c.bf16 %v4670_v1, %v4667_v31 }
 0x4a8   :  { %5855 = vmatmul.mubr.f32.gmra.mrb[130].mxu0 %v14265_v63  ;;  %4847 = vmatmul.mubr.f32.vlgmr.msra.gmra.mrb[52].mxu1 %v14222_v25  ;;  %v8489_v37 = vpop.f32.mrb[73].mxu0  ;;  %v9894_v25 = vpack.c.bf16 %v4677_v16, %v4674_v36  ;;  %v4679_v36 = vld [vmem:[#allocation4 + $0xed0] sm:$0xff]  ;;  %v4682_v16 = vld [vmem:[#allocation4 + $0xee8] sm:$0xff] }
 0x4a9   :  { %5859 = vmatprep.mubr.f32.mxu0 %v14266_v18  ;;  %4852 = vmatprep.mubr.f32.mxu1 %v14223_v30  ;;  %v8490_v13 = vadd.f32 %v8489_v37, %v8488_v26  ;;  %v14268_v30 = vrot.slane %v12580_v55, 4  ;;  %v4683_v26 = vld [vmem:[#allocation4 + $0xef0] sm:$0xff] }
 0x4aa   :  { %9889 = vmatpush1.bf16.msra.mxu1 %v9888_v46  ;;  %v4680_v46 = vld [vmem:[#allocation4 + $0xed8] sm:$0xff] }
 0x4ab   :  { %v13329_v60 = vadd.f32 %v8490_v13, %v13200_v5  ;;  %v8491_v49 = vpop.f32.mrb[74].mxu0  ;;  %9891 = vmatprep.subr.bf16.mxu1 %v9890_v40  ;;  %v13340_v10 = vsel %vm269_vm0, %v14268_v30, %v13324_v39  ;;  %v9896_v40 = vpack.c.bf16 %v4676_v35, %v4673_v58  ;;  %v9898_v37 = vpack.c.bf16 %v4683_v26, %v4680_v46  ;;  %v5294_v13 = vld [vmem:[#allocation4 + $0xf08] sm:$0xff]  ;;  %v14277_v35 = vld [vmem:[#allocation94_spill] sm:$0xff]  ;;  %v5293_v26 = vld [vmem:[#allocation4 + $0xf00] sm:$0xff] }
 0x4ac   :  { %5860 = vmatmul.mubr.f32.gmra.mrb[132].mxu0 %v14267_v29  ;;  %4853 = vmatmul.mubr.f32.gmra.mrb[54].mxu1 %v14224_v61  ;;  %v8492_v5 = vpop.f32.mrb[75].mxu0  ;;  %v14269_v61 = vrot.slane %v12571_v20, 4  ;;  %v14275_v58 = vld [vmem:[#allocation93_spill] sm:$0xff] }
 0x4ad   :  { %5864 = vmatprep.mubr.f32.mxu0 %v13340_v10  ;;  %4858 = vmatprep.mubr.f32.mxu1 %v14225_v62  ;;  %v8493_v50 = vadd.f32 %v8492_v5, %v8491_v49  ;;  %v14281_v5 = vld [vmem:[#allocation31_spill] sm:$0xff]  ;;  %v14282_v46 = vld [vmem:[#allocation77_spill] sm:$0xff] }
 0x4ae   :  { %9893 = vmatpush1.bf16.msra.mxu1 %v9892_v54  ;;  %v13351_v55 = vsel %vm269_vm0, %v14269_v61, %v13332_v23  ;;  %v5297_v54 = vld [vmem:[#allocation4 + $0xf20] sm:$0xff]  ;;  %v14283_v61 = vld [vmem:[#allocation26_spill] sm:$0xff] }
 0x4af   :  { %v13345_v31 = vadd.f32 %v8493_v50, %v13214_v0  ;;  %v8494_v1 = vpop.f32.mrb[76].mxu0  ;;  %9895 = vmatprep.subr.bf16.mxu1 %v9894_v25  ;;  %v9900_v0 = vpack.c.bf16 %v4682_v16, %v4679_v36  ;;  %v9950_v25 = vpack.c.bf16 %v5297_v54, %v5294_v13  ;;  %v5296_v50 = vld [vmem:[#allocation4 + $0xf18] sm:$0xff]  ;;  %v5299_v36 = vld [vmem:[#allocation4 + $0xf30] sm:$0xff]  ;;  %v5302_v16 = vld [vmem:[#allocation4 + $0xf48] sm:$0xff] }
 0x4b0   :  { %5865 = vmatmul.mubr.f32.gmra.mrb[134].mxu0 %v13351_v55  ;;  %4859 = vmatmul.mubr.f32.gmra.mrb[56].mxu1 %v14226_v27  ;;  %v8495_v62 = vpop.f32.mrb[77].mxu0  ;;  %v14270_v27 = vld [vmem:[#allocation89_spill] sm:$0xff]  ;;  %v5309_v13 = vld [vmem:[#allocation4 + $0xf80] sm:$0xff] }
 0x4b1   :  { %5869 = vmatprep.mubr.f32.mxu0 %v13324_v39  ;;  %4864 = vmatprep.mubr.f32.mxu1 %v14227_v28  ;;  %v8496_v20 = vadd.f32 %v8495_v62, %v8494_v1  ;;  %v14271_v28 = vld [vmem:[#allocation90_spill] sm:$0xff]  ;;  %v9952_v1 = vpack.c.bf16 %v5296_v50, %v5293_v26  ;;  %v5306_v62 = vld [vmem:[#allocation4 + $0xf68] sm:$0xff] }
 0x4b2   :  { %9897 = vmatpush1.bf16.msra.mxu1 %v9896_v40  ;;  %v5303_v40 = vld [vmem:[#allocation4 + $0xf50] sm:$0xff]  ;;  %v14284_v54 = vld [vmem:[#allocation65_spill] sm:$0xff] }
 0x4b3   :  { %v13358_v49 = vadd.f32 %v8496_v20, %v13227_v34  ;;  %9899 = vmatprep.subr.bf16.mxu1 %v9898_v37  ;;  %v14274_v34 = vld [vmem:[#allocation56_spill] sm:$0xff]  ;;  %v9956_v20 = vpack.c.bf16 %v5302_v16, %v5299_v36 }
 0x4b4   :  { %5870 = vmatmul.mubr.f32.gmra.mrb[136].mxu0 %v13332_v23  ;;  %4865 = vmatmul.mubr.f32.gmra.mrb[58].mxu1 %v14228_v24  ;;  %v14272_v24 = vld [vmem:[#allocation91_spill] sm:$0xff]  ;;  %v5321_v36 = vld [vmem:[#allocation4 + $0xfe0] sm:$0xff] }
 0x4b5   :  { %9166 = vmatprep.mubr.msk.f32.mxu0 %vm2835_vm8, %v12953_v21  ;;  %4870 = vmatprep.mubr.f32.mxu1 %v14229_v59  ;;  %v14273_v59 = vld [vmem:[#allocation92_spill] sm:$0xff] }
 0x4b6   :  { %9901 = vmatpush1.bf16.msra.mxu1 %v9900_v0  ;;  %v9958_v0 = vpack.c.bf16 %v5309_v13, %v5306_v62 }
 0x4b7   :  { %9951 = vmatprep.subr.bf16.mxu1 %v9950_v25  ;;  %v5305_v25 = vld [vmem:[#allocation4 + $0xf60] sm:$0xff] }
 0x4b8   :  { %9167 = vmatmul.mubr.msk.f32.vlgmr.msra.gmra.mrb[48].mxu0 %vm2835_vm8, %v14270_v27  ;;  %4871 = vmatmul.mubr.f32.gmra.mrb[60].mxu1 %v14230_v32  ;;  %v13381_v32 = vrot.slane %v14193_v48, 4  ;;  %v14280_v48 = vld [vmem:[#allocation25_spill] sm:$0xff] }
 0x4b9   :  { %9169 = vmatprep.mubr.msk.f32.mxu0 %vm2835_vm8, %v12960_v14  ;;  %4876 = vmatprep.mubr.f32.mxu1 %v14231_v12  ;;  %v14276_v12 = vld [vmem:[#allocation60_spill] sm:$0xff] }
 0x4bc   :  { %9170 = vmatmul.mubr.msk.f32.gmra.mrb[50].mxu0 %vm2835_vm8, %v14271_v28  ;;  %4877 = vmatmul.mubr.f32.gmra.mrb[62].mxu1 %v14232_v57  ;;  %v14278_v57 = vld [vmem:[#allocation61_spill] sm:$0xff] }
 0x4bd   :  { %9172 = vmatprep.mubr.msk.f32.mxu0 %vm2835_vm8, %v14272_v24  ;;  %4882 = vmatprep.mubr.f32.mxu1 %v14233_v45  ;;  %v14279_v45 = vrot.slane %v12850_v51, 4  ;;  %v5300_v51 = vld [vmem:[#allocation4 + $0xf38] sm:$0xff] }
 0x4be   :  { %v9954_v37 = vpack.c.bf16 %v5303_v40, %v5300_v51  ;;  %v5311_v51 = vld [vmem:[#allocation4 + $0xf90] sm:$0xff]  ;;  %v5314_v40 = vld [vmem:[#allocation4 + $0xfa8] sm:$0xff] }
 0x4bf   :  { %v13393_v30 = vsel %vm269_vm0, %v14279_v45, %v13381_v32  ;;  %v5315_v45 = vld [vmem:[#allocation4 + $0xfb0] sm:$0xff]  ;;  %v9964_v13 = vpack.c.bf16 %v5314_v40, %v5311_v51  ;;  %v5330_v51 = vld [vmem:[#allocation4 + $0x1028] sm:$0xff]  ;;  %v5333_v40 = vld [vmem:[#allocation4 + $0x1040] sm:$0xff] }
 0x4c0   :  { %9173 = vmatmul.mubr.msk.f32.gmra.mrb[52].mxu0 %vm2835_vm8, %v14273_v59  ;;  %4883 = vmatmul.mubr.f32.gmra.mrb[64].mxu1 %v14274_v34  ;;  %v5308_v34 = vld [vmem:[#allocation4 + $0xf78] sm:$0xff] }
 0x4c1   :  { %9175 = vmatprep.mubr.msk.f32.mxu0 %vm2835_vm8, %v14275_v58  ;;  %4888 = vmatprep.mubr.f32.mxu1 %v14276_v12  ;;  %v9960_v26 = vpack.c.bf16 %v5308_v34, %v5305_v25  ;;  %v5324_v34 = vld [vmem:[#allocation4 + $0xff8] sm:$0xff] }
 0x4c4   :  { %9176 = vmatmul.mubr.msk.f32.gmra.mrb[54].mxu0 %vm2835_vm8, %v14277_v35  ;;  %4889 = vmatmul.mubr.f32.gmra.mrb[66].mxu1 %v14278_v57  ;;  %v5312_v57 = vld [vmem:[#allocation4 + $0xf98] sm:$0xff] }
 0x4c5   :  { %9178 = vmatprep.mubr.msk.f32.mxu0 %vm2835_vm8, %v13393_v30  ;;  %4894 = vmatprep.mubr.f32.mxu1 %v14280_v48  ;;  %v14285_v48 = vld [vmem:[#allocation70_spill] sm:$0xff]  ;;  %v9962_v50 = vpack.c.bf16 %v5315_v45, %v5312_v57  ;;  %v14286_v57 = vld [vmem:[#allocation75_spill] sm:$0xff] }
 0x4c8   :  { %9179 = vmatmul.mubr.msk.f32.gmra.mrb[56].mxu0 %vm2835_vm8, %v13381_v32  ;;  %4895 = vmatmul.mubr.f32.gmra.mrb[68].mxu1 %v14281_v5 }
 0x4c9   :  { %4900 = vmatprep.mubr.f32.mxu1 %v14282_v46  ;;  %6194 = vmatprep.mubr.f32.mxu0 %v14153_v44 }
 0x4cc   :  { %4901 = vmatmul.mubr.f32.gmra.mrb[70].mxu1 %v14283_v61 }
 0x4cd   :  { %4971 = vmatprep.mubr.f32.mxu1 %v14153_v44 }
 0x4d0   :  { %8180 = vmatmul.mubr.msk.f32.vlgmr.msra.gmra.mrb[52].mxu1 %vm2835_vm8, %v14284_v54 }
 0x4d1   :  { %9953 = vmatpush1.bf16.msra.mxu1 %v9952_v1  ;;  %4977 = vmatprep.mubr.f32.mxu1 %v14153_v44 }
 0x4d2   :  { %9955 = vmatprep.subr.bf16.mxu1 %v9954_v37  ;;  %v5318_v37 = vld [vmem:[#allocation4 + $0xfc8] sm:$0xff] }
 0x4d3   :  { %v8547_v12 = vpop.f32.mrb[78].mxu0  ;;  %v9966_v54 = vpack.c.bf16 %v5321_v36, %v5318_v37 }
 0x4d4   :  { %8181 = vmatmul.mubr.msk.f32.gmra.mrb[54].mxu1 %vm2835_vm8, %v14285_v48  ;;  %v8548_v5 = vpop.f32.mrb[79].mxu0 }
 0x4d5   :  { %9957 = vmatpush1.bf16.msra.mxu1 %v9956_v20  ;;  %v8549_v46 = vadd.f32 %v8548_v5, %v8547_v12  ;;  %4983 = vmatprep.mubr.f32.mxu1 %v14153_v44  ;;  %v5317_v20 = vld [vmem:[#allocation4 + $0xfc0] sm:$0xff]  ;;  %v5327_v12 = vld [vmem:[#allocation4 + $0x1010] sm:$0xff] }
 0x4d6   :  { %9959 = vmatprep.subr.bf16.mxu1 %v9958_v0  ;;  %v5320_v0 = vld [vmem:[#allocation4 + $0xfd8] sm:$0xff]  ;;  %v9970_v5 = vpack.c.bf16 %v5327_v12, %v5324_v34 }
 0x4d7   :  { %v13412_v61 = vadd.f32 %v13289_v6, %v8549_v46  ;;  %v8550_v1 = vpop.f32.mrb[80].mxu0  ;;  %v9968_v48 = vpack.c.bf16 %v5320_v0, %v5317_v20  ;;  %v5323_v46 = vld [vmem:[#allocation4 + $0xff0] sm:$0xff]  ;;  %v5336_v20 = vld [vmem:[#allocation4 + $0x1058] sm:$0xff] }
 0x4d8   :  { %8182 = vmatmul.mubr.msk.f32.gmra.mrb[56].mxu1 %vm2835_vm8, %v14245_v22  ;;  %v8551_v16 = vpop.f32.mrb[81].mxu0  ;;  %v5339_v0 = vld [vmem:[#allocation4 + $0x1070] sm:$0xff] }
 0x4d9   :  { %9961 = vmatpush1.bf16.msra.mxu1 %v9960_v26  ;;  %v8552_v62 = vadd.f32 %v8551_v16, %v8550_v1  ;;  %4989 = vmatprep.mubr.f32.mxu1 %v14153_v44  ;;  %v5326_v26 = vld [vmem:[#allocation4 + $0x1008] sm:$0xff]  ;;  %v9974_v16 = vpack.c.bf16 %v5333_v40, %v5330_v51  ;;  %v9978_v12 = vpack.c.bf16 %v5339_v0, %v5336_v20  ;;  %v5341_v51 = vld [vmem:[#allocation4 + $0x1080] sm:$0xff]  ;;  %v5344_v40 = vld [vmem:[#allocation4 + $0x1098] sm:$0xff] }
 0x4da   :  { %9963 = vmatprep.subr.bf16.mxu1 %v9962_v50  ;;  %v9972_v36 = vpack.c.bf16 %v5326_v26, %v5323_v46  ;;  %v5350_v20 = vld [vmem:[#allocation4 + $0x10c8] sm:$0xff] }
 0x4db   :  { %v13418_v25 = vadd.f32 %v13294_v43, %v8552_v62  ;;  %v8553_v6 = vpop.f32.mrb[82].mxu0  ;;  %v5329_v62 = vld [vmem:[#allocation4 + $0x1020] sm:$0xff] }
 0x4dc   :  { %8183 = vmatmul.mubr.msk.f32.gmra.mrb[58].mxu1 %vm2835_vm8, %v14286_v57  ;;  %v8554_v22 = vpop.f32.mrb[83].mxu0  ;;  %v5335_v57 = vld [vmem:[#allocation4 + $0x1050] sm:$0xff] }
 0x4dd   :  { %9965 = vmatpush1.bf16.msra.mxu1 %v9964_v13  ;;  %v8555_v45 = vadd.f32 %v8554_v22, %v8553_v6  ;;  %4995 = vmatprep.mubr.f32.mxu1 %v14153_v44  ;;  %v5332_v13 = vld [vmem:[#allocation4 + $0x1038] sm:$0xff]  ;;  %v5338_v22 = vld [vmem:[#allocation4 + $0x1068] sm:$0xff] }
 0x4de   :  { %9967 = vmatprep.subr.bf16.mxu1 %v9966_v54  ;;  %v9976_v34 = vpack.c.bf16 %v5332_v13, %v5329_v62  ;;  %v9980_v26 = vpack.c.bf16 %v5338_v22, %v5335_v57  ;;  %v9984_v62 = vpack.c.bf16 %v5344_v40, %v5341_v51  ;;  %v5353_v22 = vld [vmem:[#allocation4 + $0x10e0] sm:$0xff]  ;;  %v5359_v40 = vld [vmem:[#allocation4 + $0x1110] sm:$0xff] }
 0x4df   :  { %v13424_v50 = vadd.f32 %v13299_v15, %v8555_v45  ;;  %v8556_v43 = vpop.f32.mrb[84].mxu0 }
 0x4e0   :  { %8184 = vmatmul.mubr.msk.f32.gmra.mrb[60].mxu1 %vm2835_vm8, %v14247_v17  ;;  %v8557_v1 = vpop.f32.mrb[85].mxu0 }
 0x4e1   :  { %9969 = vmatpush1.bf16.msra.mxu1 %v9968_v48  ;;  %v8558_v37 = vadd.f32 %v8557_v1, %v8556_v43  ;;  %5001 = vmatprep.mubr.f32.mxu1 %v14153_v44  ;;  %v5342_v48 = vld [vmem:[#allocation4 + $0x1088] sm:$0xff] }
 0x4e2   :  { %9971 = vmatprep.subr.bf16.mxu1 %v9970_v5  ;;  %v5345_v5 = vld [vmem:[#allocation4 + $0x10a0] sm:$0xff] }
 0x4e3   :  { %v13430_v54 = vadd.f32 %v13304_v3, %v8558_v37  ;;  %v8559_v15 = vpop.f32.mrb[86].mxu0  ;;  %v9982_v43 = vpack.c.bf16 %v5345_v5, %v5342_v48  ;;  %v5348_v37 = vld [vmem:[#allocation4 + $0x10b8] sm:$0xff] }
 0x4e4   :  { %8185 = vmatmul.mubr.msk.f32.gmra.mrb[62].mxu1 %vm2835_vm8, %v14248_v7  ;;  %v8560_v17 = vpop.f32.mrb[87].mxu0  ;;  %v5360_v5 = vld [vmem:[#allocation4 + $0x1118] sm:$0xff] }
 0x4e5   :  { %9973 = vmatpush1.bf16.msra.mxu1 %v9972_v36  ;;  %v8561_v6 = vadd.f32 %v8560_v17, %v8559_v15  ;;  %5007 = vmatprep.mubr.f32.mxu1 %v14153_v44  ;;  %v5351_v36 = vld [vmem:[#allocation4 + $0x10d0] sm:$0xff]  ;;  %v5354_v17 = vld [vmem:[#allocation4 + $0x10e8] sm:$0xff] }
 0x4e6   :  { %9975 = vmatprep.subr.bf16.mxu1 %v9974_v16  ;;  %v9986_v13 = vpack.c.bf16 %v5351_v36, %v5348_v37  ;;  %v5347_v15 = vld [vmem:[#allocation4 + $0x10b0] sm:$0xff]  ;;  %v5366_v36 = vld [vmem:[#allocation4 + $0x1148] sm:$0xff] }
 0x4e7   :  { %v13436_v45 = vadd.f32 %v13309_v4, %v8561_v6  ;;  %v8562_v3 = vpop.f32.mrb[88].mxu0  ;;  %v5357_v6 = vld [vmem:[#allocation4 + $0x1100] sm:$0xff] }
 0x4e8   :  { %8186 = vmatmul.mubr.msk.f32.gmra.mrb[64].mxu1 %vm2835_vm8, %v14250_v2  ;;  %v8563_v7 = vpop.f32.mrb[89].mxu0  ;;  %v9990_v57 = vpack.c.bf16 %v5357_v6, %v5354_v17  ;;  %v5372_v17 = vld [vmem:[#allocation4 + $0x1178] sm:$0xff]  ;;  %v5375_v6 = vld [vmem:[#allocation4 + $0x1190] sm:$0xff] }
 0x4e9   :  { %9977 = vmatpush1.bf16.msra.mxu1 %v9976_v34  ;;  %v8564_v46 = vadd.f32 %v8563_v7, %v8562_v3  ;;  %5013 = vmatprep.mubr.f32.mxu1 %v14153_v44  ;;  %v5356_v3 = vld [vmem:[#allocation4 + $0x10f8] sm:$0xff]  ;;  %v5363_v7 = vld [vmem:[#allocation4 + $0x1130] sm:$0xff] }
 0x4ea   :  { %9979 = vmatprep.subr.bf16.mxu1 %v9978_v12  ;;  %v9988_v12 = vpack.c.bf16 %v5350_v20, %v5347_v15  ;;  %v9994_v51 = vpack.c.bf16 %v5363_v7, %v5360_v5  ;;  %v5365_v20 = vld [vmem:[#allocation4 + $0x1140] sm:$0xff]  ;;  %v5380_v7 = vld [vmem:[#allocation4 + $0x11b8] sm:$0xff] }
 0x4eb   :  { %v13442_v1 = vadd.f32 %v13314_v9, %v8564_v46  ;;  %v8565_v4 = vpop.f32.mrb[90].mxu0  ;;  %v14287_v46 = vld [vmem:[#allocation29_spill] sm:$0xff]  ;;  %v5377_v5 = vld [vmem:[#allocation4 + $0x11a0] sm:$0xff] }
 0x4ec   :  { %8187 = vmatmul.mubr.msk.f32.gmra.mrb[66].mxu1 %vm2835_vm8, %v12905_v38  ;;  %v8566_v2 = vpop.f32.mrb[91].mxu0 }
 0x4ed   :  { %9981 = vmatpush1.bf16.msra.mxu1 %v9980_v26  ;;  %v8567_v16 = vadd.f32 %v8566_v2, %v8565_v4  ;;  %5019 = vmatprep.mubr.f32.mxu1 %v14153_v44  ;;  %v5362_v4 = vld [vmem:[#allocation4 + $0x1128] sm:$0xff]  ;;  %v5369_v2 = vld [vmem:[#allocation4 + $0x1160] sm:$0xff] }
 0x4ee   :  { %9983 = vmatprep.subr.bf16.mxu1 %v9982_v43  ;;  %v9992_v43 = vpack.c.bf16 %v5356_v3, %v5353_v22  ;;  %v9998_v15 = vpack.c.bf16 %v5369_v2, %v5366_v36  ;;  %v5381_v22 = vld [vmem:[#allocation4 + $0x11c0] sm:$0xff] }
 0x4ef   :  { %v13448_v0 = vadd.f32 %v13319_v47, %v8567_v16  ;;  %v8568_v9 = vpop.f32.mrb[92].mxu0  ;;  %v5389_v2 = vld [vmem:[#allocation4 + $0x1200] sm:$0xff] }
 0x4f0   :  { %8188 = vmatmul.mubr.msk.f32.gmra.mrb[68].mxu1 %vm2835_vm8, %v13268_v42  ;;  %v8569_v38 = vpop.f32.mrb[93].mxu0 }
 0x4f1   :  { %9985 = vmatpush1.bf16.msra.mxu1 %v9984_v62  ;;  %v8570_v34 = vadd.f32 %v8569_v38, %v8568_v9  ;;  %5025 = vmatprep.mubr.f32.mxu1 %v14153_v44  ;;  %v5368_v9 = vld [vmem:[#allocation4 + $0x1158] sm:$0xff] }
 0x4f2   :  { %9987 = vmatprep.subr.bf16.mxu1 %v9986_v13  ;;  %v9996_v13 = vpack.c.bf16 %v5362_v4, %v5359_v40  ;;  %v10000_v38 = vpack.c.bf16 %v5368_v9, %v5365_v20  ;;  %v5390_v40 = vld [vmem:[#allocation4 + $0x1208] sm:$0xff]  ;;  %v5393_v4 = vld [vmem:[#allocation4 + $0x1220] sm:$0xff]  ;;  %v5395_v9 = vld [vmem:[#allocation4 + $0x1230] sm:$0xff] }
 0x4f3   :  { %v13454_v48 = vadd.f32 %v13329_v60, %v8570_v34  ;;  %v8571_v47 = vpop.f32.mrb[94].mxu0  ;;  %v5371_v34 = vld [vmem:[#allocation4 + $0x1170] sm:$0xff]  ;;  %v10014_v36 = vpack.c.bf16 %v5393_v4, %v5390_v40 }
 0x4f4   :  { %8189 = vmatmul.mubr.msk.f32.gmra.mrb[70].mxu1 %vm2835_vm8, %v14287_v46  ;;  %v8572_v42 = vpop.f32.mrb[95].mxu0  ;;  %v5384_v46 = vld [vmem:[#allocation4 + $0x11d8] sm:$0xff] }
 0x4f5   :  { %9989 = vmatpush1.bf16.msra.mxu1 %v9988_v12  ;;  %v8573_v26 = vadd.f32 %v8572_v42, %v8571_v47  ;;  %5574 = vmatprep.mubr.f32.mxu1 %v14252_v33  ;;  %v5374_v12 = vld [vmem:[#allocation4 + $0x1188] sm:$0xff]  ;;  %v5387_v42 = vld [vmem:[#allocation4 + $0x11f0] sm:$0xff] }
 0x4f6   :  { %9991 = vmatprep.subr.bf16.mxu1 %v9990_v57  ;;  %v5378_v57 = vld [vmem:[#allocation4 + $0x11a8] sm:$0xff]  ;;  %v10004_v3 = vpack.c.bf16 %v5374_v12, %v5371_v34 }
 0x4f7   :  { %v13460_v37 = vadd.f32 %v13345_v31, %v8573_v26  ;;  %v8574_v60 = vpop.f32.mrb[96].mxu0  ;;  %v10002_v31 = vpack.c.bf16 %v5375_v6, %v5372_v17  ;;  %v10006_v47 = vpack.c.bf16 %v5381_v22, %v5378_v57  ;;  %v10010_v26 = vpack.c.bf16 %v5387_v42, %v5384_v46  ;;  %v5398_v17 = vld [vmem:[#allocation4 + $0x1248] sm:$0xff]  ;;  %v5401_v57 = vld [vmem:[#allocation4 + $0x1260] sm:$0xff]  ;;  %v5404_v22 = vld [vmem:[#allocation4 + $0x1278] sm:$0xff] }
 0x4f8   :  { %v8575_v16 = vpop.f32.mrb[97].mxu0  ;;  %v5402_v6 = vld [vmem:[#allocation4 + $0x1268] sm:$0xff]  ;;  %v10020_v34 = vpack.c.bf16 %v5398_v17, %v5395_v9  ;;  %v10024_v46 = vpack.c.bf16 %v5404_v22, %v5401_v57 }
 0x4f9   :  { %9993 = vmatpush1.bf16.msra.mxu1 %v9992_v43  ;;  %v8576_v62 = vadd.f32 %v8575_v16, %v8574_v60  ;;  %v5383_v43 = vld [vmem:[#allocation4 + $0x11d0] sm:$0xff]  ;;  %v5392_v16 = vld [vmem:[#allocation4 + $0x1218] sm:$0xff] }
 0x4fa   :  { %9995 = vmatprep.subr.bf16.mxu1 %v9994_v51  ;;  %v5386_v51 = vld [vmem:[#allocation4 + $0x11e8] sm:$0xff] }
 0x4fb   :  { %v13463_v33 = vadd.f32 %v13358_v49, %v8576_v62  ;;  %v10008_v49 = vpack.c.bf16 %v5380_v7, %v5377_v5  ;;  %v10012_v60 = vpack.c.bf16 %v5386_v51, %v5383_v43  ;;  %v5396_v62 = vld [vmem:[#allocation4 + $0x1238] sm:$0xff]  ;;  %v14289_v5 = vld [vmem:[#allocation53_spill] sm:$0xff]  ;;  %v14290_v7 = vld [vmem:[#allocation58_spill] sm:$0xff] }
 0x4fd   :  { %9997 = vmatpush1.bf16.msra.mxu1 %v9996_v13  ;;  %v5399_v13 = vld [vmem:[#allocation4 + $0x1250] sm:$0xff] }
 0x4fe   :  { %9999 = vmatprep.subr.bf16.mxu1 %v9998_v15  ;;  %v10016_v15 = vpack.c.bf16 %v5392_v16, %v5389_v2  ;;  %v10018_v20 = vpack.c.bf16 %v5399_v13, %v5396_v62 }
 0x501   :  { %10001 = vmatpush1.bf16.msra.mxu1 %v10000_v38  ;;  %v5405_v38 = vld [vmem:[#allocation4 + $0x1280] sm:$0xff] }
 0x502   :  { %10003 = vmatprep.subr.bf16.mxu1 %v10002_v31  ;;  %v14288_v31 = vld [vmem:[#allocation48_spill] sm:$0xff]  ;;  %v10022_v12 = vpack.c.bf16 %v5405_v38, %v5402_v6 }
 0x505   :  { %10005 = vmatpush1.bf16.msra.mxu1 %v10004_v3  ;;  %v5408_v3 = vld [vmem:[#allocation4 + $0x1298] sm:$0xff] }
 0x506   :  { %10007 = vmatprep.subr.bf16.mxu1 %v10006_v47  ;;  %v5411_v47 = vld [vmem:[#allocation4 + $0x12b0] sm:$0xff] }
 0x507   :  { %v10026_v42 = vpack.c.bf16 %v5411_v47, %v5408_v3 }
 0x509   :  { %10009 = vmatpush1.bf16.msra.mxu1 %v10008_v49  ;;  %v5407_v49 = vld [vmem:[#allocation4 + $0x1290] sm:$0xff] }
 0x50a   :  { %10011 = vmatprep.subr.bf16.mxu1 %v10010_v26 }
 0x50d   :  { %10013 = vmatpush1.bf16.msra.mxu1 %v10012_v60 }
 0x50e   :  { %10015 = vmatprep.subr.bf16.mxu1 %v10014_v36  ;;  %v14291_v36 = vld [vmem:[#allocation72_spill] sm:$0xff] }
 0x510   :  { %5575 = vmatmul.mubr.f32.vlgmr.msra.gmra.mrb[52].mxu1 %v14253_v11  ;;  %v5410_v11 = vld [vmem:[#allocation4 + $0x12a8] sm:$0xff] }
 0x511   :  { %5580 = vmatprep.mubr.f32.mxu1 %v14288_v31  ;;  %10017 = vmatpush1.bf16.msra.mxu1 %v10016_v15  ;;  %v10028_v26 = vpack.c.bf16 %v5410_v11, %v5407_v49 }
 0x512   :  { %10019 = vmatprep.subr.bf16.mxu1 %v10018_v20 }
 0x514   :  { %5581 = vmatmul.mubr.f32.gmra.mrb[54].mxu1 %v14289_v5 }
 0x515   :  { %5586 = vmatprep.mubr.f32.mxu1 %v14290_v7  ;;  %10021 = vmatpush1.bf16.msra.mxu1 %v10020_v34 }
 0x516   :  { %10023 = vmatprep.subr.bf16.mxu1 %v10022_v12 }
 0x518   :  { %5587 = vmatmul.mubr.f32.gmra.mrb[56].mxu1 %v14257_v53 }
 0x519   :  { %5592 = vmatprep.mubr.f32.mxu1 %v14258_v41  ;;  %10025 = vmatpush1.bf16.msra.mxu1 %v10024_v46  ;;  %v14292_v41 = vld [vmem:[#allocation83_spill] sm:$0xff] }
 0x51a   :  { %10027 = vmatprep.subr.bf16.mxu1 %v10026_v42 }
 0x51b   :  { %v8627_v43 = vpop.f32.mrb[98].mxu0 }
 0x51c   :  { %5593 = vmatmul.mubr.f32.gmra.mrb[58].mxu1 %v14259_v8  ;;  %v8628_v51 = vpop.f32.mrb[99].mxu0 }
 0x51d   :  { %v8629_v40 = vadd.f32 %v8628_v51, %v8627_v43  ;;  %5598 = vmatprep.mubr.f32.mxu1 %v14260_v56  ;;  %10029 = vmatpush1.bf16.msra.mxu1 %v10028_v26 }
 0x51f   :  { %v13474_v4 = vadd.f32 %v13412_v61, %v8629_v40  ;;  %v8630_v60 = vpop.f32.mrb[100].mxu0 }
 0x520   :  { %5599 = vmatmul.mubr.f32.gmra.mrb[60].mxu1 %v14291_v36  ;;  %v8631_v53 = vpop.f32.mrb[101].mxu0 }
 0x521   :  { %v8632_v2 = vadd.f32 %v8631_v53, %v8630_v60  ;;  %5604 = vmatprep.mubr.f32.mxu1 %v14292_v41 }
 0x523   :  { %v13479_v16 = vadd.f32 %v13418_v25, %v8632_v2  ;;  %v8633_v62 = vpop.f32.mrb[102].mxu0 }
 0x524   :  { %5605 = vmatmul.mubr.f32.gmra.mrb[62].mxu1 %v14263_v52  ;;  %v8634_v8 = vpop.f32.mrb[103].mxu0 }
 0x525   :  { %v8635_v13 = vadd.f32 %v8634_v8, %v8633_v62  ;;  %5610 = vmatprep.mubr.f32.mxu1 %v14264_v19 }
 0x527   :  { %v13484_v56 = vadd.f32 %v13424_v50, %v8635_v13  ;;  %v8636_v61 = vpop.f32.mrb[104].mxu0 }
 0x528   :  { %5611 = vmatmul.mubr.f32.gmra.mrb[64].mxu1 %v14265_v63  ;;  %v8637_v15 = vpop.f32.mrb[105].mxu0 }
 0x529   :  { %v8638_v20 = vadd.f32 %v8637_v15, %v8636_v61  ;;  %5616 = vmatprep.mubr.f32.mxu1 %v14266_v18  ;;  %v13539_v15 = vld [vmem:[#allocation7 + $0x1] ss:$8 sm:$0x7] }
 0x52b   :  { %v13489_v25 = vadd.f32 %v13430_v54, %v8638_v20  ;;  %v8639_v9 = vpop.f32.mrb[106].mxu0 }
 0x52c   :  { %5617 = vmatmul.mubr.f32.gmra.mrb[66].mxu1 %v14267_v29  ;;  %v8640_v52 = vpop.f32.mrb[107].mxu0 }
 0x52d   :  { %v8641_v17 = vadd.f32 %v8640_v52, %v8639_v9  ;;  %5622 = vmatprep.mubr.f32.mxu1 %v13340_v10  ;;  %v14293_v52 = vld [vmem:[#allocation22_spill] sm:$0xff] }
 0x52f   :  { %v13494_v19 = vadd.f32 %v13436_v45, %v8641_v17  ;;  %v8642_v50 = vpop.f32.mrb[108].mxu0  ;;  %v14294_v17 = vsub.s32 2, %v14293_v52 }
 0x530   :  { %5623 = vmatmul.mubr.f32.gmra.mrb[68].mxu1 %v13351_v55  ;;  %v8643_v63 = vpop.f32.mrb[109].mxu0 }
 0x531   :  { %v8644_v6 = vadd.f32 %v8643_v63, %v8642_v50  ;;  %5628 = vmatprep.mubr.f32.mxu1 %v13324_v39 }
 0x533   :  { %v10520_v18 = vadd.f32 %v13442_v1, %v8644_v6  ;;  %v8645_v54 = vpop.f32.mrb[110].mxu0 }
 0x534   :  { %5629 = vmatmul.mubr.f32.gmra.mrb[70].mxu1 %v13332_v23  ;;  %v8646_v29 = vpop.f32.mrb[111].mxu0 }
 0x535   :  { %v8647_v38 = vadd.f32 %v8646_v29, %v8645_v54  ;;  %5699 = vmatprep.mubr.f32.mxu1 %v14153_v44 }
 0x537   :  { %v10535_v10 = vadd.f32 %v13448_v0, %v8647_v38  ;;  %v8648_v45 = vpop.f32.mrb[112].mxu0 }
 0x538   :  { %8200 = vmatmul.mubr.msk.f32.vlgmr.msra.gmra.mrb[52].mxu1 %vm2835_vm8, %v12953_v21  ;;  %v8649_v55 = vpop.f32.mrb[113].mxu0 }
 0x539   :  { %v8650_v31 = vadd.f32 %v8649_v55, %v8648_v45  ;;  %5705 = vmatprep.mubr.f32.mxu1 %v14153_v44 }
 0x53b   :  { %v10530_v39 = vadd.f32 %v13454_v48, %v8650_v31  ;;  %v8651_v1 = vpop.f32.mrb[114].mxu0 }
 0x53c   :  { %8201 = vmatmul.mubr.msk.f32.gmra.mrb[54].mxu1 %vm2835_vm8, %v14270_v27  ;;  %v8652_v23 = vpop.f32.mrb[115].mxu0 }
 0x53d   :  { %v8653_v34 = vadd.f32 %v8652_v23, %v8651_v1  ;;  %5711 = vmatprep.mubr.f32.mxu1 %v14153_v44 }
 0x53f   :  { %v10545_v0 = vadd.f32 %v13460_v37, %v8653_v34  ;;  %v8654_v12 = vpop.f32.mrb[116].mxu0 }
 0x540   :  { %8202 = vmatmul.mubr.msk.f32.gmra.mrb[56].mxu1 %vm2835_vm8, %v12960_v14  ;;  %v8655_v21 = vpop.f32.mrb[117].mxu0 }
 0x541   :  { %v8656_v57 = vadd.f32 %v8655_v21, %v8654_v12  ;;  %5717 = vmatprep.mubr.f32.mxu1 %v14153_v44 }
 0x543   :  { %v10540_v48 = vadd.f32 %v13463_v33, %v8656_v57 }
 0x544   :  { %8203 = vmatmul.mubr.msk.f32.gmra.mrb[58].mxu1 %vm2835_vm8, %v14271_v28 }
 0x545   :  { %5723 = vmatprep.mubr.f32.mxu1 %v14153_v44 }
 0x548   :  { %8204 = vmatmul.mubr.msk.f32.gmra.mrb[60].mxu1 %vm2835_vm8, %v14272_v24 }
 0x549   :  { %5729 = vmatprep.mubr.f32.mxu1 %v14153_v44 }
 0x54c   :  { %8205 = vmatmul.mubr.msk.f32.gmra.mrb[62].mxu1 %vm2835_vm8, %v14273_v59 }
 0x54d   :  { %5735 = vmatprep.mubr.f32.mxu1 %v14153_v44 }
 0x550   :  { %8206 = vmatmul.mubr.msk.f32.gmra.mrb[64].mxu1 %vm2835_vm8, %v14275_v58 }
 0x551   :  { %5741 = vmatprep.mubr.f32.mxu1 %v14153_v44 }
 0x554   :  { %8207 = vmatmul.mubr.msk.f32.gmra.mrb[66].mxu1 %vm2835_vm8, %v14277_v35 }
 0x555   :  { %5747 = vmatprep.mubr.f32.mxu1 %v14153_v44 }
 0x558   :  { %8208 = vmatmul.mubr.msk.f32.gmra.mrb[68].mxu1 %vm2835_vm8, %v13393_v30 }
 0x559   :  { %5753 = vmatprep.mubr.f32.mxu1 %v14153_v44 }
 0x55c   :  { %8209 = vmatmul.mubr.msk.f32.gmra.mrb[70].mxu1 %vm2835_vm8, %v13381_v32 }
 0x563   :  { %v8707_v14 = vpop.f32.mrb[118].mxu0 }
 0x564   :  { %v8708_v27 = vpop.f32.mrb[119].mxu0 }
 0x565   :  { %v8709_v28 = vadd.f32 %v8708_v27, %v8707_v14 }
 0x567   :  { %v8710_v24 = vpop.f32.mrb[120].mxu0  ;;  %v10506_v59 = vadd.f32 %v13474_v4, %v8709_v28 }
 0x568   :  { %v8711_v58 = vpop.f32.mrb[121].mxu0 }
 0x569   :  { %v8712_v37 = vadd.f32 %v8711_v58, %v8710_v24 }
 0x56b   :  { %v8713_v33 = vpop.f32.mrb[122].mxu0  ;;  %v10501_v35 = vadd.f32 %v13479_v16, %v8712_v37 }
 0x56c   :  { %v8714_v22 = vpop.f32.mrb[123].mxu0 }
 0x56d   :  { %v8715_v3 = vadd.f32 %v8714_v22, %v8713_v33 }
 0x56f   :  { %v8716_v47 = vpop.f32.mrb[124].mxu0  ;;  %v10516_v30 = vadd.f32 %v13484_v56, %v8715_v3 }
 0x570   :  { %v8717_v5 = vpop.f32.mrb[125].mxu0 }
 0x571   :  { %v8718_v7 = vadd.f32 %v8717_v5, %v8716_v47 }
 0x573   :  { %v8719_v46 = vpop.f32.mrb[126].mxu0  ;;  %v10511_v32 = vadd.f32 %v13489_v25, %v8718_v7 }
 0x574   :  { %v8720_v42 = vpop.f32.mrb[127].mxu0 }
 0x575   :  { %v8721_v49 = vadd.f32 %v8720_v42, %v8719_v46 }
 0x577   :  { %v8722_v11 = vpop.f32.mrb[128].mxu0  ;;  %v10526_v26 = vadd.f32 %v13494_v19, %v8721_v49  ;;  %v6032_v19 = vrot.slane %v13539_v15, %v14294_v17 }
 0x578   :  { %v8723_v43 = vpop.f32.mrb[129].mxu0 }
 0x579   :  { %v8724_v51 = vadd.f32 %v8723_v43, %v8722_v11 }
 0x57b   :  { %v8725_v40 = vpop.f32.mrb[130].mxu0  ;;  %v10521_v4 = vadd.f32 %v10520_v18, %v8724_v51 }
 0x57c   :  { %v8726_v60 = vpop.f32.mrb[131].mxu0 }
 0x57d   :  { %v8727_v36 = vadd.f32 %v8726_v60, %v8725_v40 }
 0x57f   :  { %v8728_v53 = vpop.f32.mrb[132].mxu0  ;;  %v10536_v2 = vadd.f32 %v10535_v10, %v8727_v36  ;;  %v6426_v36 = vld [vmem:[#allocation6 + $0x308] sm:$0xff] }
 0x580   :  { %v8729_v41 = vpop.f32.mrb[133].mxu0 }
 0x581   :  { %v8730_v16 = vadd.f32 %v8729_v41, %v8728_v53  ;;  %v6428_v53 = vld [vmem:[#allocation6 + $0x318] sm:$0xff] }
 0x582   :  { %v10122_v41 = vpack.c.bf16 %v6428_v53, %v6426_v36  ;;  %v6461_v36 = vld [vmem:[#allocation6 + $0x420] sm:$0xff]  ;;  %v6463_v53 = vld [vmem:[#allocation6 + $0x430] sm:$0xff] }
 0x583   :  { %v8731_v62 = vpop.f32.mrb[134].mxu0  ;;  %v10531_v8 = vadd.f32 %v10530_v39, %v8730_v16  ;;  %v6427_v16 = vld [vmem:[#allocation6 + $0x310] sm:$0xff] }
 0x584   :  { %v8732_v13 = vpop.f32.mrb[135].mxu0  ;;  %10123 = vmatprep.subr.bf16.mxu1 %v10122_v41  ;;  %v6468_v41 = vld [vmem:[#allocation6 + $0x458] sm:$0xff] }
 0x585   :  { %v8733_v56 = vadd.f32 %v8732_v13, %v8731_v62  ;;  %v6430_v62 = vld [vmem:[#allocation6 + $0x328] sm:$0xff] }
 0x587   :  { %v8734_v61 = vpop.f32.mrb[136].mxu0  ;;  %v10546_v20 = vadd.f32 %v10545_v0, %v8733_v56 }
 0x588   :  { %v8735_v25 = vpop.f32.mrb[137].mxu0 }
 0x589   :  { %v8736_v9 = vadd.f32 %v8735_v25, %v8734_v61  ;;  %v6429_v61 = vld [vmem:[#allocation6 + $0x320] sm:$0xff]  ;;  %v6431_v25 = vld [vmem:[#allocation6 + $0x330] sm:$0xff] }
 0x58a   :  { %v10128_v52 = vpack.c.bf16 %v6431_v25, %v6429_v61  ;;  %v6472_v61 = vld [vmem:[#allocation6 + $0x478] sm:$0xff] }
 0x58b   :  { %v9168_v50 = vpop.f32.mrb[48].mxu0  ;;  %v10541_v63 = vadd.f32 %v10540_v48, %v8736_v9  ;;  %v6436_v9 = vld [vmem:[#allocation6 + $0x358] sm:$0xff] }
 0x58c   :  { %v10502_v6 = vadd.f32 %v10501_v35, %v9168_v50  ;;  %v5941_v18 = vpop.f32.mrb[49].mxu0  ;;  %v6435_v50 = vld [vmem:[#allocation6 + $0x350] sm:$0xff] }
 0x58d   :  { %v10507_v54 = vadd.f32 %v10506_v59, %v5941_v18 }
 0x58e   :  { %v6041_v29 = vadd.f32 %v10502_v6, %v6032_v19  ;;  %v6440_v6 = vld [vmem:[#allocation6 + $0x378] sm:$0xff] }
 0x58f   :  { %v6038_v38 = vadd.f32 %v10507_v54, %v6032_v19  ;;  %v9171_v10 = vpop.f32.mrb[50].mxu0 }
 0x590   :  { %v6071_v45 = vmax.f32 %v6041_v29, 0.0  ;;  %v10512_v55 = vadd.f32 %v10511_v32, %v9171_v10  ;;  %v5951_v31 = vpop.f32.mrb[51].mxu0  ;;  %v6437_v29 = vld [vmem:[#allocation6 + $0x360] sm:$0xff]  ;;  %v6442_v10 = vld [vmem:[#allocation6 + $0x388] sm:$0xff] }
 0x591   :  { %v6068_v39 = vmax.f32 %v6038_v38, 0.0  ;;  %v10517_v1 = vadd.f32 %v10516_v30, %v5951_v31  ;;  %v6439_v38 = vld [vmem:[#allocation6 + $0x370] sm:$0xff] }
 0x592   :  { %v6047_v23 = vadd.f32 %v10512_v55, %v6032_v19  ;;  %v10136_v55 = vpack.c.bf16 %v6439_v38, %v6437_v29  ;;  %v6480_v29 = vld [vmem:[#allocation6 + $0x4b8] sm:$0xff] }
 0x593   :  { %v6044_v34 = vadd.f32 %v10517_v1, %v6032_v19  ;;  %v9174_v0 = vpop.f32.mrb[52].mxu0  ;;  %v13544_v12 = vpack.c.bf16 %v6071_v45, %v6068_v39  ;;  %v6444_v45 = vld [vmem:[#allocation6 + $0x398] sm:$0xff]  ;;  %v6441_v39 = vld [vmem:[#allocation6 + $0x380] sm:$0xff]  ;;  %v6443_v1 = vld [vmem:[#allocation6 + $0x390] sm:$0xff] }
 0x594   :  { %v6077_v21 = vmax.f32 %v6047_v23, 0.0  ;;  %v10522_v57 = vadd.f32 %v10521_v4, %v9174_v0  ;;  %v5961_v14 = vpop.f32.mrb[53].mxu0  ;;  %v10138_v31 = vpack.c.bf16 %v6444_v45, %v6442_v10  ;;  %v6446_v23 = vld [vmem:[#allocation6 + $0x3a8] sm:$0xff]  ;;  %v10140_v0 = vpack.c.bf16 %v6443_v1, %v6441_v39  ;;  %v14295_v38 = vld [vmem:[#allocation23_spill] sm:$0xff] }
 0x595   :  { %v6074_v48 = vmax.f32 %v6044_v34, 0.0  ;;  %v10527_v27 = vadd.f32 %v10526_v26, %v5961_v14  ;;  %v6448_v34 = vld [vmem:[#allocation6 + $0x3b8] sm:$0xff]  ;;  %v6447_v14 = vld [vmem:[#allocation6 + $0x3b0] sm:$0xff]  ;;  %v13556_v10 = vrot.slane %v13539_v15, %v14295_v38 }
 0x596   :  { %v6053_v28 = vadd.f32 %v10522_v57, %v6032_v19  ;;  %v6445_v57 = vld [vmem:[#allocation6 + $0x3a0] sm:$0xff] }
 0x597   :  { %v6050_v24 = vadd.f32 %v10527_v27, %v6032_v19  ;;  %v9177_v59 = vpop.f32.mrb[54].mxu0  ;;  %v13546_v58 = vpack.c.bf16 %v6077_v21, %v6074_v48  ;;  %v10142_v21 = vpack.c.bf16 %v6448_v34, %v6446_v23  ;;  %v6450_v48 = vld [vmem:[#allocation6 + $0x3c8] sm:$0xff]  ;;  %v6452_v27 = vld [vmem:[#allocation6 + $0x3d8] sm:$0xff]  ;;  %v6477_v34 = vld [vmem:[#allocation6 + $0x4a0] sm:$0xff] }
 0x598   :  { %v6083_v37 = vmax.f32 %v6053_v28, 0.0  ;;  %v10532_v33 = vadd.f32 %v10531_v8, %v9177_v59  ;;  %v5971_v35 = vpop.f32.mrb[55].mxu0  ;;  %v6432_v8 = vld [vmem:[#allocation6 + $0x338] sm:$0xff]  ;;  %v10144_v28 = vpack.c.bf16 %v6447_v14, %v6445_v57  ;;  %v6449_v59 = vld [vmem:[#allocation6 + $0x3c0] sm:$0xff] }
 0x599   :  { %v6080_v22 = vmax.f32 %v6050_v24, 0.0  ;;  %v10537_v3 = vadd.f32 %v10536_v2, %v5971_v35  ;;  %v6425_v2 = vld [vmem:[#allocation6 + $0x300] sm:$0xff]  ;;  %v10126_v56 = vpack.c.bf16 %v6432_v8, %v6430_v62  ;;  %v10146_v24 = vpack.c.bf16 %v6452_v27, %v6450_v48  ;;  %v6456_v35 = vld [vmem:[#allocation6 + $0x3f8] sm:$0xff] }
 0x59a   :  { %v6059_v47 = vadd.f32 %v10532_v33, %v6032_v19  ;;  %v10124_v13 = vpack.c.bf16 %v6427_v16, %v6425_v2  ;;  %v6454_v33 = vld [vmem:[#allocation6 + $0x3e8] sm:$0xff]  ;;  %v10160_v16 = vpack.c.bf16 %v6463_v53, %v6461_v36  ;;  %v6465_v8 = vld [vmem:[#allocation6 + $0x440] sm:$0xff] }
 0x59b   :  { %v6056_v30 = vadd.f32 %v10537_v3, %v6032_v19  ;;  %v9180_v5 = vpop.f32.mrb[56].mxu0  ;;  %v13548_v7 = vpack.c.bf16 %v6083_v37, %v6080_v22  ;;  %v6451_v37 = vld [vmem:[#allocation6 + $0x3d0] sm:$0xff]  ;;  %v10150_v3 = vpack.c.bf16 %v6456_v35, %v6454_v33  ;;  %v6466_v2 = vld [vmem:[#allocation6 + $0x448] sm:$0xff] }
 0x59c   :  { %v6089_v46 = vmax.f32 %v6059_v47, 0.0  ;;  %v10542_v32 = vadd.f32 %v10541_v63, %v9180_v5  ;;  %v5981_v42 = vpop.f32.mrb[57].mxu0  ;;  %10125 = vmatpush1.bf16.msra.mxu1 %v10124_v13  ;;  %v6438_v63 = vld [vmem:[#allocation6 + $0x368] sm:$0xff]  ;;  %v10148_v22 = vpack.c.bf16 %v6451_v37, %v6449_v59  ;;  %v6453_v47 = vld [vmem:[#allocation6 + $0x3e0] sm:$0xff]  ;;  %v10162_v62 = vpack.c.bf16 %v6468_v41, %v6466_v2  ;;  %v6467_v13 = vld [vmem:[#allocation6 + $0x450] sm:$0xff] }
 0x59d   :  { %v6086_v49 = vmax.f32 %v6056_v30, 0.0  ;;  %v10547_v11 = vadd.f32 %v10546_v20, %v5981_v42  ;;  %v6434_v20 = vld [vmem:[#allocation6 + $0x348] sm:$0xff]  ;;  %10127 = vmatprep.subr.bf16.mxu1 %v10126_v56  ;;  %v10134_v54 = vpack.c.bf16 %v6440_v6, %v6438_v63  ;;  %v6455_v30 = vld [vmem:[#allocation6 + $0x3f0] sm:$0xff]  ;;  %v10164_v25 = vpack.c.bf16 %v6467_v13, %v6465_v8  ;;  %v6473_v6 = vld [vmem:[#allocation6 + $0x480] sm:$0xff] }
 0x59e   :  { %v6065_v26 = vadd.f32 %v10542_v32, %v6032_v19  ;;  %v10130_v17 = vpack.c.bf16 %v6436_v9, %v6434_v20  ;;  %v6458_v5 = vld [vmem:[#allocation6 + $0x408] sm:$0xff]  ;;  %v10152_v32 = vpack.c.bf16 %v6455_v30, %v6453_v47  ;;  %v6469_v9 = vld [vmem:[#allocation6 + $0x460] sm:$0xff] }
 0x59f   :  { %v6062_v43 = vadd.f32 %v10547_v11, %v6032_v19  ;;  %v13550_v51 = vpack.c.bf16 %v6089_v46, %v6086_v49  ;;  %v6433_v19 = vld [vmem:[#allocation6 + $0x340] sm:$0xff]  ;;  %v6460_v46 = vld [vmem:[#allocation6 + $0x418] sm:$0xff]  ;;  %v6459_v11 = vld [vmem:[#allocation6 + $0x410] sm:$0xff] }
 0x5a0   :  { %v6095_v40 = vmax.f32 %v6065_v26, 0.0  ;;  %10129 = vmatpush1.bf16.msra.mxu1 %v10128_v52  ;;  %v10132_v18 = vpack.c.bf16 %v6435_v50, %v6433_v19  ;;  %v10154_v42 = vpack.c.bf16 %v6460_v46, %v6458_v5  ;;  %v6457_v49 = vld [vmem:[#allocation6 + $0x400] sm:$0xff]  ;;  %v6462_v26 = vld [vmem:[#allocation6 + $0x428] sm:$0xff]  ;;  %v6471_v52 = vld [vmem:[#allocation6 + $0x470] sm:$0xff] }
 0x5a1   :  { %v6092_v4 = vmax.f32 %v6062_v43, 0.0  ;;  %10131 = vmatprep.subr.bf16.mxu1 %v10130_v17  ;;  %v6464_v43 = vld [vmem:[#allocation6 + $0x438] sm:$0xff]  ;;  %v6470_v56 = vld [vmem:[#allocation6 + $0x468] sm:$0xff]  ;;  %v10168_v50 = vpack.c.bf16 %v6471_v52, %v6469_v9 }
 0x5a2   :  { %v10166_v20 = vpack.c.bf16 %v6472_v61, %v6470_v56  ;;  %v6474_v17 = vld [vmem:[#allocation6 + $0x488] sm:$0xff]  ;;  %v6476_v19 = vld [vmem:[#allocation6 + $0x498] sm:$0xff] }
 0x5a3   :  { %v13552_v60 = vpack.c.bf16 %v6095_v40, %v6092_v4  ;;  %v10156_v40 = vpack.c.bf16 %v6459_v11, %v6457_v49  ;;  %v10158_v4 = vpack.c.bf16 %v6464_v43, %v6462_v26  ;;  %v10170_v63 = vpack.c.bf16 %v6476_v19, %v6474_v17 }
 0x5a4   :  { %10133 = vmatpush1.bf16.msra.mxu1 %v10132_v18  ;;  %v6475_v18 = vld [vmem:[#allocation6 + $0x490] sm:$0xff] }
 0x5a5   :  { %10135 = vmatprep.subr.bf16.mxu1 %v10134_v54  ;;  %v6478_v54 = vld [vmem:[#allocation6 + $0x4a8] sm:$0xff]  ;;  %v10172_v39 = vpack.c.bf16 %v6475_v18, %v6473_v6 }
 0x5a6   :  { %v10174_v23 = vpack.c.bf16 %v6480_v29, %v6478_v54 }
 0x5a8   :  { %10137 = vmatpush1.bf16.msra.mxu1 %v10136_v55  ;;  %v14296_v55 = vld [vmem:[#allocation24_spill] sm:$0xff] }
 0x5a9   :  { %10139 = vmatprep.subr.bf16.mxu1 %v10138_v31  ;;  %v13560_v31 = vrot.slane %v13539_v15, %v14296_v55 }
 0x5ac   :  { %10141 = vmatpush1.bf16.msra.mxu1 %v10140_v0  ;;  %v6479_v0 = vld [vmem:[#allocation6 + $0x4b0] sm:$0xff] }
 0x5ad   :  { %10143 = vmatprep.subr.bf16.mxu1 %v10142_v21  ;;  %v10176_v48 = vpack.c.bf16 %v6479_v0, %v6477_v34 }
 0x5b0   :  { %10145 = vmatpush1.bf16.msra.mxu1 %v10144_v28 }
 0x5b1   :  { %10147 = vmatprep.subr.bf16.mxu1 %v10146_v24 }
 0x5b4   :  { %10149 = vmatpush1.bf16.msra.mxu1 %v10148_v22 }
 0x5b5   :  { %10151 = vmatprep.subr.bf16.mxu1 %v10150_v3 }
 0x5b8   :  { %10153 = vmatpush1.bf16.msra.mxu1 %v10152_v32 }
 0x5b9   :  { %10155 = vmatprep.subr.bf16.mxu1 %v10154_v42 }
 0x5bc   :  { %10157 = vmatpush1.bf16.msra.mxu1 %v10156_v40 }
 0x5bd   :  { %10159 = vmatprep.subr.bf16.mxu1 %v10158_v4 }
 0x5c0   :  { %10161 = vmatpush1.bf16.msra.mxu1 %v10160_v16 }
 0x5c1   :  { %10163 = vmatprep.subr.bf16.mxu1 %v10162_v62 }
 0x5c4   :  { %10165 = vmatpush1.bf16.msra.mxu1 %v10164_v25 }
 0x5c5   :  { %10167 = vmatprep.subr.bf16.mxu1 %v10166_v20 }
 0x5c8   :  { %10169 = vmatpush1.bf16.msra.mxu1 %v10168_v50 }
 0x5c9   :  { %10171 = vmatprep.subr.bf16.mxu1 %v10170_v63 }
 0x5cc   :  { %10173 = vmatpush1.bf16.msra.mxu1 %v10172_v39 }
 0x5cd   :  { %10175 = vmatprep.subr.bf16.mxu1 %v10174_v23 }
 0x5d0   :  { %10177 = vmatpush1.bf16.msra.mxu1 %v10176_v48 }
 0x60b   :  { %v5701_v45 = vpop.f32.mrb[52].mxu1 }
 0x60c   :  { %v5703_v1 = vpop.f32.mrb[53].mxu1  ;;  %v6036_v21 = vadd.f32 %v13556_v10, %v5701_v45 }
 0x60d   :  { %v6037_v57 = vadd.f32 %v13560_v31, %v5703_v1 }
 0x60e   :  { %v6066_v24 = vmax.f32 %v6036_v21, 0.0 }
 0x60f   :  { %v5707_v14 = vpop.f32.mrb[54].mxu1  ;;  %v6067_v37 = vmax.f32 %v6037_v57, 0.0 }
 0x610   :  { %v6039_v27 = vadd.f32 %v13556_v10, %v5707_v14  ;;  %v5709_v28 = vpop.f32.mrb[55].mxu1 }
 0x611   :  { %v6040_v15 = vadd.f32 %v13560_v31, %v5709_v28 }
 0x612   :  { %v6069_v59 = vmax.f32 %v6039_v27, 0.0 }
 0x613   :  { %v6070_v33 = vmax.f32 %v6040_v15, 0.0  ;;  %v5713_v35 = vpop.f32.mrb[56].mxu1 }
 0x614   :  { %v10080_v22 = vpack.c.bf16 %v6069_v59, %v6066_v24  ;;  %v5715_v3 = vpop.f32.mrb[57].mxu1  ;;  %v6042_v30 = vadd.f32 %v13556_v10, %v5713_v35 }
 0x615   :  { %v10078_v47 = vpack.c.bf16 %v6070_v33, %v6067_v37  ;;  %v6043_v5 = vadd.f32 %v13560_v31, %v5715_v3 }
 0x616   :  { %v6072_v11 = vmax.f32 %v6042_v30, 0.0  ;;  %v6518_v30 = vld [vmem:[#allocation6 + $0x5e8] sm:$0xff] }
 0x617   :  { %v5719_v46 = vpop.f32.mrb[58].mxu1  ;;  %10079 = vmatprep.subr.bf16.mxu0 %v10078_v47  ;;  %v6073_v43 = vmax.f32 %v6043_v5, 0.0  ;;  %v6096_v5 = vld [vmem:[#allocation10] sm:$0xff] }
 0x618   :  { %v6045_v32 = vadd.f32 %v13556_v10, %v5719_v46  ;;  %v5721_v42 = vpop.f32.mrb[59].mxu1  ;;  %10081 = vmatpush1.bf16.msra.mxu0 %v10080_v22  ;;  %v6490_v46 = vld [vmem:[#allocation6 + $0x508] sm:$0xff] }
 0x619   :  { %v6046_v49 = vadd.f32 %v13560_v31, %v5721_v42 }
 0x61a   :  { %v6075_v26 = vmax.f32 %v6045_v32, 0.0  ;;  %v6492_v32 = vld [vmem:[#allocation6 + $0x518] sm:$0xff] }
 0x61b   :  { %v6076_v40 = vmax.f32 %v6046_v49, 0.0  ;;  %v5725_v4 = vpop.f32.mrb[60].mxu1  ;;  %v10186_v42 = vpack.c.bf16 %v6492_v32, %v6490_v46  ;;  %v6489_v49 = vld [vmem:[#allocation6 + $0x500] sm:$0xff]  ;;  %v6329_v32 = vld [vmem:[#allocation6 + $0x8] sm:$0xff] }
 0x61c   :  { %v10084_v36 = vpack.c.bf16 %v6075_v26, %v6072_v11  ;;  %v5727_v53 = vpop.f32.mrb[61].mxu1  ;;  %v6048_v41 = vadd.f32 %v13556_v10, %v5725_v4  ;;  %v6496_v26 = vld [vmem:[#allocation6 + $0x538] sm:$0xff]  ;;  %v6495_v4 = vld [vmem:[#allocation6 + $0x530] sm:$0xff] }
 0x61d   :  { %v10082_v2 = vpack.c.bf16 %v6076_v40, %v6073_v43  ;;  %v6049_v16 = vadd.f32 %v13560_v31, %v5727_v53  ;;  %v6493_v40 = vld [vmem:[#allocation6 + $0x520] sm:$0xff] }
 0x61e   :  { %v6078_v61 = vmax.f32 %v6048_v41, 0.0  ;;  %v10192_v53 = vpack.c.bf16 %v6495_v4, %v6493_v40  ;;  %v6481_v41 = vld [vmem:[#allocation6 + $0x4c0] sm:$0xff] }
 0x61f   :  { %v5731_v62 = vpop.f32.mrb[62].mxu1  ;;  %10083 = vmatprep.subr.bf16.mxu0 %v10082_v2  ;;  %v6079_v20 = vmax.f32 %v6049_v16, 0.0  ;;  %v6484_v2 = vld [vmem:[#allocation6 + $0x4d8] sm:$0xff]  ;;  %v6483_v16 = vld [vmem:[#allocation6 + $0x4d0] sm:$0xff] }
 0x620   :  { %v6051_v8 = vadd.f32 %v13556_v10, %v5731_v62  ;;  %v5733_v13 = vpop.f32.mrb[63].mxu1  ;;  %10085 = vmatpush1.bf16.msra.mxu0 %v10084_v36  ;;  %v6482_v36 = vld [vmem:[#allocation6 + $0x4c8] sm:$0xff] }
 0x621   :  { %v6052_v56 = vadd.f32 %v13560_v31, %v5733_v13  ;;  %v10178_v62 = vpack.c.bf16 %v6484_v2, %v6482_v36  ;;  %v6498_v13 = vld [vmem:[#allocation6 + $0x548] sm:$0xff] }
 0x622   :  { %v6081_v25 = vmax.f32 %v6051_v8, 0.0  ;;  %v10180_v8 = vpack.c.bf16 %v6483_v16, %v6481_v41 }
 0x623   :  { %v6082_v9 = vmax.f32 %v6052_v56, 0.0  ;;  %v5737_v52 = vpop.f32.mrb[64].mxu1  ;;  %v6500_v56 = vld [vmem:[#allocation6 + $0x558] sm:$0xff]  ;;  %10179 = vmatprep.subr.bf16.mxu1 %v10178_v62 }
 0x624   :  { %v10088_v17 = vpack.c.bf16 %v6081_v25, %v6078_v61  ;;  %v5739_v19 = vpop.f32.mrb[65].mxu1  ;;  %v6054_v63 = vadd.f32 %v13556_v10, %v5737_v52  ;;  %v10194_v61 = vpack.c.bf16 %v6500_v56, %v6498_v13  ;;  %v6497_v25 = vld [vmem:[#allocation6 + $0x540] sm:$0xff]  ;;  %10181 = vmatpush1.bf16.msra.mxu1 %v10180_v8 }
 0x625   :  { %v10086_v50 = vpack.c.bf16 %v6082_v9, %v6079_v20  ;;  %v6055_v6 = vadd.f32 %v13560_v31, %v5739_v19  ;;  %v6499_v20 = vld [vmem:[#allocation6 + $0x550] sm:$0xff]  ;;  %v6486_v9 = vld [vmem:[#allocation6 + $0x4e8] sm:$0xff]  ;;  %v6485_v19 = vld [vmem:[#allocation6 + $0x4e0] sm:$0xff] }
 0x626   :  { %v6084_v39 = vmax.f32 %v6054_v63, 0.0  ;;  %v10196_v52 = vpack.c.bf16 %v6499_v20, %v6497_v25 }
 0x627   :  { %v5743_v18 = vpop.f32.mrb[66].mxu1  ;;  %10087 = vmatprep.subr.bf16.mxu0 %v10086_v50  ;;  %v6085_v23 = vmax.f32 %v6055_v6, 0.0  ;;  %v6487_v50 = vld [vmem:[#allocation6 + $0x4f0] sm:$0xff] }
 0x628   :  { %v6057_v54 = vadd.f32 %v13556_v10, %v5743_v18  ;;  %v5745_v29 = vpop.f32.mrb[67].mxu1  ;;  %10089 = vmatpush1.bf16.msra.mxu0 %v10088_v17  ;;  %v6488_v17 = vld [vmem:[#allocation6 + $0x4f8] sm:$0xff]  ;;  %v10184_v6 = vpack.c.bf16 %v6487_v50, %v6485_v19  ;;  %v6502_v18 = vld [vmem:[#allocation6 + $0x568] sm:$0xff] }
 0x629   :  { %v6058_v45 = vadd.f32 %v13560_v31, %v5745_v29  ;;  %v10182_v63 = vpack.c.bf16 %v6488_v17, %v6486_v9 }
 0x62a   :  { %v6087_v1 = vmax.f32 %v6057_v54, 0.0  ;;  %v6504_v54 = vld [vmem:[#allocation6 + $0x578] sm:$0xff] }
 0x62b   :  { %v6088_v34 = vmax.f32 %v6058_v45, 0.0  ;;  %v5749_v0 = vpop.f32.mrb[68].mxu1  ;;  %10183 = vmatprep.subr.bf16.mxu1 %v10182_v63  ;;  %v10198_v29 = vpack.c.bf16 %v6504_v54, %v6502_v18  ;;  %v6501_v45 = vld [vmem:[#allocation6 + $0x560] sm:$0xff] }
 0x62c   :  { %v10092_v21 = vpack.c.bf16 %v6087_v1, %v6084_v39  ;;  %v5751_v57 = vpop.f32.mrb[69].mxu1  ;;  %v6060_v48 = vadd.f32 %v13556_v10, %v5749_v0  ;;  %v6503_v39 = vld [vmem:[#allocation6 + $0x570] sm:$0xff]  ;;  %10185 = vmatpush1.bf16.msra.mxu1 %v10184_v6 }
 0x62d   :  { %v10090_v14 = vpack.c.bf16 %v6088_v34, %v6085_v23  ;;  %v6061_v27 = vadd.f32 %v13560_v31, %v5751_v57  ;;  %v10200_v1 = vpack.c.bf16 %v6503_v39, %v6501_v45  ;;  %v6506_v23 = vld [vmem:[#allocation6 + $0x588] sm:$0xff]  ;;  %v6508_v34 = vld [vmem:[#allocation6 + $0x598] sm:$0xff]  ;;  %v6507_v57 = vld [vmem:[#allocation6 + $0x590] sm:$0xff] }
 0x62e   :  { %v6090_v37 = vmax.f32 %v6060_v48, 0.0  ;;  %v10202_v0 = vpack.c.bf16 %v6508_v34, %v6506_v23  ;;  %v6510_v48 = vld [vmem:[#allocation6 + $0x5a8] sm:$0xff] }
 0x62f   :  { %v5755_v28 = vpop.f32.mrb[70].mxu1  ;;  %10091 = vmatprep.subr.bf16.mxu0 %v10090_v14  ;;  %v6091_v35 = vmax.f32 %v6061_v27, 0.0  ;;  %v6512_v27 = vld [vmem:[#allocation6 + $0x5b8] sm:$0xff] }
 0x630   :  { %v6063_v15 = vadd.f32 %v13556_v10, %v5755_v28  ;;  %v5757_v24 = vpop.f32.mrb[71].mxu1  ;;  %10093 = vmatpush1.bf16.msra.mxu0 %v10092_v21  ;;  %v6097_v10 = vld [vmem:[#allocation10 + $0x8] sm:$0xff]  ;;  %v6505_v21 = vld [vmem:[#allocation6 + $0x580] sm:$0xff]  ;;  %v10206_v28 = vpack.c.bf16 %v6512_v27, %v6510_v48 }
 0x631   :  { %v6064_v59 = vadd.f32 %v13560_v31, %v5757_v24  ;;  %v6098_v31 = vld [vmem:[#allocation10 + $0x10] sm:$0xff]  ;;  %v10204_v14 = vpack.c.bf16 %v6507_v57, %v6505_v21  ;;  %v6511_v24 = vld [vmem:[#allocation6 + $0x5b0] sm:$0xff] }
 0x632   :  { %v6093_v33 = vmax.f32 %v6063_v15, 0.0  ;;  %v6509_v15 = vld [vmem:[#allocation6 + $0x5a0] sm:$0xff] }
 0x633   :  { %v6094_v22 = vmax.f32 %v6064_v59, 0.0  ;;  %v10208_v59 = vpack.c.bf16 %v6511_v24, %v6509_v15 }
 0x634   :  { %v10097_v3 = vpack.c.bf16 %v6093_v33, %v6090_v37  ;;  %v6514_v37 = vld [vmem:[#allocation6 + $0x5c8] sm:$0xff]  ;;  %v6516_v33 = vld [vmem:[#allocation6 + $0x5d8] sm:$0xff] }
 0x635   :  { %v10094_v47 = vpack.c.bf16 %v6094_v22, %v6091_v35  ;;  %v10210_v35 = vpack.c.bf16 %v6516_v33, %v6514_v37  ;;  %v6513_v22 = vld [vmem:[#allocation6 + $0x5c0] sm:$0xff] }
 0x637   :  { %10096 = vmatprep.subr.msk.bf16.mxu0 %vm11485_vm2, %v10094_v47 }
 0x638   :  { %10099 = vmatpush1.bf16.msk.msra.mxu0 %vm11485_vm2, %v10097_v3  ;;  %v6515_v3 = vld [vmem:[#allocation6 + $0x5d0] sm:$0xff] }
 0x639   :  { %10101 = vmatprep.subr.bf16.mxu0 %v13544_v12  ;;  %v10212_v47 = vpack.c.bf16 %v6515_v3, %v6513_v22 }
 0x63b   :  { %8222 = vmatmul.mubr.msk.f32.vlgmr.msra.gmra.mrb[138].mxu0 %vm6102_vm9, %v6096_v5 }
 0x63c   :  { %10103 = vmatpush3.bf16.msra.mxu0 %v13544_v12  ;;  %6200 = vmatprep.mubr.f32.mxu0 %v14153_v44  ;;  %v6099_v12 = vld [vmem:[#allocation10 + $0x18] sm:$0xff] }
 0x63d   :  { %10105 = vmatprep.subr.bf16.mxu0 %v13546_v58 }
 0x63f   :  { %8223 = vmatmul.mubr.msk.f32.gmra.mrb[140].mxu0 %vm6102_vm9, %v6097_v10 }
 0x640   :  { %10107 = vmatpush3.bf16.msra.mxu0 %v13546_v58  ;;  %6206 = vmatprep.mubr.f32.mxu0 %v14153_v44  ;;  %v6100_v58 = vld [vmem:[#allocation10 + $0x20] sm:$0xff] }
 0x641   :  { %10109 = vmatprep.subr.bf16.mxu0 %v13548_v7 }
 0x643   :  { %8224 = vmatmul.mubr.msk.f32.gmra.mrb[142].mxu0 %vm6102_vm9, %v6098_v31 }
 0x644   :  { %10111 = vmatpush3.bf16.msra.mxu0 %v13548_v7  ;;  %6212 = vmatprep.mubr.f32.mxu0 %v14153_v44  ;;  %v6101_v7 = vld [vmem:[#allocation10 + $0x28] sm:$0xff] }
 0x645   :  { %10113 = vmatprep.subr.bf16.mxu0 %v13550_v51 }
 0x647   :  { %8225 = vmatmul.mubr.msk.f32.gmra.mrb[144].mxu0 %vm6102_vm9, %v6099_v12 }
 0x648   :  { %10115 = vmatpush3.bf16.msra.mxu0 %v13550_v51  ;;  %6218 = vmatprep.mubr.f32.mxu0 %v14153_v44  ;;  %v6491_v51 = vld [vmem:[#allocation6 + $0x510] sm:$0xff] }
 0x649   :  { %10118 = vmatprep.subr.msk.bf16.mxu0 %vm11485_vm2, %v13552_v60  ;;  %v10188_v11 = vpack.c.bf16 %v6491_v51, %v6489_v49 }
 0x64b   :  { %8226 = vmatmul.mubr.msk.f32.gmra.mrb[146].mxu0 %vm6102_vm9, %v6100_v58 }
 0x64c   :  { %10121 = vmatpush3.bf16.msk.msra.mxu0 %vm11485_vm2, %v13552_v60  ;;  %6224 = vmatprep.mubr.f32.mxu0 %v14153_v44  ;;  %v6494_v60 = vld [vmem:[#allocation6 + $0x528] sm:$0xff] }
 0x64d   :  { %10187 = vmatprep.subr.bf16.mxu0 %v10186_v42  ;;  %v10190_v43 = vpack.c.bf16 %v6496_v26, %v6494_v60 }
 0x64f   :  { %8227 = vmatmul.mubr.msk.f32.gmra.mrb[148].mxu0 %vm6102_vm9, %v6101_v7 }
 0x650   :  { %9201 = vmatprep.mubr.msk.f32.mxu0 %vm6102_vm9, %v6096_v5  ;;  %v6520_v5 = vld [vmem:[#allocation6 + $0x5f8] sm:$0xff] }
 0x653   :  { %9202 = vmatmul.mubr.msk.f32.vlgmr.msra.gmra.mrb[150].mxu0 %vm6102_vm9, %v6097_v10  ;;  %v10214_v10 = vpack.c.bf16 %v6520_v5, %v6518_v30  ;;  %v6328_v5 = vld [vmem:[#allocation6] sm:$0xff] }
 0x654   :  { %9204 = vmatprep.mubr.msk.f32.mxu0 %vm6102_vm9, %v6098_v31  ;;  %10189 = vmatpush1.bf16.msra.mxu0 %v10188_v11  ;;  %v6517_v31 = vld [vmem:[#allocation6 + $0x5e0] sm:$0xff] }
 0x655   :  { %10191 = vmatprep.subr.bf16.mxu0 %v10190_v43 }
 0x657   :  { %9205 = vmatmul.mubr.msk.f32.gmra.mrb[152].mxu0 %vm6102_vm9, %v6099_v12  ;;  %v6519_v12 = vld [vmem:[#allocation6 + $0x5f0] sm:$0xff] }
 0x658   :  { %9207 = vmatprep.mubr.msk.f32.mxu0 %vm6102_vm9, %v6100_v58  ;;  %10193 = vmatpush1.bf16.msra.mxu0 %v10192_v53  ;;  %v10216_v46 = vpack.c.bf16 %v6519_v12, %v6517_v31  ;;  %v6331_v58 = vld [vmem:[#allocation6 + $0x18] sm:$0xff] }
 0x659   :  { %10195 = vmatprep.subr.bf16.mxu0 %v10194_v61  ;;  %v10218_v42 = vpack.c.bf16 %v6331_v58, %v6329_v32  ;;  %v6333_v32 = vld [vmem:[#allocation6 + $0x28] sm:$0xff]  ;;  %v6335_v58 = vld [vmem:[#allocation6 + $0x38] sm:$0xff] }
 0x65b   :  { %9208 = vmatmul.mubr.msk.f32.gmra.mrb[154].mxu0 %vm6102_vm9, %v6101_v7 }
 0x65c   :  { %6755 = vmatprep.mubr.f32.mxu0 %v14153_v44  ;;  %10197 = vmatpush1.bf16.msra.mxu0 %v10196_v52 }
 0x65d   :  { %10199 = vmatprep.subr.bf16.mxu0 %v10198_v29 }
 0x660   :  { %10201 = vmatpush1.bf16.msra.mxu0 %v10200_v1 }
 0x661   :  { %10203 = vmatprep.subr.bf16.mxu0 %v10202_v0 }
 0x664   :  { %10205 = vmatpush1.bf16.msra.mxu0 %v10204_v14 }
 0x665   :  { %10207 = vmatprep.subr.bf16.mxu0 %v10206_v28 }
 0x668   :  { %10209 = vmatpush1.bf16.msra.mxu0 %v10208_v59 }
 0x669   :  { %10211 = vmatprep.subr.bf16.mxu0 %v10210_v35 }
 0x66c   :  { %10213 = vmatpush1.bf16.msra.mxu0 %v10212_v47 }
 0x66d   :  { %10215 = vmatprep.subr.bf16.mxu0 %v10214_v10  ;;  %v6330_v10 = vld [vmem:[#allocation6 + $0x10] sm:$0xff] }
 0x670   :  { %10217 = vmatpush1.bf16.msra.mxu0 %v10216_v46 }
 0x671   :  { %10219 = vmatprep.subr.bf16.mxu0 %v10218_v42 }
 0x70e   :  { %v13618_v7 = vpop.f32.mrb[138].mxu0 }
 0x70f   :  { %v13620_v49 = vpop.f32.mrb[139].mxu0  ;;  %v6539_v11 = vrot.slane %v13618_v7, 1  ;;  %v7091_v60 = vrot.slane %v13618_v7, 2 }
 0x710   :  { %v6542_v4 = vrot.slane %v13620_v49, 1  ;;  %v7094_v36 = vrot.slane %v13620_v49, 2 }
 0x712   :  { %v13622_v51 = vpop.f32.mrb[140].mxu0 }
 0x713   :  { %v6540_v26 = vrot.slane %v13622_v51, 1  ;;  %v7092_v43 = vrot.slane %v13622_v51, 2  ;;  %v13628_v40 = vpop.f32.mrb[141].mxu0 }
 0x714   :  { %v6543_v53 = vrot.slane %v13628_v40, 1  ;;  %v7095_v2 = vrot.slane %v13628_v40, 2 }
 0x715   :  { %v6541_v41 = vsel %vm212_vm3, %v6539_v11, %v6540_v26  ;;  %v13636_v16 = vsel %vm897_vm4, %v7091_v60, %v7092_v43 }
 0x716   :  { %v13638_v62 = vpop.f32.mrb[142].mxu0  ;;  %v6544_v8 = vsel %vm212_vm3, %v6542_v4, %v6543_v53  ;;  %v13642_v13 = vsel %vm897_vm4, %v7094_v36, %v7095_v2  ;;  %v10220_v36 = vpack.c.bf16 %v6330_v10, %v6328_v5 }
 0x717   :  { %v6548_v56 = vrot.slane %v13638_v62, 1  ;;  %v7100_v61 = vrot.slane %v13638_v62, 2  ;;  %v13646_v25 = vpop.f32.mrb[143].mxu0  ;;  %6654 = vmatprep.mubr.f32.mxu1 %v6544_v8 }
 0x718   :  { %v6550_v20 = vrot.slane %v13646_v25, 1  ;;  %v7102_v9 = vrot.slane %v13646_v25, 2  ;;  %6655 = vmatmul.mubr.f32.vlgmr.msra.gmra.mrb[72].mxu1 %v6541_v41  ;;  %v6334_v41 = vld [vmem:[#allocation6 + $0x30] sm:$0xff] }
 0x719   :  { %v6549_v52 = vsel %vm212_vm3, %v6540_v26, %v6548_v56  ;;  %v13652_v17 = vsel %vm897_vm4, %v7092_v43, %v7100_v61 }
 0x71a   :  { %v13654_v19 = vpop.f32.mrb[144].mxu0  ;;  %v6551_v50 = vsel %vm212_vm3, %v6543_v53, %v6550_v20  ;;  %v13658_v63 = vsel %vm897_vm4, %v7095_v2, %v7102_v9  ;;  %v10222_v53 = vpack.c.bf16 %v6335_v58, %v6333_v32  ;;  %v6332_v2 = vld [vmem:[#allocation6 + $0x20] sm:$0xff] }
 0x71b   :  { %v6554_v6 = vrot.slane %v13654_v19, 1  ;;  %v7106_v18 = vrot.slane %v13654_v19, 2  ;;  %v13662_v54 = vpop.f32.mrb[145].mxu0  ;;  %6660 = vmatprep.mubr.f32.mxu1 %v6551_v50 }
 0x71c   :  { %v6556_v29 = vrot.slane %v13662_v54, 1  ;;  %v7108_v45 = vrot.slane %v13662_v54, 2  ;;  %6661 = vmatmul.mubr.f32.gmra.mrb[74].mxu1 %v6549_v52 }
 0x71d   :  { %v6555_v39 = vsel %vm212_vm3, %v6548_v56, %v6554_v6  ;;  %v13668_v1 = vsel %vm897_vm4, %v7100_v61, %v7106_v18  ;;  %v6337_v61 = vld [vmem:[#allocation6 + $0x48] sm:$0xff] }
 0x71e   :  { %v13670_v23 = vpop.f32.mrb[146].mxu0  ;;  %v6557_v34 = vsel %vm212_vm3, %v6550_v20, %v6556_v29  ;;  %v13674_v0 = vsel %vm897_vm4, %v7102_v9, %v7108_v45  ;;  %v6339_v20 = vld [vmem:[#allocation6 + $0x58] sm:$0xff] }
 0x71f   :  { %v6560_v21 = vrot.slane %v13670_v23, 1  ;;  %v7112_v57 = vrot.slane %v13670_v23, 2  ;;  %v13678_v14 = vpop.f32.mrb[147].mxu0  ;;  %6666 = vmatprep.mubr.f32.mxu1 %v6557_v34  ;;  %v6336_v34 = vld [vmem:[#allocation6 + $0x40] sm:$0xff] }
 0x720   :  { %v6562_v48 = vrot.slane %v13678_v14, 1  ;;  %v7114_v27 = vrot.slane %v13678_v14, 2  ;;  %6667 = vmatmul.mubr.f32.gmra.mrb[76].mxu1 %v6555_v39  ;;  %v10226_v39 = vpack.c.bf16 %v6339_v20, %v6337_v61 }
 0x721   :  { %v6561_v28 = vsel %vm212_vm3, %v6554_v6, %v6560_v21  ;;  %v13684_v15 = vsel %vm897_vm4, %v7106_v18, %v7112_v57 }
 0x722   :  { %v13686_v24 = vpop.f32.mrb[148].mxu0  ;;  %v6563_v59 = vsel %vm212_vm3, %v6556_v29, %v6562_v48  ;;  %v13690_v37 = vsel %vm897_vm4, %v7108_v45, %v7114_v27  ;;  %v10224_v45 = vpack.c.bf16 %v6334_v41, %v6332_v2 }
 0x723   :  { %v6566_v33 = vrot.slane %v13686_v24, 1  ;;  %v7118_v35 = vrot.slane %v13686_v24, 2  ;;  %v13694_v22 = vpop.f32.mrb[149].mxu0  ;;  %6672 = vmatprep.mubr.f32.mxu1 %v6563_v59  ;;  %v6343_v59 = vld [vmem:[#allocation6 + $0x78] sm:$0xff] }
 0x724   :  { %v6568_v3 = vrot.slane %v13694_v22, 1  ;;  %v7120_v47 = vrot.slane %v13694_v22, 2  ;;  %6673 = vmatmul.mubr.f32.gmra.mrb[78].mxu1 %v6561_v28  ;;  %v6341_v28 = vld [vmem:[#allocation6 + $0x68] sm:$0xff] }
 0x725   :  { %v6567_v30 = vsel %vm212_vm3, %v6560_v21, %v6566_v33  ;;  %v13702_v31 = vsel %vm897_vm4, %v7112_v57, %v7118_v35  ;;  %v6338_v21 = vld [vmem:[#allocation6 + $0x50] sm:$0xff] }
 0x726   :  { %v13704_v12 = vpop.f32.mrb[150].mxu0  ;;  %v6569_v46 = vsel %vm212_vm3, %v6562_v48, %v6568_v3  ;;  %v13710_v42 = vsel %vm897_vm4, %v7114_v27, %v7120_v47  ;;  %v10228_v58 = vpack.c.bf16 %v6338_v21, %v6336_v34  ;;  %v6348_v34 = vld [vmem:[#allocation6 + $0xa0] sm:$0xff]  ;;  %v6350_v21 = vld [vmem:[#allocation6 + $0xb0] sm:$0xff] }
 0x727   :  { %v6546_v11 = vrot.slane %v13704_v12, 1  ;;  %v7098_v60 = vrot.slane %v13704_v12, 2  ;;  %v13714_v26 = vpop.f32.mrb[151].mxu0  ;;  %6678 = vmatprep.mubr.f32.mxu1 %v6569_v46 }
 0x728   :  { %v6545_v43 = vrot.slane %v13714_v26, 1  ;;  %v7097_v4 = vrot.slane %v13714_v26, 2  ;;  %6679 = vmatmul.mubr.f32.gmra.mrb[80].mxu1 %v6567_v30 }
 0x729   :  { %6684 = vmatprep.mubr.f32.mxu1 %v6568_v3 }
 0x72a   :  { %v13718_v8 = vpop.f32.mrb[152].mxu0  ;;  %v6547_v56 = vsel %vm212_vm3, %v6545_v43, %v6546_v11  ;;  %v13722_v9 = vsel %vm897_vm4, %v7097_v4, %v7098_v60  ;;  %v6342_v43 = vld [vmem:[#allocation6 + $0x70] sm:$0xff] }
 0x72b   :  { %v6558_v52 = vrot.slane %v13718_v8, 1  ;;  %v7110_v50 = vrot.slane %v13718_v8, 2  ;;  %v13726_v6 = vpop.f32.mrb[153].mxu0  ;;  %6756 = vmatmul.mubr.f32.vlgmr.msra.gmra.mrb[156].mxu0 %v6547_v56 }
 0x72c   :  { %v6552_v18 = vrot.slane %v13726_v6, 1  ;;  %v7104_v29 = vrot.slane %v13726_v6, 2  ;;  %10221 = vmatpush1.bf16.msra.mxu0 %v10220_v36  ;;  %6685 = vmatmul.mubr.f32.gmra.mrb[82].mxu1 %v6566_v33  ;;  %v6345_v36 = vld [vmem:[#allocation6 + $0x88] sm:$0xff] }
 0x72d   :  { %6761 = vmatprep.mubr.f32.mxu0 %v14153_v44  ;;  %10223 = vmatprep.subr.bf16.mxu0 %v10222_v53  ;;  %v6347_v53 = vld [vmem:[#allocation6 + $0x98] sm:$0xff] }
 0x72e   :  { %v6553_v57 = vsel %vm212_vm3, %v6546_v11, %v6552_v18  ;;  %v13732_v48 = vpop.f32.mrb[154].mxu0  ;;  %v6559_v27 = vsel %vm212_vm3, %v6552_v18, %v6558_v52  ;;  %v13736_v3 = vsel %vm897_vm4, %v7098_v60, %v7104_v29  ;;  %v13743_v10 = vsel %vm897_vm4, %v7104_v29, %v7110_v50  ;;  %v6340_v60 = vld [vmem:[#allocation6 + $0x60] sm:$0xff]  ;;  %v6346_v18 = vld [vmem:[#allocation6 + $0x90] sm:$0xff]  ;;  %v6349_v29 = vld [vmem:[#allocation6 + $0xa8] sm:$0xff]  ;;  %9222 = vmatprep.mubr.msk.f32.mxu1 %vm11270_vm10, %v14153_v44 }
 0x72f   :  { %6762 = vmatmul.mubr.f32.gmra.mrb[158].mxu0 %v6553_v57  ;;  %v6570_v33 = vrot.slane %v13732_v48, 1  ;;  %v7122_v30 = vrot.slane %v13732_v48, 2  ;;  %v13740_v5 = vpop.f32.mrb[155].mxu0  ;;  %v10230_v11 = vpack.c.bf16 %v6343_v59, %v6341_v28  ;;  %v10232_v61 = vpack.c.bf16 %v6342_v43, %v6340_v60  ;;  %v6353_v57 = vld [vmem:[#allocation6 + $0xc8] sm:$0xff] }
 0x730   :  { %10225 = vmatpush1.bf16.msra.mxu0 %v10224_v45  ;;  %6767 = vmatprep.mubr.f32.mxu0 %v14153_v44  ;;  %v6564_v46 = vrot.slane %v13740_v5, 1  ;;  %v7116_v32 = vrot.slane %v13740_v5, 2  ;;  %v10234_v20 = vpack.c.bf16 %v6347_v53, %v6345_v36  ;;  %v6351_v45 = vld [vmem:[#allocation6 + $0xb8] sm:$0xff]  ;;  %v10240_v28 = vpack.c.bf16 %v6350_v21, %v6348_v34  ;;  %v6358_v36 = vld [vmem:[#allocation6 + $0xf0] sm:$0xff]  ;;  %v6361_v53 = vld [vmem:[#allocation6 + $0x108] sm:$0xff] }
 0x731   :  { %10227 = vmatprep.subr.bf16.mxu0 %v10226_v39  ;;  %v10238_v39 = vpack.c.bf16 %v6351_v45, %v6349_v29  ;;  %v6365_v29 = vld [vmem:[#allocation6 + $0x128] sm:$0xff]  ;;  %v6367_v45 = vld [vmem:[#allocation6 + $0x138] sm:$0xff] }
 0x732   :  { %v6565_v4 = vsel %vm212_vm3, %v6558_v52, %v6564_v46  ;;  %v6571_v2 = vsel %vm212_vm3, %v6564_v46, %v6570_v33  ;;  %v13751_v41 = vsel %vm897_vm4, %v7110_v50, %v7116_v32  ;;  %v13756_v56 = vsel %vm897_vm4, %v7116_v32, %v7122_v30  ;;  %v6344_v52 = vld [vmem:[#allocation6 + $0x80] sm:$0xff]  ;;  %v6354_v32 = vld [vmem:[#allocation6 + $0xd0] sm:$0xff]  ;;  %v6369_v34 = vld [vmem:[#allocation6 + $0x148] sm:$0xff] }
 0x733   :  { %6768 = vmatmul.mubr.f32.gmra.mrb[160].mxu0 %v6559_v27  ;;  %v10236_v50 = vpack.c.bf16 %v6346_v18, %v6344_v52  ;;  %v6355_v27 = vld [vmem:[#allocation6 + $0xd8] sm:$0xff]  ;;  %v6352_v46 = vld [vmem:[#allocation6 + $0xc0] sm:$0xff]  ;;  %v6362_v18 = vld [vmem:[#allocation6 + $0x110] sm:$0xff] }
 0x734   :  { %10229 = vmatpush1.bf16.msra.mxu0 %v10228_v58  ;;  %6773 = vmatprep.mubr.f32.mxu0 %v14153_v44  ;;  %v10242_v59 = vpack.c.bf16 %v6355_v27, %v6353_v57  ;;  %v6357_v58 = vld [vmem:[#allocation6 + $0xe8] sm:$0xff]  ;;  %v10244_v60 = vpack.c.bf16 %v6354_v32, %v6352_v46  ;;  %v6360_v52 = vld [vmem:[#allocation6 + $0x100] sm:$0xff]  ;;  %v6371_v21 = vld [vmem:[#allocation6 + $0x158] sm:$0xff] }
 0x735   :  { %10231 = vmatprep.subr.bf16.mxu0 %v10230_v11  ;;  %v6359_v11 = vld [vmem:[#allocation6 + $0xf8] sm:$0xff]  ;;  %v10258_v27 = vpack.c.bf16 %v6371_v21, %v6369_v34  ;;  %v6373_v46 = vld [vmem:[#allocation6 + $0x168] sm:$0xff] }
 0x736   :  { %v10246_v43 = vpack.c.bf16 %v6359_v11, %v6357_v58  ;;  %v6375_v32 = vld [vmem:[#allocation6 + $0x178] sm:$0xff] }
 0x737   :  { %6774 = vmatmul.mubr.f32.gmra.mrb[162].mxu0 %v6565_v4  ;;  %v6356_v4 = vld [vmem:[#allocation6 + $0xe0] sm:$0xff]  ;;  %v10262_v11 = vpack.c.bf16 %v6375_v32, %v6373_v46 }
 0x738   :  { %10233 = vmatpush1.bf16.msra.mxu0 %v10232_v61  ;;  %6779 = vmatprep.mubr.f32.mxu0 %v14153_v44  ;;  %v10248_v61 = vpack.c.bf16 %v6358_v36, %v6356_v4  ;;  %v6377_v4 = vld [vmem:[#allocation6 + $0x188] sm:$0xff]  ;;  %v6379_v36 = vld [vmem:[#allocation6 + $0x198] sm:$0xff] }
 0x739   :  { %10235 = vmatprep.subr.bf16.mxu0 %v10234_v20 }
 0x73b   :  { %6780 = vmatmul.mubr.f32.gmra.mrb[164].mxu0 %v6571_v2  ;;  %v6363_v2 = vld [vmem:[#allocation6 + $0x118] sm:$0xff] }
 0x73c   :  { %10237 = vmatpush1.bf16.msra.mxu0 %v10236_v50  ;;  %6785 = vmatprep.mubr.f32.mxu0 %v14153_v44  ;;  %v10250_v20 = vpack.c.bf16 %v6363_v2, %v6361_v53  ;;  %v10254_v50 = vpack.c.bf16 %v6367_v45, %v6365_v29  ;;  %v10266_v2 = vpack.c.bf16 %v6379_v36, %v6377_v4 }
 0x73d   :  { %10239 = vmatprep.subr.bf16.mxu0 %v10238_v39  ;;  %v6366_v39 = vld [vmem:[#allocation6 + $0x130] sm:$0xff] }
 0x73f   :  { %6786 = vmatmul.mubr.f32.gmra.mrb[166].mxu0 %v6570_v33  ;;  %v10252_v33 = vpack.c.bf16 %v6362_v18, %v6360_v52  ;;  %v6381_v52 = vld [vmem:[#allocation6 + $0x1a8] sm:$0xff]  ;;  %v6383_v18 = vld [vmem:[#allocation6 + $0x1b8] sm:$0xff] }
 0x740   :  { %10241 = vmatpush1.bf16.msra.mxu0 %v10240_v28  ;;  %6856 = vmatprep.mubr.f32.mxu0 %v13620_v49  ;;  %v6364_v49 = vld [vmem:[#allocation6 + $0x120] sm:$0xff]  ;;  %v10270_v45 = vpack.c.bf16 %v6383_v18, %v6381_v52 }
 0x741   :  { %10243 = vmatprep.subr.bf16.mxu0 %v10242_v59  ;;  %v10256_v57 = vpack.c.bf16 %v6366_v39, %v6364_v49  ;;  %v6368_v28 = vld [vmem:[#allocation6 + $0x140] sm:$0xff]  ;;  %v6370_v59 = vld [vmem:[#allocation6 + $0x150] sm:$0xff]  ;;  %v6385_v49 = vld [vmem:[#allocation6 + $0x1c8] sm:$0xff] }
 0x742   :  { %v10260_v58 = vpack.c.bf16 %v6370_v59, %v6368_v28  ;;  %v6387_v39 = vld [vmem:[#allocation6 + $0x1d8] sm:$0xff]  ;;  %v6389_v28 = vld [vmem:[#allocation6 + $0x1e8] sm:$0xff] }
 0x743   :  { %v10274_v21 = vpack.c.bf16 %v6387_v39, %v6385_v49  ;;  %v6391_v59 = vld [vmem:[#allocation6 + $0x1f8] sm:$0xff] }
 0x744   :  { %10245 = vmatpush1.bf16.msra.mxu0 %v10244_v60  ;;  %v6372_v60 = vld [vmem:[#allocation6 + $0x160] sm:$0xff]  ;;  %v10278_v32 = vpack.c.bf16 %v6391_v59, %v6389_v28 }
 0x745   :  { %10247 = vmatprep.subr.bf16.mxu0 %v10246_v43  ;;  %v6374_v43 = vld [vmem:[#allocation6 + $0x170] sm:$0xff] }
 0x746   :  { %v10264_v53 = vpack.c.bf16 %v6374_v43, %v6372_v60  ;;  %v6393_v60 = vld [vmem:[#allocation6 + $0x208] sm:$0xff]  ;;  %v6395_v43 = vld [vmem:[#allocation6 + $0x218] sm:$0xff] }
 0x747   :  { %v10282_v36 = vpack.c.bf16 %v6395_v43, %v6393_v60  ;;  %v6408_v60 = vld [vmem:[#allocation6 + $0x280] sm:$0xff]  ;;  %v6413_v43 = vld [vmem:[#allocation6 + $0x2a8] sm:$0xff] }
 0x748   :  { %10249 = vmatpush1.bf16.msra.mxu0 %v10248_v61  ;;  %v6376_v61 = vld [vmem:[#allocation6 + $0x180] sm:$0xff] }
 0x749   :  { %10251 = vmatprep.subr.bf16.mxu0 %v10250_v20  ;;  %v6378_v20 = vld [vmem:[#allocation6 + $0x190] sm:$0xff] }
 0x74a   :  { %v10268_v29 = vpack.c.bf16 %v6378_v20, %v6376_v61  ;;  %v6397_v61 = vld [vmem:[#allocation6 + $0x228] sm:$0xff]  ;;  %v6399_v20 = vld [vmem:[#allocation6 + $0x238] sm:$0xff] }
 0x74b   :  { %v10286_v18 = vpack.c.bf16 %v6399_v20, %v6397_v61 }
 0x74c   :  { %10253 = vmatpush1.bf16.msra.mxu0 %v10252_v33  ;;  %v6380_v33 = vld [vmem:[#allocation6 + $0x1a0] sm:$0xff] }
 0x74d   :  { %10255 = vmatprep.subr.bf16.mxu0 %v10254_v50  ;;  %v6382_v50 = vld [vmem:[#allocation6 + $0x1b0] sm:$0xff] }
 0x74e   :  { %v10272_v34 = vpack.c.bf16 %v6382_v50, %v6380_v33  ;;  %v6401_v33 = vld [vmem:[#allocation6 + $0x248] sm:$0xff]  ;;  %v6403_v50 = vld [vmem:[#allocation6 + $0x258] sm:$0xff] }
 0x74f   :  { %v10290_v39 = vpack.c.bf16 %v6403_v50, %v6401_v33  ;;  %v6420_v33 = vld [vmem:[#allocation6 + $0x2e0] sm:$0xff]  ;;  %v6996_v50 = vld [vmem:[#allocation6 + $0x608] sm:$0xff] }
 0x750   :  { %10257 = vmatpush1.bf16.msra.mxu0 %v10256_v57  ;;  %v6384_v57 = vld [vmem:[#allocation6 + $0x1c0] sm:$0xff] }
 0x751   :  { %10259 = vmatprep.subr.bf16.mxu0 %v10258_v27  ;;  %v6386_v27 = vld [vmem:[#allocation6 + $0x1d0] sm:$0xff] }
 0x752   :  { %v10276_v46 = vpack.c.bf16 %v6386_v27, %v6384_v57  ;;  %v6405_v57 = vld [vmem:[#allocation6 + $0x268] sm:$0xff]  ;;  %v6407_v27 = vld [vmem:[#allocation6 + $0x278] sm:$0xff] }
 0x753   :  { %v10294_v59 = vpack.c.bf16 %v6407_v27, %v6405_v57  ;;  %v6997_v57 = vld [vmem:[#allocation6 + $0x610] sm:$0xff]  ;;  %v7000_v27 = vld [vmem:[#allocation6 + $0x628] sm:$0xff] }
 0x754   :  { %10261 = vmatpush1.bf16.msra.mxu0 %v10260_v58  ;;  %v6388_v58 = vld [vmem:[#allocation6 + $0x1e0] sm:$0xff] }
 0x755   :  { %10263 = vmatprep.subr.bf16.mxu0 %v10262_v11  ;;  %v6390_v11 = vld [vmem:[#allocation6 + $0x1f0] sm:$0xff] }
 0x756   :  { %v10280_v4 = vpack.c.bf16 %v6390_v11, %v6388_v58 }
 0x758   :  { %10265 = vmatpush1.bf16.msra.mxu0 %v10264_v53  ;;  %v6392_v53 = vld [vmem:[#allocation6 + $0x200] sm:$0xff] }
 0x759   :  { %10267 = vmatprep.subr.bf16.mxu0 %v10266_v2  ;;  %v6394_v2 = vld [vmem:[#allocation6 + $0x210] sm:$0xff] }
 0x75a   :  { %v10284_v52 = vpack.c.bf16 %v6394_v2, %v6392_v53  ;;  %v6412_v53 = vld [vmem:[#allocation6 + $0x2a0] sm:$0xff]  ;;  %v6417_v2 = vld [vmem:[#allocation6 + $0x2c8] sm:$0xff] }
 0x75c   :  { %10269 = vmatpush1.bf16.msra.mxu0 %v10268_v29  ;;  %v6396_v29 = vld [vmem:[#allocation6 + $0x220] sm:$0xff] }
 0x75d   :  { %10271 = vmatprep.subr.bf16.mxu0 %v10270_v45  ;;  %v6398_v45 = vld [vmem:[#allocation6 + $0x230] sm:$0xff] }
 0x75e   :  { %v10288_v49 = vpack.c.bf16 %v6398_v45, %v6396_v29 }
 0x760   :  { %10273 = vmatpush1.bf16.msra.mxu0 %v10272_v34  ;;  %v6400_v34 = vld [vmem:[#allocation6 + $0x240] sm:$0xff] }
 0x761   :  { %10275 = vmatprep.subr.bf16.mxu0 %v10274_v21  ;;  %v6402_v21 = vld [vmem:[#allocation6 + $0x250] sm:$0xff] }
 0x762   :  { %v10292_v28 = vpack.c.bf16 %v6402_v21, %v6400_v34  ;;  %v6995_v21 = vld [vmem:[#allocation6 + $0x600] sm:$0xff] }
 0x764   :  { %10277 = vmatpush1.bf16.msra.mxu0 %v10276_v46  ;;  %v6404_v46 = vld [vmem:[#allocation6 + $0x260] sm:$0xff] }
 0x765   :  { %10279 = vmatprep.subr.bf16.mxu0 %v10278_v32  ;;  %v6409_v32 = vld [vmem:[#allocation6 + $0x288] sm:$0xff] }
 0x768   :  { %10281 = vmatpush1.bf16.msra.mxu0 %v10280_v4 }
 0x769   :  { %10283 = vmatprep.subr.bf16.mxu0 %v10282_v36 }
 0x76b   :  { %6857 = vmatmul.mubr.f32.vlgmr.msra.gmra.mrb[156].mxu0 %v13618_v7  ;;  %v6406_v7 = vld [vmem:[#allocation6 + $0x270] sm:$0xff] }
 0x76c   :  { %6862 = vmatprep.mubr.f32.mxu0 %v13628_v40  ;;  %10285 = vmatpush1.bf16.msra.mxu0 %v10284_v52  ;;  %v6411_v40 = vld [vmem:[#allocation6 + $0x298] sm:$0xff]  ;;  %v10296_v58 = vpack.c.bf16 %v6406_v7, %v6404_v46  ;;  %v6416_v52 = vld [vmem:[#allocation6 + $0x2c0] sm:$0xff] }
 0x76d   :  { %10287 = vmatprep.subr.bf16.mxu0 %v10286_v18  ;;  %v10298_v11 = vpack.c.bf16 %v6411_v40, %v6409_v32  ;;  %v6421_v18 = vld [vmem:[#allocation6 + $0x2e8] sm:$0xff]  ;;  %v6999_v7 = vld [vmem:[#allocation6 + $0x620] sm:$0xff]  ;;  %v7001_v32 = vld [vmem:[#allocation6 + $0x630] sm:$0xff] }
 0x76e   :  { %v7004_v40 = vld [vmem:[#allocation6 + $0x648] sm:$0xff] }
 0x76f   :  { %6863 = vmatmul.mubr.f32.gmra.mrb[158].mxu0 %v13622_v51  ;;  %v6410_v51 = vld [vmem:[#allocation6 + $0x290] sm:$0xff] }
 0x770   :  { %6868 = vmatprep.mubr.f32.mxu0 %v13646_v25  ;;  %10289 = vmatpush1.bf16.msra.mxu0 %v10288_v49  ;;  %v6415_v25 = vld [vmem:[#allocation6 + $0x2b8] sm:$0xff]  ;;  %v10300_v4 = vpack.c.bf16 %v6410_v51, %v6408_v60  ;;  %v7003_v51 = vld [vmem:[#allocation6 + $0x640] sm:$0xff] }
 0x771   :  { %10291 = vmatprep.subr.bf16.mxu0 %v10290_v39  ;;  %v10302_v36 = vpack.c.bf16 %v6415_v25, %v6413_v43  ;;  %v6998_v49 = vld [vmem:[#allocation6 + $0x618] sm:$0xff]  ;;  %v7005_v43 = vld [vmem:[#allocation6 + $0x650] sm:$0xff]  ;;  %v7008_v25 = vld [vmem:[#allocation6 + $0x668] sm:$0xff] }
 0x772   :  { %v10314_v34 = vpack.c.bf16 %v6998_v49, %v6996_v50 }
 0x773   :  { %6869 = vmatmul.mubr.f32.gmra.mrb[160].mxu0 %v13638_v62  ;;  %v6414_v62 = vld [vmem:[#allocation6 + $0x2b0] sm:$0xff] }
 0x774   :  { %6874 = vmatprep.mubr.f32.mxu0 %v13662_v54  ;;  %10293 = vmatpush1.bf16.msra.mxu0 %v10292_v28  ;;  %v6419_v54 = vld [vmem:[#allocation6 + $0x2d8] sm:$0xff]  ;;  %v10304_v61 = vpack.c.bf16 %v6414_v62, %v6412_v53  ;;  %v7007_v62 = vld [vmem:[#allocation6 + $0x660] sm:$0xff] }
 0x775   :  { %10295 = vmatprep.subr.bf16.mxu0 %v10294_v59  ;;  %v10306_v20 = vpack.c.bf16 %v6419_v54, %v6417_v2  ;;  %v7002_v28 = vld [vmem:[#allocation6 + $0x638] sm:$0xff]  ;;  %v10316_v59 = vpack.c.bf16 %v6997_v57, %v6995_v21  ;;  %v7012_v2 = vld [vmem:[#allocation6 + $0x688] sm:$0xff] }
 0x776   :  { %v10318_v46 = vpack.c.bf16 %v7002_v28, %v7000_v27  ;;  %v7014_v54 = vld [vmem:[#allocation6 + $0x698] sm:$0xff]  ;;  %v7023_v28 = vld [vmem:[#allocation6 + $0x6e0] sm:$0xff] }
 0x777   :  { %6875 = vmatmul.mubr.f32.gmra.mrb[162].mxu0 %v13654_v19  ;;  %v6418_v19 = vld [vmem:[#allocation6 + $0x2d0] sm:$0xff]  ;;  %v7026_v21 = vld [vmem:[#allocation6 + $0x6f8] sm:$0xff] }
 0x778   :  { %6880 = vmatprep.mubr.f32.mxu0 %v13678_v14  ;;  %10297 = vmatpush1.bf16.msra.mxu0 %v10296_v58  ;;  %v6423_v14 = vld [vmem:[#allocation6 + $0x2f8] sm:$0xff]  ;;  %v10308_v29 = vpack.c.bf16 %v6418_v19, %v6416_v52  ;;  %v7011_v52 = vld [vmem:[#allocation6 + $0x680] sm:$0xff]  ;;  %v7016_v19 = vld [vmem:[#allocation6 + $0x6a8] sm:$0xff] }
 0x779   :  { %10299 = vmatprep.subr.bf16.mxu0 %v10298_v11  ;;  %v10310_v45 = vpack.c.bf16 %v6423_v14, %v6421_v18  ;;  %v7006_v58 = vld [vmem:[#allocation6 + $0x658] sm:$0xff]  ;;  %v10320_v11 = vpack.c.bf16 %v7001_v32, %v6999_v7 }
 0x77a   :  { %v10322_v60 = vpack.c.bf16 %v7006_v58, %v7004_v40  ;;  %v7018_v18 = vld [vmem:[#allocation6 + $0x6b8] sm:$0xff]  ;;  %v7027_v40 = vld [vmem:[#allocation6 + $0x700] sm:$0xff]  ;;  %v7029_v58 = vld [vmem:[#allocation6 + $0x710] sm:$0xff] }
 0x77b   :  { %6881 = vmatmul.mubr.f32.gmra.mrb[164].mxu0 %v13670_v23  ;;  %v6422_v23 = vld [vmem:[#allocation6 + $0x2f0] sm:$0xff] }
 0x77c   :  { %6886 = vmatprep.mubr.f32.mxu0 %v13694_v22  ;;  %10301 = vmatpush1.bf16.msra.mxu0 %v10300_v4  ;;  %v10312_v39 = vpack.c.bf16 %v6422_v23, %v6420_v33  ;;  %v7010_v4 = vld [vmem:[#allocation6 + $0x678] sm:$0xff]  ;;  %v7020_v33 = vld [vmem:[#allocation6 + $0x6c8] sm:$0xff]  ;;  %v7089_v22 = vld [vmem:[#allocation6 + $0x8f0] sm:$0xff] }
 0x77d   :  { %10303 = vmatprep.subr.bf16.mxu0 %v10302_v36  ;;  %v10324_v36 = vpack.c.bf16 %v7005_v43, %v7003_v51  ;;  %v10326_v53 = vpack.c.bf16 %v7010_v4, %v7008_v25  ;;  %v7022_v23 = vld [vmem:[#allocation6 + $0x6d8] sm:$0xff]  ;;  %v10348_v51 = vpack.c.bf16 %v7029_v58, %v7027_v40  ;;  %v7033_v25 = vld [vmem:[#allocation6 + $0x730] sm:$0xff]  ;;  %v7036_v4 = vld [vmem:[#allocation6 + $0x748] sm:$0xff] }
 0x77e   :  { %v10338_v49 = vpack.c.bf16 %v7022_v23, %v7020_v33  ;;  %v7045_v33 = vld [vmem:[#allocation6 + $0x790] sm:$0xff]  ;;  %v7048_v23 = vld [vmem:[#allocation6 + $0x7a8] sm:$0xff]  ;;  %v7055_v58 = vld [vmem:[#allocation6 + $0x7e0] sm:$0xff] }
 0x77f   :  { %6887 = vmatmul.mubr.f32.gmra.mrb[166].mxu0 %v13686_v24 }
 0x780   :  { %10305 = vmatpush1.bf16.msra.mxu0 %v10304_v61  ;;  %6957 = vmatprep.mubr.f32.mxu0 %v14153_v44 }
 0x781   :  { %10307 = vmatprep.subr.bf16.mxu0 %v10306_v20  ;;  %v10330_v20 = vpack.c.bf16 %v7014_v54, %v7012_v2  ;;  %v7037_v2 = vld [vmem:[#allocation6 + $0x750] sm:$0xff]  ;;  %v7040_v54 = vld [vmem:[#allocation6 + $0x768] sm:$0xff] }
 0x784   :  { %10309 = vmatpush1.bf16.msra.mxu0 %v10308_v29  ;;  %v10334_v29 = vpack.c.bf16 %v7018_v18, %v7016_v19  ;;  %v7041_v19 = vld [vmem:[#allocation6 + $0x770] sm:$0xff]  ;;  %v7044_v18 = vld [vmem:[#allocation6 + $0x788] sm:$0xff] }
 0x785   :  { %10311 = vmatprep.subr.bf16.mxu0 %v10310_v45  ;;  %v7015_v45 = vld [vmem:[#allocation6 + $0x6a0] sm:$0xff] }
 0x788   :  { %10313 = vmatpush1.bf16.msra.mxu0 %v10312_v39  ;;  %v7019_v39 = vld [vmem:[#allocation6 + $0x6c0] sm:$0xff] }
 0x789   :  { %10315 = vmatprep.subr.bf16.mxu0 %v10314_v34  ;;  %v7024_v34 = vld [vmem:[#allocation6 + $0x6e8] sm:$0xff] }
 0x78a   :  { %v10342_v27 = vpack.c.bf16 %v7026_v21, %v7024_v34  ;;  %v7049_v34 = vld [vmem:[#allocation6 + $0x7b0] sm:$0xff]  ;;  %v7052_v21 = vld [vmem:[#allocation6 + $0x7c8] sm:$0xff] }
 0x78b   :  { %6958 = vmatmul.mubr.f32.vlgmr.msra.gmra.mrb[156].mxu0 %v13714_v26  ;;  %v7009_v26 = vld [vmem:[#allocation6 + $0x670] sm:$0xff] }
 0x78c   :  { %10317 = vmatpush1.bf16.msra.mxu0 %v10316_v59  ;;  %6963 = vmatprep.mubr.f32.mxu0 %v14153_v44  ;;  %v10328_v61 = vpack.c.bf16 %v7009_v26, %v7007_v62  ;;  %v7028_v59 = vld [vmem:[#allocation6 + $0x708] sm:$0xff]  ;;  %v7035_v26 = vld [vmem:[#allocation6 + $0x740] sm:$0xff] }
 0x78d   :  { %10319 = vmatprep.subr.bf16.mxu0 %v10318_v46  ;;  %v7030_v46 = vld [vmem:[#allocation6 + $0x718] sm:$0xff] }
 0x78e   :  { %v10346_v32 = vpack.c.bf16 %v7030_v46, %v7028_v59  ;;  %v7053_v59 = vld [vmem:[#allocation6 + $0x7d0] sm:$0xff]  ;;  %v7056_v46 = vld [vmem:[#allocation6 + $0x7e8] sm:$0xff] }
 0x78f   :  { %6964 = vmatmul.mubr.f32.gmra.mrb[158].mxu0 %v13704_v12  ;;  %v7013_v12 = vld [vmem:[#allocation6 + $0x690] sm:$0xff] }
 0x790   :  { %10321 = vmatpush1.bf16.msra.mxu0 %v10320_v11  ;;  %6969 = vmatprep.mubr.f32.mxu0 %v14153_v44  ;;  %v10332_v14 = vpack.c.bf16 %v7013_v12, %v7011_v52  ;;  %v7032_v11 = vld [vmem:[#allocation6 + $0x728] sm:$0xff]  ;;  %v7039_v12 = vld [vmem:[#allocation6 + $0x760] sm:$0xff] }
 0x791   :  { %10323 = vmatprep.subr.bf16.mxu0 %v10322_v60  ;;  %v7034_v60 = vld [vmem:[#allocation6 + $0x738] sm:$0xff] }
 0x792   :  { %v10350_v43 = vpack.c.bf16 %v7034_v60, %v7032_v11  ;;  %v7057_v11 = vld [vmem:[#allocation6 + $0x7f0] sm:$0xff]  ;;  %v7060_v60 = vld [vmem:[#allocation6 + $0x808] sm:$0xff] }
 0x793   :  { %6970 = vmatmul.mubr.f32.gmra.mrb[160].mxu0 %v13726_v6  ;;  %v7017_v6 = vld [vmem:[#allocation6 + $0x6b0] sm:$0xff] }
 0x794   :  { %10325 = vmatpush1.bf16.msra.mxu0 %v10324_v36  ;;  %6975 = vmatprep.mubr.f32.mxu0 %v14153_v44  ;;  %v10336_v50 = vpack.c.bf16 %v7017_v6, %v7015_v45  ;;  %v7038_v36 = vld [vmem:[#allocation6 + $0x758] sm:$0xff]  ;;  %v7043_v6 = vld [vmem:[#allocation6 + $0x780] sm:$0xff] }
 0x795   :  { %10327 = vmatprep.subr.bf16.mxu0 %v10326_v53  ;;  %v10354_v62 = vpack.c.bf16 %v7038_v36, %v7036_v4  ;;  %v7061_v4 = vld [vmem:[#allocation6 + $0x810] sm:$0xff]  ;;  %v7064_v36 = vld [vmem:[#allocation6 + $0x828] sm:$0xff] }
 0x797   :  { %6976 = vmatmul.mubr.f32.gmra.mrb[162].mxu0 %v13718_v8  ;;  %v7021_v8 = vld [vmem:[#allocation6 + $0x6d0] sm:$0xff] }
 0x798   :  { %10329 = vmatpush1.bf16.msra.mxu0 %v10328_v61  ;;  %6981 = vmatprep.mubr.f32.mxu0 %v14153_v44  ;;  %v10340_v57 = vpack.c.bf16 %v7021_v8, %v7019_v39  ;;  %v7042_v61 = vld [vmem:[#allocation6 + $0x778] sm:$0xff]  ;;  %v7047_v8 = vld [vmem:[#allocation6 + $0x7a0] sm:$0xff] }
 0x799   :  { %10331 = vmatprep.subr.bf16.mxu0 %v10330_v20  ;;  %v10356_v20 = vpack.c.bf16 %v7037_v2, %v7035_v26  ;;  %v10358_v52 = vpack.c.bf16 %v7042_v61, %v7040_v54  ;;  %v7063_v2 = vld [vmem:[#allocation6 + $0x820] sm:$0xff]  ;;  %v7065_v54 = vld [vmem:[#allocation6 + $0x830] sm:$0xff]  ;;  %v7068_v61 = vld [vmem:[#allocation6 + $0x848] sm:$0xff] }
 0x79b   :  { %6982 = vmatmul.mubr.f32.gmra.mrb[164].mxu0 %v13740_v5  ;;  %v7025_v5 = vld [vmem:[#allocation6 + $0x6f0] sm:$0xff] }
 0x79c   :  { %10333 = vmatpush1.bf16.msra.mxu0 %v10332_v14  ;;  %6987 = vmatprep.mubr.f32.mxu0 %v14153_v44  ;;  %v10344_v7 = vpack.c.bf16 %v7025_v5, %v7023_v28  ;;  %v7046_v14 = vld [vmem:[#allocation6 + $0x798] sm:$0xff]  ;;  %v7051_v5 = vld [vmem:[#allocation6 + $0x7c0] sm:$0xff] }
 0x79d   :  { %10335 = vmatprep.subr.bf16.mxu0 %v10334_v29  ;;  %v10360_v29 = vpack.c.bf16 %v7041_v19, %v7039_v12  ;;  %v10362_v45 = vpack.c.bf16 %v7046_v14, %v7044_v18  ;;  %v7067_v19 = vld [vmem:[#allocation6 + $0x840] sm:$0xff]  ;;  %v7069_v18 = vld [vmem:[#allocation6 + $0x850] sm:$0xff]  ;;  %v7072_v14 = vld [vmem:[#allocation6 + $0x868] sm:$0xff] }
 0x79f   :  { %6988 = vmatmul.mubr.f32.gmra.mrb[166].mxu0 %v13732_v48 }
 0x7a0   :  { %10337 = vmatpush1.bf16.msra.mxu0 %v10336_v50  ;;  %7206 = vmatprep.mubr.f32.mxu0 %v13642_v13  ;;  %v7031_v13 = vld [vmem:[#allocation6 + $0x720] sm:$0xff]  ;;  %v7050_v50 = vld [vmem:[#allocation6 + $0x7b8] sm:$0xff] }
 0x7a1   :  { %10339 = vmatprep.subr.bf16.mxu0 %v10338_v49  ;;  %v10352_v53 = vpack.c.bf16 %v7033_v25, %v7031_v13  ;;  %v10364_v49 = vpack.c.bf16 %v7045_v33, %v7043_v6  ;;  %v10366_v39 = vpack.c.bf16 %v7050_v50, %v7048_v23  ;;  %v7059_v25 = vld [vmem:[#allocation6 + $0x800] sm:$0xff]  ;;  %v7076_v23 = vld [vmem:[#allocation6 + $0x888] sm:$0xff] }
 0x7a2   :  { %v7071_v33 = vld [vmem:[#allocation6 + $0x860] sm:$0xff] }
 0x7a4   :  { %10341 = vmatpush1.bf16.msra.mxu0 %v10340_v57  ;;  %v7054_v57 = vld [vmem:[#allocation6 + $0x7d8] sm:$0xff] }
 0x7a5   :  { %10343 = vmatprep.subr.bf16.mxu0 %v10342_v27  ;;  %v10368_v27 = vpack.c.bf16 %v7049_v34, %v7047_v8  ;;  %v10370_v28 = vpack.c.bf16 %v7054_v57, %v7052_v21  ;;  %v7080_v8 = vld [vmem:[#allocation6 + $0x8a8] sm:$0xff]  ;;  %v7079_v57 = vld [vmem:[#allocation6 + $0x8a0] sm:$0xff] }
 0x7a8   :  { %10345 = vmatpush1.bf16.msra.mxu0 %v10344_v7  ;;  %v7058_v7 = vld [vmem:[#allocation6 + $0x7f8] sm:$0xff] }
 0x7a9   :  { %10347 = vmatprep.subr.bf16.mxu0 %v10346_v32  ;;  %v10372_v32 = vpack.c.bf16 %v7053_v59, %v7051_v5  ;;  %v10374_v40 = vpack.c.bf16 %v7058_v7, %v7056_v46  ;;  %v7085_v59 = vld [vmem:[#allocation6 + $0x8d0] sm:$0xff]  ;;  %v7090_v46 = vld [vmem:[#allocation6 + $0x8f8] sm:$0xff] }
 0x7ac   :  { %10349 = vmatpush1.bf16.msra.mxu0 %v10348_v51  ;;  %v7062_v51 = vld [vmem:[#allocation6 + $0x818] sm:$0xff] }
 0x7ad   :  { %10351 = vmatprep.subr.bf16.mxu0 %v10350_v43  ;;  %v10376_v43 = vpack.c.bf16 %v7057_v11, %v7055_v58  ;;  %v10378_v13 = vpack.c.bf16 %v7062_v51, %v7060_v60 }
 0x7b0   :  { %10353 = vmatpush1.bf16.msra.mxu0 %v10352_v53  ;;  %v7066_v53 = vld [vmem:[#allocation6 + $0x838] sm:$0xff] }
 0x7b1   :  { %10355 = vmatprep.subr.bf16.mxu0 %v10354_v62  ;;  %v10380_v62 = vpack.c.bf16 %v7061_v4, %v7059_v25  ;;  %v10382_v26 = vpack.c.bf16 %v7066_v53, %v7064_v36  ;;  %v6327_v25 = vld [vmem:[#allocation7 + $0x2] ss:$8 sm:$0x3] }
 0x7b4   :  { %10357 = vmatpush1.bf16.msra.mxu0 %v10356_v20  ;;  %v7070_v20 = vld [vmem:[#allocation6 + $0x858] sm:$0xff] }
 0x7b5   :  { %10359 = vmatprep.subr.bf16.mxu0 %v10358_v52  ;;  %v10384_v52 = vpack.c.bf16 %v7065_v54, %v7063_v2  ;;  %v10386_v12 = vpack.c.bf16 %v7070_v20, %v7068_v61 }
 0x7b8   :  { %10361 = vmatpush1.bf16.msra.mxu0 %v10360_v29  ;;  %v7074_v29 = vld [vmem:[#allocation6 + $0x878] sm:$0xff] }
 0x7b9   :  { %10363 = vmatprep.subr.bf16.mxu0 %v10362_v45  ;;  %v10388_v45 = vpack.c.bf16 %v7069_v18, %v7067_v19  ;;  %v10390_v6 = vpack.c.bf16 %v7074_v29, %v7072_v14 }
 0x7bc   :  { %10365 = vmatpush1.bf16.msra.mxu0 %v10364_v49 }
 0x7bd   :  { %10367 = vmatprep.subr.bf16.mxu0 %v10366_v39  ;;  %v7075_v39 = vld [vmem:[#allocation6 + $0x880] sm:$0xff] }
 0x7c0   :  { %10369 = vmatpush1.bf16.msra.mxu0 %v10368_v27  ;;  %v7084_v27 = vld [vmem:[#allocation6 + $0x8c8] sm:$0xff] }
 0x7c1   :  { %10371 = vmatprep.subr.bf16.mxu0 %v10370_v28 }
 0x7c4   :  { %10373 = vmatpush1.bf16.msra.mxu0 %v10372_v32  ;;  %v7087_v32 = vld [vmem:[#allocation6 + $0x8e0] sm:$0xff] }
 0x7c5   :  { %10375 = vmatprep.subr.bf16.mxu0 %v10374_v40 }
 0x7c8   :  { %10377 = vmatpush1.bf16.msra.mxu0 %v10376_v43 }
 0x7c9   :  { %10379 = vmatprep.subr.bf16.mxu0 %v10378_v13 }
 0x7cb   :  { %7207 = vmatmul.mubr.f32.vlgmr.msra.gmra.mrb[156].mxu0 %v13636_v16  ;;  %v7073_v16 = vld [vmem:[#allocation6 + $0x870] sm:$0xff] }
 0x7cc   :  { %7212 = vmatprep.mubr.f32.mxu0 %v13658_v63  ;;  %10381 = vmatpush1.bf16.msra.mxu0 %v10380_v62  ;;  %v7078_v63 = vld [vmem:[#allocation6 + $0x898] sm:$0xff]  ;;  %v10392_v50 = vpack.c.bf16 %v7073_v16, %v7071_v33  ;;  %v7364_v62 = vrot.slane %v6327_v25, %v14296_v55 }
 0x7cd   :  { %10383 = vmatprep.subr.bf16.mxu0 %v10382_v26  ;;  %v10394_v49 = vpack.c.bf16 %v7078_v63, %v7076_v23 }
 0x7cf   :  { %7213 = vmatmul.mubr.f32.gmra.mrb[158].mxu0 %v13652_v17  ;;  %v7077_v17 = vld [vmem:[#allocation6 + $0x890] sm:$0xff] }
 0x7d0   :  { %7218 = vmatprep.mubr.f32.mxu0 %v13674_v0  ;;  %10385 = vmatpush1.bf16.msra.mxu0 %v10384_v52  ;;  %v7082_v0 = vld [vmem:[#allocation6 + $0x8b8] sm:$0xff]  ;;  %v10396_v34 = vpack.c.bf16 %v7077_v17, %v7075_v39 }
 0x7d1   :  { %10387 = vmatprep.subr.bf16.mxu0 %v10386_v12  ;;  %v10398_v21 = vpack.c.bf16 %v7082_v0, %v7080_v8  ;;  %v7360_v12 = vrot.slane %v6327_v25, %v14295_v38 }
 0x7d3   :  { %7219 = vmatmul.mubr.f32.gmra.mrb[160].mxu0 %v13668_v1  ;;  %v7081_v1 = vld [vmem:[#allocation6 + $0x8b0] sm:$0xff] }
 0x7d4   :  { %7224 = vmatprep.mubr.f32.mxu0 %v13690_v37  ;;  %10389 = vmatpush1.bf16.msra.mxu0 %v10388_v45  ;;  %v7086_v37 = vld [vmem:[#allocation6 + $0x8d8] sm:$0xff]  ;;  %v10400_v28 = vpack.c.bf16 %v7081_v1, %v7079_v57 }
 0x7d5   :  { %10391 = vmatprep.subr.bf16.mxu0 %v10390_v6  ;;  %v10402_v5 = vpack.c.bf16 %v7086_v37, %v7084_v27 }
 0x7d7   :  { %7225 = vmatmul.mubr.f32.gmra.mrb[162].mxu0 %v13684_v15  ;;  %v7083_v15 = vld [vmem:[#allocation6 + $0x8c0] sm:$0xff] }
 0x7d8   :  { %7230 = vmatprep.mubr.f32.mxu0 %v13710_v42  ;;  %10393 = vmatpush1.bf16.msra.mxu0 %v10392_v50  ;;  %v7088_v42 = vld [vmem:[#allocation6 + $0x8e8] sm:$0xff]  ;;  %v10404_v7 = vpack.c.bf16 %v7085_v59, %v7083_v15 }
 0x7d9   :  { %10395 = vmatprep.subr.bf16.mxu0 %v10394_v49 }
 0x7db   :  { %7231 = vmatmul.mubr.f32.gmra.mrb[164].mxu0 %v13702_v31  ;;  %v10406_v31 = vpack.c.bf16 %v7090_v46, %v7088_v42 }
 0x7dc   :  { %7236 = vmatprep.mubr.f32.mxu0 %v7120_v47  ;;  %10397 = vmatpush1.bf16.msra.mxu0 %v10396_v34  ;;  %v10408_v47 = vpack.c.bf16 %v7089_v22, %v7087_v32 }
 0x7dd   :  { %10399 = vmatprep.subr.bf16.mxu0 %v10398_v21 }
 0x7df   :  { %7237 = vmatmul.mubr.f32.gmra.mrb[166].mxu0 %v7118_v35 }
 0x7e0   :  { %10401 = vmatpush1.bf16.msra.mxu0 %v10400_v28  ;;  %7307 = vmatprep.mubr.f32.mxu0 %v14153_v44 }
 0x7e1   :  { %10403 = vmatprep.subr.bf16.mxu0 %v10402_v5 }
 0x7e4   :  { %10405 = vmatpush1.bf16.msra.mxu0 %v10404_v7 }
 0x7e5   :  { %10407 = vmatprep.subr.bf16.mxu0 %v10406_v31 }
 0x7e8   :  { %10409 = vmatpush1.bf16.msra.mxu0 %v10408_v47 }
 0x7eb   :  { %7308 = vmatmul.mubr.f32.vlgmr.msra.gmra.mrb[156].mxu0 %v13722_v9  ;;  %v6656_v40 = vpop.f32.mrb[72].mxu1 }
 0x7ec   :  { %v6658_v58 = vpop.f32.mrb[73].mxu1  ;;  %7313 = vmatprep.mubr.f32.mxu0 %v14153_v44 }
 0x7ef   :  { %7314 = vmatmul.mubr.f32.gmra.mrb[158].mxu0 %v13736_v3  ;;  %v6662_v24 = vpop.f32.mrb[74].mxu1 }
 0x7f0   :  { %v6664_v35 = vpop.f32.mrb[75].mxu1  ;;  %7319 = vmatprep.mubr.f32.mxu0 %v14153_v44 }
 0x7f3   :  { %7320 = vmatmul.mubr.f32.gmra.mrb[160].mxu0 %v13743_v10  ;;  %v6668_v11 = vpop.f32.mrb[76].mxu1 }
 0x7f4   :  { %v6670_v60 = vpop.f32.mrb[77].mxu1  ;;  %7325 = vmatprep.mubr.f32.mxu0 %v14153_v44 }
 0x7f7   :  { %7326 = vmatmul.mubr.f32.gmra.mrb[162].mxu0 %v13751_v41  ;;  %v6674_v51 = vpop.f32.mrb[78].mxu1 }
 0x7f8   :  { %v6676_v9 = vpop.f32.mrb[79].mxu1  ;;  %7331 = vmatprep.mubr.f32.mxu0 %v14153_v44 }
 0x7fb   :  { %7332 = vmatmul.mubr.f32.gmra.mrb[164].mxu0 %v13756_v56  ;;  %v6680_v43 = vpop.f32.mrb[80].mxu1 }
 0x7fc   :  { %v6682_v3 = vpop.f32.mrb[81].mxu1  ;;  %7337 = vmatprep.mubr.f32.mxu0 %v14153_v44 }
 0x7ff   :  { %7338 = vmatmul.mubr.f32.gmra.mrb[166].mxu0 %v7122_v30  ;;  %v6686_v10 = vpop.f32.mrb[82].mxu1 }
 0x800   :  { %v6688_v13 = vpop.f32.mrb[83].mxu1 }
 0x8be   :  { %v7309_v4 = vpop.f32.mrb[156].mxu0 }
 0x8bf   :  { %v10548_v36 = vadd.f32 %v7309_v4, %v6656_v40  ;;  %v7311_v53 = vpop.f32.mrb[157].mxu0 }
 0x8c0   :  { %v10549_v41 = vadd.f32 %v7311_v53, %v6658_v58 }
 0x8c1   :  { %v13818_v63 = vadd.f32 %v10548_v36, %v7360_v12 }
 0x8c2   :  { %v7315_v26 = vpop.f32.mrb[158].mxu0  ;;  %v7368_v56 = vadd.f32 %v10549_v41, %v7364_v62 }
 0x8c3   :  { %v10550_v2 = vadd.f32 %v7315_v26, %v6662_v24  ;;  %v7317_v54 = vpop.f32.mrb[159].mxu0  ;;  %v7379_v34 = vmax.f32 %v13818_v63, 0.0 }
 0x8c4   :  { %v10551_v61 = vadd.f32 %v7317_v54, %v6664_v35  ;;  %v7380_v19 = vmax.f32 %v7368_v56, 0.0 }
 0x8c5   :  { %v13816_v45 = vadd.f32 %v10550_v2, %v7360_v12 }
 0x8c6   :  { %v7370_v20 = vadd.f32 %v10551_v61, %v7364_v62  ;;  %v7321_v52 = vpop.f32.mrb[160].mxu0 }
 0x8c7   :  { %v10552_v48 = vadd.f32 %v7321_v52, %v6668_v11  ;;  %v7323_v30 = vpop.f32.mrb[161].mxu0  ;;  %v7381_v49 = vmax.f32 %v13816_v45, 0.0  ;;  %v11269_v11 = vmov 0.0|0.0  }
 0x8c8   :  { %v7382_v18 = vmax.f32 %v7370_v20, 0.0  ;;  %v10553_v14 = vadd.f32 %v7323_v30, %v6670_v60  ;;  %10410 = vmatprep.subr.bf16.mxu1 %v11269_v11 }
 0x8c9   :  { %v13814_v29 = vadd.f32 %v10552_v48, %v7360_v12  ;;  %v11018_v28 = vpack.i.bf16 %v7381_v49, %v7379_v34 }
 0x8ca   :  { %v7372_v6 = vadd.f32 %v10553_v14, %v7364_v62  ;;  %v7327_v55 = vpop.f32.mrb[162].mxu0  ;;  %v11008_v33 = vpack.i.bf16 %v7382_v18, %v7380_v19 }
 0x8cb   :  { %v10554_v16 = vadd.f32 %v7327_v55, %v6674_v51  ;;  %v7329_v23 = vpop.f32.mrb[163].mxu0  ;;  %v7383_v24 = vmax.f32 %v13814_v29, 0.0 }
 0x8cc   :  { %v10555_v50 = vadd.f32 %v7329_v23, %v6676_v9  ;;  %11009 = vrot.lane.b32.xlu0 %v11008_v33, %s11268_s0  ;;  %v7384_v39 = vmax.f32 %v7372_v6, 0.0 }
 0x8cd   :  { %v13821_v38 = vadd.f32 %v10554_v16, %v7360_v12 }
 0x8ce   :  { %v7333_v17 = vpop.f32.mrb[164].mxu0  ;;  %v7374_v21 = vadd.f32 %v10555_v50, %v7364_v62 }
 0x8cf   :  { %v10556_v8 = vadd.f32 %v7333_v17, %v6680_v43  ;;  %v7335_v0 = vpop.f32.mrb[165].mxu0 }
 0x8d0   :  { %v10557_v57 = vadd.f32 %v7335_v0, %v6682_v3  ;;  %7431 = vrot.lane.b32.xlu0 %v7384_v39, %s11268_s0  ;;  %v7386_v59 = vmax.f32 %v7374_v21, 0.0 }
 0x8d1   :  { %v13826_v1 = vadd.f32 %v10556_v8, %v7360_v12 }
 0x8d2   :  { %v7376_v27 = vadd.f32 %v10557_v57, %v7364_v62  ;;  %v7339_v37 = vpop.f32.mrb[166].mxu0 }
 0x8d3   :  { %v10558_v5 = vadd.f32 %v7339_v37, %v6686_v10  ;;  %v7341_v15 = vpop.f32.mrb[167].mxu0  ;;  %v7387_v51 = vmax.f32 %v13826_v1, 0.0  ;;  %v7385_v10 = vmax.f32 %v13821_v38, 0.0 }
 0x8d4   :  { %v7388_v42 = vmax.f32 %v7376_v27, 0.0  ;;  %v10559_v46 = vadd.f32 %v7341_v15, %v6688_v13  ;;  %11019 = vrot.lane.b32.xlu0 %v11018_v28, %s11268_s0 }
 0x8d5   :  { %v13831_v7 = vadd.f32 %v10558_v5, %v7360_v12  ;;  %v11028_v25 = vpack.i.bf16 %v7387_v51, %v7385_v10 }
 0x8d6   :  { %v7378_v31 = vadd.f32 %v10559_v46, %v7364_v62  ;;  %v11013_v32 = vpack.i.bf16 %v7388_v42, %v7386_v59 }
 0x8d7   :  { %v7389_v36 = vmax.f32 %v13831_v7, 0.0 }
 0x8d8   :  { %11014 = vrot.lane.b32.xlu1 %v11013_v32, %s11268_s0  ;;  %v7390_v22 = vmax.f32 %v7378_v31, 0.0 }
 0x8dc   :  { %7437 = vrot.lane.b32.xlu1 %v7390_v22, %s11268_s0 }
 0x93e   :  { %v11010_v47 = vpop.permute.xlu0 %11009 }
 0x93f   :  { %v11012_v40 = vunpack.i.h.bf16 %v11010_v47  ;;  %v11011_v58 = vunpack.i.l.bf16 %v11010_v47 }
 0x941   :  { %v7445_v35 = vmax.f32 %v7380_v19, %v11011_v58  ;;  %v7446_v9 = vmax.f32 %v7382_v18, %v11012_v40 }
 0x942   :  { %v7432_v60 = vpop.permute.xlu0 %7431 }
 0x943   :  { %v7447_v43 = vmax.f32 %v7384_v39, %v7432_v60  ;;  %v11023_v3 = vpack.i.bf16 %v7445_v35, %v7383_v24 }
 0x945   :  { %v11033_v13 = vpack.i.bf16 %v7447_v43, %v7446_v9  ;;  %11024 = vrot.lane.b32.xlu1 %v11023_v3, %s11268_s0  ;;  %v7771_v43 = vld [vmem:[#allocation13 + $0x20] sm:$0xff] }
 0x946   :  { %v11020_v61 = vpop.permute.xlu0 %11019 }
 0x947   :  { %11034 = vrot.lane.b32.xlu0 %v11033_v13, %s11268_s0  ;;  %v11021_v20 = vunpack.i.l.bf16 %v11020_v61  ;;  %v11022_v52 = vunpack.i.h.bf16 %v11020_v61  ;;  %v7679_v13 = vld [vmem:[%s14001_s8 + $0x80] sm:$0xff]  ;;  %v7666_v61 = vld [vmem:[%s14001_s8 + $0x18] sm:$0xff] }
 0x949   :  { %11029 = vrot.lane.b32.xlu1 %v11028_v25, %s11268_s0  ;;  %v7415_v48 = vmax.f32 %v7379_v34, %v11021_v20  ;;  %v7416_v18 = vmax.f32 %v7381_v49, %v11022_v52  ;;  %v7680_v25 = vld [vmem:[%s14001_s8 + $0x88] sm:$0xff]  ;;  %v7683_v20 = vld [vmem:[%s14001_s8 + $0xa0] sm:$0xff] }
 0x94a   :  { %v11015_v4 = vpop.permute.xlu1 %11014  ;;  %v7684_v52 = vld [vmem:[%s14001_s8 + $0xa8] sm:$0xff] }
 0x94b   :  { %v11017_v53 = vunpack.i.h.bf16 %v11015_v4  ;;  %v11016_v41 = vunpack.i.l.bf16 %v11015_v4  ;;  %v10430_v4 = vpack.c.bf16 %v7680_v25, %v7679_v13  ;;  %v7774_v25 = vld [vmem:[#allocation13 + $0x38] sm:$0xff] }
 0x94d   :  { %v7449_v62 = vmax.f32 %v7388_v42, %v11017_v53  ;;  %v7448_v26 = vmax.f32 %v7386_v59, %v11016_v41  ;;  %7407 = vrot.lane.b32.xlu1 %v7389_v36, %s11268_s0  ;;  %v7664_v53 = vld [vmem:[%s14001_s8 + $0x8] sm:$0xff]  ;;  %v7681_v41 = vld [vmem:[%s14001_s8 + $0x90] sm:$0xff] }
 0x94e   :  { %v7438_v54 = vpop.permute.xlu1 %7437 }
 0x94f   :  { %v11038_v2 = vpack.i.bf16 %v7449_v62, %v7448_v26  ;;  %v7450_v56 = vmax.f32 %v7390_v22, %v7438_v54  ;;  %v7682_v62 = vld [vmem:[%s14001_s8 + $0x98] sm:$0xff]  ;;  %v7589_v26 = vld [vmem:[#allocation12 + $0x8] sm:$0xff] }
 0x950   :  { %v10434_v54 = vpack.c.bf16 %v7682_v62, %v7681_v41 }
 0x951   :  { %11039 = vrot.lane.b32.xlu0 %v11038_v2, %s11268_s0 }
 0x955   :  { %7467 = vrot.lane.b32.xlu0 %v7450_v56, %s11268_s0  ;;  %v7665_v56 = vld [vmem:[%s14001_s8 + $0x10] sm:$0xff] }
 0x9b7   :  { %v11025_v12 = vpop.permute.xlu1 %11024 }
 0x9b8   :  { %v11027_v30 = vunpack.i.h.bf16 %v11025_v12  ;;  %v11026_v19 = vunpack.i.l.bf16 %v11025_v12  ;;  %v10436_v12 = vpack.c.bf16 %v7666_v61, %v7665_v56 }
 0x9b9   :  { %v11035_v14 = vpop.permute.xlu0 %11034 }
 0x9ba   :  { %v7475_v29 = vsel %vm2835_vm8, %v7415_v48, %v11027_v30  ;;  %v7417_v6 = vmax.f32 %v7383_v24, %v11026_v19  ;;  %v11037_v55 = vunpack.i.h.bf16 %v11035_v14  ;;  %v11036_v33 = vunpack.i.l.bf16 %v11035_v14  ;;  %v7667_v30 = vld [vmem:[%s14001_s8 + $0x20] sm:$0xff]  ;;  %v7668_v19 = vld [vmem:[%s14001_s8 + $0x28] sm:$0xff]  ;;  %v7686_v14 = vld [vmem:[%s14001_s8 + $0xb8] sm:$0xff] }
 0x9bb   :  { %v7487_v63 = vrot.slane %v7475_v29, 1  ;;  %v11030_v39 = vpop.permute.xlu1 %11029  ;;  %v10438_v48 = vpack.c.bf16 %v7684_v52, %v7683_v20  ;;  %v7852_v20 = vld [vmem:[#allocation15 + $0x10] sm:$0xff]  ;;  %v7853_v52 = vld [vmem:[#allocation15 + $0x18] sm:$0xff] }
 0x9bc   :  { %v7476_v16 = vsel %vm2835_vm8, %v7416_v18, %v11036_v33  ;;  %v7477_v23 = vsel %vm2835_vm8, %v7417_v6, %v11037_v55  ;;  %v11032_v49 = vunpack.i.h.bf16 %v11030_v39  ;;  %v11031_v0 = vunpack.i.l.bf16 %v11030_v39  ;;  %v7685_v18 = vld [vmem:[%s14001_s8 + $0xb0] sm:$0xff]  ;;  %v7670_v33 = vld [vmem:[%s14001_s8 + $0x38] sm:$0xff]  ;;  %v7672_v39 = vld [vmem:[%s14001_s8 + $0x48] sm:$0xff] }
 0x9bd   :  { %v7488_v50 = vrot.slane %v7476_v16, 1  ;;  %v7490_v38 = vrot.slane %v7477_v23, 1  ;;  %v10442_v6 = vpack.c.bf16 %v7686_v14, %v7685_v18  ;;  %v7669_v55 = vld [vmem:[%s14001_s8 + $0x30] sm:$0xff]  ;;  %v7856_v18 = vld [vmem:[#allocation15 + $0x30] sm:$0xff]  ;;  %v7857_v14 = vld [vmem:[#allocation15 + $0x38] sm:$0xff] }
 0x9be   :  { %v7419_v27 = vmax.f32 %v7387_v51, %v11032_v49  ;;  %v7418_v37 = vmax.f32 %v7385_v10, %v11031_v0  ;;  %v7510_v10 = vld [vmem:[#allocation12] sm:$0xff]  ;;  %v7673_v0 = vld [vmem:[%s14001_s8 + $0x50] sm:$0xff] }
 0x9bf   :  { %v7491_v17 = vsel %vm212_vm3, %v7488_v50, %v7490_v38  ;;  %v7489_v8 = vsel %vm212_vm3, %v7487_v63, %v7488_v50  ;;  %v7408_v57 = vpop.permute.xlu1 %7407  ;;  %v10444_v63 = vpack.c.bf16 %v7670_v33, %v7669_v55 }
 0x9c0   :  { %v7505_v45 = vmax.f32 %v7476_v16, %v7491_v17  ;;  %v7504_v34 = vmax.f32 %v7475_v29, %v7489_v8  ;;  %v7420_v15 = vmax.f32 %v7389_v36, %v7408_v57  ;;  %v7663_v36 = vld [vmem:[%s14001_s8] sm:$0xff]  ;;  %v10440_v29 = vpack.c.bf16 %v7668_v19, %v7667_v30  ;;  %v7689_v17 = vld [vmem:[%s14001_s8 + $0xd0] sm:$0xff]  ;;  %v7690_v8 = vld [vmem:[%s14001_s8 + $0xd8] sm:$0xff] }
 0x9c1   :  { %v10432_v2 = vpack.c.bf16 %v7664_v53, %v7663_v36  ;;  %v7687_v16 = vld [vmem:[%s14001_s8 + $0xc0] sm:$0xff]  ;;  %v10450_v49 = vpack.c.bf16 %v7690_v8, %v7689_v17  ;;  %v7692_v57 = vld [vmem:[%s14001_s8 + $0xe8] sm:$0xff]  ;;  %v7855_v30 = vld [vmem:[#allocation15 + $0x28] sm:$0xff] }
 0x9c2   :  { %v10411_v21 = vpack.c.bf16 %v7505_v45, %v7504_v34  ;;  %v7674_v34 = vld [vmem:[%s14001_s8 + $0x58] sm:$0xff]  ;;  %v7695_v53 = vld [vmem:[#allocation7 + $0x3] ss:$0 sm:$0xff] }
 0x9c3   :  { %v11040_v1 = vpop.permute.xlu0 %11039 }
 0x9c4   :  { %v11042_v28 = vunpack.i.h.bf16 %v11040_v1  ;;  %v11041_v5 = vunpack.i.l.bf16 %v11040_v1  ;;  %10412 = vmatpush3.bf16.msra.mxu1 %v10411_v21  ;;  %v10452_v1 = vpack.c.bf16 %v7674_v34, %v7673_v0 }
 0x9c5   :  { %10413 = vmatprep.subr.bf16.mxu1 %v11269_v11 }
 0x9c6   :  { %v7478_v59 = vsel %vm2835_vm8, %v7418_v37, %v11041_v5  ;;  %v7479_v42 = vsel %vm2835_vm8, %v7419_v27, %v11042_v28  ;;  %v7675_v37 = vld [vmem:[%s14001_s8 + $0x60] sm:$0xff]  ;;  %v7676_v28 = vld [vmem:[%s14001_s8 + $0x68] sm:$0xff] }
 0x9c7   :  { %v7492_v46 = vrot.slane %v7478_v59, 1  ;;  %v7494_v7 = vrot.slane %v7479_v42, 1  ;;  %v7468_v31 = vpop.permute.xlu0 %7467  ;;  %v10456_v5 = vpack.c.bf16 %v7676_v28, %v7675_v37 }
 0x9c8   :  { %v7480_v32 = vsel %vm2835_vm8, %v7420_v15, %v7468_v31  ;;  %v7693_v15 = vld [vmem:[%s14001_s8 + $0xf0] sm:$0xff] }
 0x9c9   :  { %v7495_v22 = vsel %vm212_vm3, %v7492_v46, %v7494_v7  ;;  %v7496_v47 = vrot.slane %v7480_v32, 1  ;;  %v7493_v40 = vsel %vm212_vm3, %v7490_v38, %v7492_v46  ;;  %v7671_v38 = vld [vmem:[%s14001_s8 + $0x40] sm:$0xff] }
 0x9ca   :  { %v7507_v58 = vmax.f32 %v7478_v59, %v7495_v22  ;;  %v7506_v24 = vmax.f32 %v7477_v23, %v7493_v40  ;;  %v7688_v23 = vld [vmem:[%s14001_s8 + $0xc8] sm:$0xff]  ;;  %v10448_v45 = vpack.c.bf16 %v7672_v39, %v7671_v38  ;;  %v7694_v59 = vld [vmem:[%s14001_s8 + $0xf8] sm:$0xff]  ;;  %v7768_v40 = vld [vmem:[#allocation13 + $0x8] sm:$0xff] }
 0x9cb   :  { %v7497_v35 = vsel %vm212_vm3, %v7494_v7, %v7496_v47  ;;  %v7509_v51 = vmax.f32 %v7480_v32, %v7496_v47  ;;  %v10446_v50 = vpack.c.bf16 %v7688_v23, %v7687_v16  ;;  %v10458_v46 = vpack.c.bf16 %v7694_v59, %v7693_v15  ;;  %v7678_v7 = vld [vmem:[%s14001_s8 + $0x78] sm:$0xff]  ;;  %v7767_v47 = vld [vmem:[#allocation13] sm:$0xff]  ;;  %v7858_v23 = vld [vmem:[#allocation7 + $0x5] ss:$0 sm:$0xff] }
 0x9cc   :  { %v7508_v60 = vmax.f32 %v7479_v42, %v7497_v35  ;;  %v10414_v9 = vpack.c.bf16 %v7507_v58, %v7506_v24  ;;  %v7677_v42 = vld [vmem:[%s14001_s8 + $0x70] sm:$0xff]  ;;  %v10463_v58 = vpack.c.bf16 %v7768_v40, %v7767_v47  ;;  %v7769_v35 = vld [vmem:[#allocation13 + $0x10] sm:$0xff] }
 0x9cd   :  { %v10460_v31 = vpack.c.bf16 %v7678_v7, %v7677_v42 }
 0x9ce   :  { %10415 = vmatpush3.bf16.msra.mxu1 %v10414_v9  ;;  %v10417_v3 = vpack.c.bf16 %v7509_v51, %v7508_v60  ;;  %v7770_v60 = vld [vmem:[#allocation13 + $0x18] sm:$0xff] }
 0x9cf   :  { %10416 = vmatprep.subr.bf16.mxu1 %v11269_v11 }
 0x9d2   :  { %10419 = vmatpush3.bf16.msk.msra.mxu1 %vm13865_vm11, %v10417_v3 }
 0x9d3   :  { %10420 = vmatprep.subr.bf16.mxu1 %v11269_v11 }
 0x9d5   :  { %9223 = vmatmul.mubr.msk.f32.vlgmr.msra.gmra.mrb[84].mxu1 %vm7511_vm12, %v7510_v10  ;;  %v7773_v10 = vld [vmem:[#allocation13 + $0x30] sm:$0xff] }
 0x9d6   :  { %10422 = vmatpush3.bf16.msra.mxu1 %v10411_v21  ;;  %9237 = vmatprep.mubr.msk.f32.mxu1 %vm11270_vm10, %v14153_v44  ;;  %v7691_v21 = vld [vmem:[%s14001_s8 + $0xe0] sm:$0xff] }
 0x9d7   :  { %10423 = vmatprep.subr.bf16.mxu1 %v11269_v11  ;;  %v10454_v27 = vpack.c.bf16 %v7692_v57, %v7691_v21 }
 0x9da   :  { %10425 = vmatpush3.bf16.msra.mxu1 %v10414_v9  ;;  %v10466_v9 = vpack.c.bf16 %v7770_v60, %v7769_v35 }
 0x9db   :  { %10426 = vmatprep.subr.bf16.mxu1 %v11269_v11 }
 0x9de   :  { %10429 = vmatpush3.bf16.msk.msra.mxu1 %vm13865_vm11, %v10417_v3  ;;  %v7772_v3 = vld [vmem:[#allocation13 + $0x28] sm:$0xff] }
 0x9df   :  { %10431 = vmatprep.subr.bf16.mxu1 %v10430_v4  ;;  %v10469_v13 = vpack.c.bf16 %v7772_v3, %v7771_v43  ;;  %v10472_v4 = vpack.c.bf16 %v7774_v25, %v7773_v10 }
 0x9e1   :  { %9238 = vmatmul.mubr.msk.f32.vlgmr.msra.gmra.mrb[86].mxu1 %vm7511_vm12, %v7589_v26  ;;  %v7850_v26 = vld [vmem:[#allocation15] sm:$0xff] }
 0x9e2   :  { %10433 = vmatpush3.bf16.msra.mxu1 %v10432_v2  ;;  %v7851_v2 = vld [vmem:[#allocation15 + $0x8] sm:$0xff] }
 0x9e3   :  { %10435 = vmatprep.subr.bf16.mxu1 %v10434_v54  ;;  %v10475_v56 = vpack.c.bf16 %v7851_v2, %v7850_v26 }
 0x9e6   :  { %10437 = vmatpush3.bf16.msra.mxu1 %v10436_v12  ;;  %v10478_v12 = vpack.c.bf16 %v7853_v52, %v7852_v20 }
 0x9e7   :  { %10439 = vmatprep.subr.bf16.mxu1 %v10438_v48  ;;  %v7854_v48 = vld [vmem:[#allocation15 + $0x20] sm:$0xff] }
 0x9e8   :  { %v10481_v19 = vpack.c.bf16 %v7855_v30, %v7854_v48 }
 0x9ea   :  { %10441 = vmatpush3.bf16.msra.mxu1 %v10440_v29  ;;  %v10484_v29 = vpack.c.bf16 %v7857_v14, %v7856_v18 }
 0x9eb   :  { %10443 = vmatprep.subr.bf16.mxu1 %v10442_v6  ;;  %v7775_v6 = vld [vmem:[#allocation7 + $0x4] ss:$0 sm:$0xff] }
 0x9ee   :  { %10445 = vmatpush3.bf16.msra.mxu1 %v10444_v63 }
 0x9ef   :  { %10447 = vmatprep.subr.bf16.mxu1 %v10446_v50 }
 0x9f2   :  { %10449 = vmatpush3.bf16.msra.mxu1 %v10448_v45 }
 0x9f3   :  { %10451 = vmatprep.subr.bf16.mxu1 %v10450_v49 }
 0x9f6   :  { %10453 = vmatpush3.bf16.msra.mxu1 %v10452_v1 }
 0x9f7   :  { %10455 = vmatprep.subr.bf16.mxu1 %v10454_v27 }
 0x9fa   :  { %10457 = vmatpush3.bf16.msra.mxu1 %v10456_v5 }
 0x9fb   :  { %10459 = vmatprep.subr.bf16.mxu1 %v10458_v46 }
 0x9fe   :  { %10461 = vmatpush3.bf16.msra.mxu1 %v10460_v31 }
 0x9ff   :  { %10462 = vmatprep.subr.bf16.mxu1 %v11269_v11 }
 0xaa8   :  { %v7584_v32 = vpop.f32.mrb[84].mxu1 }
 0xaa9   :  { %v9224_v22 = vpop.f32.mrb[85].mxu1 }
 0xab4   :  { %v7659_v24 = vpop.f32.mrb[86].mxu1 }
 0xab5   :  { %7760 = vmatprep.mubr.f32.mxu1 %v7659_v24  ;;  %v9239_v51 = vpop.f32.mrb[87].mxu1 }
 0xab6   :  { %7761 = vmatmul.mubr.f32.vlgmr.msra.gmra.mrb[88].mxu1 %v7584_v32 }
 0xab7   :  { %10464 = vmatpush3.bf16.msra.mxu1 %v10463_v58  ;;  %9256 = vmatprep.mubr.msk.f32.mxu1 %vm11270_vm10, %v14153_v44 }
 0xab8   :  { %10465 = vmatprep.subr.bf16.mxu1 %v11269_v11 }
 0xabb   :  { %10467 = vmatpush3.bf16.msra.mxu1 %v10466_v9 }
 0xabc   :  { %10468 = vmatprep.subr.bf16.mxu1 %v11269_v11 }
 0xabf   :  { %10470 = vmatpush3.bf16.msra.mxu1 %v10469_v13 }
 0xac0   :  { %10471 = vmatprep.subr.bf16.mxu1 %v11269_v11 }
 0xac3   :  { %10473 = vmatpush3.bf16.msra.mxu1 %v10472_v4 }
 0xac4   :  { %10474 = vmatprep.subr.bf16.mxu1 %v11269_v11 }
 0xb89   :  { %v8817_v36 = vpop.f32.mrb[88].mxu1 }
 0xb8a   :  { %v8818_v41 = vpop.f32.mrb[89].mxu1 }
 0xb8b   :  { %v8819_v62 = vadd.f32 %v8818_v41, %v8817_v36 }
 0xb8d   :  { %v7763_v54 = vadd.f32 %v8819_v62, %v7695_v53 }
 0xb8f   :  { %v7766_v61 = vmax.f32 %v7763_v54, 0.0 }
 0xb91   :  { %9257 = vmatmul.mubr.msk.f32.vlgmr.msra.gmra.mrb[90].mxu1 %vm2835_vm8, %v7766_v61 }
 0xb92   :  { %10476 = vmatpush3.bf16.msra.mxu1 %v10475_v56  ;;  %9275 = vmatprep.mubr.msk.f32.mxu1 %vm11270_vm10, %v14153_v44 }
 0xb93   :  { %10477 = vmatprep.subr.bf16.mxu1 %v11269_v11 }
 0xb96   :  { %10479 = vmatpush3.bf16.msra.mxu1 %v10478_v12 }
 0xb97   :  { %10480 = vmatprep.subr.bf16.mxu1 %v11269_v11 }
 0xb9a   :  { %10482 = vmatpush3.bf16.msra.mxu1 %v10481_v19 }
 0xb9b   :  { %10483 = vmatprep.subr.bf16.mxu1 %v11269_v11 }
 0xb9e   :  { %10485 = vmatpush3.bf16.msra.mxu1 %v10484_v29 }
 0xc64   :  { %v7845_v55 = vpop.f32.mrb[90].mxu1 }
 0xc65   :  { %v7846_v33 = vadd.f32 %v7845_v55, %v7775_v6  ;;  %v9258_v16 = vpop.f32.mrb[91].mxu1 }
 0xc67   :  { %v7849_v44 = vmax.f32 %v7846_v33, 0.0 }
 0xc69   :  { %9276 = vmatmul.mubr.msk.f32.vlgmr.msra.gmra.mrb[92].mxu1 %vm2835_vm8, %v7849_v44 }
 0xd3c   :  { %v7928_v63 = vpop.f32.mrb[92].mxu1 }
 0xd3d   :  { %v7929_v50 = vadd.f32 %v7928_v63, %v7858_v23  ;;  %v9277_v38 = vpop.f32.mrb[93].mxu1 }
 0xd3f   :  { %7932 = vst [vmem:[%s14004_s11] sm:$0xff] %v7929_v50 }
 0xd40   :  { %7937 = vsyncpa [#allocation3], 1 }
 0xd41   :  { %7938 = vsyncpa [#allocation5], 1 }
 0xd42   :  { %7939 = vsyncpa [#allocation8], 1 }
 0xd43   :  { %7940 = vsyncpa [#allocation11], 1 }
 0xd44   :  { %7941 = vsyncpa [#allocation14], 1 }

</bundles_post_ra>
